<compile_context>
chip_gen: v5e
topology: v5e:2x2
jax: 0.10.0
libtpu: 0.0.40
codegen_flags: <defaults>
</compile_context>

<pallas_src>
import jax
import jax.numpy as jnp
from jax.experimental import pallas as pl
from jax.experimental.pallas import tpu as pltpu

NUM_HEADS = 4
D = 128 * 4          # feature dim (matches Linear in_features = 128*4)
B = 128              # batch rows
TILE_B = 128         # full batch per grid step (grid = (1,) for B = 128)


def heads_kernel(x_ref, w_ref, b_ref, o_ref):
    """One batch-tile grid step; all heads fused in-kernel.

    x_ref: (TILE_B, D)        f32   VMEM   input activations
    w_ref: (NUM_HEADS, D, D)  bf16  VMEM   all head weights (in x out layout)
    b_ref: (NUM_HEADS, 1, D)  f32   VMEM   all head biases
    o_ref: (TILE_B, D)        f32   VMEM   output activations
    """
    x = x_ref[...]                                   # f32 carry, lives in registers/VMEM values
    for h in range(NUM_HEADS):                       # static unroll over heads
        w = w_ref[h].astype(jnp.float32)             # bf16 stream -> f32 into the MXU
        y = jnp.dot(x, w, preferred_element_type=jnp.float32) + b_ref[h]
        x = jnp.tanh(x + y)
    o_ref[...] = x


def model_forward(x, weights_bf16, biases):
    """x: (B, D) f32; weights_bf16: (H, D, D) bf16 (in x out); biases: (H, D) f32."""
    Bsz, Dm = x.shape
    H = weights_bf16.shape[0]
    assert Dm == D and H == NUM_HEADS
    assert Bsz % TILE_B == 0, "batch must be divisible by TILE_B"
    b3 = biases.reshape(H, 1, D)

    cost = pl.CostEstimate(
        flops=2 * Bsz * D * D * H + 3 * Bsz * D * H,
        transcendentals=Bsz * D * H,
        bytes_accessed=H * D * D * 2 + H * D * 4 + 2 * Bsz * D * 4,
    )

    grid = (Bsz // TILE_B,)
    return pl.pallas_call(
        heads_kernel,
        out_shape=jax.ShapeDtypeStruct((Bsz, D), jnp.float32),
        grid_spec=pltpu.PrefetchScalarGridSpec(
            num_scalar_prefetch=0,
            grid=grid,
            in_specs=[
                pl.BlockSpec((TILE_B, D), lambda i: (i, 0)),          # x tile (batch)
                pl.BlockSpec((NUM_HEADS, D, D), lambda i: (0, 0, 0)),  # all weights, once
                pl.BlockSpec((NUM_HEADS, 1, D), lambda i: (0, 0, 0)),  # all biases, once
            ],
            out_specs=pl.BlockSpec((TILE_B, D), lambda i: (i, 0)),
        ),
        compiler_params=pltpu.CompilerParams(
            dimension_semantics=("parallel",),
        ),
        cost_estimate=cost,
    )(x, weights_bf16, b3)


def reference_forward(x, weights_f32, biases):
    out = x
    for h in range(NUM_HEADS):
        y = out @ weights_f32[h] + biases[h]
        out = jnp.tanh(out + y)
    return out


if __name__ == "__main__":
    key = jax.random.PRNGKey(0)
    kx, kw, kb = jax.random.split(key, 3)

    x = jax.random.normal(kx, (B, D), dtype=jnp.float32)
    # Deterministic "Linear(D, D)"-style init per head; stored transposed (in x out).
    bound = 1.0 / jnp.sqrt(jnp.float32(D))
    weights = jax.random.uniform(
        kw, (NUM_HEADS, D, D), dtype=jnp.float32, minval=-bound, maxval=bound
    )
    biases = jax.random.uniform(
        kb, (NUM_HEADS, D), dtype=jnp.float32, minval=-bound, maxval=bound
    )

    # Weights are streamed to the kernel in bf16 (halves weight HBM traffic);
    # activations stay f32 inside the kernel.
    weights_bf16 = weights.astype(jnp.bfloat16)

    out = model_forward(x, weights_bf16, biases)
    out = jax.block_until_ready(out)

    # Reference uses the same (bf16-quantized) weights, in f32, so the check
    # isolates kernel correctness.
    ref = reference_forward(x, weights_bf16.astype(jnp.float32), biases)
    assert out.shape == (B, D)
    assert jnp.allclose(out, ref, atol=3e-2, rtol=3e-2), (
        float(jnp.max(jnp.abs(out - ref)))
    )

    print("KERNEL_OK")
</pallas_src>

<mosaic_0001>
module attributes {stable_mosaic.version = 11 : i64} {
  func.func @heads_kernel(%arg0: i32, %arg1: memref<128x512xf32, #tpu.memory_space<vmem>>, %arg2: memref<4x512x512xbf16, #tpu.memory_space<vmem>>, %arg3: memref<4x1x512xf32, #tpu.memory_space<vmem>>, %arg4: memref<128x512xf32, #tpu.memory_space<vmem>>) attributes {dimension_semantics = [#tpu.dimension_semantics<parallel>], iteration_bounds = array<i64: 1>, scalar_prefetch = 0 : i64, scratch_operands = 0 : i64, tpu.core_type = #tpu.core_type<tc>, window_params = [{transform_indices = @transform_0, window_bounds = array<i64: 128, 512>}, {pipeline_mode = #tpu.pipeline_mode<synchronous>, transform_indices = @transform_1, window_bounds = array<i64: 4, 512, 512>}, {pipeline_mode = #tpu.pipeline_mode<synchronous>, transform_indices = @transform_2, window_bounds = array<i64: 4, 1, 512>}, {transform_indices = @transform_3, window_bounds = array<i64: 128, 512>}]} {
    %c0 = arith.constant 0 : index
    %c0_0 = arith.constant 0 : index
    %0 = vector.load %arg1[%c0, %c0_0] : memref<128x512xf32, #tpu.memory_space<vmem>>, vector<128x512xf32>
    %c0_1 = arith.constant 0 : index
    %c0_2 = arith.constant 0 : index
    %c0_3 = arith.constant 0 : index
    %1 = vector.load %arg2[%c0_1, %c0_2, %c0_3] : memref<4x512x512xbf16, #tpu.memory_space<vmem>>, vector<1x512x512xbf16>
    %2 = vector.shape_cast %1 : vector<1x512x512xbf16> to vector<512x512xbf16>
    %3 = arith.extf %2 : vector<512x512xbf16> to vector<512x512xf32>
    %cst = arith.constant dense<0.000000e+00> : vector<128x512xf32>
    %4 = tpu.matmul %0, %3, %cst {dimension_numbers = #tpu.dot_dimension_numbers<[1], [0], [0], [1], [0, 0, 1, 1], [], []>} : vector<128x512xf32>, vector<512x512xf32>, vector<128x512xf32> -> vector<128x512xf32>
    %c0_4 = arith.constant 0 : index
    %c0_5 = arith.constant 0 : index
    %c0_6 = arith.constant 0 : index
    %5 = vector.load %arg3[%c0_4, %c0_5, %c0_6] : memref<4x1x512xf32, #tpu.memory_space<vmem>>, vector<1x1x512xf32>
    %6 = vector.shape_cast %5 : vector<1x1x512xf32> to vector<1x512xf32>
    %7 = vector.broadcast %6 : vector<1x512xf32> to vector<128x512xf32>
    %8 = arith.addf %4, %7 : vector<128x512xf32>
    %9 = arith.addf %0, %8 : vector<128x512xf32>
    %10 = math.tanh %9 : vector<128x512xf32>
    %c1 = arith.constant 1 : index
    %c0_7 = arith.constant 0 : index
    %c0_8 = arith.constant 0 : index
    %11 = vector.load %arg2[%c1, %c0_7, %c0_8] : memref<4x512x512xbf16, #tpu.memory_space<vmem>>, vector<1x512x512xbf16>
    %12 = vector.shape_cast %11 : vector<1x512x512xbf16> to vector<512x512xbf16>
    %13 = arith.extf %12 : vector<512x512xbf16> to vector<512x512xf32>
    %cst_9 = arith.constant dense<0.000000e+00> : vector<128x512xf32>
    %14 = tpu.matmul %10, %13, %cst_9 {dimension_numbers = #tpu.dot_dimension_numbers<[1], [0], [0], [1], [0, 0, 1, 1], [], []>} : vector<128x512xf32>, vector<512x512xf32>, vector<128x512xf32> -> vector<128x512xf32>
    %c1_10 = arith.constant 1 : index
    %c0_11 = arith.constant 0 : index
    %c0_12 = arith.constant 0 : index
    %15 = vector.load %arg3[%c1_10, %c0_11, %c0_12] : memref<4x1x512xf32, #tpu.memory_space<vmem>>, vector<1x1x512xf32>
    %16 = vector.shape_cast %15 : vector<1x1x512xf32> to vector<1x512xf32>
    %17 = vector.broadcast %16 : vector<1x512xf32> to vector<128x512xf32>
    %18 = arith.addf %14, %17 : vector<128x512xf32>
    %19 = arith.addf %10, %18 : vector<128x512xf32>
    %20 = math.tanh %19 : vector<128x512xf32>
    %c2 = arith.constant 2 : index
    %c0_13 = arith.constant 0 : index
    %c0_14 = arith.constant 0 : index
    %21 = vector.load %arg2[%c2, %c0_13, %c0_14] : memref<4x512x512xbf16, #tpu.memory_space<vmem>>, vector<1x512x512xbf16>
    %22 = vector.shape_cast %21 : vector<1x512x512xbf16> to vector<512x512xbf16>
    %23 = arith.extf %22 : vector<512x512xbf16> to vector<512x512xf32>
    %cst_15 = arith.constant dense<0.000000e+00> : vector<128x512xf32>
    %24 = tpu.matmul %20, %23, %cst_15 {dimension_numbers = #tpu.dot_dimension_numbers<[1], [0], [0], [1], [0, 0, 1, 1], [], []>} : vector<128x512xf32>, vector<512x512xf32>, vector<128x512xf32> -> vector<128x512xf32>
    %c2_16 = arith.constant 2 : index
    %c0_17 = arith.constant 0 : index
    %c0_18 = arith.constant 0 : index
    %25 = vector.load %arg3[%c2_16, %c0_17, %c0_18] : memref<4x1x512xf32, #tpu.memory_space<vmem>>, vector<1x1x512xf32>
    %26 = vector.shape_cast %25 : vector<1x1x512xf32> to vector<1x512xf32>
    %27 = vector.broadcast %26 : vector<1x512xf32> to vector<128x512xf32>
    %28 = arith.addf %24, %27 : vector<128x512xf32>
    %29 = arith.addf %20, %28 : vector<128x512xf32>
    %30 = math.tanh %29 : vector<128x512xf32>
    %c3 = arith.constant 3 : index
    %c0_19 = arith.constant 0 : index
    %c0_20 = arith.constant 0 : index
    %31 = vector.load %arg2[%c3, %c0_19, %c0_20] : memref<4x512x512xbf16, #tpu.memory_space<vmem>>, vector<1x512x512xbf16>
    %32 = vector.shape_cast %31 : vector<1x512x512xbf16> to vector<512x512xbf16>
    %33 = arith.extf %32 : vector<512x512xbf16> to vector<512x512xf32>
    %cst_21 = arith.constant dense<0.000000e+00> : vector<128x512xf32>
    %34 = tpu.matmul %30, %33, %cst_21 {dimension_numbers = #tpu.dot_dimension_numbers<[1], [0], [0], [1], [0, 0, 1, 1], [], []>} : vector<128x512xf32>, vector<512x512xf32>, vector<128x512xf32> -> vector<128x512xf32>
    %c3_22 = arith.constant 3 : index
    %c0_23 = arith.constant 0 : index
    %c0_24 = arith.constant 0 : index
    %35 = vector.load %arg3[%c3_22, %c0_23, %c0_24] : memref<4x1x512xf32, #tpu.memory_space<vmem>>, vector<1x1x512xf32>
    %36 = vector.shape_cast %35 : vector<1x1x512xf32> to vector<1x512xf32>
    %37 = vector.broadcast %36 : vector<1x512xf32> to vector<128x512xf32>
    %38 = arith.addf %34, %37 : vector<128x512xf32>
    %39 = arith.addf %30, %38 : vector<128x512xf32>
    %40 = math.tanh %39 : vector<128x512xf32>
    %c0_25 = arith.constant 0 : index
    %c0_26 = arith.constant 0 : index
    %41 = vector.load %arg4[%c0_25, %c0_26] : memref<128x512xf32, #tpu.memory_space<vmem>>, vector<128x512xf32>
    tpu.vector_store %arg4[%c0_25, %c0_26], %40 {strides = array<i32>} : memref<128x512xf32, #tpu.memory_space<vmem>>, vector<128x512xf32>,
    return
  }
  func.func @transform_0(%arg0: i32) -> (i32, i32) {
    %c0_i32 = arith.constant 0 : i32
    %c0_i32_0 = arith.constant 0 : i32
    return %arg0, %c0_i32 : i32, i32
  }
  func.func @transform_1(%arg0: i32) -> (i32, i32, i32) {
    %c0_i32 = arith.constant 0 : i32
    %c0_i32_0 = arith.constant 0 : i32
    %c0_i32_1 = arith.constant 0 : i32
    %c0_i32_2 = arith.constant 0 : i32
    return %c0_i32, %c0_i32_0, %c0_i32_1 : i32, i32, i32
  }
  func.func @transform_2(%arg0: i32) -> (i32, i32, i32) {
    %c0_i32 = arith.constant 0 : i32
    %c0_i32_0 = arith.constant 0 : i32
    %c0_i32_1 = arith.constant 0 : i32
    %c0_i32_2 = arith.constant 0 : i32
    return %c0_i32, %c0_i32_0, %c0_i32_1 : i32, i32, i32
  }
  func.func @transform_3(%arg0: i32) -> (i32, i32) {
    %c0_i32 = arith.constant 0 : i32
    %c0_i32_0 = arith.constant 0 : i32
    return %arg0, %c0_i32 : i32, i32
  }
}

</mosaic_0001>

<bundles_post_ra>
// kernel: tpu_custom_call.1
= control target key start
LH: loop header
LB: loop body
LE: loop exit
PB: predicated region body
PF: predicated region fallthrough
CT: control target
= control target key end

     0   :  { %8 = vsyncpa [#allocation3], 0  ;;  %s12767_s0 = inlined_call_operand.hbm [shape: f32[128,512], index: 0, kind: input, shape index: {}]   ;;  %s12768_s1 = inlined_call_operand.hbm [shape: bf16[4,512,512], index: 1, kind: input, shape index: {}]   ;;  %s12769_s2 = inlined_call_operand.hbm [shape: f32[4,1,512], index: 2, kind: input, shape index: {}]   ;;  %s12770_s3 = inlined_call_operand.hbm [shape: f32[128,512], index: 3, kind: output, shape index: {}]  }
   0x1   :  { %9 = vsyncpa [#allocation6], 0  ;;  %s28_s14 = sshll.u32 %s12768_s1, 4  ;;  %s29_s14 = int_to_ptr.hbm [resolvable:$true] %s28_s14 }
   0x2   :  { %10 = vsyncpa [#allocation4], 0  ;;  %s7220_s15 = smov [#allocation5]   ;;  %s15_s19 = sshll.u32 %s12767_s0, 4  ;;  %s16_s19 = int_to_ptr.hbm [resolvable:$true] %s15_s19 }
   0x3   :  { %s30_s16 = sshll.u32 %s7220_s15, 4  ;;  %s7221_s20 = smov 256   ;;  %s31_s16 = int_to_ptr.vmem [resolvable:$true] %s30_s16 }
   0x4   :  { %s7222_s21 = smov 16   ;;  %s7223_s22 = smov [#allocation2]  }
   0x5   :  { %36 = dma.hbm_to_vmem [thread:$0]  %s29_s14, 65536, %s31_s16, [#allocation6], %s7221_s20, %s7221_s20, %s7222_s21  }
   0x6   :  { %s17_s23 = sshll.u32 %s7223_s22, 4  ;;  %s7224_s24 = smov 512   ;;  %s18_s23 = int_to_ptr.vmem [resolvable:$true] %s17_s23 }
   0x7   :  { %s7225_s25 = smov 32   ;;  %s41_s27 = sshll.u32 %s12769_s2, 4  ;;  %s42_s27 = int_to_ptr.hbm [resolvable:$true] %s41_s27 }
   0x8   :  { %23 = dma.hbm_to_vmem [thread:$0]  %s16_s19, 8192, %s18_s23, [#allocation3], %s7224_s24, %s7224_s24, %s7225_s25  }
   0x9   :  { %s7226_s28 = smov [#allocation7]   ;;  %s7227_s29 = smov 64  }
   0xa   :  { %s43_s0 = sshll.u32 %s7226_s28, 4  ;;  %s7228_s30 = smov 4   ;;  %s44_s0 = int_to_ptr.vmem [resolvable:$true] %s43_s0 }
   0xb   :  { %49 = dma.hbm_to_vmem [thread:$0]  %s42_s27, 256, %s44_s0, [#allocation6], %s7227_s29, %s7227_s29, %s7228_s30  }
   0xc   :  { %7214 = dma.done.wait [#allocation3], 8192  }
   0xd   :  { %7215 = vsyncadd [#allocation3], 4294959104 }
   0xe   :  { %7216 = dma.done.wait [#allocation6], 65792  }
   0xf   :  { %7217 = vsyncadd [#allocation6], 4294901504  ;;  %v7262_v0 = vld [vmem:[#allocation5 + $0xf0] sm:$0xff]  ;;  %v7271_v6 = vld [vmem:[#allocation5 + $0xe0] sm:$0xff]  ;;  %s7229_s2 = smov [#allocation8]   ;;  %s6450_s7 = sshll.u32 %s12770_s3, 4  ;;  %s6451_s7 = int_to_ptr.hbm [resolvable:$true] %s6450_s7 }
  0x10   :  { %v7264_v1 = vld [vmem:[#allocation5 + $0x1f0] sm:$0xff]  ;;  %v314_v3 = vunpack.c.l.bf16 %v7262_v0  ;;  %v7273_v7 = vld [vmem:[#allocation5 + $0x1e0] sm:$0xff]  ;;  %v310_v9 = vunpack.c.l.bf16 %v7271_v6  ;;  %s6448_s4 = sshll.u32 %s7229_s2, 4  ;;  %s6449_s4 = int_to_ptr.vmem [resolvable:$true] %s6448_s4 }
  0x11   :  { %v7266_v2 = vld [vmem:[#allocation5 + $0x2f0] sm:$0xff]  ;;  %v378_v4 = vunpack.c.l.bf16 %v7264_v1  ;;  %v7275_v8 = vld [vmem:[#allocation5 + $0x2e0] sm:$0xff]  ;;  %v374_v10 = vunpack.c.l.bf16 %v7273_v7 }
  0x12   :  { %v442_v5 = vunpack.c.l.bf16 %v7266_v2  ;;  %v438_v11 = vunpack.c.l.bf16 %v7275_v8  ;;  %v7280_v12 = vld [vmem:[#allocation5 + $0x3f0] sm:$0xff]  ;;  %520 = vmatpush.msra.mxu0 %v314_v3  ;;  %v7291_v19 = vld [vmem:[#allocation5 + $0x3e0] sm:$0xff] }
  0x13   :  { %v7282_v13 = vld [vmem:[#allocation5 + $0xd0] sm:$0xff]  ;;  %585 = vmatpush.msra.mxu1 %v378_v4  ;;  %v506_v15 = vunpack.c.l.bf16 %v7280_v12  ;;  %v7293_v20 = vld [vmem:[#allocation5 + $0xc0] sm:$0xff]  ;;  %v502_v22 = vunpack.c.l.bf16 %v7291_v19 }
  0x14   :  { %v7284_v14 = vld [vmem:[#allocation5 + $0x1d0] sm:$0xff]  ;;  %v306_v16 = vunpack.c.l.bf16 %v7282_v13  ;;  %650 = vmatpush.msra.mxu2 %v442_v5  ;;  %v7297_v23 = vld [vmem:[#allocation5 + $0x1c0] sm:$0xff]  ;;  %521 = vmatpush.msra.mxu0 %v310_v9  ;;  %v302_v26 = vunpack.c.l.bf16 %v7293_v20 }
  0x15   :  { %v370_v17 = vunpack.c.l.bf16 %v7284_v14  ;;  %v7289_v18 = vld [vmem:[#allocation5 + $0x2d0] sm:$0xff]  ;;  %v7299_v24 = vld [vmem:[#allocation5 + $0x2c0] sm:$0xff]  ;;  %586 = vmatpush.msra.mxu1 %v374_v10  ;;  %v366_v27 = vunpack.c.l.bf16 %v7297_v23  ;;  %715 = vmatpush.msra.mxu3 %v506_v15 }
  0x16   :  { %v434_v21 = vunpack.c.l.bf16 %v7289_v18  ;;  %v7301_v25 = vld [vmem:[#allocation5 + $0x3d0] sm:$0xff]  ;;  %651 = vmatpush.msra.mxu2 %v438_v11  ;;  %v430_v31 = vunpack.c.l.bf16 %v7299_v24  ;;  %v7313_v33 = vld [vmem:[#allocation5 + $0x3c0] sm:$0xff]  ;;  %522 = vmatpush.msra.mxu0 %v306_v16 }
  0x17   :  { %v7305_v28 = vld [vmem:[#allocation5 + $0xb0] sm:$0xff]  ;;  %v498_v32 = vunpack.c.l.bf16 %v7301_v25  ;;  %v7315_v34 = vld [vmem:[#allocation5 + $0xa0] sm:$0xff]  ;;  %587 = vmatpush.msra.mxu1 %v370_v17  ;;  %716 = vmatpush.msra.mxu3 %v502_v22  ;;  %v494_v41 = vunpack.c.l.bf16 %v7313_v33 }
  0x18   :  { %v7307_v29 = vld [vmem:[#allocation5 + $0x1b0] sm:$0xff]  ;;  %v7317_v35 = vld [vmem:[#allocation5 + $0x1a0] sm:$0xff]  ;;  %v298_v36 = vunpack.c.l.bf16 %v7305_v28  ;;  %652 = vmatpush.msra.mxu2 %v434_v21  ;;  %523 = vmatpush.msra.mxu0 %v302_v26  ;;  %v294_v44 = vunpack.c.l.bf16 %v7315_v34 }
  0x19   :  { %v7309_v30 = vld [vmem:[#allocation5 + $0x2b0] sm:$0xff]  ;;  %v362_v37 = vunpack.c.l.bf16 %v7307_v29  ;;  %v7321_v38 = vld [vmem:[#allocation5 + $0x2a0] sm:$0xff]  ;;  %588 = vmatpush.msra.mxu1 %v366_v27  ;;  %v358_v45 = vunpack.c.l.bf16 %v7317_v35  ;;  %717 = vmatpush.msra.mxu3 %v498_v32 }
  0x1a   :  { %v7323_v39 = vld [vmem:[#allocation5 + $0x3b0] sm:$0xff]  ;;  %v426_v40 = vunpack.c.l.bf16 %v7309_v30  ;;  %v7335_v47 = vld [vmem:[#allocation5 + $0x3a0] sm:$0xff]  ;;  %653 = vmatpush.msra.mxu2 %v430_v31  ;;  %v422_v48 = vunpack.c.l.bf16 %v7321_v38  ;;  %524 = vmatpush.msra.mxu0 %v298_v36 }
  0x1b   :  { %v7327_v42 = vld [vmem:[#allocation5 + $0x90] sm:$0xff]  ;;  %v490_v49 = vunpack.c.l.bf16 %v7323_v39  ;;  %v7339_v50 = vld [vmem:[#allocation5 + $0x80] sm:$0xff]  ;;  %589 = vmatpush.msra.mxu1 %v362_v37  ;;  %718 = vmatpush.msra.mxu3 %v494_v41  ;;  %v486_v57 = vunpack.c.l.bf16 %v7335_v47 }
  0x1c   :  { %v7329_v43 = vld [vmem:[#allocation5 + $0x190] sm:$0xff]  ;;  %v7341_v51 = vld [vmem:[#allocation5 + $0x180] sm:$0xff]  ;;  %v290_v52 = vunpack.c.l.bf16 %v7327_v42  ;;  %654 = vmatpush.msra.mxu2 %v426_v40  ;;  %525 = vmatpush.msra.mxu0 %v294_v44  ;;  %v286_v60 = vunpack.c.l.bf16 %v7339_v50 }
  0x1d   :  { %v7333_v46 = vld [vmem:[#allocation5 + $0x290] sm:$0xff]  ;;  %v354_v53 = vunpack.c.l.bf16 %v7329_v43  ;;  %v7345_v54 = vld [vmem:[#allocation5 + $0x280] sm:$0xff]  ;;  %590 = vmatpush.msra.mxu1 %v358_v45  ;;  %v350_v61 = vunpack.c.l.bf16 %v7341_v51  ;;  %719 = vmatpush.msra.mxu3 %v490_v49 }
  0x1e   :  { %v7347_v55 = vld [vmem:[#allocation5 + $0x390] sm:$0xff]  ;;  %v418_v56 = vunpack.c.l.bf16 %v7333_v46  ;;  %v7359_v63 = vld [vmem:[#allocation5 + $0x380] sm:$0xff]  ;;  %655 = vmatpush.msra.mxu2 %v422_v48  ;;  %v414_v3 = vunpack.c.l.bf16 %v7345_v54  ;;  %526 = vmatpush.msra.mxu0 %v290_v52 }
  0x1f   :  { %v7351_v58 = vld [vmem:[#allocation5 + $0x70] sm:$0xff]  ;;  %v482_v4 = vunpack.c.l.bf16 %v7347_v55  ;;  %v7363_v5 = vld [vmem:[#allocation5 + $0x60] sm:$0xff]  ;;  %591 = vmatpush.msra.mxu1 %v354_v53  ;;  %720 = vmatpush.msra.mxu3 %v486_v57  ;;  %v478_v21 = vunpack.c.l.bf16 %v7359_v63 }
  0x20   :  { %v7353_v59 = vld [vmem:[#allocation5 + $0x170] sm:$0xff]  ;;  %v7365_v9 = vld [vmem:[#allocation5 + $0x160] sm:$0xff]  ;;  %v282_v10 = vunpack.c.l.bf16 %v7351_v58  ;;  %656 = vmatpush.msra.mxu2 %v418_v56  ;;  %527 = vmatpush.msra.mxu0 %v286_v60  ;;  %v278_v27 = vunpack.c.l.bf16 %v7363_v5 }
  0x21   :  { %v7357_v62 = vld [vmem:[#allocation5 + $0x270] sm:$0xff]  ;;  %v346_v11 = vunpack.c.l.bf16 %v7353_v59  ;;  %v7369_v15 = vld [vmem:[#allocation5 + $0x260] sm:$0xff]  ;;  %592 = vmatpush.msra.mxu1 %v350_v61  ;;  %v342_v31 = vunpack.c.l.bf16 %v7365_v9  ;;  %721 = vmatpush.msra.mxu3 %v482_v4 }
  0x22   :  { %v7371_v16 = vld [vmem:[#allocation5 + $0x370] sm:$0xff]  ;;  %v410_v17 = vunpack.c.l.bf16 %v7357_v62  ;;  %v7383_v36 = vld [vmem:[#allocation5 + $0x360] sm:$0xff]  ;;  %657 = vmatpush.msra.mxu2 %v414_v3  ;;  %v406_v37 = vunpack.c.l.bf16 %v7369_v15  ;;  %528 = vmatpush.msra.mxu0 %v282_v10 }
  0x23   :  { %v7375_v22 = vld [vmem:[#allocation5 + $0x50] sm:$0xff]  ;;  %v474_v40 = vunpack.c.l.bf16 %v7371_v16  ;;  %v7387_v41 = vld [vmem:[#allocation5 + $0x40] sm:$0xff]  ;;  %593 = vmatpush.msra.mxu1 %v346_v11  ;;  %722 = vmatpush.msra.mxu3 %v478_v21  ;;  %v470_v56 = vunpack.c.l.bf16 %v7383_v36 }
  0x24   :  { %v7377_v26 = vld [vmem:[#allocation5 + $0x150] sm:$0xff]  ;;  %13467 = vst [vmem:[#allocation13_spill] sm:$0xff] %v7387_v41  ;;  %v7389_v44 = vld [vmem:[#allocation5 + $0x140] sm:$0xff]  ;;  %v274_v45 = vunpack.c.l.bf16 %v7375_v22  ;;  %658 = vmatpush.msra.mxu2 %v410_v17  ;;  %529 = vmatpush.msra.mxu0 %v278_v27  ;;  %v270_v61 = vunpack.c.l.bf16 %v7387_v41 }
  0x25   :  { %13466 = vst [vmem:[#allocation12_spill] sm:$0xff] %v7377_v26  ;;  %v7381_v32 = vld [vmem:[#allocation5 + $0x250] sm:$0xff]  ;;  %v338_v48 = vunpack.c.l.bf16 %v7377_v26  ;;  %v7393_v49 = vld [vmem:[#allocation5 + $0x240] sm:$0xff]  ;;  %594 = vmatpush.msra.mxu1 %v342_v31  ;;  %v334_v3 = vunpack.c.l.bf16 %v7389_v44  ;;  %723 = vmatpush.msra.mxu3 %v474_v40 }
  0x26   :  { %13468 = vst [vmem:[#allocation14_spill] sm:$0xff] %v7389_v44  ;;  %v7395_v52 = vld [vmem:[#allocation5 + $0x350] sm:$0xff]  ;;  %v402_v53 = vunpack.c.l.bf16 %v7381_v32  ;;  %v7407_v10 = vld [vmem:[#allocation5 + $0x340] sm:$0xff]  ;;  %659 = vmatpush.msra.mxu2 %v406_v37  ;;  %v398_v11 = vunpack.c.l.bf16 %v7393_v49  ;;  %530 = vmatpush.msra.mxu0 %v274_v45 }
  0x27   :  { %13469 = vst [vmem:[#allocation15_spill] sm:$0xff] %v7393_v49  ;;  %v7399_v57 = vld [vmem:[#allocation5 + $0x30] sm:$0xff]  ;;  %v466_v17 = vunpack.c.l.bf16 %v7395_v52  ;;  %v7411_v21 = vld [vmem:[#allocation5 + $0x20] sm:$0xff]  ;;  %595 = vmatpush.msra.mxu1 %v338_v48  ;;  %724 = vmatpush.msra.mxu3 %v470_v56  ;;  %v462_v40 = vunpack.c.l.bf16 %v7407_v10 }
  0x28   :  { %13470 = vst [vmem:[#allocation16_spill] sm:$0xff] %v7395_v52  ;;  %v7401_v60 = vld [vmem:[#allocation5 + $0x130] sm:$0xff]  ;;  %v7413_v26 = vld [vmem:[#allocation5 + $0x120] sm:$0xff]  ;;  %v266_v27 = vunpack.c.l.bf16 %v7399_v57  ;;  %660 = vmatpush.msra.mxu2 %v402_v53  ;;  %531 = vmatpush.msra.mxu0 %v270_v61  ;;  %v262_v45 = vunpack.c.l.bf16 %v7411_v21 }
  0x29   :  { %13471 = vst [vmem:[#allocation17_spill] sm:$0xff] %v7399_v57  ;;  %v7405_v4 = vld [vmem:[#allocation5 + $0x230] sm:$0xff]  ;;  %v330_v31 = vunpack.c.l.bf16 %v7401_v60  ;;  %v7417_v44 = vld [vmem:[#allocation5 + $0x220] sm:$0xff]  ;;  %596 = vmatpush.msra.mxu1 %v334_v3  ;;  %v326_v48 = vunpack.c.l.bf16 %v7413_v26  ;;  %725 = vmatpush.msra.mxu3 %v466_v17 }
  0x2a   :  { %13472 = vst [vmem:[#allocation18_spill] sm:$0xff] %v7401_v60  ;;  %v7419_v41 = vld [vmem:[#allocation5 + $0x330] sm:$0xff]  ;;  %v394_v37 = vunpack.c.l.bf16 %v7405_v4  ;;  %v7431_v57 = vld [vmem:[#allocation5 + $0x320] sm:$0xff]  ;;  %661 = vmatpush.msra.mxu2 %v398_v11  ;;  %v390_v53 = vunpack.c.l.bf16 %v7417_v44  ;;  %532 = vmatpush.msra.mxu0 %v266_v27 }
  0x2b   :  { %13473 = vst [vmem:[#allocation19_spill] sm:$0xff] %v7405_v4  ;;  %v7423_v49 = vld [vmem:[#allocation5 + $0x10] sm:$0xff]  ;;  %v458_v56 = vunpack.c.l.bf16 %v7419_v41  ;;  %v7435_v4 = vld [vmem:[#allocation5] sm:$0xff]  ;;  %597 = vmatpush.msra.mxu1 %v330_v31  ;;  %726 = vmatpush.msra.mxu3 %v462_v40  ;;  %v454_v17 = vunpack.c.l.bf16 %v7431_v57  ;;  %v7455_v40 = vld [vmem:[#allocation2 + $0x8] sm:$0xff] }
  0x2c   :  { %13474 = vst [vmem:[#allocation20_spill] sm:$0xff] %v7407_v10  ;;  %v7425_v52 = vld [vmem:[#allocation5 + $0x110] sm:$0xff]  ;;  %v7437_v10 = vld [vmem:[#allocation5 + $0x100] sm:$0xff]  ;;  %v258_v61 = vunpack.c.l.bf16 %v7423_v49  ;;  %662 = vmatpush.msra.mxu2 %v394_v37  ;;  %533 = vmatpush.msra.mxu0 %v262_v45 }
  0x2d   :  { %13475 = vst [vmem:[#allocation21_spill] sm:$0xff] %v7411_v21  ;;  %v7429_v60 = vld [vmem:[#allocation5 + $0x210] sm:$0xff]  ;;  %v322_v3 = vunpack.c.l.bf16 %v7425_v52  ;;  %598 = vmatpush.msra.mxu1 %v326_v48  ;;  %v318_v27 = vunpack.c.l.bf16 %v7437_v10  ;;  %v7449_v31 = vld [vmem:[#allocation5 + $0x300] sm:$0xff]  ;;  %727 = vmatpush.msra.mxu3 %v458_v56  ;;  %v7461_v56 = vld [vmem:[#allocation2 + $0x18] sm:$0xff] }
  0x2e   :  { %13476 = vst [vmem:[#allocation22_spill] sm:$0xff] %v7413_v26  ;;  %v7441_v26 = vld [vmem:[#allocation5 + $0x200] sm:$0xff]  ;;  %v7443_v21 = vld [vmem:[#allocation5 + $0x310] sm:$0xff]  ;;  %v386_v11 = vunpack.c.l.bf16 %v7429_v60  ;;  %663 = vmatpush.msra.mxu2 %v390_v53  ;;  %534 = vmatpush.msra.mxu0 %v258_v61  ;;  %v446_v45 = vunpack.c.l.bf16 %v7449_v31  ;;  %v443_v53 = vunpack.c.h.bf16 %v7266_v2  ;;  %v315_v61 = vunpack.c.h.bf16 %v7262_v0 }
  0x2f   :  { %13477 = vst [vmem:[#allocation23_spill] sm:$0xff] %v7417_v44  ;;  %v254_v44 = vunpack.c.l.bf16 %v7435_v4  ;;  %599 = vmatpush.msra.mxu1 %v322_v3  ;;  %728 = vmatpush.msra.mxu3 %v454_v17  ;;  %v7453_v37 = vld [vmem:[#allocation2] sm:$0xff]  ;;  %v7458_v48 = vld [vmem:[#allocation2 + $0x10] sm:$0xff]  ;;  %v507_v3 = vunpack.c.h.bf16 %v7280_v12  ;;  %v311_v2 = vunpack.c.h.bf16 %v7271_v6  ;;  %v375_v0 = vunpack.c.h.bf16 %v7273_v7  ;;  %v7479_v6 = vld [vmem:[#allocation2 + $0x28] sm:$0xff] }
  0x30   :  { %13478 = vst [vmem:[#allocation24_spill] sm:$0xff] %v7423_v49  ;;  %v450_v49 = vunpack.c.l.bf16 %v7443_v21  ;;  %664 = vmatpush.msra.mxu2 %v386_v11  ;;  %v379_v11 = vunpack.c.h.bf16 %v7264_v1  ;;  %v435_v12 = vunpack.c.h.bf16 %v7289_v18  ;;  %v307_v1 = vunpack.c.h.bf16 %v7282_v13  ;;  %v7482_v17 = vld [vmem:[#allocation2 + $0x30] sm:$0xff]  ;;  %v7485_v18 = vld [vmem:[#allocation2 + $0x38] sm:$0xff] }
  0x31   :  { %13479 = vst [vmem:[#allocation25_spill] sm:$0xff] %v7425_v52  ;;  %v382_v52 = vunpack.c.l.bf16 %v7441_v26  ;;  %535 = vmatpush.msra.mxu0 %v254_v44  ;;  %600 = vmatpush.msra.mxu1 %v318_v27  ;;  %v439_v44 = vunpack.c.h.bf16 %v7275_v8  ;;  %v499_v8 = vunpack.c.h.bf16 %v7301_v25  ;;  %v431_v7 = vunpack.c.h.bf16 %v7299_v24 }
  0x32   :  { %729 = vmatpush.msra.mxu3 %v450_v49  ;;  %536 = vmatmul.f32.vlgmr.msra.gmra.mxu0 %v7453_v37  ;;  %v503_v49 = vunpack.c.h.bf16 %v7291_v19  ;;  %v371_v19 = vunpack.c.h.bf16 %v7284_v14  ;;  %v303_v13 = vunpack.c.h.bf16 %v7293_v20  ;;  %v495_v25 = vunpack.c.h.bf16 %v7313_v33 }
  0x33   :  { %665 = vmatpush.msra.mxu2 %v382_v52  ;;  %601 = vmatmul.f32.vlgmr.msra.gmra.mxu1 %v7455_v40  ;;  %v7477_v52 = vld [vmem:[#allocation2 + $0x20] sm:$0xff]  ;;  %v367_v14 = vunpack.c.h.bf16 %v7297_v23  ;;  %v427_v27 = vunpack.c.h.bf16 %v7309_v30  ;;  %v299_v24 = vunpack.c.h.bf16 %v7305_v28  ;;  %v363_v20 = vunpack.c.h.bf16 %v7307_v29  ;;  %v7503_v28 = vld [vmem:[#allocation2 + $0x48] sm:$0xff]  ;;  %v7508_v29 = vld [vmem:[#allocation2 + $0x58] sm:$0xff] }
  0x34   :  { %666 = vmatmul.f32.vlgmr.msra.gmra.mxu2 %v7458_v48  ;;  %730 = vmatpush.msra.mxu3 %v446_v45  ;;  %v491_v45 = vunpack.c.h.bf16 %v7323_v39  ;;  %v423_v33 = vunpack.c.h.bf16 %v7321_v38  ;;  %v295_v23 = vunpack.c.h.bf16 %v7315_v34  ;;  %v487_v30 = vunpack.c.h.bf16 %v7335_v47 }
  0x35   :  { %910 = vmatpush.msrb.mxu2 %v443_v53  ;;  %731 = vmatmul.f32.vlgmr.msra.gmra.mxu3 %v7461_v56  ;;  %v7501_v53 = vld [vmem:[#allocation2 + $0x40] sm:$0xff]  ;;  %v359_v39 = vunpack.c.h.bf16 %v7317_v35  ;;  %v419_v34 = vunpack.c.h.bf16 %v7333_v46  ;;  %v291_v35 = vunpack.c.h.bf16 %v7327_v42  ;;  %v483_v38 = vunpack.c.h.bf16 %v7347_v55 }
  0x36   :  { %780 = vmatpush.msrb.mxu0 %v315_v61  ;;  %975 = vmatpush.msrb.mxu3 %v507_v3  ;;  %v7506_v61 = vld [vmem:[#allocation2 + $0x50] sm:$0xff]  ;;  %v355_v47 = vunpack.c.h.bf16 %v7329_v43  ;;  %v7518_v3 = vld [vmem:[#allocation2 + $0x60] sm:$0xff]  ;;  %v415_v42 = vunpack.c.h.bf16 %v7345_v54  ;;  %v287_v43 = vunpack.c.h.bf16 %v7339_v50  ;;  %v479_v46 = vunpack.c.h.bf16 %v7359_v63 }
  0x37   :  { %845 = vmatpush.msrb.mxu1 %v379_v11  ;;  %911 = vmatpush.msrb.mxu2 %v439_v44  ;;  %v7520_v11 = vld [vmem:[#allocation2 + $0x68] sm:$0xff]  ;;  %v7522_v44 = vld [vmem:[#allocation2 + $0x70] sm:$0xff]  ;;  %v351_v55 = vunpack.c.h.bf16 %v7341_v51  ;;  %v411_v50 = vunpack.c.h.bf16 %v7357_v62  ;;  %v283_v51 = vunpack.c.h.bf16 %v7351_v58  ;;  %v475_v54 = vunpack.c.h.bf16 %v7371_v16 }
  0x38   :  { %781 = vmatpush.msrb.mxu0 %v311_v2  ;;  %976 = vmatpush.msrb.mxu3 %v503_v49  ;;  %v7524_v2 = vld [vmem:[#allocation2 + $0x78] sm:$0xff]  ;;  %v7534_v49 = vld [vmem:[#allocation2 + $0x80] sm:$0xff]  ;;  %v347_v63 = vunpack.c.h.bf16 %v7353_v59  ;;  %v407_v58 = vunpack.c.h.bf16 %v7369_v15  ;;  %v279_v59 = vunpack.c.h.bf16 %v7363_v5  ;;  %v471_v62 = vunpack.c.h.bf16 %v7383_v36  ;;  %v13480_v15 = vld [vmem:[#allocation16_spill] sm:$0xff] }
  0x39   :  { %846 = vmatpush.msrb.mxu1 %v375_v0  ;;  %912 = vmatpush.msrb.mxu2 %v435_v12  ;;  %v7536_v0 = vld [vmem:[#allocation2 + $0x88] sm:$0xff]  ;;  %v7538_v12 = vld [vmem:[#allocation2 + $0x90] sm:$0xff]  ;;  %v343_v16 = vunpack.c.h.bf16 %v7365_v9  ;;  %v403_v5 = vunpack.c.h.bf16 %v7381_v32  ;;  %v275_v9 = vunpack.c.h.bf16 %v7375_v22  ;;  %v467_v36 = vunpack.c.h.bf16 %v13480_v15 }
  0x3a   :  { %782 = vmatpush.msrb.mxu0 %v307_v1  ;;  %977 = vmatpush.msrb.mxu3 %v499_v8  ;;  %v7540_v1 = vld [vmem:[#allocation2 + $0x98] sm:$0xff]  ;;  %v7550_v8 = vld [vmem:[#allocation2 + $0xa0] sm:$0xff]  ;;  %v13482_v22 = vld [vmem:[#allocation15_spill] sm:$0xff] }
  0x3b   :  { %539 = vmatmul.f32.gmra.mxu0 %v7477_v52  ;;  %604 = vmatmul.f32.gmra.mxu1 %v7479_v6  ;;  %v399_v32 = vunpack.c.h.bf16 %v13482_v22  ;;  %v7616_v15 = vld [vmem:[#allocation2 + $0x128] sm:$0xff]  ;;  %v13490_v22 = vld [vmem:[#allocation21_spill] sm:$0xff] }
  0x3c   :  { %669 = vmatmul.f32.gmra.mxu2 %v7482_v17  ;;  %847 = vmatpush.msrb.mxu1 %v371_v19  ;;  %v7552_v19 = vld [vmem:[#allocation2 + $0xa8] sm:$0xff] }
  0x3d   :  { %734 = vmatmul.f32.gmra.mxu3 %v7485_v18  ;;  %913 = vmatpush.msrb.mxu2 %v431_v7  ;;  %v7554_v7 = vld [vmem:[#allocation2 + $0xb0] sm:$0xff] }
  0x3e   :  { %783 = vmatpush.msrb.mxu0 %v303_v13  ;;  %978 = vmatpush.msrb.mxu3 %v495_v25  ;;  %v7556_v13 = vld [vmem:[#allocation2 + $0xb8] sm:$0xff]  ;;  %v7566_v25 = vld [vmem:[#allocation2 + $0xc0] sm:$0xff] }
  0x3f   :  { %848 = vmatpush.msrb.mxu1 %v367_v14  ;;  %914 = vmatpush.msrb.mxu2 %v427_v27  ;;  %v7568_v14 = vld [vmem:[#allocation2 + $0xc8] sm:$0xff]  ;;  %v7570_v27 = vld [vmem:[#allocation2 + $0xd0] sm:$0xff] }
  0x40   :  { %784 = vmatpush.msrb.mxu0 %v299_v24  ;;  %979 = vmatpush.msrb.mxu3 %v491_v45  ;;  %v7572_v24 = vld [vmem:[#allocation2 + $0xd8] sm:$0xff]  ;;  %v13481_v45 = vld [vmem:[#allocation12_spill] sm:$0xff] }
  0x41   :  { %849 = vmatpush.msrb.mxu1 %v363_v20  ;;  %915 = vmatpush.msrb.mxu2 %v423_v33  ;;  %v339_v20 = vunpack.c.h.bf16 %v13481_v45  ;;  %v7582_v33 = vld [vmem:[#allocation2 + $0xe0] sm:$0xff]  ;;  %v7620_v45 = vld [vmem:[#allocation2 + $0x138] sm:$0xff] }
  0x42   :  { %785 = vmatpush.msrb.mxu0 %v295_v23  ;;  %980 = vmatpush.msrb.mxu3 %v487_v30  ;;  %v7584_v23 = vld [vmem:[#allocation2 + $0xe8] sm:$0xff]  ;;  %v7586_v30 = vld [vmem:[#allocation2 + $0xf0] sm:$0xff] }
  0x43   :  { %542 = vmatmul.f32.gmra.mxu0 %v7501_v53  ;;  %607 = vmatmul.f32.gmra.mxu1 %v7503_v28 }
  0x44   :  { %672 = vmatmul.f32.gmra.mxu2 %v7506_v61  ;;  %850 = vmatpush.msrb.mxu1 %v359_v39  ;;  %v7588_v39 = vld [vmem:[#allocation2 + $0xf8] sm:$0xff] }
  0x45   :  { %737 = vmatmul.f32.gmra.mxu3 %v7508_v29  ;;  %916 = vmatpush.msrb.mxu2 %v419_v34  ;;  %v13483_v34 = vld [vmem:[#allocation13_spill] sm:$0xff] }
  0x46   :  { %786 = vmatpush.msrb.mxu0 %v291_v35  ;;  %981 = vmatpush.msrb.mxu3 %v483_v38  ;;  %v271_v35 = vunpack.c.h.bf16 %v13483_v34  ;;  %v13484_v38 = vld [vmem:[#allocation20_spill] sm:$0xff]  ;;  %v455_v34 = vunpack.c.h.bf16 %v7431_v57  ;;  %v387_v57 = vunpack.c.h.bf16 %v7429_v60  ;;  %v383_v60 = vunpack.c.h.bf16 %v7441_v26  ;;  %v7673_v26 = vld [vmem:[#allocation5 + $0x2f8] sm:$0xff] }
  0x47   :  { %851 = vmatpush.msrb.mxu1 %v355_v47  ;;  %917 = vmatpush.msrb.mxu2 %v415_v42  ;;  %v463_v47 = vunpack.c.h.bf16 %v13484_v38  ;;  %v13485_v42 = vld [vmem:[#allocation14_spill] sm:$0xff]  ;;  %13495 = vst [vmem:[#allocation12_spill] sm:$0xff] %v7673_v26 }
  0x48   :  { %787 = vmatpush.msrb.mxu0 %v287_v43  ;;  %982 = vmatpush.msrb.mxu3 %v479_v46  ;;  %v335_v43 = vunpack.c.h.bf16 %v13485_v42  ;;  %v7598_v46 = vld [vmem:[#allocation2 + $0x100] sm:$0xff]  ;;  %v7632_v42 = vld [vmem:[#allocation2 + $0x148] sm:$0xff] }
  0x49   :  { %852 = vmatpush.msrb.mxu1 %v351_v55  ;;  %918 = vmatpush.msrb.mxu2 %v411_v50  ;;  %v7600_v55 = vld [vmem:[#allocation2 + $0x108] sm:$0xff]  ;;  %v7602_v50 = vld [vmem:[#allocation2 + $0x110] sm:$0xff] }
  0x4a   :  { %788 = vmatpush.msrb.mxu0 %v283_v51  ;;  %983 = vmatpush.msrb.mxu3 %v475_v54  ;;  %v7604_v51 = vld [vmem:[#allocation2 + $0x118] sm:$0xff]  ;;  %v13486_v54 = vld [vmem:[#allocation19_spill] sm:$0xff] }
  0x4b   :  { %545 = vmatmul.f32.gmra.mxu0 %v7518_v3  ;;  %610 = vmatmul.f32.gmra.mxu1 %v7520_v11 }
  0x4c   :  { %675 = vmatmul.f32.gmra.mxu2 %v7522_v44  ;;  %853 = vmatpush.msrb.mxu1 %v347_v63  ;;  %v395_v63 = vunpack.c.h.bf16 %v13486_v54  ;;  %v7636_v54 = vld [vmem:[#allocation2 + $0x158] sm:$0xff] }
  0x4d   :  { %740 = vmatmul.f32.gmra.mxu3 %v7524_v2  ;;  %919 = vmatpush.msrb.mxu2 %v407_v58  ;;  %v13487_v58 = vld [vmem:[#allocation17_spill] sm:$0xff] }
  0x4e   :  { %789 = vmatpush.msrb.mxu0 %v279_v59  ;;  %984 = vmatpush.msrb.mxu3 %v471_v62  ;;  %v267_v59 = vunpack.c.h.bf16 %v13487_v58  ;;  %v459_v62 = vunpack.c.h.bf16 %v7419_v41  ;;  %v13489_v41 = vld [vmem:[#allocation23_spill] sm:$0xff] }
  0x4f   :  { %854 = vmatpush.msrb.mxu1 %v343_v16  ;;  %920 = vmatpush.msrb.mxu2 %v403_v5  ;;  %v13488_v16 = vld [vmem:[#allocation18_spill] sm:$0xff] }
  0x50   :  { %790 = vmatpush.msrb.mxu0 %v275_v9  ;;  %985 = vmatpush.msrb.mxu3 %v467_v36  ;;  %v331_v5 = vunpack.c.h.bf16 %v13488_v16  ;;  %v7614_v9 = vld [vmem:[#allocation2 + $0x120] sm:$0xff]  ;;  %v7618_v36 = vld [vmem:[#allocation2 + $0x130] sm:$0xff] }
  0x51   :  { %855 = vmatpush.msrb.mxu1 %v339_v20  ;;  %921 = vmatpush.msrb.mxu2 %v399_v32  ;;  %v391_v20 = vunpack.c.h.bf16 %v13489_v41  ;;  %v263_v32 = vunpack.c.h.bf16 %v13490_v22  ;;  %v7648_v41 = vld [vmem:[#allocation2 + $0x168] sm:$0xff]  ;;  %v7652_v22 = vld [vmem:[#allocation2 + $0x178] sm:$0xff] }
  0x52   :  { %791 = vmatpush.msrb.mxu0 %v271_v35  ;;  %986 = vmatpush.msrb.mxu3 %v463_v47  ;;  %v13491_v35 = vld [vmem:[#allocation22_spill] sm:$0xff] }
  0x53   :  { %548 = vmatmul.f32.gmra.mxu0 %v7534_v49  ;;  %613 = vmatmul.f32.gmra.mxu1 %v7536_v0  ;;  %v327_v38 = vunpack.c.h.bf16 %v13491_v35  ;;  %v7630_v47 = vld [vmem:[#allocation2 + $0x140] sm:$0xff] }
  0x54   :  { %678 = vmatmul.f32.gmra.mxu2 %v7538_v12  ;;  %856 = vmatpush.msrb.mxu1 %v335_v43  ;;  %v7634_v43 = vld [vmem:[#allocation2 + $0x150] sm:$0xff]  ;;  %v7662_v35 = vld [vmem:[#allocation2 + $0x180] sm:$0xff] }
  0x55   :  { %743 = vmatmul.f32.gmra.mxu3 %v7540_v1  ;;  %922 = vmatpush.msrb.mxu2 %v395_v63  ;;  %v13492_v63 = vld [vmem:[#allocation24_spill] sm:$0xff] }
  0x56   :  { %792 = vmatpush.msrb.mxu0 %v267_v59  ;;  %987 = vmatpush.msrb.mxu3 %v459_v62  ;;  %v259_v58 = vunpack.c.h.bf16 %v13492_v63  ;;  %v451_v59 = vunpack.c.h.bf16 %v7443_v21  ;;  %v13493_v62 = vld [vmem:[#allocation25_spill] sm:$0xff]  ;;  %v255_v21 = vunpack.c.h.bf16 %v7435_v4  ;;  %v444_v4 = vunpack.c.l.bf16 %v7673_v26 }
  0x57   :  { %857 = vmatpush.msrb.mxu1 %v331_v5  ;;  %923 = vmatpush.msrb.mxu2 %v391_v20  ;;  %v323_v16 = vunpack.c.h.bf16 %v13493_v62  ;;  %v7646_v5 = vld [vmem:[#allocation2 + $0x160] sm:$0xff]  ;;  %v7650_v20 = vld [vmem:[#allocation2 + $0x170] sm:$0xff]  ;;  %v7668_v63 = vld [vmem:[#allocation2 + $0x198] sm:$0xff] }
  0x58   :  { %793 = vmatpush.msrb.mxu0 %v263_v32  ;;  %988 = vmatpush.msrb.mxu3 %v455_v34  ;;  %v447_v32 = vunpack.c.h.bf16 %v7449_v31  ;;  %v319_v34 = vunpack.c.h.bf16 %v7437_v10  ;;  %13494 = vst [vmem:[#allocation16_spill] sm:$0xff] %v7668_v63  ;;  %v7677_v10 = vld [vmem:[#allocation5 + $0xf8] sm:$0xff]  ;;  %v7683_v62 = vld [vmem:[#allocation2 + $0x1a0] sm:$0xff] }
  0x59   :  { %858 = vmatpush.msrb.mxu1 %v327_v38  ;;  %924 = vmatpush.msrb.mxu2 %v387_v57  ;;  %v7664_v38 = vld [vmem:[#allocation2 + $0x188] sm:$0xff]  ;;  %v7666_v57 = vld [vmem:[#allocation2 + $0x190] sm:$0xff]  ;;  %13496 = vst [vmem:[#allocation15_spill] sm:$0xff] %v7677_v10  ;;  %v7679_v31 = vld [vmem:[#allocation5 + $0x3f8] sm:$0xff] }
  0x5a   :  { %794 = vmatpush.msrb.mxu0 %v259_v58  ;;  %989 = vmatpush.msrb.mxu3 %v451_v59  ;;  %13497 = vst [vmem:[#allocation13_spill] sm:$0xff] %v7679_v31  ;;  %v316_v58 = vunpack.c.l.bf16 %v7677_v10  ;;  %v508_v59 = vunpack.c.l.bf16 %v7679_v31  ;;  %v7716_v26 = vld [vmem:[#allocation2 + $0x1d8] sm:$0xff] }
  0x5b   :  { %551 = vmatmul.f32.gmra.mxu0 %v7550_v8  ;;  %616 = vmatmul.f32.gmra.mxu1 %v7552_v19  ;;  %13498 = vst [vmem:[#allocation20_spill] sm:$0xff] %v7683_v62 }
  0x5c   :  { %681 = vmatmul.f32.gmra.mxu2 %v7554_v7  ;;  %859 = vmatpush.msrb.mxu1 %v323_v16  ;;  %v7685_v16 = vld [vmem:[#allocation2 + $0x1a8] sm:$0xff]  ;;  %13510 = vst [vmem:[#allocation28_spill] sm:$0xff] %v7716_v26 }
  0x5d   :  { %746 = vmatmul.f32.gmra.mxu3 %v7556_v13  ;;  %925 = vmatpush.msrb.mxu2 %v383_v60  ;;  %13499 = vst [vmem:[#allocation14_spill] sm:$0xff] %v7685_v16  ;;  %v7687_v60 = vld [vmem:[#allocation5 + $0x1f8] sm:$0xff] }
  0x5e   :  { %795 = vmatpush.msrb.mxu0 %v255_v21  ;;  %990 = vmatpush.msrb.mxu3 %v447_v32  ;;  %13500 = vst [vmem:[#allocation19_spill] sm:$0xff] %v7687_v60  ;;  %v7689_v21 = vld [vmem:[#allocation2 + $0x1b0] sm:$0xff]  ;;  %v380_v32 = vunpack.c.l.bf16 %v7687_v60 }
  0x5f   :  { %860 = vmatpush.msrb.mxu1 %v319_v34  ;;  %1170 = vmatpush.msra.mxu2 %v444_v4  ;;  %13501 = vst [vmem:[#allocation17_spill] sm:$0xff] %v7689_v21  ;;  %v7692_v34 = vld [vmem:[#allocation2 + $0x1b8] sm:$0xff]  ;;  %v7698_v4 = vld [vmem:[#allocation5 + $0x2e8] sm:$0xff] }
  0x60   :  { %1040 = vmatpush.msra.mxu0 %v316_v58  ;;  %1235 = vmatpush.msra.mxu3 %v508_v59  ;;  %13502 = vst [vmem:[#allocation18_spill] sm:$0xff] %v7692_v34  ;;  %v7700_v58 = vld [vmem:[#allocation5 + $0xe8] sm:$0xff]  ;;  %v440_v31 = vunpack.c.l.bf16 %v7698_v4 }
  0x61   :  { %1105 = vmatpush.msra.mxu1 %v380_v32  ;;  %13503 = vst [vmem:[#allocation23_spill] sm:$0xff] %v7698_v4  ;;  %v7702_v59 = vld [vmem:[#allocation5 + $0x3e8] sm:$0xff]  ;;  %v312_v60 = vunpack.c.l.bf16 %v7700_v58  ;;  %v7713_v32 = vld [vmem:[#allocation2 + $0x1d0] sm:$0xff]  ;;  %v7740_v4 = vld [vmem:[#allocation2 + $0x1f8] sm:$0xff] }
  0x62   :  { %13504 = vst [vmem:[#allocation21_spill] sm:$0xff] %v7700_v58  ;;  %v504_v10 = vunpack.c.l.bf16 %v7702_v59  ;;  %1171 = vmatpush.msra.mxu2 %v440_v31  ;;  %v7724_v58 = vld [vmem:[#allocation5 + $0xd8] sm:$0xff] }
  0x63   :  { %554 = vmatmul.f32.gmra.mxu0 %v7566_v25  ;;  %619 = vmatmul.f32.gmra.mxu1 %v7568_v14  ;;  %13505 = vst [vmem:[#allocation22_spill] sm:$0xff] %v7702_v59  ;;  %v7722_v59 = vld [vmem:[#allocation5 + $0x2d8] sm:$0xff] }
  0x64   :  { %684 = vmatmul.f32.gmra.mxu2 %v7570_v27  ;;  %13509 = vst [vmem:[#allocation27_spill] sm:$0xff] %v7713_v32  ;;  %1041 = vmatpush.msra.mxu0 %v312_v60  ;;  %v7726_v31 = vld [vmem:[#allocation5 + $0x3d8] sm:$0xff]  ;;  %v436_v60 = vunpack.c.l.bf16 %v7722_v59 }
  0x65   :  { %749 = vmatmul.f32.gmra.mxu3 %v7572_v24  ;;  %13511 = vst [vmem:[#allocation29_spill] sm:$0xff] %v7722_v59 }
  0x66   :  { %1236 = vmatpush.msra.mxu3 %v504_v10  ;;  %13512 = vst [vmem:[#allocation30_spill] sm:$0xff] %v7724_v58  ;;  %v500_v10 = vunpack.c.l.bf16 %v7726_v31  ;;  %1172 = vmatpush.msra.mxu2 %v436_v60  ;;  %v7753_v60 = vld [vmem:[#allocation5 + $0xc8] sm:$0xff] }
  0x67   :  { %13513 = vst [vmem:[#allocation31_spill] sm:$0xff] %v7726_v31 }
  0x68   :  { %13518 = vst [vmem:[#allocation36_spill] sm:$0xff] %v7740_v4  ;;  %1237 = vmatpush.msra.mxu3 %v500_v10 }
  0x69   :  { %13521 = vst [vmem:[#allocation39_spill] sm:$0xff] %v7753_v60 }
  0x6b   :  { %557 = vmatmul.f32.gmra.mxu0 %v7582_v33  ;;  %622 = vmatmul.f32.gmra.mxu1 %v7584_v23 }
  0x6c   :  { %687 = vmatmul.f32.gmra.mxu2 %v7586_v30 }
  0x6d   :  { %752 = vmatmul.f32.gmra.mxu3 %v7588_v39 }
  0x73   :  { %560 = vmatmul.f32.gmra.mxu0 %v7598_v46  ;;  %625 = vmatmul.f32.gmra.mxu1 %v7600_v55 }
  0x74   :  { %690 = vmatmul.f32.gmra.mxu2 %v7602_v50 }
  0x75   :  { %755 = vmatmul.f32.gmra.mxu3 %v7604_v51 }
  0x7b   :  { %563 = vmatmul.f32.gmra.mxu0 %v7614_v9  ;;  %628 = vmatmul.f32.gmra.mxu1 %v7616_v15 }
  0x7c   :  { %693 = vmatmul.f32.gmra.mxu2 %v7618_v36 }
  0x7d   :  { %758 = vmatmul.f32.gmra.mxu3 %v7620_v45 }
  0x83   :  { %566 = vmatmul.f32.gmra.mxu0 %v7630_v47  ;;  %631 = vmatmul.f32.gmra.mxu1 %v7632_v42 }
  0x84   :  { %696 = vmatmul.f32.gmra.mxu2 %v7634_v43 }
  0x85   :  { %761 = vmatmul.f32.gmra.mxu3 %v7636_v54 }
  0x8b   :  { %569 = vmatmul.f32.gmra.mxu0 %v7646_v5  ;;  %634 = vmatmul.f32.gmra.mxu1 %v7648_v41 }
  0x8c   :  { %699 = vmatmul.f32.gmra.mxu2 %v7650_v20 }
  0x8d   :  { %764 = vmatmul.f32.gmra.mxu3 %v7652_v22 }
  0x93   :  { %572 = vmatmul.f32.gmra.mxu0 %v7662_v35  ;;  %637 = vmatmul.f32.gmra.mxu1 %v7664_v38 }
  0x94   :  { %702 = vmatmul.f32.gmra.mxu2 %v7666_v57 }
  0x95   :  { %767 = vmatmul.f32.gmra.mxu3 %v7668_v63  ;;  %v7742_v63 = vld [vmem:[#allocation7] sm:$0xf] }
  0x96   :  { %13519 = vst [vmem:[#allocation37_spill] sm:$0xff] %v7742_v63  ;;  %v7749_v31 = vperm.slane %v7742_v63, 0 }
  0x9b   :  { %575 = vmatmul.f32.gmra.mxu0 %v7683_v62  ;;  %640 = vmatmul.f32.gmra.mxu1 %v7685_v16  ;;  %v7707_v62 = vld [vmem:[#allocation2 + $0x1c0] sm:$0xff]  ;;  %v7709_v16 = vld [vmem:[#allocation2 + $0x1c8] sm:$0xff] }
  0x9c   :  { %705 = vmatmul.f32.gmra.mxu2 %v7689_v21  ;;  %13506 = vst [vmem:[#allocation24_spill] sm:$0xff] %v7707_v62  ;;  %v7711_v21 = vld [vmem:[#allocation5 + $0x1e8] sm:$0xff] }
  0x9d   :  { %770 = vmatmul.f32.gmra.mxu3 %v7692_v34  ;;  %13507 = vst [vmem:[#allocation25_spill] sm:$0xff] %v7709_v16  ;;  %v376_v34 = vunpack.c.l.bf16 %v7711_v21 }
  0x9e   :  { %13508 = vst [vmem:[#allocation26_spill] sm:$0xff] %v7711_v21  ;;  %v308_v21 = vunpack.c.l.bf16 %v7724_v58 }
  0x9f   :  { %1106 = vmatpush.msra.mxu1 %v376_v34  ;;  %v7737_v34 = vld [vmem:[#allocation2 + $0x1f0] sm:$0xff] }
  0xa0   :  { %13517 = vst [vmem:[#allocation35_spill] sm:$0xff] %v7737_v34  ;;  %1042 = vmatpush.msra.mxu0 %v308_v21  ;;  %v7751_v21 = vld [vmem:[#allocation5 + $0x2c8] sm:$0xff] }
  0xa1   :  { %13520 = vst [vmem:[#allocation38_spill] sm:$0xff] %v7751_v21  ;;  %v432_v10 = vunpack.c.l.bf16 %v7751_v21 }
  0xa3   :  { %578 = vmatmul.f32.gmra.mxu0 %v7707_v62  ;;  %643 = vmatmul.f32.gmra.mxu1 %v7709_v16  ;;  %v7731_v62 = vld [vmem:[#allocation2 + $0x1e0] sm:$0xff]  ;;  %v7733_v16 = vld [vmem:[#allocation2 + $0x1e8] sm:$0xff] }
  0xa4   :  { %708 = vmatmul.f32.gmra.mxu2 %v7713_v32  ;;  %13514 = vst [vmem:[#allocation32_spill] sm:$0xff] %v7731_v62  ;;  %v7735_v32 = vld [vmem:[#allocation5 + $0x1d8] sm:$0xff] }
  0xa5   :  { %773 = vmatmul.f32.gmra.mxu3 %v7716_v26  ;;  %13515 = vst [vmem:[#allocation33_spill] sm:$0xff] %v7733_v16  ;;  %v372_v26 = vunpack.c.l.bf16 %v7735_v32  ;;  %1173 = vmatpush.msra.mxu2 %v432_v10 }
  0xa6   :  { %13516 = vst [vmem:[#allocation34_spill] sm:$0xff] %v7735_v32  ;;  %v7755_v32 = vld [vmem:[#allocation5 + $0x3c8] sm:$0xff] }
  0xa7   :  { %1107 = vmatpush.msra.mxu1 %v372_v26  ;;  %13522 = vst [vmem:[#allocation40_spill] sm:$0xff] %v7755_v32  ;;  %v7760_v26 = vld [vmem:[#allocation5 + $0x1c8] sm:$0xff] }
  0xa8   :  { %13523 = vst [vmem:[#allocation41_spill] sm:$0xff] %v7760_v26  ;;  %v368_v63 = vunpack.c.l.bf16 %v7760_v26 }
  0xaa   :  { %1108 = vmatpush.msra.mxu1 %v368_v63 }
  0xab   :  { %581 = vmatmul.f32.gmra.mxu0 %v7731_v62  ;;  %646 = vmatmul.f32.gmra.mxu1 %v7733_v16  ;;  %v304_v62 = vunpack.c.l.bf16 %v7753_v60  ;;  %v496_v16 = vunpack.c.l.bf16 %v7755_v32  ;;  %v7768_v32 = vld [vmem:[#allocation5 + $0x2b8] sm:$0xff] }
  0xac   :  { %711 = vmatmul.f32.gmra.mxu2 %v7737_v34  ;;  %v7770_v60 = vld [vmem:[#allocation5 + $0xb8] sm:$0xff]  ;;  %v428_v10 = vunpack.c.l.bf16 %v7768_v32 }
  0xad   :  { %776 = vmatmul.f32.gmra.mxu3 %v7740_v4  ;;  %1043 = vmatpush.msra.mxu0 %v304_v62 }
  0xae   :  { %1238 = vmatpush.msra.mxu3 %v496_v16  ;;  %v300_v16 = vunpack.c.l.bf16 %v7770_v60  ;;  %1174 = vmatpush.msra.mxu2 %v428_v10  ;;  %v7791_v10 = vld [vmem:[#allocation5 + $0x3a8] sm:$0xff] }
  0xaf   :  { %v537_v58 = vpop.f32.mrf.mxu0 }
  0xb0   :  { %v602_v34 = vpop.f32.mrf.mxu1  ;;  %v538_v4 = vadd.f32 %v537_v58, %v7749_v31  ;;  %v7772_v58 = vld [vmem:[#allocation5 + $0x3b8] sm:$0xff]  ;;  %1044 = vmatpush.msra.mxu0 %v300_v16 }
  0xb1   :  { %13524 = vst [vmem:[#allocation42_spill] sm:$0xff] %v7772_v58 }
  0xb2   :  { %v603_v21 = vadd.f32 %v602_v34, %v538_v4 }
  0xb3   :  { %796 = vmatmul.f32.vlgmr.msrb.gmra.mxu0 %v7453_v37  ;;  %861 = vmatmul.f32.vlgmr.msrb.gmra.mxu1 %v7455_v40  ;;  %v492_v37 = vunpack.c.l.bf16 %v7772_v58 }
  0xb4   :  { %926 = vmatmul.f32.vlgmr.msrb.gmra.mxu2 %v7458_v48  ;;  %v7777_v48 = vld [vmem:[#allocation5 + $0x1b8] sm:$0xff] }
  0xb5   :  { %991 = vmatmul.f32.vlgmr.msrb.gmra.mxu3 %v7461_v56  ;;  %v364_v26 = vunpack.c.l.bf16 %v7777_v48 }
  0xb6   :  { %1239 = vmatpush.msra.mxu3 %v492_v37 }
  0xb7   :  { %v667_v62 = vpop.f32.mrf.mxu2  ;;  %1109 = vmatpush.msra.mxu1 %v364_v26 }
  0xb8   :  { %v668_v40 = vadd.f32 %v667_v62, %v603_v21  ;;  %v540_v4 = vpop.f32.mrf.mxu0  ;;  %v605_v34 = vpop.f32.mrf.mxu1  ;;  %v7787_v21 = vld [vmem:[#allocation5 + $0x2a8] sm:$0xff] }
  0xb9   :  { %v541_v56 = vadd.f32 %v540_v4, %v7749_v31  ;;  %v732_v63 = vpop.f32.mrf.mxu3  ;;  %v7789_v62 = vld [vmem:[#allocation5 + $0xa8] sm:$0xff] }
  0xba   :  { %v7781_v59 = vadd.f32 %v732_v63, %v668_v40  ;;  %v424_v40 = vunpack.c.l.bf16 %v7787_v21  ;;  %v296_v37 = vunpack.c.l.bf16 %v7789_v62 }
  0xbb   :  { %799 = vmatmul.f32.gmra.mxu0 %v7477_v52  ;;  %864 = vmatmul.f32.gmra.mxu1 %v7479_v6  ;;  %v606_v58 = vadd.f32 %v605_v34, %v541_v56  ;;  %v488_v52 = vunpack.c.l.bf16 %v7791_v10 }
  0xbc   :  { %13525 = vst [vmem:[#allocation43_spill] sm:$0xff] %v7781_v59  ;;  %929 = vmatmul.f32.gmra.mxu2 %v7482_v17  ;;  %v7796_v17 = vld [vmem:[#allocation5 + $0x1a8] sm:$0xff]  ;;  %1045 = vmatpush.msra.mxu0 %v296_v37 }
  0xbd   :  { %994 = vmatmul.f32.gmra.mxu3 %v7485_v18  ;;  %1175 = vmatpush.msra.mxu2 %v424_v40  ;;  %v360_v56 = vunpack.c.l.bf16 %v7796_v17  ;;  %v7810_v40 = vld [vmem:[#allocation5 + $0x398] sm:$0xff] }
  0xbe   :  { %1240 = vmatpush.msra.mxu3 %v488_v52 }
  0xbf   :  { %v670_v16 = vpop.f32.mrf.mxu2  ;;  %1110 = vmatpush.msra.mxu1 %v360_v56 }
  0xc0   :  { %v671_v6 = vadd.f32 %v670_v16, %v606_v58  ;;  %v543_v4 = vpop.f32.mrf.mxu0  ;;  %v608_v34 = vpop.f32.mrf.mxu1  ;;  %v7806_v58 = vld [vmem:[#allocation5 + $0x298] sm:$0xff] }
  0xc1   :  { %v544_v18 = vadd.f32 %v543_v4, %v7749_v31  ;;  %v735_v26 = vpop.f32.mrf.mxu3  ;;  %v7808_v16 = vld [vmem:[#allocation5 + $0x98] sm:$0xff] }
  0xc2   :  { %v7800_v63 = vadd.f32 %v735_v26, %v671_v6  ;;  %v420_v6 = vunpack.c.l.bf16 %v7806_v58  ;;  %v292_v52 = vunpack.c.l.bf16 %v7808_v16 }
  0xc3   :  { %802 = vmatmul.f32.gmra.mxu0 %v7501_v53  ;;  %867 = vmatmul.f32.gmra.mxu1 %v7503_v28  ;;  %v609_v59 = vadd.f32 %v608_v34, %v544_v18  ;;  %v484_v53 = vunpack.c.l.bf16 %v7810_v40 }
  0xc4   :  { %13526 = vst [vmem:[#allocation44_spill] sm:$0xff] %v7800_v63  ;;  %932 = vmatmul.f32.gmra.mxu2 %v7506_v61  ;;  %v7815_v61 = vld [vmem:[#allocation5 + $0x198] sm:$0xff]  ;;  %1046 = vmatpush.msra.mxu0 %v292_v52 }
  0xc5   :  { %997 = vmatmul.f32.gmra.mxu3 %v7508_v29  ;;  %1176 = vmatpush.msra.mxu2 %v420_v6  ;;  %v356_v26 = vunpack.c.l.bf16 %v7815_v61  ;;  %v7829_v6 = vld [vmem:[#allocation5 + $0x388] sm:$0xff] }
  0xc6   :  { %1241 = vmatpush.msra.mxu3 %v484_v53 }
  0xc7   :  { %v673_v37 = vpop.f32.mrf.mxu2  ;;  %1111 = vmatpush.msra.mxu1 %v356_v26 }
  0xc8   :  { %v674_v28 = vadd.f32 %v673_v37, %v609_v59  ;;  %v546_v4 = vpop.f32.mrf.mxu0  ;;  %v611_v34 = vpop.f32.mrf.mxu1  ;;  %v7825_v59 = vld [vmem:[#allocation5 + $0x288] sm:$0xff] }
  0xc9   :  { %v547_v29 = vadd.f32 %v546_v4, %v7749_v31  ;;  %v738_v18 = vpop.f32.mrf.mxu3  ;;  %v7827_v37 = vld [vmem:[#allocation5 + $0x88] sm:$0xff] }
  0xca   :  { %v7819_v56 = vadd.f32 %v738_v18, %v674_v28  ;;  %v416_v28 = vunpack.c.l.bf16 %v7825_v59  ;;  %v288_v53 = vunpack.c.l.bf16 %v7827_v37 }
  0xcb   :  { %805 = vmatmul.f32.gmra.mxu0 %v7518_v3  ;;  %870 = vmatmul.f32.gmra.mxu1 %v7520_v11  ;;  %v612_v63 = vadd.f32 %v611_v34, %v547_v29  ;;  %v480_v3 = vunpack.c.l.bf16 %v7829_v6 }
  0xcc   :  { %13527 = vst [vmem:[#allocation45_spill] sm:$0xff] %v7819_v56  ;;  %935 = vmatmul.f32.gmra.mxu2 %v7522_v44  ;;  %v7834_v44 = vld [vmem:[#allocation5 + $0x188] sm:$0xff]  ;;  %1047 = vmatpush.msra.mxu0 %v288_v53 }
  0xcd   :  { %1000 = vmatmul.f32.gmra.mxu3 %v7524_v2  ;;  %1177 = vmatpush.msra.mxu2 %v416_v28  ;;  %v352_v18 = vunpack.c.l.bf16 %v7834_v44  ;;  %v7848_v28 = vld [vmem:[#allocation5 + $0x378] sm:$0xff] }
  0xce   :  { %1242 = vmatpush.msra.mxu3 %v480_v3 }
  0xcf   :  { %v676_v52 = vpop.f32.mrf.mxu2  ;;  %1112 = vmatpush.msra.mxu1 %v352_v18 }
  0xd0   :  { %v677_v11 = vadd.f32 %v676_v52, %v612_v63  ;;  %v549_v4 = vpop.f32.mrf.mxu0  ;;  %v614_v34 = vpop.f32.mrf.mxu1  ;;  %v7844_v63 = vld [vmem:[#allocation5 + $0x278] sm:$0xff] }
  0xd1   :  { %v550_v2 = vadd.f32 %v549_v4, %v7749_v31  ;;  %v741_v29 = vpop.f32.mrf.mxu3  ;;  %v7846_v52 = vld [vmem:[#allocation5 + $0x78] sm:$0xff] }
  0xd2   :  { %v7838_v26 = vadd.f32 %v741_v29, %v677_v11  ;;  %v412_v11 = vunpack.c.l.bf16 %v7844_v63  ;;  %v284_v3 = vunpack.c.l.bf16 %v7846_v52 }
  0xd3   :  { %808 = vmatmul.f32.gmra.mxu0 %v7534_v49  ;;  %873 = vmatmul.f32.gmra.mxu1 %v7536_v0  ;;  %v615_v56 = vadd.f32 %v614_v34, %v550_v2  ;;  %v476_v49 = vunpack.c.l.bf16 %v7848_v28 }
  0xd4   :  { %13528 = vst [vmem:[#allocation46_spill] sm:$0xff] %v7838_v26  ;;  %938 = vmatmul.f32.gmra.mxu2 %v7538_v12  ;;  %v7853_v12 = vld [vmem:[#allocation5 + $0x178] sm:$0xff]  ;;  %1048 = vmatpush.msra.mxu0 %v284_v3 }
  0xd5   :  { %1003 = vmatmul.f32.gmra.mxu3 %v7540_v1  ;;  %1178 = vmatpush.msra.mxu2 %v412_v11  ;;  %v348_v29 = vunpack.c.l.bf16 %v7853_v12  ;;  %v7867_v11 = vld [vmem:[#allocation5 + $0x368] sm:$0xff] }
  0xd6   :  { %1243 = vmatpush.msra.mxu3 %v476_v49 }
  0xd7   :  { %v679_v53 = vpop.f32.mrf.mxu2  ;;  %1113 = vmatpush.msra.mxu1 %v348_v29 }
  0xd8   :  { %v680_v0 = vadd.f32 %v679_v53, %v615_v56  ;;  %v552_v4 = vpop.f32.mrf.mxu0  ;;  %v617_v34 = vpop.f32.mrf.mxu1  ;;  %v7863_v56 = vld [vmem:[#allocation5 + $0x268] sm:$0xff] }
  0xd9   :  { %v553_v1 = vadd.f32 %v552_v4, %v7749_v31  ;;  %v744_v2 = vpop.f32.mrf.mxu3  ;;  %v7865_v53 = vld [vmem:[#allocation5 + $0x68] sm:$0xff] }
  0xda   :  { %v7857_v18 = vadd.f32 %v744_v2, %v680_v0  ;;  %v408_v0 = vunpack.c.l.bf16 %v7863_v56  ;;  %v280_v49 = vunpack.c.l.bf16 %v7865_v53 }
  0xdb   :  { %811 = vmatmul.f32.gmra.mxu0 %v7550_v8  ;;  %876 = vmatmul.f32.gmra.mxu1 %v7552_v19  ;;  %v618_v26 = vadd.f32 %v617_v34, %v553_v1  ;;  %v472_v8 = vunpack.c.l.bf16 %v7867_v11 }
  0xdc   :  { %13529 = vst [vmem:[#allocation47_spill] sm:$0xff] %v7857_v18  ;;  %941 = vmatmul.f32.gmra.mxu2 %v7554_v7  ;;  %v7872_v7 = vld [vmem:[#allocation5 + $0x168] sm:$0xff]  ;;  %1049 = vmatpush.msra.mxu0 %v280_v49 }
  0xdd   :  { %1006 = vmatmul.f32.gmra.mxu3 %v7556_v13  ;;  %1179 = vmatpush.msra.mxu2 %v408_v0  ;;  %v344_v2 = vunpack.c.l.bf16 %v7872_v7  ;;  %v7886_v0 = vld [vmem:[#allocation5 + $0x358] sm:$0xff] }
  0xde   :  { %1244 = vmatpush.msra.mxu3 %v472_v8 }
  0xdf   :  { %v682_v3 = vpop.f32.mrf.mxu2  ;;  %1114 = vmatpush.msra.mxu1 %v344_v2 }
  0xe0   :  { %v683_v19 = vadd.f32 %v682_v3, %v618_v26  ;;  %v555_v4 = vpop.f32.mrf.mxu0  ;;  %v620_v34 = vpop.f32.mrf.mxu1  ;;  %v7882_v26 = vld [vmem:[#allocation5 + $0x258] sm:$0xff] }
  0xe1   :  { %v556_v13 = vadd.f32 %v555_v4, %v7749_v31  ;;  %v747_v1 = vpop.f32.mrf.mxu3  ;;  %v7884_v3 = vld [vmem:[#allocation5 + $0x58] sm:$0xff] }
  0xe2   :  { %v7876_v29 = vadd.f32 %v747_v1, %v683_v19  ;;  %v404_v19 = vunpack.c.l.bf16 %v7882_v26  ;;  %v276_v8 = vunpack.c.l.bf16 %v7884_v3 }
  0xe3   :  { %814 = vmatmul.f32.gmra.mxu0 %v7566_v25  ;;  %879 = vmatmul.f32.gmra.mxu1 %v7568_v14  ;;  %v621_v18 = vadd.f32 %v620_v34, %v556_v13  ;;  %v468_v25 = vunpack.c.l.bf16 %v7886_v0 }
  0xe4   :  { %13530 = vst [vmem:[#allocation48_spill] sm:$0xff] %v7876_v29  ;;  %944 = vmatmul.f32.gmra.mxu2 %v7570_v27  ;;  %v7891_v27 = vld [vmem:[#allocation5 + $0x158] sm:$0xff]  ;;  %1050 = vmatpush.msra.mxu0 %v276_v8 }
  0xe5   :  { %1009 = vmatmul.f32.gmra.mxu3 %v7572_v24  ;;  %1180 = vmatpush.msra.mxu2 %v404_v19  ;;  %v340_v1 = vunpack.c.l.bf16 %v7891_v27  ;;  %v7905_v19 = vld [vmem:[#allocation5 + $0x348] sm:$0xff] }
  0xe6   :  { %1245 = vmatpush.msra.mxu3 %v468_v25 }
  0xe7   :  { %v685_v49 = vpop.f32.mrf.mxu2  ;;  %1115 = vmatpush.msra.mxu1 %v340_v1 }
  0xe8   :  { %v686_v14 = vadd.f32 %v685_v49, %v621_v18  ;;  %v558_v4 = vpop.f32.mrf.mxu0  ;;  %v623_v34 = vpop.f32.mrf.mxu1  ;;  %v7901_v18 = vld [vmem:[#allocation5 + $0x248] sm:$0xff] }
  0xe9   :  { %v559_v24 = vadd.f32 %v558_v4, %v7749_v31  ;;  %v750_v13 = vpop.f32.mrf.mxu3  ;;  %v7903_v49 = vld [vmem:[#allocation5 + $0x48] sm:$0xff] }
  0xea   :  { %v7895_v2 = vadd.f32 %v750_v13, %v686_v14  ;;  %v400_v14 = vunpack.c.l.bf16 %v7901_v18  ;;  %v272_v25 = vunpack.c.l.bf16 %v7903_v49 }
  0xeb   :  { %817 = vmatmul.f32.gmra.mxu0 %v7582_v33  ;;  %882 = vmatmul.f32.gmra.mxu1 %v7584_v23  ;;  %v624_v29 = vadd.f32 %v623_v34, %v559_v24  ;;  %v464_v33 = vunpack.c.l.bf16 %v7905_v19 }
  0xec   :  { %13531 = vst [vmem:[#allocation49_spill] sm:$0xff] %v7895_v2  ;;  %947 = vmatmul.f32.gmra.mxu2 %v7586_v30  ;;  %v7910_v30 = vld [vmem:[#allocation5 + $0x148] sm:$0xff]  ;;  %1051 = vmatpush.msra.mxu0 %v272_v25 }
  0xed   :  { %1012 = vmatmul.f32.gmra.mxu3 %v7588_v39  ;;  %1181 = vmatpush.msra.mxu2 %v400_v14  ;;  %v336_v13 = vunpack.c.l.bf16 %v7910_v30  ;;  %v7924_v14 = vld [vmem:[#allocation5 + $0x338] sm:$0xff] }
  0xee   :  { %1246 = vmatpush.msra.mxu3 %v464_v33 }
  0xef   :  { %v688_v8 = vpop.f32.mrf.mxu2  ;;  %1116 = vmatpush.msra.mxu1 %v336_v13 }
  0xf0   :  { %v689_v23 = vadd.f32 %v688_v8, %v624_v29  ;;  %v561_v4 = vpop.f32.mrf.mxu0  ;;  %v626_v34 = vpop.f32.mrf.mxu1  ;;  %v7920_v29 = vld [vmem:[#allocation5 + $0x238] sm:$0xff] }
  0xf1   :  { %v562_v39 = vadd.f32 %v561_v4, %v7749_v31  ;;  %v753_v24 = vpop.f32.mrf.mxu3  ;;  %v7922_v8 = vld [vmem:[#allocation5 + $0x38] sm:$0xff] }
  0xf2   :  { %v7914_v1 = vadd.f32 %v753_v24, %v689_v23  ;;  %v396_v23 = vunpack.c.l.bf16 %v7920_v29  ;;  %v268_v33 = vunpack.c.l.bf16 %v7922_v8 }
  0xf3   :  { %820 = vmatmul.f32.gmra.mxu0 %v7598_v46  ;;  %885 = vmatmul.f32.gmra.mxu1 %v7600_v55  ;;  %v627_v2 = vadd.f32 %v626_v34, %v562_v39  ;;  %v460_v46 = vunpack.c.l.bf16 %v7924_v14 }
  0xf4   :  { %13532 = vst [vmem:[#allocation50_spill] sm:$0xff] %v7914_v1  ;;  %950 = vmatmul.f32.gmra.mxu2 %v7602_v50  ;;  %v7929_v50 = vld [vmem:[#allocation5 + $0x138] sm:$0xff]  ;;  %1052 = vmatpush.msra.mxu0 %v268_v33 }
  0xf5   :  { %1015 = vmatmul.f32.gmra.mxu3 %v7604_v51  ;;  %1182 = vmatpush.msra.mxu2 %v396_v23  ;;  %v332_v24 = vunpack.c.l.bf16 %v7929_v50  ;;  %v7943_v23 = vld [vmem:[#allocation5 + $0x328] sm:$0xff] }
  0xf6   :  { %1247 = vmatpush.msra.mxu3 %v460_v46 }
  0xf7   :  { %v691_v25 = vpop.f32.mrf.mxu2  ;;  %1117 = vmatpush.msra.mxu1 %v332_v24 }
  0xf8   :  { %v692_v55 = vadd.f32 %v691_v25, %v627_v2  ;;  %v564_v4 = vpop.f32.mrf.mxu0  ;;  %v629_v34 = vpop.f32.mrf.mxu1  ;;  %v7939_v2 = vld [vmem:[#allocation5 + $0x228] sm:$0xff] }
  0xf9   :  { %v565_v51 = vadd.f32 %v564_v4, %v7749_v31  ;;  %v756_v39 = vpop.f32.mrf.mxu3  ;;  %v7941_v25 = vld [vmem:[#allocation5 + $0x28] sm:$0xff] }
  0xfa   :  { %v7933_v13 = vadd.f32 %v756_v39, %v692_v55  ;;  %v392_v55 = vunpack.c.l.bf16 %v7939_v2  ;;  %v264_v46 = vunpack.c.l.bf16 %v7941_v25 }
  0xfb   :  { %823 = vmatmul.f32.gmra.mxu0 %v7614_v9  ;;  %888 = vmatmul.f32.gmra.mxu1 %v7616_v15  ;;  %v630_v1 = vadd.f32 %v629_v34, %v565_v51  ;;  %v456_v9 = vunpack.c.l.bf16 %v7943_v23 }
  0xfc   :  { %13533 = vst [vmem:[#allocation51_spill] sm:$0xff] %v7933_v13  ;;  %953 = vmatmul.f32.gmra.mxu2 %v7618_v36  ;;  %v7948_v36 = vld [vmem:[#allocation5 + $0x128] sm:$0xff]  ;;  %1053 = vmatpush.msra.mxu0 %v264_v46 }
  0xfd   :  { %1018 = vmatmul.f32.gmra.mxu3 %v7620_v45  ;;  %1183 = vmatpush.msra.mxu2 %v392_v55  ;;  %v328_v39 = vunpack.c.l.bf16 %v7948_v36  ;;  %v7962_v55 = vld [vmem:[#allocation5 + $0x318] sm:$0xff] }
  0xfe   :  { %1248 = vmatpush.msra.mxu3 %v456_v9 }
  0xff   :  { %v694_v33 = vpop.f32.mrf.mxu2  ;;  %1118 = vmatpush.msra.mxu1 %v328_v39 }
 0x100   :  { %v695_v15 = vadd.f32 %v694_v33, %v630_v1  ;;  %v567_v4 = vpop.f32.mrf.mxu0  ;;  %v632_v34 = vpop.f32.mrf.mxu1  ;;  %v7958_v1 = vld [vmem:[#allocation5 + $0x218] sm:$0xff] }
 0x101   :  { %v568_v45 = vadd.f32 %v567_v4, %v7749_v31  ;;  %v759_v51 = vpop.f32.mrf.mxu3  ;;  %v7960_v33 = vld [vmem:[#allocation5 + $0x18] sm:$0xff] }
 0x102   :  { %v7952_v24 = vadd.f32 %v759_v51, %v695_v15  ;;  %v388_v15 = vunpack.c.l.bf16 %v7958_v1  ;;  %v260_v9 = vunpack.c.l.bf16 %v7960_v33 }
 0x103   :  { %826 = vmatmul.f32.gmra.mxu0 %v7630_v47  ;;  %891 = vmatmul.f32.gmra.mxu1 %v7632_v42  ;;  %v633_v13 = vadd.f32 %v632_v34, %v568_v45  ;;  %v452_v47 = vunpack.c.l.bf16 %v7962_v55 }
 0x104   :  { %13534 = vst [vmem:[#allocation52_spill] sm:$0xff] %v7952_v24  ;;  %956 = vmatmul.f32.gmra.mxu2 %v7634_v43  ;;  %v7967_v43 = vld [vmem:[#allocation5 + $0x118] sm:$0xff]  ;;  %1054 = vmatpush.msra.mxu0 %v260_v9 }
 0x105   :  { %1021 = vmatmul.f32.gmra.mxu3 %v7636_v54  ;;  %1184 = vmatpush.msra.mxu2 %v388_v15  ;;  %v324_v51 = vunpack.c.l.bf16 %v7967_v43  ;;  %v7981_v15 = vld [vmem:[#allocation5 + $0x308] sm:$0xff] }
 0x106   :  { %1249 = vmatpush.msra.mxu3 %v452_v47  ;;  %13537 = vst [vmem:[#allocation55_spill] sm:$0xff] %v7981_v15 }
 0x107   :  { %v697_v46 = vpop.f32.mrf.mxu2  ;;  %1119 = vmatpush.msra.mxu1 %v324_v51 }
 0x108   :  { %v698_v42 = vadd.f32 %v697_v46, %v633_v13  ;;  %v570_v4 = vpop.f32.mrf.mxu0  ;;  %v635_v34 = vpop.f32.mrf.mxu1  ;;  %v7977_v13 = vld [vmem:[#allocation5 + $0x208] sm:$0xff] }
 0x109   :  { %v571_v54 = vadd.f32 %v570_v4, %v7749_v31  ;;  %v762_v45 = vpop.f32.mrf.mxu3  ;;  %v7979_v46 = vld [vmem:[#allocation5 + $0x8] sm:$0xff] }
 0x10a   :  { %v7971_v39 = vadd.f32 %v762_v45, %v698_v42  ;;  %13536 = vst [vmem:[#allocation54_spill] sm:$0xff] %v7979_v46  ;;  %v384_v42 = vunpack.c.l.bf16 %v7977_v13  ;;  %v256_v47 = vunpack.c.l.bf16 %v7979_v46 }
 0x10b   :  { %829 = vmatmul.f32.gmra.mxu0 %v7646_v5  ;;  %894 = vmatmul.f32.gmra.mxu1 %v7648_v41  ;;  %v636_v24 = vadd.f32 %v635_v34, %v571_v54  ;;  %v448_v5 = vunpack.c.l.bf16 %v7981_v15  ;;  %v13542_v15 = vld [vmem:[#allocation15_spill] sm:$0xff] }
 0x10c   :  { %13535 = vst [vmem:[#allocation53_spill] sm:$0xff] %v7971_v39  ;;  %959 = vmatmul.f32.gmra.mxu2 %v7650_v20  ;;  %v7986_v20 = vld [vmem:[#allocation5 + $0x108] sm:$0xff]  ;;  %1055 = vmatpush.msra.mxu0 %v256_v47  ;;  %v13543_v47 = vld [vmem:[#allocation13_spill] sm:$0xff] }
 0x10d   :  { %1024 = vmatmul.f32.gmra.mxu3 %v7652_v22  ;;  %13538 = vst [vmem:[#allocation56_spill] sm:$0xff] %v7986_v20  ;;  %1185 = vmatpush.msra.mxu2 %v384_v42  ;;  %v320_v45 = vunpack.c.l.bf16 %v7986_v20  ;;  %v317_v42 = vunpack.c.h.bf16 %v13542_v15  ;;  %v509_v46 = vunpack.c.h.bf16 %v13543_v47  ;;  %v13547_v15 = vld [vmem:[#allocation14_spill] sm:$0xff] }
 0x10e   :  { %1250 = vmatpush.msra.mxu3 %v448_v5 }
 0x10f   :  { %v700_v9 = vpop.f32.mrf.mxu2  ;;  %1120 = vmatpush.msra.mxu1 %v320_v45  ;;  %1300 = vmatpush.msrb.mxu0 %v317_v42  ;;  %v13546_v45 = vld [vmem:[#allocation20_spill] sm:$0xff]  ;;  %v13551_v42 = vld [vmem:[#allocation21_spill] sm:$0xff] }
 0x110   :  { %v701_v41 = vadd.f32 %v700_v9, %v636_v24  ;;  %v573_v4 = vpop.f32.mrf.mxu0  ;;  %v638_v34 = vpop.f32.mrf.mxu1  ;;  %v13540_v24 = vld [vmem:[#allocation16_spill] sm:$0xff]  ;;  %1495 = vmatpush.msrb.mxu3 %v509_v46  ;;  %v313_v47 = vunpack.c.h.bf16 %v13551_v42  ;;  %v13557_v42 = vld [vmem:[#allocation27_spill] sm:$0xff] }
 0x111   :  { %v574_v22 = vadd.f32 %v573_v4, %v7749_v31  ;;  %v765_v54 = vpop.f32.mrf.mxu3  ;;  %v13541_v9 = vld [vmem:[#allocation12_spill] sm:$0xff] }
 0x112   :  { %v7990_v51 = vadd.f32 %v765_v54, %v701_v41  ;;  %v445_v4 = vunpack.c.h.bf16 %v13541_v9  ;;  %v13548_v9 = vld [vmem:[#allocation17_spill] sm:$0xff]  ;;  %1301 = vmatpush.msrb.mxu0 %v313_v47  ;;  %v13560_v47 = vld [vmem:[#allocation30_spill] sm:$0xff] }
 0x113   :  { %832 = vmatmul.f32.gmra.mxu0 %v7662_v35  ;;  %897 = vmatmul.f32.gmra.mxu1 %v7664_v38  ;;  %v639_v39 = vadd.f32 %v638_v34, %v574_v22  ;;  %v13544_v35 = vld [vmem:[#allocation19_spill] sm:$0xff] }
 0x114   :  { %13539 = vst [vmem:[#allocation57_spill] sm:$0xff] %v7990_v51  ;;  %962 = vmatmul.f32.gmra.mxu2 %v7666_v57  ;;  %v381_v38 = vunpack.c.h.bf16 %v13544_v35  ;;  %v13552_v35 = vld [vmem:[#allocation22_spill] sm:$0xff] }
 0x115   :  { %1027 = vmatmul.f32.gmra.mxu3 %v13540_v24  ;;  %1430 = vmatpush.msrb.mxu2 %v445_v4 }
 0x116   :  { %1365 = vmatpush.msrb.mxu1 %v381_v38  ;;  %v13553_v38 = vld [vmem:[#allocation26_spill] sm:$0xff] }
 0x117   :  { %v703_v20 = vpop.f32.mrf.mxu2 }
 0x118   :  { %v704_v41 = vadd.f32 %v703_v20, %v639_v39  ;;  %v576_v54 = vpop.f32.mrf.mxu0  ;;  %v641_v5 = vpop.f32.mrf.mxu1  ;;  %v13549_v39 = vld [vmem:[#allocation18_spill] sm:$0xff]  ;;  %v13550_v20 = vld [vmem:[#allocation23_spill] sm:$0xff] }
 0x119   :  { %v577_v34 = vadd.f32 %v576_v54, %v7749_v31  ;;  %v768_v57 = vpop.f32.mrf.mxu3  ;;  %v441_v4 = vunpack.c.h.bf16 %v13550_v20  ;;  %v505_v54 = vunpack.c.h.bf16 %v13552_v35  ;;  %v309_v35 = vunpack.c.h.bf16 %v13560_v47  ;;  %v13566_v47 = vld [vmem:[#allocation35_spill] sm:$0xff] }
 0x11a   :  { %v8001_v22 = vadd.f32 %v768_v57, %v704_v41 }
 0x11b   :  { %835 = vmatmul.f32.gmra.mxu0 %v13546_v45  ;;  %900 = vmatmul.f32.gmra.mxu1 %v13547_v15  ;;  %v642_v24 = vadd.f32 %v641_v5, %v577_v34  ;;  %v377_v45 = vunpack.c.h.bf16 %v13553_v38  ;;  %v13561_v38 = vld [vmem:[#allocation31_spill] sm:$0xff] }
 0x11c   :  { %13545 = vst [vmem:[#allocation16_spill] sm:$0xff] %v8001_v22  ;;  %965 = vmatmul.f32.gmra.mxu2 %v13548_v9  ;;  %1496 = vmatpush.msrb.mxu3 %v505_v54  ;;  %v13555_v9 = vld [vmem:[#allocation24_spill] sm:$0xff] }
 0x11d   :  { %1030 = vmatmul.f32.gmra.mxu3 %v13549_v39  ;;  %1431 = vmatpush.msrb.mxu2 %v441_v4  ;;  %v13556_v39 = vld [vmem:[#allocation25_spill] sm:$0xff] }
 0x11e   :  { %1366 = vmatpush.msrb.mxu1 %v377_v45  ;;  %1302 = vmatpush.msrb.mxu0 %v309_v35  ;;  %v13562_v45 = vld [vmem:[#allocation34_spill] sm:$0xff] }
 0x11f   :  { %v706_v51 = vpop.f32.mrf.mxu2  ;;  %v13569_v35 = vld [vmem:[#allocation38_spill] sm:$0xff] }
 0x120   :  { %v707_v46 = vadd.f32 %v706_v51, %v642_v24  ;;  %v579_v41 = vpop.f32.mrf.mxu0  ;;  %v644_v57 = vpop.f32.mrf.mxu1  ;;  %v13558_v51 = vld [vmem:[#allocation28_spill] sm:$0xff]  ;;  %v13559_v24 = vld [vmem:[#allocation29_spill] sm:$0xff] }
 0x121   :  { %v580_v5 = vadd.f32 %v579_v41, %v7749_v31  ;;  %v771_v34 = vpop.f32.mrf.mxu3  ;;  %v437_v4 = vunpack.c.h.bf16 %v13559_v24  ;;  %v501_v41 = vunpack.c.h.bf16 %v13561_v38  ;;  %v433_v38 = vunpack.c.h.bf16 %v13569_v35  ;;  %v8042_v35 = vld [vmem:[#allocation2 + $0x8] sm:$0xff] }
 0x122   :  { %v8012_v15 = vadd.f32 %v771_v34, %v707_v46 }
 0x123   :  { %838 = vmatmul.f32.gmra.mxu0 %v13555_v9  ;;  %903 = vmatmul.f32.gmra.mxu1 %v13556_v39  ;;  %v645_v20 = vadd.f32 %v644_v57, %v580_v5  ;;  %v373_v9 = vunpack.c.h.bf16 %v13562_v45 }
 0x124   :  { %13554 = vst [vmem:[#allocation12_spill] sm:$0xff] %v8012_v15  ;;  %968 = vmatmul.f32.gmra.mxu2 %v13557_v42  ;;  %1497 = vmatpush.msrb.mxu3 %v501_v41  ;;  %v13564_v42 = vld [vmem:[#allocation32_spill] sm:$0xff] }
 0x125   :  { %1033 = vmatmul.f32.gmra.mxu3 %v13558_v51  ;;  %1432 = vmatpush.msrb.mxu2 %v437_v4  ;;  %v13565_v51 = vld [vmem:[#allocation33_spill] sm:$0xff]  ;;  %v13571_v41 = vld [vmem:[#allocation40_spill] sm:$0xff] }
 0x126   :  { %1367 = vmatpush.msrb.mxu1 %v373_v9 }
 0x127   :  { %v709_v22 = vpop.f32.mrf.mxu2  ;;  %1433 = vmatpush.msrb.mxu2 %v433_v38  ;;  %v8045_v38 = vld [vmem:[#allocation2 + $0x10] sm:$0xff] }
 0x128   :  { %v710_v54 = vadd.f32 %v709_v22, %v645_v20  ;;  %v582_v46 = vpop.f32.mrf.mxu0  ;;  %v647_v34 = vpop.f32.mrf.mxu1  ;;  %v13567_v22 = vld [vmem:[#allocation36_spill] sm:$0xff]  ;;  %v13568_v20 = vld [vmem:[#allocation37_spill] sm:$0xff] }
 0x129   :  { %v583_v57 = vadd.f32 %v582_v46, %v7749_v31  ;;  %v774_v5 = vpop.f32.mrf.mxu3  ;;  %v8030_v4 = vperm.slane %v13568_v20, 1  ;;  %v13570_v31 = vld [vmem:[#allocation39_spill] sm:$0xff]  ;;  %v8039_v20 = vld [vmem:[#allocation2] sm:$0xff] }
 0x12a   :  { %v8023_v39 = vadd.f32 %v774_v5, %v710_v54  ;;  %v305_v46 = vunpack.c.h.bf16 %v13570_v31  ;;  %v497_v54 = vunpack.c.h.bf16 %v13571_v41  ;;  %v8048_v31 = vld [vmem:[#allocation2 + $0x18] sm:$0xff]  ;;  %v301_v41 = vunpack.c.h.bf16 %v7770_v60  ;;  %v8061_v60 = vld [vmem:[#allocation2 + $0x28] sm:$0xff] }
 0x12b   :  { %841 = vmatmul.f32.gmra.mxu0 %v13564_v42  ;;  %906 = vmatmul.f32.gmra.mxu1 %v13565_v51  ;;  %v648_v24 = vadd.f32 %v647_v34, %v583_v57  ;;  %v13572_v34 = vld [vmem:[#allocation41_spill] sm:$0xff] }
 0x12c   :  { %13563 = vst [vmem:[#allocation15_spill] sm:$0xff] %v8023_v39  ;;  %971 = vmatmul.f32.gmra.mxu2 %v13566_v47  ;;  %1303 = vmatpush.msrb.mxu0 %v305_v46  ;;  %v369_v57 = vunpack.c.h.bf16 %v13572_v34  ;;  %v429_v46 = vunpack.c.h.bf16 %v7768_v32  ;;  %v8058_v32 = vld [vmem:[#allocation2 + $0x20] sm:$0xff] }
 0x12d   :  { %1036 = vmatmul.f32.gmra.mxu3 %v13567_v22 }
 0x12e   :  { %1498 = vmatpush.msrb.mxu3 %v497_v54  ;;  %1368 = vmatpush.msrb.mxu1 %v369_v57  ;;  %v13574_v54 = vld [vmem:[#allocation42_spill] sm:$0xff] }
 0x12f   :  { %v712_v45 = vpop.f32.mrf.mxu2  ;;  %1434 = vmatpush.msrb.mxu2 %v429_v46  ;;  %1304 = vmatpush.msrb.mxu0 %v301_v41  ;;  %v8064_v46 = vld [vmem:[#allocation2 + $0x30] sm:$0xff]  ;;  %v425_v41 = vunpack.c.h.bf16 %v7787_v21  ;;  %v8077_v21 = vld [vmem:[#allocation2 + $0x40] sm:$0xff] }
 0x130   :  { %v713_v9 = vadd.f32 %v712_v45, %v648_v24  ;;  %v797_v5 = vpop.f32.mrf.mxu0  ;;  %v862_v42 = vpop.f32.mrf.mxu1  ;;  %v493_v45 = vunpack.c.h.bf16 %v13574_v54  ;;  %v297_v54 = vunpack.c.h.bf16 %v7789_v62  ;;  %v8080_v62 = vld [vmem:[#allocation2 + $0x48] sm:$0xff] }
 0x131   :  { %v777_v51 = vpop.f32.mrf.mxu3  ;;  %v798_v47 = vadd.f32 %v797_v5, %v8030_v4  ;;  %1435 = vmatpush.msrb.mxu2 %v425_v41  ;;  %v421_v41 = vunpack.c.h.bf16 %v7806_v58  ;;  %v8096_v58 = vld [vmem:[#allocation2 + $0x60] sm:$0xff] }
 0x132   :  { %v8037_v22 = vadd.f32 %v777_v51, %v713_v9  ;;  %1499 = vmatpush.msrb.mxu3 %v493_v45  ;;  %v489_v45 = vunpack.c.h.bf16 %v7791_v10  ;;  %1305 = vmatpush.msrb.mxu0 %v297_v54  ;;  %v293_v54 = vunpack.c.h.bf16 %v7808_v16  ;;  %v8099_v16 = vld [vmem:[#allocation2 + $0x68] sm:$0xff] }
 0x133   :  { %1056 = vmatmul.f32.vlgmr.msra.gmra.mxu0 %v8039_v20  ;;  %1121 = vmatmul.f32.vlgmr.msra.gmra.mxu1 %v8042_v35  ;;  %v863_v24 = vadd.f32 %v862_v42, %v798_v47  ;;  %v365_v42 = vunpack.c.h.bf16 %v7777_v48  ;;  %v8067_v48 = vld [vmem:[#allocation2 + $0x38] sm:$0xff] }
 0x134   :  { %13573 = vst [vmem:[#allocation13_spill] sm:$0xff] %v8037_v22  ;;  %1186 = vmatmul.f32.vlgmr.msra.gmra.mxu2 %v8045_v38  ;;  %1500 = vmatpush.msrb.mxu3 %v489_v45  ;;  %v485_v45 = vunpack.c.h.bf16 %v7810_v40 }
 0x135   :  { %1251 = vmatmul.f32.vlgmr.msra.gmra.mxu3 %v8048_v31  ;;  %1369 = vmatpush.msrb.mxu1 %v365_v42 }
 0x136   :  { %1436 = vmatpush.msrb.mxu2 %v421_v41  ;;  %1306 = vmatpush.msrb.mxu0 %v293_v54  ;;  %v417_v41 = vunpack.c.h.bf16 %v7825_v59  ;;  %v289_v54 = vunpack.c.h.bf16 %v7827_v37  ;;  %v8115_v59 = vld [vmem:[#allocation2 + $0x80] sm:$0xff]  ;;  %v8118_v37 = vld [vmem:[#allocation2 + $0x88] sm:$0xff] }
 0x137   :  { %v927_v9 = vpop.f32.mrf.mxu2  ;;  %1501 = vmatpush.msrb.mxu3 %v485_v45  ;;  %v481_v45 = vunpack.c.h.bf16 %v7829_v6 }
 0x138   :  { %v928_v5 = vadd.f32 %v927_v9, %v863_v24  ;;  %v800_v34 = vpop.f32.mrf.mxu0  ;;  %v865_v57 = vpop.f32.mrf.mxu1  ;;  %1437 = vmatpush.msrb.mxu2 %v417_v41  ;;  %1307 = vmatpush.msrb.mxu0 %v289_v54  ;;  %v413_v41 = vunpack.c.h.bf16 %v7844_v63  ;;  %v285_v54 = vunpack.c.h.bf16 %v7846_v52  ;;  %v8134_v63 = vld [vmem:[#allocation2 + $0xa0] sm:$0xff]  ;;  %v8137_v52 = vld [vmem:[#allocation2 + $0xa8] sm:$0xff] }
 0x139   :  { %v801_v51 = vadd.f32 %v800_v34, %v8030_v4  ;;  %v992_v47 = vpop.f32.mrf.mxu3  ;;  %1502 = vmatpush.msrb.mxu3 %v481_v45  ;;  %v477_v45 = vunpack.c.h.bf16 %v7848_v28 }
 0x13a   :  { %v8056_v22 = vadd.f32 %v992_v47, %v928_v5  ;;  %1438 = vmatpush.msrb.mxu2 %v413_v41  ;;  %1308 = vmatpush.msrb.mxu0 %v285_v54  ;;  %v409_v41 = vunpack.c.h.bf16 %v7863_v56  ;;  %v281_v54 = vunpack.c.h.bf16 %v7865_v53  ;;  %v8153_v56 = vld [vmem:[#allocation2 + $0xc0] sm:$0xff]  ;;  %v8156_v53 = vld [vmem:[#allocation2 + $0xc8] sm:$0xff] }
 0x13b   :  { %1059 = vmatmul.f32.gmra.mxu0 %v8058_v32  ;;  %1124 = vmatmul.f32.gmra.mxu1 %v8061_v60  ;;  %v866_v24 = vadd.f32 %v865_v57, %v801_v51  ;;  %v361_v57 = vunpack.c.h.bf16 %v7796_v17  ;;  %v8086_v17 = vld [vmem:[#allocation2 + $0x58] sm:$0xff] }
 0x13c   :  { %13575 = vst [vmem:[#allocation19_spill] sm:$0xff] %v8056_v22  ;;  %1189 = vmatmul.f32.gmra.mxu2 %v8064_v46  ;;  %1503 = vmatpush.msrb.mxu3 %v477_v45  ;;  %v473_v45 = vunpack.c.h.bf16 %v7867_v11 }
 0x13d   :  { %1254 = vmatmul.f32.gmra.mxu3 %v8067_v48  ;;  %1370 = vmatpush.msrb.mxu1 %v361_v57 }
 0x13e   :  { %1439 = vmatpush.msrb.mxu2 %v409_v41  ;;  %1309 = vmatpush.msrb.mxu0 %v281_v54  ;;  %v405_v41 = vunpack.c.h.bf16 %v7882_v26  ;;  %v277_v54 = vunpack.c.h.bf16 %v7884_v3  ;;  %v8172_v26 = vld [vmem:[#allocation2 + $0xe0] sm:$0xff]  ;;  %v8175_v3 = vld [vmem:[#allocation2 + $0xe8] sm:$0xff] }
 0x13f   :  { %v930_v9 = vpop.f32.mrf.mxu2  ;;  %1504 = vmatpush.msrb.mxu3 %v473_v45  ;;  %v469_v45 = vunpack.c.h.bf16 %v7886_v0 }
 0x140   :  { %v931_v5 = vadd.f32 %v930_v9, %v866_v24  ;;  %v803_v34 = vpop.f32.mrf.mxu0  ;;  %v868_v42 = vpop.f32.mrf.mxu1  ;;  %v8083_v24 = vld [vmem:[#allocation2 + $0x50] sm:$0xff]  ;;  %1440 = vmatpush.msrb.mxu2 %v405_v41  ;;  %1310 = vmatpush.msrb.mxu0 %v277_v54  ;;  %v401_v41 = vunpack.c.h.bf16 %v7901_v18  ;;  %v273_v54 = vunpack.c.h.bf16 %v7903_v49  ;;  %v8191_v18 = vld [vmem:[#allocation2 + $0x100] sm:$0xff]  ;;  %v8194_v49 = vld [vmem:[#allocation2 + $0x108] sm:$0xff] }
 0x141   :  { %v804_v51 = vadd.f32 %v803_v34, %v8030_v4  ;;  %v995_v47 = vpop.f32.mrf.mxu3  ;;  %1505 = vmatpush.msrb.mxu3 %v469_v45  ;;  %v465_v45 = vunpack.c.h.bf16 %v7905_v19 }
 0x142   :  { %v8075_v39 = vadd.f32 %v995_v47, %v931_v5  ;;  %1441 = vmatpush.msrb.mxu2 %v401_v41  ;;  %1311 = vmatpush.msrb.mxu0 %v273_v54  ;;  %v397_v41 = vunpack.c.h.bf16 %v7920_v29  ;;  %v269_v54 = vunpack.c.h.bf16 %v7922_v8  ;;  %v8210_v29 = vld [vmem:[#allocation2 + $0x120] sm:$0xff]  ;;  %v8213_v8 = vld [vmem:[#allocation2 + $0x128] sm:$0xff] }
 0x143   :  { %1062 = vmatmul.f32.gmra.mxu0 %v8077_v21  ;;  %1127 = vmatmul.f32.gmra.mxu1 %v8080_v62  ;;  %v869_v10 = vadd.f32 %v868_v42, %v804_v51  ;;  %v357_v42 = vunpack.c.h.bf16 %v7815_v61  ;;  %v8105_v61 = vld [vmem:[#allocation2 + $0x78] sm:$0xff] }
 0x144   :  { %13576 = vst [vmem:[#allocation20_spill] sm:$0xff] %v8075_v39  ;;  %1192 = vmatmul.f32.gmra.mxu2 %v8083_v24  ;;  %1506 = vmatpush.msrb.mxu3 %v465_v45  ;;  %v461_v45 = vunpack.c.h.bf16 %v7924_v14 }
 0x145   :  { %1257 = vmatmul.f32.gmra.mxu3 %v8086_v17  ;;  %1371 = vmatpush.msrb.mxu1 %v357_v42 }
 0x146   :  { %1442 = vmatpush.msrb.mxu2 %v397_v41  ;;  %1312 = vmatpush.msrb.mxu0 %v269_v54  ;;  %v393_v41 = vunpack.c.h.bf16 %v7939_v2  ;;  %v265_v54 = vunpack.c.h.bf16 %v7941_v25  ;;  %v8229_v2 = vld [vmem:[#allocation2 + $0x140] sm:$0xff]  ;;  %v8232_v25 = vld [vmem:[#allocation2 + $0x148] sm:$0xff] }
 0x147   :  { %v933_v9 = vpop.f32.mrf.mxu2  ;;  %1507 = vmatpush.msrb.mxu3 %v461_v45  ;;  %v457_v45 = vunpack.c.h.bf16 %v7943_v23 }
 0x148   :  { %v934_v5 = vadd.f32 %v933_v9, %v869_v10  ;;  %v806_v34 = vpop.f32.mrf.mxu0  ;;  %v871_v57 = vpop.f32.mrf.mxu1  ;;  %v8102_v10 = vld [vmem:[#allocation2 + $0x70] sm:$0xff]  ;;  %1443 = vmatpush.msrb.mxu2 %v393_v41  ;;  %1313 = vmatpush.msrb.mxu0 %v265_v54  ;;  %v389_v41 = vunpack.c.h.bf16 %v7958_v1  ;;  %v261_v54 = vunpack.c.h.bf16 %v7960_v33  ;;  %v8248_v1 = vld [vmem:[#allocation2 + $0x160] sm:$0xff]  ;;  %v8251_v33 = vld [vmem:[#allocation2 + $0x168] sm:$0xff] }
 0x149   :  { %v807_v51 = vadd.f32 %v806_v34, %v8030_v4  ;;  %v998_v47 = vpop.f32.mrf.mxu3  ;;  %1508 = vmatpush.msrb.mxu3 %v457_v45  ;;  %v453_v45 = vunpack.c.h.bf16 %v7962_v55 }
 0x14a   :  { %v8094_v15 = vadd.f32 %v998_v47, %v934_v5  ;;  %1444 = vmatpush.msrb.mxu2 %v389_v41  ;;  %1314 = vmatpush.msrb.mxu0 %v261_v54  ;;  %v385_v41 = vunpack.c.h.bf16 %v7977_v13  ;;  %v13587_v54 = vld [vmem:[#allocation54_spill] sm:$0xff] }
 0x14b   :  { %1065 = vmatmul.f32.gmra.mxu0 %v8096_v58  ;;  %1130 = vmatmul.f32.gmra.mxu1 %v8099_v16  ;;  %v872_v40 = vadd.f32 %v871_v57, %v807_v51  ;;  %v353_v57 = vunpack.c.h.bf16 %v7834_v44  ;;  %v8124_v44 = vld [vmem:[#allocation2 + $0x98] sm:$0xff]  ;;  %v8267_v13 = vld [vmem:[#allocation2 + $0x180] sm:$0xff] }
 0x14c   :  { %13577 = vst [vmem:[#allocation14_spill] sm:$0xff] %v8094_v15  ;;  %1195 = vmatmul.f32.gmra.mxu2 %v8102_v10  ;;  %1509 = vmatpush.msrb.mxu3 %v453_v45  ;;  %v257_v45 = vunpack.c.h.bf16 %v13587_v54  ;;  %v8270_v54 = vld [vmem:[#allocation2 + $0x188] sm:$0xff] }
 0x14d   :  { %1260 = vmatmul.f32.gmra.mxu3 %v8105_v61  ;;  %1372 = vmatpush.msrb.mxu1 %v353_v57  ;;  %13591 = vst [vmem:[#allocation29_spill] sm:$0xff] %v8267_v13 }
 0x14e   :  { %1445 = vmatpush.msrb.mxu2 %v385_v41  ;;  %1315 = vmatpush.msrb.mxu0 %v257_v45  ;;  %13592 = vst [vmem:[#allocation30_spill] sm:$0xff] %v8270_v54  ;;  %v8273_v41 = vld [vmem:[#allocation2 + $0x190] sm:$0xff]  ;;  %v8276_v45 = vld [vmem:[#allocation2 + $0x198] sm:$0xff] }
 0x14f   :  { %v936_v9 = vpop.f32.mrf.mxu2  ;;  %13593 = vst [vmem:[#allocation31_spill] sm:$0xff] %v8273_v41 }
 0x150   :  { %v937_v5 = vadd.f32 %v936_v9, %v872_v40  ;;  %v809_v34 = vpop.f32.mrf.mxu0  ;;  %v874_v42 = vpop.f32.mrf.mxu1  ;;  %v8121_v40 = vld [vmem:[#allocation2 + $0x90] sm:$0xff]  ;;  %13594 = vst [vmem:[#allocation34_spill] sm:$0xff] %v8276_v45 }
 0x151   :  { %v810_v51 = vadd.f32 %v809_v34, %v8030_v4  ;;  %v1001_v47 = vpop.f32.mrf.mxu3 }
 0x152   :  { %v8113_v15 = vadd.f32 %v1001_v47, %v937_v5 }
 0x153   :  { %1068 = vmatmul.f32.gmra.mxu0 %v8115_v59  ;;  %1133 = vmatmul.f32.gmra.mxu1 %v8118_v37  ;;  %v875_v6 = vadd.f32 %v874_v42, %v810_v51  ;;  %v349_v42 = vunpack.c.h.bf16 %v7853_v12  ;;  %v8143_v12 = vld [vmem:[#allocation2 + $0xb8] sm:$0xff] }
 0x154   :  { %13578 = vst [vmem:[#allocation17_spill] sm:$0xff] %v8113_v15  ;;  %1198 = vmatmul.f32.gmra.mxu2 %v8121_v40 }
 0x155   :  { %1263 = vmatmul.f32.gmra.mxu3 %v8124_v44  ;;  %1373 = vmatpush.msrb.mxu1 %v349_v42 }
 0x157   :  { %v939_v9 = vpop.f32.mrf.mxu2 }
 0x158   :  { %v940_v5 = vadd.f32 %v939_v9, %v875_v6  ;;  %v812_v34 = vpop.f32.mrf.mxu0  ;;  %v877_v57 = vpop.f32.mrf.mxu1  ;;  %v8140_v6 = vld [vmem:[#allocation2 + $0xb0] sm:$0xff] }
 0x159   :  { %v813_v51 = vadd.f32 %v812_v34, %v8030_v4  ;;  %v1004_v47 = vpop.f32.mrf.mxu3 }
 0x15a   :  { %v8132_v15 = vadd.f32 %v1004_v47, %v940_v5 }
 0x15b   :  { %1071 = vmatmul.f32.gmra.mxu0 %v8134_v63  ;;  %1136 = vmatmul.f32.gmra.mxu1 %v8137_v52  ;;  %v878_v28 = vadd.f32 %v877_v57, %v813_v51  ;;  %v345_v57 = vunpack.c.h.bf16 %v7872_v7  ;;  %v8162_v7 = vld [vmem:[#allocation2 + $0xd8] sm:$0xff] }
 0x15c   :  { %13579 = vst [vmem:[#allocation18_spill] sm:$0xff] %v8132_v15  ;;  %1201 = vmatmul.f32.gmra.mxu2 %v8140_v6 }
 0x15d   :  { %1266 = vmatmul.f32.gmra.mxu3 %v8143_v12  ;;  %1374 = vmatpush.msrb.mxu1 %v345_v57 }
 0x15f   :  { %v942_v9 = vpop.f32.mrf.mxu2 }
 0x160   :  { %v943_v5 = vadd.f32 %v942_v9, %v878_v28  ;;  %v815_v34 = vpop.f32.mrf.mxu0  ;;  %v880_v42 = vpop.f32.mrf.mxu1  ;;  %v8159_v28 = vld [vmem:[#allocation2 + $0xd0] sm:$0xff] }
 0x161   :  { %v816_v51 = vadd.f32 %v815_v34, %v8030_v4  ;;  %v1007_v47 = vpop.f32.mrf.mxu3 }
 0x162   :  { %v8151_v15 = vadd.f32 %v1007_v47, %v943_v5 }
 0x163   :  { %1074 = vmatmul.f32.gmra.mxu0 %v8153_v56  ;;  %1139 = vmatmul.f32.gmra.mxu1 %v8156_v53  ;;  %v881_v11 = vadd.f32 %v880_v42, %v816_v51  ;;  %v341_v42 = vunpack.c.h.bf16 %v7891_v27  ;;  %v8181_v27 = vld [vmem:[#allocation2 + $0xf8] sm:$0xff] }
 0x164   :  { %13580 = vst [vmem:[#allocation23_spill] sm:$0xff] %v8151_v15  ;;  %1204 = vmatmul.f32.gmra.mxu2 %v8159_v28 }
 0x165   :  { %1269 = vmatmul.f32.gmra.mxu3 %v8162_v7  ;;  %1375 = vmatpush.msrb.mxu1 %v341_v42 }
 0x167   :  { %v945_v9 = vpop.f32.mrf.mxu2 }
 0x168   :  { %v946_v5 = vadd.f32 %v945_v9, %v881_v11  ;;  %v818_v34 = vpop.f32.mrf.mxu0  ;;  %v883_v57 = vpop.f32.mrf.mxu1  ;;  %v8178_v11 = vld [vmem:[#allocation2 + $0xf0] sm:$0xff] }
 0x169   :  { %v819_v51 = vadd.f32 %v818_v34, %v8030_v4  ;;  %v1010_v47 = vpop.f32.mrf.mxu3 }
 0x16a   :  { %v8170_v15 = vadd.f32 %v1010_v47, %v946_v5 }
 0x16b   :  { %1077 = vmatmul.f32.gmra.mxu0 %v8172_v26  ;;  %1142 = vmatmul.f32.gmra.mxu1 %v8175_v3  ;;  %v884_v0 = vadd.f32 %v883_v57, %v819_v51  ;;  %v337_v57 = vunpack.c.h.bf16 %v7910_v30  ;;  %v8200_v30 = vld [vmem:[#allocation2 + $0x118] sm:$0xff] }
 0x16c   :  { %13581 = vst [vmem:[#allocation21_spill] sm:$0xff] %v8170_v15  ;;  %1207 = vmatmul.f32.gmra.mxu2 %v8178_v11 }
 0x16d   :  { %1272 = vmatmul.f32.gmra.mxu3 %v8181_v27  ;;  %1376 = vmatpush.msrb.mxu1 %v337_v57 }
 0x16f   :  { %v948_v9 = vpop.f32.mrf.mxu2 }
 0x170   :  { %v949_v5 = vadd.f32 %v948_v9, %v884_v0  ;;  %v821_v34 = vpop.f32.mrf.mxu0  ;;  %v886_v42 = vpop.f32.mrf.mxu1  ;;  %v8197_v0 = vld [vmem:[#allocation2 + $0x110] sm:$0xff] }
 0x171   :  { %v822_v51 = vadd.f32 %v821_v34, %v8030_v4  ;;  %v1013_v47 = vpop.f32.mrf.mxu3 }
 0x172   :  { %v8189_v15 = vadd.f32 %v1013_v47, %v949_v5 }
 0x173   :  { %1080 = vmatmul.f32.gmra.mxu0 %v8191_v18  ;;  %1145 = vmatmul.f32.gmra.mxu1 %v8194_v49  ;;  %v887_v19 = vadd.f32 %v886_v42, %v822_v51  ;;  %v333_v42 = vunpack.c.h.bf16 %v7929_v50  ;;  %v8219_v50 = vld [vmem:[#allocation2 + $0x138] sm:$0xff] }
 0x174   :  { %13582 = vst [vmem:[#allocation22_spill] sm:$0xff] %v8189_v15  ;;  %1210 = vmatmul.f32.gmra.mxu2 %v8197_v0 }
 0x175   :  { %1275 = vmatmul.f32.gmra.mxu3 %v8200_v30  ;;  %1377 = vmatpush.msrb.mxu1 %v333_v42 }
 0x177   :  { %v951_v9 = vpop.f32.mrf.mxu2 }
 0x178   :  { %v952_v5 = vadd.f32 %v951_v9, %v887_v19  ;;  %v824_v34 = vpop.f32.mrf.mxu0  ;;  %v889_v57 = vpop.f32.mrf.mxu1  ;;  %v8216_v19 = vld [vmem:[#allocation2 + $0x130] sm:$0xff] }
 0x179   :  { %v825_v51 = vadd.f32 %v824_v34, %v8030_v4  ;;  %v1016_v47 = vpop.f32.mrf.mxu3 }
 0x17a   :  { %v8208_v15 = vadd.f32 %v1016_v47, %v952_v5 }
 0x17b   :  { %1083 = vmatmul.f32.gmra.mxu0 %v8210_v29  ;;  %1148 = vmatmul.f32.gmra.mxu1 %v8213_v8  ;;  %v890_v14 = vadd.f32 %v889_v57, %v825_v51  ;;  %v329_v57 = vunpack.c.h.bf16 %v7948_v36  ;;  %v8238_v36 = vld [vmem:[#allocation2 + $0x158] sm:$0xff] }
 0x17c   :  { %13583 = vst [vmem:[#allocation26_spill] sm:$0xff] %v8208_v15  ;;  %1213 = vmatmul.f32.gmra.mxu2 %v8216_v19 }
 0x17d   :  { %1278 = vmatmul.f32.gmra.mxu3 %v8219_v50  ;;  %1378 = vmatpush.msrb.mxu1 %v329_v57 }
 0x17f   :  { %v954_v9 = vpop.f32.mrf.mxu2 }
 0x180   :  { %v955_v5 = vadd.f32 %v954_v9, %v890_v14  ;;  %v827_v34 = vpop.f32.mrf.mxu0  ;;  %v892_v42 = vpop.f32.mrf.mxu1  ;;  %v8235_v14 = vld [vmem:[#allocation2 + $0x150] sm:$0xff] }
 0x181   :  { %v828_v51 = vadd.f32 %v827_v34, %v8030_v4  ;;  %v1019_v47 = vpop.f32.mrf.mxu3 }
 0x182   :  { %v8227_v15 = vadd.f32 %v1019_v47, %v955_v5 }
 0x183   :  { %1086 = vmatmul.f32.gmra.mxu0 %v8229_v2  ;;  %1151 = vmatmul.f32.gmra.mxu1 %v8232_v25  ;;  %v893_v23 = vadd.f32 %v892_v42, %v828_v51  ;;  %v325_v42 = vunpack.c.h.bf16 %v7967_v43  ;;  %v8257_v43 = vld [vmem:[#allocation2 + $0x178] sm:$0xff] }
 0x184   :  { %13584 = vst [vmem:[#allocation24_spill] sm:$0xff] %v8227_v15  ;;  %1216 = vmatmul.f32.gmra.mxu2 %v8235_v14 }
 0x185   :  { %1281 = vmatmul.f32.gmra.mxu3 %v8238_v36  ;;  %1379 = vmatpush.msrb.mxu1 %v325_v42 }
 0x187   :  { %v957_v9 = vpop.f32.mrf.mxu2 }
 0x188   :  { %v958_v5 = vadd.f32 %v957_v9, %v893_v23  ;;  %v830_v34 = vpop.f32.mrf.mxu0  ;;  %v895_v57 = vpop.f32.mrf.mxu1  ;;  %v8254_v23 = vld [vmem:[#allocation2 + $0x170] sm:$0xff]  ;;  %v13588_v9 = vld [vmem:[#allocation55_spill] sm:$0xff] }
 0x189   :  { %v831_v51 = vadd.f32 %v830_v34, %v8030_v4  ;;  %v1022_v47 = vpop.f32.mrf.mxu3  ;;  %13586 = vst [vmem:[#allocation27_spill] sm:$0xff] %v8254_v23 }
 0x18a   :  { %v8246_v15 = vadd.f32 %v1022_v47, %v958_v5  ;;  %v449_v5 = vunpack.c.h.bf16 %v13588_v9 }
 0x18b   :  { %1089 = vmatmul.f32.gmra.mxu0 %v8248_v1  ;;  %1154 = vmatmul.f32.gmra.mxu1 %v8251_v33  ;;  %v896_v55 = vadd.f32 %v895_v57, %v831_v51  ;;  %v13589_v57 = vld [vmem:[#allocation56_spill] sm:$0xff] }
 0x18c   :  { %13585 = vst [vmem:[#allocation25_spill] sm:$0xff] %v8246_v15  ;;  %1219 = vmatmul.f32.gmra.mxu2 %v8254_v23  ;;  %v321_v51 = vunpack.c.h.bf16 %v13589_v57  ;;  %1510 = vmatpush.msrb.mxu3 %v449_v5 }
 0x18d   :  { %1284 = vmatmul.f32.gmra.mxu3 %v8257_v43 }
 0x18e   :  { %1380 = vmatpush.msrb.mxu1 %v321_v51  ;;  %v8282_v51 = vld [vmem:[#allocation2 + $0x1a0] sm:$0xff] }
 0x18f   :  { %v960_v34 = vpop.f32.mrf.mxu2  ;;  %13596 = vst [vmem:[#allocation33_spill] sm:$0xff] %v8282_v51 }
 0x190   :  { %v961_v42 = vadd.f32 %v960_v34, %v896_v55  ;;  %v833_v47 = vpop.f32.mrf.mxu0  ;;  %v898_v15 = vpop.f32.mrf.mxu1 }
 0x191   :  { %v834_v39 = vadd.f32 %v833_v47, %v8030_v4  ;;  %v1025_v22 = vpop.f32.mrf.mxu3 }
 0x192   :  { %v8265_v23 = vadd.f32 %v1025_v22, %v961_v42 }
 0x193   :  { %1092 = vmatmul.f32.gmra.mxu0 %v8267_v13  ;;  %1157 = vmatmul.f32.gmra.mxu1 %v8270_v54  ;;  %v899_v55 = vadd.f32 %v898_v15, %v834_v39  ;;  %v8285_v15 = vld [vmem:[#allocation2 + $0x1a8] sm:$0xff] }
 0x194   :  { %13590 = vst [vmem:[#allocation28_spill] sm:$0xff] %v8265_v23  ;;  %1222 = vmatmul.f32.gmra.mxu2 %v8273_v41  ;;  %v8288_v23 = vld [vmem:[#allocation2 + $0x1b0] sm:$0xff]  ;;  %v8297_v41 = vld [vmem:[#allocation2 + $0x1c0] sm:$0xff] }
 0x195   :  { %1287 = vmatmul.f32.gmra.mxu3 %v8276_v45  ;;  %13597 = vst [vmem:[#allocation35_spill] sm:$0xff] %v8285_v15 }
 0x196   :  { %13598 = vst [vmem:[#allocation36_spill] sm:$0xff] %v8288_v23 }
 0x197   :  { %v963_v22 = vpop.f32.mrf.mxu2  ;;  %13601 = vst [vmem:[#allocation39_spill] sm:$0xff] %v8297_v41 }
 0x198   :  { %v964_v9 = vadd.f32 %v963_v22, %v899_v55  ;;  %v836_v5 = vpop.f32.mrf.mxu0  ;;  %v901_v34 = vpop.f32.mrf.mxu1  ;;  %v8291_v55 = vld [vmem:[#allocation2 + $0x1b8] sm:$0xff] }
 0x199   :  { %v837_v42 = vadd.f32 %v836_v5, %v8030_v4  ;;  %v1028_v47 = vpop.f32.mrf.mxu3  ;;  %13599 = vst [vmem:[#allocation37_spill] sm:$0xff] %v8291_v55 }
 0x19a   :  { %v8280_v57 = vadd.f32 %v1028_v47, %v964_v9 }
 0x19b   :  { %1095 = vmatmul.f32.gmra.mxu0 %v8282_v51  ;;  %1160 = vmatmul.f32.gmra.mxu1 %v8285_v15  ;;  %v902_v39 = vadd.f32 %v901_v34, %v837_v42  ;;  %v8300_v34 = vld [vmem:[#allocation2 + $0x1c8] sm:$0xff] }
 0x19c   :  { %13595 = vst [vmem:[#allocation32_spill] sm:$0xff] %v8280_v57  ;;  %1225 = vmatmul.f32.gmra.mxu2 %v8288_v23  ;;  %v8303_v23 = vld [vmem:[#allocation2 + $0x1d0] sm:$0xff] }
 0x19d   :  { %1290 = vmatmul.f32.gmra.mxu3 %v8291_v55  ;;  %13602 = vst [vmem:[#allocation40_spill] sm:$0xff] %v8300_v34  ;;  %v8318_v55 = vld [vmem:[#allocation5 + $0x5f0] sm:$0xff] }
 0x19e   :  { %13603 = vst [vmem:[#allocation41_spill] sm:$0xff] %v8303_v23  ;;  %v1941_v54 = vunpack.c.l.bf16 %v8318_v55 }
 0x19f   :  { %v966_v22 = vpop.f32.mrf.mxu2  ;;  %13608 = vst [vmem:[#allocation58_spill] sm:$0xff] %v8318_v55 }
 0x1a0   :  { %v967_v9 = vadd.f32 %v966_v22, %v902_v39  ;;  %v839_v5 = vpop.f32.mrf.mxu0  ;;  %v904_v47 = vpop.f32.mrf.mxu1  ;;  %v8306_v39 = vld [vmem:[#allocation2 + $0x1d8] sm:$0xff]  ;;  %v8309_v22 = vld [vmem:[#allocation5 + $0x6f0] sm:$0xff]  ;;  %2149 = vmatpush.msra.mxu1 %v1941_v54 }
 0x1a1   :  { %v840_v57 = vadd.f32 %v839_v5, %v8030_v4  ;;  %v1031_v51 = vpop.f32.mrf.mxu3  ;;  %13604 = vst [vmem:[#allocation42_spill] sm:$0xff] %v8306_v39 }
 0x1a2   :  { %v8295_v45 = vadd.f32 %v1031_v51, %v967_v9  ;;  %13605 = vst [vmem:[#allocation54_spill] sm:$0xff] %v8309_v22  ;;  %v8311_v51 = vld [vmem:[#allocation5 + $0x4f0] sm:$0xff] }
 0x1a3   :  { %1098 = vmatmul.f32.gmra.mxu0 %v8297_v41  ;;  %1163 = vmatmul.f32.gmra.mxu1 %v8300_v34  ;;  %v905_v42 = vadd.f32 %v904_v47, %v840_v57  ;;  %13606 = vst [vmem:[#allocation55_spill] sm:$0xff] %v8311_v51  ;;  %v8313_v9 = vld [vmem:[#allocation5 + $0x7f0] sm:$0xff]  ;;  %v1877_v34 = vunpack.c.l.bf16 %v8311_v51 }
 0x1a4   :  { %13600 = vst [vmem:[#allocation38_spill] sm:$0xff] %v8295_v45  ;;  %1228 = vmatmul.f32.gmra.mxu2 %v8303_v23  ;;  %v2005_v45 = vunpack.c.l.bf16 %v8309_v22  ;;  %v2069_v57 = vunpack.c.l.bf16 %v8313_v9  ;;  %v8324_v22 = vld [vmem:[#allocation2 + $0x1e0] sm:$0xff] }
 0x1a5   :  { %1293 = vmatmul.f32.gmra.mxu3 %v8306_v39  ;;  %13607 = vst [vmem:[#allocation56_spill] sm:$0xff] %v8313_v9  ;;  %2084 = vmatpush.msra.mxu0 %v1877_v34  ;;  %v8327_v9 = vld [vmem:[#allocation2 + $0x1e8] sm:$0xff]  ;;  %v8343_v34 = vld [vmem:[#allocation5 + $0x4e0] sm:$0xff] }
 0x1a6   :  { %2214 = vmatpush.msra.mxu2 %v2005_v45  ;;  %2279 = vmatpush.msra.mxu3 %v2069_v57  ;;  %13610 = vst [vmem:[#allocation60_spill] sm:$0xff] %v8324_v22  ;;  %v8345_v57 = vld [vmem:[#allocation5 + $0x7e0] sm:$0xff]  ;;  %v1873_v54 = vunpack.c.l.bf16 %v8343_v34 }
 0x1a7   :  { %v969_v5 = vpop.f32.mrf.mxu2  ;;  %13611 = vst [vmem:[#allocation61_spill] sm:$0xff] %v8327_v9 }
 0x1a8   :  { %v970_v47 = vadd.f32 %v969_v5, %v905_v42  ;;  %v842_v41 = vpop.f32.mrf.mxu0  ;;  %v907_v23 = vpop.f32.mrf.mxu1  ;;  %v8330_v5 = vld [vmem:[#allocation2 + $0x1f0] sm:$0xff]  ;;  %13615 = vst [vmem:[#allocation65_spill] sm:$0xff] %v8345_v57  ;;  %2085 = vmatpush.msra.mxu0 %v1873_v54 }
 0x1a9   :  { %v843_v39 = vadd.f32 %v842_v41, %v8030_v4  ;;  %v1034_v15 = vpop.f32.mrf.mxu3  ;;  %13612 = vst [vmem:[#allocation62_spill] sm:$0xff] %v8330_v5  ;;  %v8333_v4 = vld [vmem:[#allocation2 + $0x1f8] sm:$0xff]  ;;  %v8336_v41 = vld [vmem:[#allocation7] sm:$0xf] }
 0x1aa   :  { %v8322_v13 = vadd.f32 %v1034_v15, %v970_v47  ;;  %13613 = vst [vmem:[#allocation63_spill] sm:$0xff] %v8333_v4  ;;  %v8339_v45 = vperm.slane %v8336_v41, 2  ;;  %v8341_v15 = vld [vmem:[#allocation5 + $0x6e0] sm:$0xff]  ;;  %v2065_v47 = vunpack.c.l.bf16 %v8345_v57 }
 0x1ab   :  { %1101 = vmatmul.f32.gmra.mxu0 %v8324_v22  ;;  %1166 = vmatmul.f32.gmra.mxu1 %v8327_v9  ;;  %v908_v42 = vadd.f32 %v907_v23, %v843_v39  ;;  %13614 = vst [vmem:[#allocation64_spill] sm:$0xff] %v8336_v41  ;;  %v2001_v39 = vunpack.c.l.bf16 %v8341_v15  ;;  %v8350_v9 = vld [vmem:[#allocation5 + $0x5e0] sm:$0xff] }
 0x1ac   :  { %13609 = vst [vmem:[#allocation59_spill] sm:$0xff] %v8322_v13  ;;  %1231 = vmatmul.f32.gmra.mxu2 %v8330_v5  ;;  %v1937_v55 = vunpack.c.l.bf16 %v8350_v9  ;;  %2280 = vmatpush.msra.mxu3 %v2065_v47 }
 0x1ad   :  { %1296 = vmatmul.f32.gmra.mxu3 %v8333_v4  ;;  %2215 = vmatpush.msra.mxu2 %v2001_v39 }
 0x1ae   :  { %2150 = vmatpush.msra.mxu1 %v1937_v55 }
 0x1af   :  { %v972_v23 = vpop.f32.mrf.mxu2 }
 0x1b0   :  { %v973_v13 = vadd.f32 %v972_v23, %v908_v42  ;;  %v1057_v4 = vpop.f32.mrf.mxu0  ;;  %v1122_v5 = vpop.f32.mrf.mxu1  ;;  %v8360_v42 = vld [vmem:[#allocation5 + $0x6d0] sm:$0xff] }
 0x1b1   :  { %v1037_v41 = vpop.f32.mrf.mxu3  ;;  %v1058_v22 = vadd.f32 %v1057_v4, %v8339_v45  ;;  %v8362_v4 = vld [vmem:[#allocation5 + $0x4d0] sm:$0xff] }
 0x1b2   :  { %v8354_v51 = vadd.f32 %v1037_v41, %v973_v13  ;;  %v8364_v23 = vld [vmem:[#allocation5 + $0x7d0] sm:$0xff]  ;;  %v1997_v13 = vunpack.c.l.bf16 %v8360_v42  ;;  %v1869_v41 = vunpack.c.l.bf16 %v8362_v4 }
 0x1b3   :  { %1316 = vmatmul.f32.vlgmr.msrb.gmra.mxu0 %v8039_v20  ;;  %1381 = vmatmul.f32.vlgmr.msrb.gmra.mxu1 %v8042_v35  ;;  %v1123_v57 = vadd.f32 %v1122_v5, %v1058_v22  ;;  %v2061_v20 = vunpack.c.l.bf16 %v8364_v23 }
 0x1b4   :  { %13616 = vst [vmem:[#allocation66_spill] sm:$0xff] %v8354_v51  ;;  %1446 = vmatmul.f32.vlgmr.msrb.gmra.mxu2 %v8045_v38  ;;  %v8369_v38 = vld [vmem:[#allocation5 + $0x5d0] sm:$0xff]  ;;  %2086 = vmatpush.msra.mxu0 %v1869_v41 }
 0x1b5   :  { %1511 = vmatmul.f32.vlgmr.msrb.gmra.mxu3 %v8048_v31  ;;  %2216 = vmatpush.msra.mxu2 %v1997_v13  ;;  %v1933_v54 = vunpack.c.l.bf16 %v8369_v38  ;;  %v8383_v13 = vld [vmem:[#allocation5 + $0x7c0] sm:$0xff] }
 0x1b6   :  { %2281 = vmatpush.msra.mxu3 %v2061_v20  ;;  %13617 = vst [vmem:[#allocation67_spill] sm:$0xff] %v8383_v13 }
 0x1b7   :  { %v1187_v39 = vpop.f32.mrf.mxu2  ;;  %2151 = vmatpush.msra.mxu1 %v1933_v54 }
 0x1b8   :  { %v1188_v35 = vadd.f32 %v1187_v39, %v1123_v57  ;;  %v1060_v22 = vpop.f32.mrf.mxu0  ;;  %v1125_v5 = vpop.f32.mrf.mxu1  ;;  %v8379_v57 = vld [vmem:[#allocation5 + $0x6c0] sm:$0xff] }
 0x1b9   :  { %v1061_v31 = vadd.f32 %v1060_v22, %v8339_v45  ;;  %v1252_v55 = vpop.f32.mrf.mxu3  ;;  %v8381_v39 = vld [vmem:[#allocation5 + $0x4c0] sm:$0xff] }
 0x1ba   :  { %v8373_v47 = vadd.f32 %v1252_v55, %v1188_v35  ;;  %v1993_v35 = vunpack.c.l.bf16 %v8379_v57  ;;  %v1865_v20 = vunpack.c.l.bf16 %v8381_v39 }
 0x1bb   :  { %1319 = vmatmul.f32.gmra.mxu0 %v8058_v32  ;;  %1384 = vmatmul.f32.gmra.mxu1 %v8061_v60  ;;  %v1126_v51 = vadd.f32 %v1125_v5, %v1061_v31  ;;  %v2057_v32 = vunpack.c.l.bf16 %v8383_v13 }
 0x1bc   :  { %1449 = vmatmul.f32.gmra.mxu2 %v8064_v46  ;;  %v8388_v46 = vld [vmem:[#allocation5 + $0x5c0] sm:$0xff]  ;;  %2087 = vmatpush.msra.mxu0 %v1865_v20 }
 0x1bd   :  { %1514 = vmatmul.f32.gmra.mxu3 %v8067_v48  ;;  %2217 = vmatpush.msra.mxu2 %v1993_v35  ;;  %v1929_v55 = vunpack.c.l.bf16 %v8388_v46  ;;  %v8402_v35 = vld [vmem:[#allocation5 + $0x7b0] sm:$0xff] }
 0x1be   :  { %2282 = vmatpush.msra.mxu3 %v2057_v32  ;;  %13618 = vst [vmem:[#allocation68_spill] sm:$0xff] %v8402_v35 }
 0x1bf   :  { %v1190_v41 = vpop.f32.mrf.mxu2  ;;  %2152 = vmatpush.msra.mxu1 %v1929_v55 }
 0x1c0   :  { %v1191_v60 = vadd.f32 %v1190_v41, %v1126_v51  ;;  %v1063_v22 = vpop.f32.mrf.mxu0  ;;  %v1128_v5 = vpop.f32.mrf.mxu1  ;;  %v8398_v51 = vld [vmem:[#allocation5 + $0x6b0] sm:$0xff] }
 0x1c1   :  { %v1064_v48 = vadd.f32 %v1063_v22, %v8339_v45  ;;  %v1255_v31 = vpop.f32.mrf.mxu3  ;;  %v8400_v41 = vld [vmem:[#allocation5 + $0x4b0] sm:$0xff] }
 0x1c2   :  { %v8392_v54 = vadd.f32 %v1255_v31, %v1191_v60  ;;  %v1989_v60 = vunpack.c.l.bf16 %v8398_v51  ;;  %v1861_v32 = vunpack.c.l.bf16 %v8400_v41 }
 0x1c3   :  { %1322 = vmatmul.f32.gmra.mxu0 %v8077_v21  ;;  %1387 = vmatmul.f32.gmra.mxu1 %v8080_v62  ;;  %v1129_v13 = vadd.f32 %v1128_v5, %v1064_v48  ;;  %v2053_v21 = vunpack.c.l.bf16 %v8402_v35 }
 0x1c4   :  { %1452 = vmatmul.f32.gmra.mxu2 %v8083_v24  ;;  %v8407_v24 = vld [vmem:[#allocation5 + $0x5b0] sm:$0xff]  ;;  %2088 = vmatpush.msra.mxu0 %v1861_v32 }
 0x1c5   :  { %1517 = vmatmul.f32.gmra.mxu3 %v8086_v17  ;;  %2218 = vmatpush.msra.mxu2 %v1989_v60  ;;  %v1925_v31 = vunpack.c.l.bf16 %v8407_v24  ;;  %v8421_v60 = vld [vmem:[#allocation5 + $0x7a0] sm:$0xff] }
 0x1c6   :  { %2283 = vmatpush.msra.mxu3 %v2053_v21  ;;  %13619 = vst [vmem:[#allocation69_spill] sm:$0xff] %v8421_v60 }
 0x1c7   :  { %v1193_v20 = vpop.f32.mrf.mxu2  ;;  %2153 = vmatpush.msra.mxu1 %v1925_v31 }
 0x1c8   :  { %v1194_v62 = vadd.f32 %v1193_v20, %v1129_v13  ;;  %v1066_v22 = vpop.f32.mrf.mxu0  ;;  %v1131_v5 = vpop.f32.mrf.mxu1  ;;  %v8417_v13 = vld [vmem:[#allocation5 + $0x6a0] sm:$0xff] }
 0x1c9   :  { %v1067_v17 = vadd.f32 %v1066_v22, %v8339_v45  ;;  %v1258_v48 = vpop.f32.mrf.mxu3  ;;  %v8419_v20 = vld [vmem:[#allocation5 + $0x4a0] sm:$0xff] }
 0x1ca   :  { %v8411_v55 = vadd.f32 %v1258_v48, %v1194_v62  ;;  %v1985_v62 = vunpack.c.l.bf16 %v8417_v13  ;;  %v1857_v21 = vunpack.c.l.bf16 %v8419_v20 }
 0x1cb   :  { %1325 = vmatmul.f32.gmra.mxu0 %v8096_v58  ;;  %1390 = vmatmul.f32.gmra.mxu1 %v8099_v16  ;;  %v1132_v35 = vadd.f32 %v1131_v5, %v1067_v17  ;;  %v2049_v58 = vunpack.c.l.bf16 %v8421_v60 }
 0x1cc   :  { %1455 = vmatmul.f32.gmra.mxu2 %v8102_v10  ;;  %v8426_v10 = vld [vmem:[#allocation5 + $0x5a0] sm:$0xff]  ;;  %2089 = vmatpush.msra.mxu0 %v1857_v21 }
 0x1cd   :  { %1520 = vmatmul.f32.gmra.mxu3 %v8105_v61  ;;  %2219 = vmatpush.msra.mxu2 %v1985_v62  ;;  %v1921_v48 = vunpack.c.l.bf16 %v8426_v10  ;;  %v8440_v62 = vld [vmem:[#allocation5 + $0x790] sm:$0xff] }
 0x1ce   :  { %2284 = vmatpush.msra.mxu3 %v2049_v58  ;;  %13620 = vst [vmem:[#allocation70_spill] sm:$0xff] %v8440_v62 }
 0x1cf   :  { %v1196_v32 = vpop.f32.mrf.mxu2  ;;  %2154 = vmatpush.msra.mxu1 %v1921_v48 }
 0x1d0   :  { %v1197_v16 = vadd.f32 %v1196_v32, %v1132_v35  ;;  %v1069_v22 = vpop.f32.mrf.mxu0  ;;  %v1134_v5 = vpop.f32.mrf.mxu1  ;;  %v8436_v35 = vld [vmem:[#allocation5 + $0x690] sm:$0xff] }
 0x1d1   :  { %v1070_v61 = vadd.f32 %v1069_v22, %v8339_v45  ;;  %v1261_v17 = vpop.f32.mrf.mxu3  ;;  %v8438_v32 = vld [vmem:[#allocation5 + $0x490] sm:$0xff] }
 0x1d2   :  { %v8430_v31 = vadd.f32 %v1261_v17, %v1197_v16  ;;  %v1981_v16 = vunpack.c.l.bf16 %v8436_v35  ;;  %v1853_v58 = vunpack.c.l.bf16 %v8438_v32 }
 0x1d3   :  { %1328 = vmatmul.f32.gmra.mxu0 %v8115_v59  ;;  %1393 = vmatmul.f32.gmra.mxu1 %v8118_v37  ;;  %v1135_v60 = vadd.f32 %v1134_v5, %v1070_v61  ;;  %v2045_v59 = vunpack.c.l.bf16 %v8440_v62 }
 0x1d4   :  { %1458 = vmatmul.f32.gmra.mxu2 %v8121_v40  ;;  %v8445_v40 = vld [vmem:[#allocation5 + $0x590] sm:$0xff]  ;;  %2090 = vmatpush.msra.mxu0 %v1853_v58 }
 0x1d5   :  { %1523 = vmatmul.f32.gmra.mxu3 %v8124_v44  ;;  %2220 = vmatpush.msra.mxu2 %v1981_v16  ;;  %v1917_v17 = vunpack.c.l.bf16 %v8445_v40  ;;  %v8459_v16 = vld [vmem:[#allocation5 + $0x780] sm:$0xff] }
 0x1d6   :  { %2285 = vmatpush.msra.mxu3 %v2045_v59  ;;  %13621 = vst [vmem:[#allocation71_spill] sm:$0xff] %v8459_v16 }
 0x1d7   :  { %v1199_v21 = vpop.f32.mrf.mxu2  ;;  %2155 = vmatpush.msra.mxu1 %v1917_v17 }
 0x1d8   :  { %v1200_v37 = vadd.f32 %v1199_v21, %v1135_v60  ;;  %v1072_v22 = vpop.f32.mrf.mxu0  ;;  %v1137_v5 = vpop.f32.mrf.mxu1  ;;  %v8455_v60 = vld [vmem:[#allocation5 + $0x680] sm:$0xff] }
 0x1d9   :  { %v1073_v44 = vadd.f32 %v1072_v22, %v8339_v45  ;;  %v1264_v61 = vpop.f32.mrf.mxu3  ;;  %v8457_v21 = vld [vmem:[#allocation5 + $0x480] sm:$0xff] }
 0x1da   :  { %v8449_v48 = vadd.f32 %v1264_v61, %v1200_v37  ;;  %v1977_v37 = vunpack.c.l.bf16 %v8455_v60  ;;  %v1849_v59 = vunpack.c.l.bf16 %v8457_v21 }
 0x1db   :  { %1331 = vmatmul.f32.gmra.mxu0 %v8134_v63  ;;  %1396 = vmatmul.f32.gmra.mxu1 %v8137_v52  ;;  %v1138_v62 = vadd.f32 %v1137_v5, %v1073_v44  ;;  %v2041_v63 = vunpack.c.l.bf16 %v8459_v16 }
 0x1dc   :  { %1461 = vmatmul.f32.gmra.mxu2 %v8140_v6  ;;  %v8464_v6 = vld [vmem:[#allocation5 + $0x580] sm:$0xff]  ;;  %2091 = vmatpush.msra.mxu0 %v1849_v59 }
 0x1dd   :  { %1526 = vmatmul.f32.gmra.mxu3 %v8143_v12  ;;  %2221 = vmatpush.msra.mxu2 %v1977_v37  ;;  %v1913_v61 = vunpack.c.l.bf16 %v8464_v6  ;;  %v8478_v37 = vld [vmem:[#allocation5 + $0x770] sm:$0xff] }
 0x1de   :  { %2286 = vmatpush.msra.mxu3 %v2041_v63  ;;  %13622 = vst [vmem:[#allocation72_spill] sm:$0xff] %v8478_v37 }
 0x1df   :  { %v1202_v58 = vpop.f32.mrf.mxu2  ;;  %2156 = vmatpush.msra.mxu1 %v1913_v61 }
 0x1e0   :  { %v1203_v52 = vadd.f32 %v1202_v58, %v1138_v62  ;;  %v1075_v22 = vpop.f32.mrf.mxu0  ;;  %v1140_v5 = vpop.f32.mrf.mxu1  ;;  %v8474_v62 = vld [vmem:[#allocation5 + $0x670] sm:$0xff] }
 0x1e1   :  { %v1076_v12 = vadd.f32 %v1075_v22, %v8339_v45  ;;  %v1267_v44 = vpop.f32.mrf.mxu3  ;;  %v8476_v58 = vld [vmem:[#allocation5 + $0x470] sm:$0xff] }
 0x1e2   :  { %v8468_v17 = vadd.f32 %v1267_v44, %v1203_v52  ;;  %v1973_v52 = vunpack.c.l.bf16 %v8474_v62  ;;  %v1845_v63 = vunpack.c.l.bf16 %v8476_v58 }
 0x1e3   :  { %1334 = vmatmul.f32.gmra.mxu0 %v8153_v56  ;;  %1399 = vmatmul.f32.gmra.mxu1 %v8156_v53  ;;  %v1141_v16 = vadd.f32 %v1140_v5, %v1076_v12  ;;  %v2037_v56 = vunpack.c.l.bf16 %v8478_v37 }
 0x1e4   :  { %1464 = vmatmul.f32.gmra.mxu2 %v8159_v28  ;;  %v8483_v28 = vld [vmem:[#allocation5 + $0x570] sm:$0xff]  ;;  %2092 = vmatpush.msra.mxu0 %v1845_v63 }
 0x1e5   :  { %1529 = vmatmul.f32.gmra.mxu3 %v8162_v7  ;;  %2222 = vmatpush.msra.mxu2 %v1973_v52  ;;  %v1909_v44 = vunpack.c.l.bf16 %v8483_v28  ;;  %v8497_v52 = vld [vmem:[#allocation5 + $0x760] sm:$0xff] }
 0x1e6   :  { %2287 = vmatpush.msra.mxu3 %v2037_v56  ;;  %13623 = vst [vmem:[#allocation73_spill] sm:$0xff] %v8497_v52 }
 0x1e7   :  { %v1205_v59 = vpop.f32.mrf.mxu2  ;;  %2157 = vmatpush.msra.mxu1 %v1909_v44 }
 0x1e8   :  { %v1206_v53 = vadd.f32 %v1205_v59, %v1141_v16  ;;  %v1078_v22 = vpop.f32.mrf.mxu0  ;;  %v1143_v5 = vpop.f32.mrf.mxu1  ;;  %v8493_v16 = vld [vmem:[#allocation5 + $0x660] sm:$0xff] }
 0x1e9   :  { %v1079_v7 = vadd.f32 %v1078_v22, %v8339_v45  ;;  %v1270_v12 = vpop.f32.mrf.mxu3  ;;  %v8495_v59 = vld [vmem:[#allocation5 + $0x460] sm:$0xff] }
 0x1ea   :  { %v8487_v61 = vadd.f32 %v1270_v12, %v1206_v53  ;;  %v1969_v53 = vunpack.c.l.bf16 %v8493_v16  ;;  %v1841_v56 = vunpack.c.l.bf16 %v8495_v59 }
 0x1eb   :  { %1337 = vmatmul.f32.gmra.mxu0 %v8172_v26  ;;  %1402 = vmatmul.f32.gmra.mxu1 %v8175_v3  ;;  %v1144_v37 = vadd.f32 %v1143_v5, %v1079_v7  ;;  %v2033_v26 = vunpack.c.l.bf16 %v8497_v52 }
 0x1ec   :  { %1467 = vmatmul.f32.gmra.mxu2 %v8178_v11  ;;  %v8502_v11 = vld [vmem:[#allocation5 + $0x560] sm:$0xff]  ;;  %2093 = vmatpush.msra.mxu0 %v1841_v56 }
 0x1ed   :  { %1532 = vmatmul.f32.gmra.mxu3 %v8181_v27  ;;  %2223 = vmatpush.msra.mxu2 %v1969_v53  ;;  %v1905_v12 = vunpack.c.l.bf16 %v8502_v11  ;;  %v8516_v53 = vld [vmem:[#allocation5 + $0x750] sm:$0xff] }
 0x1ee   :  { %2288 = vmatpush.msra.mxu3 %v2033_v26  ;;  %13625 = vst [vmem:[#allocation75_spill] sm:$0xff] %v8516_v53 }
 0x1ef   :  { %v1208_v63 = vpop.f32.mrf.mxu2  ;;  %2158 = vmatpush.msra.mxu1 %v1905_v12 }
 0x1f0   :  { %v1209_v3 = vadd.f32 %v1208_v63, %v1144_v37  ;;  %v1081_v22 = vpop.f32.mrf.mxu0  ;;  %v1146_v5 = vpop.f32.mrf.mxu1  ;;  %v8512_v37 = vld [vmem:[#allocation5 + $0x650] sm:$0xff] }
 0x1f1   :  { %v1082_v27 = vadd.f32 %v1081_v22, %v8339_v45  ;;  %v1273_v7 = vpop.f32.mrf.mxu3  ;;  %v8514_v63 = vld [vmem:[#allocation5 + $0x450] sm:$0xff] }
 0x1f2   :  { %v8506_v44 = vadd.f32 %v1273_v7, %v1209_v3  ;;  %13624 = vst [vmem:[#allocation74_spill] sm:$0xff] %v8514_v63  ;;  %v1965_v3 = vunpack.c.l.bf16 %v8512_v37  ;;  %v1837_v26 = vunpack.c.l.bf16 %v8514_v63 }
 0x1f3   :  { %1340 = vmatmul.f32.gmra.mxu0 %v8191_v18  ;;  %1405 = vmatmul.f32.gmra.mxu1 %v8194_v49  ;;  %v1147_v52 = vadd.f32 %v1146_v5, %v1082_v27  ;;  %v2029_v18 = vunpack.c.l.bf16 %v8516_v53  ;;  %v8523_v5 = vld [vmem:[#allocation5 + $0x550] sm:$0xff]  ;;  %v13670_v53 = vld [vmem:[#allocation19_spill] sm:$0xff] }
 0x1f4   :  { %1470 = vmatmul.f32.gmra.mxu2 %v8197_v0  ;;  %13626 = vst [vmem:[#allocation76_spill] sm:$0xff] %v8523_v5  ;;  %2094 = vmatpush.msra.mxu0 %v1837_v26  ;;  %v1901_v7 = vunpack.c.l.bf16 %v8523_v5 }
 0x1f5   :  { %1535 = vmatmul.f32.gmra.mxu3 %v8200_v30  ;;  %2224 = vmatpush.msra.mxu2 %v1965_v3 }
 0x1f6   :  { %2289 = vmatpush.msra.mxu3 %v2029_v18  ;;  %2159 = vmatpush.msra.mxu1 %v1901_v7 }
 0x1f7   :  { %v1211_v56 = vpop.f32.mrf.mxu2 }
 0x1f8   :  { %v8521_v49 = vadd.f32 %v1211_v56, %v1147_v52  ;;  %v1084_v22 = vpop.f32.mrf.mxu0  ;;  %v1149_v0 = vpop.f32.mrf.mxu1  ;;  %v8533_v52 = vld [vmem:[#allocation5 + $0x640] sm:$0xff] }
 0x1f9   :  { %v1085_v30 = vadd.f32 %v1084_v22, %v8339_v45  ;;  %v8526_v27 = vpop.f32.mrf.mxu3  ;;  %13627 = vst [vmem:[#allocation77_spill] sm:$0xff] %v8533_v52  ;;  %v8535_v56 = vld [vmem:[#allocation5 + $0x440] sm:$0xff]  ;;  %v1961_v26 = vunpack.c.l.bf16 %v8533_v52 }
 0x1fa   :  { %13628 = vst [vmem:[#allocation78_spill] sm:$0xff] %v8535_v56  ;;  %v8537_v22 = vld [vmem:[#allocation5 + $0x740] sm:$0xff]  ;;  %v1833_v18 = vunpack.c.l.bf16 %v8535_v56 }
 0x1fb   :  { %1343 = vmatmul.f32.gmra.mxu0 %v8210_v29  ;;  %1408 = vmatmul.f32.gmra.mxu1 %v8213_v8  ;;  %v1150_v12 = vadd.f32 %v1149_v0, %v1085_v30  ;;  %13629 = vst [vmem:[#allocation79_spill] sm:$0xff] %v8537_v22  ;;  %v2025_v29 = vunpack.c.l.bf16 %v8537_v22  ;;  %v8544_v30 = vld [vmem:[#allocation5 + $0x540] sm:$0xff] }
 0x1fc   :  { %1473 = vmatmul.f32.gmra.mxu2 %v8216_v19  ;;  %13630 = vst [vmem:[#allocation80_spill] sm:$0xff] %v8544_v30  ;;  %2095 = vmatpush.msra.mxu0 %v1833_v18  ;;  %v1897_v5 = vunpack.c.l.bf16 %v8544_v30  ;;  %v8598_v56 = vld [vmem:[#allocation5 + $0x400] sm:$0xff] }
 0x1fd   :  { %1538 = vmatmul.f32.gmra.mxu3 %v8219_v50  ;;  %2225 = vmatpush.msra.mxu2 %v1961_v26  ;;  %13644 = vst [vmem:[#allocation92_spill] sm:$0xff] %v8598_v56  ;;  %v8600_v52 = vld [vmem:[#allocation5 + $0x500] sm:$0xff] }
 0x1fe   :  { %2290 = vmatpush.msra.mxu3 %v2025_v29  ;;  %2160 = vmatpush.msra.mxu1 %v1897_v5  ;;  %v8565_v5 = vld [vmem:[#allocation5 + $0x530] sm:$0xff]  ;;  %13645 = vst [vmem:[#allocation93_spill] sm:$0xff] %v8600_v52 }
 0x1ff   :  { %v1214_v3 = vpop.f32.mrf.mxu2  ;;  %13634 = vst [vmem:[#allocation84_spill] sm:$0xff] %v8565_v5  ;;  %v1893_v30 = vunpack.c.l.bf16 %v8565_v5 }
 0x200   :  { %v8542_v8 = vadd.f32 %v1214_v3, %v1150_v12  ;;  %v1087_v0 = vpop.f32.mrf.mxu0  ;;  %v1152_v19 = vpop.f32.mrf.mxu1  ;;  %v8554_v12 = vld [vmem:[#allocation5 + $0x630] sm:$0xff] }
 0x201   :  { %v1088_v50 = vadd.f32 %v1087_v0, %v8339_v45  ;;  %v8547_v7 = vpop.f32.mrf.mxu3  ;;  %13631 = vst [vmem:[#allocation81_spill] sm:$0xff] %v8554_v12  ;;  %v8556_v3 = vld [vmem:[#allocation5 + $0x430] sm:$0xff]  ;;  %v1957_v18 = vunpack.c.l.bf16 %v8554_v12  ;;  %2161 = vmatpush.msra.mxu1 %v1893_v30 }
 0x202   :  { %13632 = vst [vmem:[#allocation82_spill] sm:$0xff] %v8556_v3  ;;  %v8558_v0 = vld [vmem:[#allocation5 + $0x730] sm:$0xff]  ;;  %v1829_v29 = vunpack.c.l.bf16 %v8556_v3  ;;  %v8576_v3 = vld [vmem:[#allocation5 + $0x420] sm:$0xff] }
 0x203   :  { %1346 = vmatmul.f32.gmra.mxu0 %v8229_v2  ;;  %1411 = vmatmul.f32.gmra.mxu1 %v8232_v25  ;;  %v1153_v22 = vadd.f32 %v1152_v19, %v1088_v50  ;;  %13633 = vst [vmem:[#allocation83_spill] sm:$0xff] %v8558_v0  ;;  %v2021_v2 = vunpack.c.l.bf16 %v8558_v0 }
 0x204   :  { %1476 = vmatmul.f32.gmra.mxu2 %v8235_v14  ;;  %2096 = vmatpush.msra.mxu0 %v1829_v29  ;;  %13637 = vst [vmem:[#allocation85_spill] sm:$0xff] %v8576_v3  ;;  %v1825_v29 = vunpack.c.l.bf16 %v8576_v3 }
 0x205   :  { %1541 = vmatmul.f32.gmra.mxu3 %v8238_v36  ;;  %2226 = vmatpush.msra.mxu2 %v1957_v18 }
 0x206   :  { %2291 = vmatpush.msra.mxu3 %v2021_v2  ;;  %v8584_v2 = vld [vmem:[#allocation5 + $0x720] sm:$0xff]  ;;  %2097 = vmatpush.msra.mxu0 %v1825_v29 }
 0x207   :  { %v1217_v26 = vpop.f32.mrf.mxu2  ;;  %13639 = vst [vmem:[#allocation87_spill] sm:$0xff] %v8584_v2 }
 0x208   :  { %v8563_v25 = vadd.f32 %v1217_v26, %v1153_v22  ;;  %v1090_v19 = vpop.f32.mrf.mxu0  ;;  %v1155_v14 = vpop.f32.mrf.mxu1  ;;  %v13635_v22 = vld [vmem:[#allocation27_spill] sm:$0xff]  ;;  %v8574_v26 = vld [vmem:[#allocation5 + $0x620] sm:$0xff] }
 0x209   :  { %v1091_v36 = vadd.f32 %v1090_v19, %v8339_v45  ;;  %v8568_v50 = vpop.f32.mrf.mxu3  ;;  %13636 = vst [vmem:[#allocation27_spill] sm:$0xff] %v8574_v26  ;;  %v8578_v19 = vld [vmem:[#allocation5 + $0x520] sm:$0xff]  ;;  %v1953_v18 = vunpack.c.l.bf16 %v8574_v26  ;;  %v8593_v26 = vld [vmem:[#allocation5 + $0x610] sm:$0xff] }
 0x20a   :  { %13638 = vst [vmem:[#allocation86_spill] sm:$0xff] %v8578_v19  ;;  %v1949_v12 = vunpack.c.l.bf16 %v8593_v26 }
 0x20b   :  { %1349 = vmatmul.f32.gmra.mxu0 %v8248_v1  ;;  %1414 = vmatmul.f32.gmra.mxu1 %v8251_v33  ;;  %v1156_v0 = vadd.f32 %v1155_v14, %v1091_v36  ;;  %v1889_v1 = vunpack.c.l.bf16 %v8578_v19  ;;  %v8586_v33 = vld [vmem:[#allocation5 + $0x410] sm:$0xff]  ;;  %v2017_v36 = vunpack.c.l.bf16 %v8584_v2  ;;  %13642 = vst [vmem:[#allocation90_spill] sm:$0xff] %v8593_v26  ;;  %v13648_v26 = vld [vmem:[#allocation29_spill] sm:$0xff] }
 0x20c   :  { %1479 = vmatmul.f32.gmra.mxu2 %v13635_v22  ;;  %13640 = vst [vmem:[#allocation88_spill] sm:$0xff] %v8586_v33  ;;  %v8588_v14 = vld [vmem:[#allocation5 + $0x510] sm:$0xff]  ;;  %v1821_v22 = vunpack.c.l.bf16 %v8586_v33 }
 0x20d   :  { %1544 = vmatmul.f32.gmra.mxu3 %v8257_v43  ;;  %13641 = vst [vmem:[#allocation89_spill] sm:$0xff] %v8588_v14  ;;  %2227 = vmatpush.msra.mxu2 %v1953_v18  ;;  %v1885_v43 = vunpack.c.l.bf16 %v8588_v14  ;;  %v8602_v18 = vld [vmem:[#allocation5 + $0x600] sm:$0xff] }
 0x20e   :  { %2162 = vmatpush.msra.mxu1 %v1889_v1  ;;  %13646 = vst [vmem:[#allocation94_spill] sm:$0xff] %v8602_v18  ;;  %2292 = vmatpush.msra.mxu3 %v2017_v36  ;;  %v1945_v1 = vunpack.c.l.bf16 %v8602_v18  ;;  %v13649_v14 = vld [vmem:[#allocation30_spill] sm:$0xff]  ;;  %v8614_v36 = vld [vmem:[#allocation5 + $0x710] sm:$0xff] }
 0x20f   :  { %v1220_v30 = vpop.f32.mrf.mxu2  ;;  %2098 = vmatpush.msra.mxu0 %v1821_v22  ;;  %2228 = vmatpush.msra.mxu2 %v1949_v12  ;;  %13652 = vst [vmem:[#allocation29_spill] sm:$0xff] %v8614_v36 }
 0x210   :  { %v8595_v3 = vadd.f32 %v1220_v30, %v1156_v0  ;;  %v1093_v19 = vpop.f32.mrf.mxu0  ;;  %v1158_v5 = vpop.f32.mrf.mxu1  ;;  %v1817_v0 = vunpack.c.l.bf16 %v8598_v56  ;;  %v1881_v30 = vunpack.c.l.bf16 %v8600_v52  ;;  %2163 = vmatpush.msra.mxu1 %v1885_v43  ;;  %v2013_v43 = vunpack.c.l.bf16 %v8614_v36 }
 0x211   :  { %v1094_v29 = vadd.f32 %v1093_v19, %v8339_v45  ;;  %v8605_v33 = vpop.f32.mrf.mxu3  ;;  %v13651_v19 = vld [vmem:[#allocation34_spill] sm:$0xff]  ;;  %2229 = vmatpush.msra.mxu2 %v1945_v1 }
 0x212   :  { %13643 = vst [vmem:[#allocation91_spill] sm:$0xff] %v8595_v3  ;;  %v13650_v3 = vld [vmem:[#allocation31_spill] sm:$0xff]  ;;  %2099 = vmatpush.msra.mxu0 %v1817_v0  ;;  %2164 = vmatpush.msra.mxu1 %v1881_v30  ;;  %v13657_v0 = vld [vmem:[#allocation36_spill] sm:$0xff]  ;;  %v13658_v30 = vld [vmem:[#allocation37_spill] sm:$0xff] }
 0x213   :  { %13647 = vst [vmem:[#allocation95_spill] sm:$0xff] %v8605_v33  ;;  %1352 = vmatmul.f32.gmra.mxu0 %v13648_v26  ;;  %1417 = vmatmul.f32.gmra.mxu1 %v13649_v14  ;;  %v1159_v2 = vadd.f32 %v1158_v5, %v1094_v29  ;;  %v13656_v5 = vld [vmem:[#allocation35_spill] sm:$0xff]  ;;  %v8626_v1 = vld [vmem:[#allocation5 + $0x700] sm:$0xff] }
 0x214   :  { %1482 = vmatmul.f32.gmra.mxu2 %v13650_v3  ;;  %2293 = vmatpush.msra.mxu3 %v2013_v43  ;;  %v13655_v3 = vld [vmem:[#allocation33_spill] sm:$0xff]  ;;  %13659 = vst [vmem:[#allocation34_spill] sm:$0xff] %v8626_v1 }
 0x215   :  { %1547 = vmatmul.f32.gmra.mxu3 %v13651_v19  ;;  %v2009_v19 = vunpack.c.l.bf16 %v8626_v1 }
 0x217   :  { %v1223_v22 = vpop.f32.mrf.mxu2  ;;  %2294 = vmatpush.msra.mxu3 %v2009_v19  ;;  %v7052_v19 = vld [vmem:[#allocation2 + $0x8] sm:$0xff] }
 0x218   :  { %v8617_v12 = vadd.f32 %v1223_v22, %v1159_v2  ;;  %v1096_v18 = vpop.f32.mrf.mxu0  ;;  %v1161_v52 = vpop.f32.mrf.mxu1 }
 0x219   :  { %v1097_v26 = vadd.f32 %v1096_v18, %v8339_v45  ;;  %v8620_v14 = vpop.f32.mrf.mxu3 }
 0x21a   :  { %13653 = vst [vmem:[#allocation30_spill] sm:$0xff] %v8617_v12  ;;  %v7051_v12 = vld [vmem:[#allocation2] sm:$0xff] }
 0x21b   :  { %13654 = vst [vmem:[#allocation31_spill] sm:$0xff] %v8620_v14  ;;  %1355 = vmatmul.f32.gmra.mxu0 %v13655_v3  ;;  %1420 = vmatmul.f32.gmra.mxu1 %v13656_v5  ;;  %v1162_v29 = vadd.f32 %v1161_v52, %v1097_v26  ;;  %v13662_v3 = vld [vmem:[#allocation39_spill] sm:$0xff]  ;;  %v13663_v52 = vld [vmem:[#allocation40_spill] sm:$0xff]  ;;  %v13664_v5 = vld [vmem:[#allocation41_spill] sm:$0xff] }
 0x21c   :  { %1485 = vmatmul.f32.gmra.mxu2 %v13657_v0  ;;  %v13665_v0 = vld [vmem:[#allocation42_spill] sm:$0xff] }
 0x21d   :  { %1550 = vmatmul.f32.gmra.mxu3 %v13658_v30  ;;  %v13666_v30 = vld [vmem:[#allocation54_spill] sm:$0xff] }
 0x21e   :  { %v2006_v1 = vunpack.c.h.bf16 %v13666_v30 }
 0x21f   :  { %v1226_v2 = vpop.f32.mrf.mxu2 }
 0x220   :  { %v8629_v22 = vadd.f32 %v1226_v2, %v1162_v29  ;;  %v1099_v18 = vpop.f32.mrf.mxu0  ;;  %v1164_v36 = vpop.f32.mrf.mxu1  ;;  %v13667_v29 = vld [vmem:[#allocation55_spill] sm:$0xff]  ;;  %2474 = vmatpush.msrb.mxu2 %v2006_v1  ;;  %v13674_v1 = vld [vmem:[#allocation62_spill] sm:$0xff] }
 0x221   :  { %v1100_v43 = vadd.f32 %v1099_v18, %v8339_v45  ;;  %v8632_v56 = vpop.f32.mrf.mxu3  ;;  %v1878_v2 = vunpack.c.h.bf16 %v13667_v29  ;;  %v13669_v18 = vld [vmem:[#allocation43_spill] sm:$0xff] }
 0x222   :  { %13660 = vst [vmem:[#allocation33_spill] sm:$0xff] %v8629_v22  ;;  %v13668_v22 = vld [vmem:[#allocation56_spill] sm:$0xff]  ;;  %v1560_v33 = vadd.f32 %v7051_v12, %v13669_v18  ;;  %v13677_v18 = vld [vmem:[#allocation65_spill] sm:$0xff] }
 0x223   :  { %13661 = vst [vmem:[#allocation35_spill] sm:$0xff] %v8632_v56  ;;  %1358 = vmatmul.f32.gmra.mxu0 %v13662_v3  ;;  %1423 = vmatmul.f32.gmra.mxu1 %v13663_v52  ;;  %v1165_v26 = vadd.f32 %v1164_v36, %v1100_v43  ;;  %v2070_v14 = vunpack.c.h.bf16 %v13668_v22  ;;  %v1561_v3 = vadd.f32 %v7052_v19, %v13670_v53  ;;  %v13671_v52 = vld [vmem:[#allocation58_spill] sm:$0xff]  ;;  %v13672_v12 = vld [vmem:[#allocation60_spill] sm:$0xff]  ;;  %v13673_v53 = vld [vmem:[#allocation61_spill] sm:$0xff] }
 0x224   :  { %1488 = vmatmul.f32.gmra.mxu2 %v13664_v5  ;;  %2344 = vmatpush.msrb.mxu0 %v1878_v2  ;;  %v1942_v5 = vunpack.c.h.bf16 %v13671_v52  ;;  %6474 = vtanh.f32 %v1560_v33  ;;  %v13676_v2 = vld [vmem:[#allocation64_spill] sm:$0xff]  ;;  %v2066_v33 = vunpack.c.h.bf16 %v13677_v18  ;;  %v7054_v19 = vld [vmem:[#allocation2 + $0x20] sm:$0xff] }
 0x225   :  { %1553 = vmatmul.f32.gmra.mxu3 %v13665_v0  ;;  %v7053_v0 = vld [vmem:[#allocation2 + $0x10] sm:$0xff]  ;;  %6476 = vtanh.f32 %v1561_v3  ;;  %v7055_v3 = vld [vmem:[#allocation2 + $0x28] sm:$0xff] }
 0x226   :  { %v1562_v30 = vadd.f32 %v7053_v0, %v8373_v47  ;;  %2539 = vmatpush.msrb.mxu3 %v2070_v14  ;;  %2409 = vmatpush.msrb.mxu1 %v1942_v5  ;;  %v8655_v47 = vperm.slane %v13676_v2, 3  ;;  %v1874_v14 = vunpack.c.h.bf16 %v8343_v34  ;;  %v7056_v34 = vld [vmem:[#allocation2 + $0x30] sm:$0xff] }
 0x227   :  { %v1229_v56 = vpop.f32.mrf.mxu2 }
 0x228   :  { %v8643_v63 = vadd.f32 %v1229_v56, %v1165_v26  ;;  %v1102_v36 = vpop.f32.mrf.mxu0  ;;  %v1167_v43 = vpop.f32.mrf.mxu1  ;;  %6478 = vtanh.f32 %v1562_v30  ;;  %v13675_v26 = vld [vmem:[#allocation63_spill] sm:$0xff]  ;;  %2345 = vmatpush.msrb.mxu0 %v1874_v14  ;;  %2540 = vmatpush.msrb.mxu3 %v2066_v33  ;;  %v2062_v14 = vunpack.c.h.bf16 %v8364_v23  ;;  %v7057_v33 = vld [vmem:[#allocation2 + $0x40] sm:$0xff] }
 0x229   :  { %v1103_v22 = vadd.f32 %v1102_v36, %v8339_v45  ;;  %v8648_v29 = vpop.f32.mrf.mxu3  ;;  %v2002_v45 = vunpack.c.h.bf16 %v8341_v15  ;;  %v13678_v36 = vld [vmem:[#allocation44_spill] sm:$0xff] }
 0x22a   :  { %v1564_v52 = vadd.f32 %v7054_v19, %v13678_v36  ;;  %v8665_v15 = vpop.eup %6474  ;;  %v13682_v19 = vld [vmem:[#allocation45_spill] sm:$0xff]  ;;  %2541 = vmatpush.msrb.mxu3 %v2062_v14  ;;  %v1866_v14 = vunpack.c.h.bf16 %v8381_v39 }
 0x22b   :  { %1361 = vmatmul.f32.gmra.mxu0 %v13672_v12  ;;  %1426 = vmatmul.f32.gmra.mxu1 %v13673_v53  ;;  %v1168_v56 = vadd.f32 %v1167_v43, %v1103_v22  ;;  %v13679_v43 = vld [vmem:[#allocation20_spill] sm:$0xff]  ;;  %v1938_v53 = vunpack.c.h.bf16 %v8350_v9  ;;  %v8671_v18 = vpop.eup %6476  ;;  %v1568_v36 = vadd.f32 %v7057_v33, %v13682_v19  ;;  %v13687_v19 = vld [vmem:[#allocation67_spill] sm:$0xff] }
 0x22c   :  { %1491 = vmatmul.f32.gmra.mxu2 %v13674_v1  ;;  %v1565_v0 = vadd.f32 %v7055_v3, %v13679_v43  ;;  %v1566_v1 = vadd.f32 %v7056_v34, %v8392_v54  ;;  %13680 = vst [vmem:[#allocation36_spill] sm:$0xff] %v8671_v18  ;;  %6480 = vtanh.f32 %v1564_v52  ;;  %v1998_v54 = vunpack.c.h.bf16 %v8360_v42  ;;  %v7058_v52 = vld [vmem:[#allocation2 + $0x48] sm:$0xff]  ;;  %v13683_v3 = vld [vmem:[#allocation14_spill] sm:$0xff]  ;;  %v7059_v42 = vld [vmem:[#allocation2 + $0x50] sm:$0xff] }
 0x22d   :  { %1556 = vmatmul.f32.gmra.mxu3 %v13675_v26  ;;  %2475 = vmatpush.msrb.mxu2 %v2002_v45  ;;  %v1870_v45 = vunpack.c.h.bf16 %v8362_v4  ;;  %v1569_v43 = vadd.f32 %v7058_v52, %v13683_v3  ;;  %v1570_v4 = vadd.f32 %v7059_v42, %v8411_v55  ;;  %v1994_v55 = vunpack.c.h.bf16 %v8379_v57  ;;  %v7061_v52 = vld [vmem:[#allocation2 + $0x60] sm:$0xff]  ;;  %v7063_v57 = vld [vmem:[#allocation2 + $0x70] sm:$0xff] }
 0x22e   :  { %2410 = vmatpush.msrb.mxu1 %v1938_v53  ;;  %6482 = vtanh.f32 %v1565_v0  ;;  %v1574_v39 = vadd.f32 %v7063_v57, %v8430_v31  ;;  %v7064_v31 = vld [vmem:[#allocation2 + $0x38] sm:$0xff] }
 0x22f   :  { %v1232_v5 = vpop.f32.mrf.mxu2  ;;  %6484 = vtanh.f32 %v1566_v1  ;;  %2476 = vmatpush.msrb.mxu2 %v1998_v54  ;;  %2346 = vmatpush.msrb.mxu0 %v1870_v45  ;;  %v7060_v54 = vld [vmem:[#allocation2 + $0x18] sm:$0xff] }
 0x230   :  { %v8662_v22 = vadd.f32 %v1232_v5, %v1168_v56  ;;  %v1317_v30 = vpop.f32.mrf.mxu0  ;;  %v1382_v12 = vpop.f32.mrf.mxu1  ;;  %6486 = vtanh.f32 %v1568_v36  ;;  %v13688_v36 = vld [vmem:[#allocation46_spill] sm:$0xff] }
 0x231   :  { %v8668_v26 = vpop.f32.mrf.mxu3  ;;  %v1318_v2 = vadd.f32 %v1317_v30, %v8655_v47  ;;  %v8673_v56 = vpop.eup %6478  ;;  %6488 = vtanh.f32 %v1569_v43  ;;  %v1572_v3 = vadd.f32 %v7061_v52, %v13688_v36  ;;  %2477 = vmatpush.msrb.mxu2 %v1994_v55  ;;  %2347 = vmatpush.msrb.mxu0 %v1866_v14  ;;  %v1862_v52 = vunpack.c.h.bf16 %v8400_v41  ;;  %v13694_v36 = vld [vmem:[#allocation68_spill] sm:$0xff] }
 0x232   :  { %13681 = vst [vmem:[#allocation37_spill] sm:$0xff] %v8673_v56  ;;  %v8684_v34 = vpop.eup %6480  ;;  %6490 = vtanh.f32 %v1570_v4  ;;  %v1930_v4 = vunpack.c.h.bf16 %v8388_v46 }
 0x233   :  { %2100 = vmatmul.f32.vlgmr.msra.gmra.mxu0 %v8665_v15  ;;  %2165 = vmatmul.f32.vlgmr.msra.gmra.mxu1 %v8671_v18  ;;  %v1383_v9 = vadd.f32 %v1382_v12, %v1318_v2  ;;  %v1934_v12 = vunpack.c.h.bf16 %v8369_v38  ;;  %13684 = vst [vmem:[#allocation39_spill] sm:$0xff] %v8684_v34 }
 0x234   :  { %2230 = vmatmul.f32.vlgmr.msra.gmra.mxu2 %v8673_v56  ;;  %v8688_v2 = vpop.eup %6482  ;;  %2348 = vmatpush.msrb.mxu0 %v1862_v52 }
 0x235   :  { %13685 = vst [vmem:[#allocation40_spill] sm:$0xff] %v8688_v2  ;;  %2411 = vmatpush.msrb.mxu1 %v1934_v12  ;;  %v13689_v12 = vld [vmem:[#allocation17_spill] sm:$0xff] }
 0x237   :  { %v1447_v5 = vpop.f32.mrf.mxu2  ;;  %2412 = vmatpush.msrb.mxu1 %v1930_v4 }
 0x238   :  { %v1448_v30 = vadd.f32 %v1447_v5, %v1383_v9  ;;  %v1320_v53 = vpop.f32.mrf.mxu0  ;;  %v1385_v0 = vpop.f32.mrf.mxu1  ;;  %v2058_v5 = vunpack.c.h.bf16 %v13687_v19 }
 0x239   :  { %v1321_v23 = vadd.f32 %v1320_v53, %v8655_v47  ;;  %v1512_v1 = vpop.f32.mrf.mxu3  ;;  %v8690_v9 = vpop.eup %6484  ;;  %v7062_v53 = vld [vmem:[#allocation2 + $0x68] sm:$0xff] }
 0x23a   :  { %v1513_v33 = vadd.f32 %v1512_v1, %v1448_v30  ;;  %13686 = vst [vmem:[#allocation41_spill] sm:$0xff] %v8690_v9  ;;  %v1573_v43 = vadd.f32 %v7062_v53, %v13689_v12  ;;  %v8701_v1 = vpop.eup %6486  ;;  %2542 = vmatpush.msrb.mxu3 %v2058_v5  ;;  %v1990_v5 = vunpack.c.h.bf16 %v8398_v51  ;;  %v13695_v53 = vld [vmem:[#allocation47_spill] sm:$0xff]  ;;  %v7067_v51 = vld [vmem:[#allocation2 + $0x90] sm:$0xff] }
 0x23b   :  { %2103 = vmatmul.f32.gmra.mxu0 %v8684_v34  ;;  %2168 = vmatmul.f32.gmra.mxu1 %v8688_v2  ;;  %v1386_v38 = vadd.f32 %v1385_v0, %v1321_v23  ;;  %13690 = vst [vmem:[#allocation42_spill] sm:$0xff] %v8701_v1  ;;  %v1578_v41 = vadd.f32 %v7067_v51, %v8449_v48  ;;  %v7068_v48 = vld [vmem:[#allocation2 + $0x58] sm:$0xff] }
 0x23c   :  { %v1563_v45 = vadd.f32 %v7060_v54, %v1513_v33  ;;  %2233 = vmatmul.f32.gmra.mxu2 %v8690_v9 }
 0x23d   :  { %2478 = vmatpush.msrb.mxu2 %v1990_v5 }
 0x23e   :  { %6492 = vtanh.f32 %v1563_v45  ;;  %v8705_v45 = vpop.eup %6488 }
 0x23f   :  { %v1450_v30 = vpop.f32.mrf.mxu2  ;;  %13691 = vst [vmem:[#allocation54_spill] sm:$0xff] %v8705_v45  ;;  %6494 = vtanh.f32 %v1572_v3  ;;  %v2054_v3 = vunpack.c.h.bf16 %v13694_v36 }
 0x240   :  { %v1451_v0 = vadd.f32 %v1450_v30, %v1386_v38  ;;  %v1323_v42 = vpop.f32.mrf.mxu0  ;;  %v1388_v23 = vpop.f32.mrf.mxu1  ;;  %6496 = vtanh.f32 %v1573_v43  ;;  %v7065_v30 = vld [vmem:[#allocation2 + $0x80] sm:$0xff]  ;;  %v7066_v43 = vld [vmem:[#allocation2 + $0x88] sm:$0xff] }
 0x241   :  { %v1324_v33 = vadd.f32 %v1323_v42, %v8655_v47  ;;  %v1515_v54 = vpop.f32.mrf.mxu3  ;;  %v8707_v38 = vpop.eup %6490  ;;  %6498 = vtanh.f32 %v1574_v39  ;;  %v1576_v12 = vadd.f32 %v7065_v30, %v13695_v53  ;;  %v13696_v42 = vld [vmem:[#allocation18_spill] sm:$0xff]  ;;  %v1926_v39 = vunpack.c.h.bf16 %v8407_v24  ;;  %2543 = vmatpush.msrb.mxu3 %v2054_v3  ;;  %v13701_v53 = vld [vmem:[#allocation69_spill] sm:$0xff] }
 0x242   :  { %v1516_v19 = vadd.f32 %v1515_v54, %v1451_v0  ;;  %13692 = vst [vmem:[#allocation55_spill] sm:$0xff] %v8707_v38  ;;  %v1986_v3 = vunpack.c.h.bf16 %v8417_v13  ;;  %v1858_v30 = vunpack.c.h.bf16 %v8419_v20  ;;  %v7071_v13 = vld [vmem:[#allocation2 + $0xb0] sm:$0xff] }
 0x243   :  { %2106 = vmatmul.f32.gmra.mxu0 %v8701_v1  ;;  %2171 = vmatmul.f32.gmra.mxu1 %v8705_v45  ;;  %v1389_v55 = vadd.f32 %v1388_v23, %v1324_v33  ;;  %v1577_v23 = vadd.f32 %v7066_v43, %v13696_v42  ;;  %v13702_v43 = vld [vmem:[#allocation48_spill] sm:$0xff]  ;;  %v1582_v20 = vadd.f32 %v7071_v13, %v8468_v17  ;;  %v7072_v17 = vld [vmem:[#allocation2 + $0x78] sm:$0xff] }
 0x244   :  { %v8711_v46 = vpop.eup %6492  ;;  %v1567_v14 = vadd.f32 %v7064_v31, %v1516_v19  ;;  %2236 = vmatmul.f32.gmra.mxu2 %v8707_v38  ;;  %2413 = vmatpush.msrb.mxu1 %v1926_v39 }
 0x245   :  { %13693 = vst [vmem:[#allocation56_spill] sm:$0xff] %v8711_v46  ;;  %2295 = vmatmul.f32.vlgmr.msra.gmra.mxu3 %v8711_v46  ;;  %v8721_v54 = vpop.eup %6494  ;;  %2479 = vmatpush.msrb.mxu2 %v1986_v3 }
 0x246   :  { %6500 = vtanh.f32 %v1567_v14  ;;  %13697 = vst [vmem:[#allocation43_spill] sm:$0xff] %v8721_v54  ;;  %v8725_v14 = vpop.eup %6496  ;;  %2349 = vmatpush.msrb.mxu0 %v1858_v30 }
 0x247   :  { %v1453_v0 = vpop.f32.mrf.mxu2  ;;  %13698 = vst [vmem:[#allocation19_spill] sm:$0xff] %v8725_v14  ;;  %6502 = vtanh.f32 %v1576_v12  ;;  %v2050_v12 = vunpack.c.h.bf16 %v13701_v53 }
 0x248   :  { %v1454_v4 = vadd.f32 %v1453_v0, %v1389_v55  ;;  %v1326_v57 = vpop.f32.mrf.mxu0  ;;  %v1391_v33 = vpop.f32.mrf.mxu1  ;;  %6504 = vtanh.f32 %v1577_v23  ;;  %v7069_v0 = vld [vmem:[#allocation2 + $0xa0] sm:$0xff]  ;;  %v7070_v23 = vld [vmem:[#allocation2 + $0xa8] sm:$0xff] }
 0x249   :  { %v1327_v19 = vadd.f32 %v1326_v57, %v8655_v47  ;;  %v1518_v31 = vpop.f32.mrf.mxu3  ;;  %v8727_v55 = vpop.eup %6498  ;;  %6506 = vtanh.f32 %v1578_v41  ;;  %v1580_v42 = vadd.f32 %v7069_v0, %v13702_v43  ;;  %v13703_v57 = vld [vmem:[#allocation23_spill] sm:$0xff]  ;;  %v1922_v41 = vunpack.c.h.bf16 %v8426_v10  ;;  %2544 = vmatpush.msrb.mxu3 %v2050_v12  ;;  %v13708_v43 = vld [vmem:[#allocation70_spill] sm:$0xff] }
 0x24a   :  { %v1519_v36 = vadd.f32 %v1518_v31, %v1454_v4  ;;  %13699 = vst [vmem:[#allocation58_spill] sm:$0xff] %v8727_v55  ;;  %v1982_v12 = vunpack.c.h.bf16 %v8436_v35  ;;  %v1854_v0 = vunpack.c.h.bf16 %v8438_v32  ;;  %v7075_v35 = vld [vmem:[#allocation2 + $0xd0] sm:$0xff] }
 0x24b   :  { %2109 = vmatmul.f32.gmra.mxu0 %v8721_v54  ;;  %2174 = vmatmul.f32.gmra.mxu1 %v8725_v14  ;;  %v1392_v5 = vadd.f32 %v1391_v33, %v1327_v19  ;;  %v1581_v33 = vadd.f32 %v7070_v23, %v13703_v57  ;;  %v13709_v23 = vld [vmem:[#allocation49_spill] sm:$0xff]  ;;  %v1586_v32 = vadd.f32 %v7075_v35, %v8487_v61 }
 0x24c   :  { %v8731_v24 = vpop.eup %6500  ;;  %v1571_v52 = vadd.f32 %v7068_v48, %v1519_v36  ;;  %2239 = vmatmul.f32.gmra.mxu2 %v8727_v55  ;;  %2414 = vmatpush.msrb.mxu1 %v1922_v41  ;;  %v7076_v61 = vld [vmem:[#allocation2 + $0x98] sm:$0xff] }
 0x24d   :  { %13700 = vst [vmem:[#allocation60_spill] sm:$0xff] %v8731_v24  ;;  %2298 = vmatmul.f32.gmra.mxu3 %v8731_v24  ;;  %v8741_v31 = vpop.eup %6502  ;;  %2480 = vmatpush.msrb.mxu2 %v1982_v12 }
 0x24e   :  { %6508 = vtanh.f32 %v1571_v52  ;;  %13704 = vst [vmem:[#allocation61_spill] sm:$0xff] %v8741_v31  ;;  %v8745_v52 = vpop.eup %6504  ;;  %2350 = vmatpush.msrb.mxu0 %v1854_v0 }
 0x24f   :  { %v1456_v4 = vpop.f32.mrf.mxu2  ;;  %13705 = vst [vmem:[#allocation62_spill] sm:$0xff] %v8745_v52  ;;  %6510 = vtanh.f32 %v1580_v42  ;;  %v2046_v42 = vunpack.c.h.bf16 %v13708_v43 }
 0x250   :  { %v1457_v39 = vadd.f32 %v1456_v4, %v1392_v5  ;;  %v1329_v51 = vpop.f32.mrf.mxu0  ;;  %v1394_v19 = vpop.f32.mrf.mxu1  ;;  %6512 = vtanh.f32 %v1581_v33  ;;  %v7073_v4 = vld [vmem:[#allocation2 + $0xc0] sm:$0xff]  ;;  %v7074_v33 = vld [vmem:[#allocation2 + $0xc8] sm:$0xff] }
 0x251   :  { %v1330_v36 = vadd.f32 %v1329_v51, %v8655_v47  ;;  %v1521_v48 = vpop.f32.mrf.mxu3  ;;  %v8747_v5 = vpop.eup %6506  ;;  %6514 = vtanh.f32 %v1582_v20  ;;  %v1584_v57 = vadd.f32 %v7073_v4, %v13709_v23  ;;  %v13710_v51 = vld [vmem:[#allocation21_spill] sm:$0xff]  ;;  %v1918_v20 = vunpack.c.h.bf16 %v8445_v40  ;;  %2545 = vmatpush.msrb.mxu3 %v2046_v42  ;;  %v13715_v23 = vld [vmem:[#allocation71_spill] sm:$0xff] }
 0x252   :  { %v1522_v53 = vadd.f32 %v1521_v48, %v1457_v39  ;;  %13706 = vst [vmem:[#allocation63_spill] sm:$0xff] %v8747_v5  ;;  %v1978_v42 = vunpack.c.h.bf16 %v8455_v60  ;;  %v1850_v4 = vunpack.c.h.bf16 %v8457_v21  ;;  %v7079_v60 = vld [vmem:[#allocation2 + $0xf0] sm:$0xff] }
 0x253   :  { %2112 = vmatmul.f32.gmra.mxu0 %v8741_v31  ;;  %2177 = vmatmul.f32.gmra.mxu1 %v8745_v52  ;;  %v1395_v3 = vadd.f32 %v1394_v19, %v1330_v36  ;;  %v1585_v19 = vadd.f32 %v7074_v33, %v13710_v51  ;;  %v13716_v33 = vld [vmem:[#allocation50_spill] sm:$0xff]  ;;  %v1590_v21 = vadd.f32 %v7079_v60, %v8506_v44  ;;  %v7080_v44 = vld [vmem:[#allocation2 + $0xb8] sm:$0xff] }
 0x254   :  { %v8751_v10 = vpop.eup %6508  ;;  %v1575_v30 = vadd.f32 %v7072_v17, %v1522_v53  ;;  %2242 = vmatmul.f32.gmra.mxu2 %v8747_v5  ;;  %2415 = vmatpush.msrb.mxu1 %v1918_v20 }
 0x255   :  { %13707 = vst [vmem:[#allocation64_spill] sm:$0xff] %v8751_v10  ;;  %2301 = vmatmul.f32.gmra.mxu3 %v8751_v10  ;;  %v8761_v48 = vpop.eup %6510  ;;  %2481 = vmatpush.msrb.mxu2 %v1978_v42 }
 0x256   :  { %6516 = vtanh.f32 %v1575_v30  ;;  %13711 = vst [vmem:[#allocation65_spill] sm:$0xff] %v8761_v48  ;;  %v8765_v30 = vpop.eup %6512  ;;  %2351 = vmatpush.msrb.mxu0 %v1850_v4 }
 0x257   :  { %v1459_v39 = vpop.f32.mrf.mxu2  ;;  %13712 = vst [vmem:[#allocation44_spill] sm:$0xff] %v8765_v30  ;;  %6518 = vtanh.f32 %v1584_v57  ;;  %v2042_v57 = vunpack.c.h.bf16 %v13715_v23 }
 0x258   :  { %v1460_v41 = vadd.f32 %v1459_v39, %v1395_v3  ;;  %v1332_v13 = vpop.f32.mrf.mxu0  ;;  %v1397_v36 = vpop.f32.mrf.mxu1  ;;  %6520 = vtanh.f32 %v1585_v19  ;;  %v7077_v39 = vld [vmem:[#allocation2 + $0xe0] sm:$0xff]  ;;  %v7078_v19 = vld [vmem:[#allocation2 + $0xe8] sm:$0xff] }
 0x259   :  { %v1333_v53 = vadd.f32 %v1332_v13, %v8655_v47  ;;  %v1524_v17 = vpop.f32.mrf.mxu3  ;;  %v8767_v3 = vpop.eup %6514  ;;  %6522 = vtanh.f32 %v1586_v32  ;;  %v1588_v51 = vadd.f32 %v7077_v39, %v13716_v33  ;;  %v13717_v13 = vld [vmem:[#allocation22_spill] sm:$0xff]  ;;  %v1914_v32 = vunpack.c.h.bf16 %v8464_v6  ;;  %2546 = vmatpush.msrb.mxu3 %v2042_v57 }
 0x25a   :  { %v1525_v43 = vadd.f32 %v1524_v17, %v1460_v41  ;;  %13713 = vst [vmem:[#allocation20_spill] sm:$0xff] %v8767_v3  ;;  %v1277_v57 = vadd.f32 %v8526_v27, %v8521_v49  ;;  %v1974_v39 = vunpack.c.h.bf16 %v8474_v62  ;;  %v1846_v33 = vunpack.c.h.bf16 %v8476_v58  ;;  %v7083_v62 = vld [vmem:[#allocation2 + $0x110] sm:$0xff] }
 0x25b   :  { %2115 = vmatmul.f32.gmra.mxu0 %v8761_v48  ;;  %2180 = vmatmul.f32.gmra.mxu1 %v8765_v30  ;;  %v1398_v12 = vadd.f32 %v1397_v36, %v1333_v53  ;;  %v1589_v36 = vadd.f32 %v7078_v19, %v13717_v13  ;;  %v7081_v19 = vld [vmem:[#allocation2 + $0x100] sm:$0xff]  ;;  %v13723_v13 = vld [vmem:[#allocation51_spill] sm:$0xff]  ;;  %v1910_v49 = vunpack.c.h.bf16 %v8483_v28 }
 0x25c   :  { %v8771_v40 = vpop.eup %6516  ;;  %v1579_v0 = vadd.f32 %v7076_v61, %v1525_v43  ;;  %2245 = vmatmul.f32.gmra.mxu2 %v8767_v3  ;;  %2416 = vmatpush.msrb.mxu1 %v1914_v32  ;;  %v1594_v58 = vadd.f32 %v7083_v62, %v1277_v57  ;;  %v7084_v57 = vld [vmem:[#allocation2 + $0xd8] sm:$0xff] }
 0x25d   :  { %13714 = vst [vmem:[#allocation45_spill] sm:$0xff] %v8771_v40  ;;  %2304 = vmatmul.f32.gmra.mxu3 %v8771_v40  ;;  %v8781_v17 = vpop.eup %6518  ;;  %2482 = vmatpush.msrb.mxu2 %v1974_v39 }
 0x25e   :  { %6524 = vtanh.f32 %v1579_v0  ;;  %13718 = vst [vmem:[#allocation14_spill] sm:$0xff] %v8781_v17  ;;  %v8785_v0 = vpop.eup %6520  ;;  %2352 = vmatpush.msrb.mxu0 %v1846_v33  ;;  %2417 = vmatpush.msrb.mxu1 %v1910_v49  ;;  %v1280_v33 = vadd.f32 %v8547_v7, %v8542_v8  ;;  %v1906_v8 = vunpack.c.h.bf16 %v8502_v11 }
 0x25f   :  { %v1462_v41 = vpop.f32.mrf.mxu2  ;;  %13719 = vst [vmem:[#allocation67_spill] sm:$0xff] %v8785_v0  ;;  %6526 = vtanh.f32 %v1588_v51  ;;  %v13722_v51 = vld [vmem:[#allocation72_spill] sm:$0xff] }
 0x260   :  { %v1463_v20 = vadd.f32 %v1462_v41, %v1398_v12  ;;  %v1335_v35 = vpop.f32.mrf.mxu0  ;;  %v1400_v53 = vpop.f32.mrf.mxu1  ;;  %6528 = vtanh.f32 %v1589_v36  ;;  %v2038_v41 = vunpack.c.h.bf16 %v13722_v51  ;;  %v1592_v36 = vadd.f32 %v7081_v19, %v13723_v13  ;;  %v13729_v13 = vld [vmem:[#allocation73_spill] sm:$0xff]  ;;  %2418 = vmatpush.msrb.mxu1 %v1906_v8 }
 0x261   :  { %v1336_v43 = vadd.f32 %v1335_v35, %v8655_v47  ;;  %v1527_v61 = vpop.f32.mrf.mxu3  ;;  %v8787_v12 = vpop.eup %6522  ;;  %6530 = vtanh.f32 %v1590_v21  ;;  %v7082_v35 = vld [vmem:[#allocation2 + $0x108] sm:$0xff]  ;;  %v1842_v19 = vunpack.c.h.bf16 %v8495_v59 }
 0x262   :  { %v1528_v23 = vadd.f32 %v1527_v61, %v1463_v20  ;;  %13720 = vst [vmem:[#allocation46_spill] sm:$0xff] %v8787_v12  ;;  %2547 = vmatpush.msrb.mxu3 %v2038_v41  ;;  %v1970_v41 = vunpack.c.h.bf16 %v8493_v16  ;;  %v7087_v16 = vld [vmem:[#allocation2 + $0x130] sm:$0xff] }
 0x263   :  { %2118 = vmatmul.f32.gmra.mxu0 %v8781_v17  ;;  %2183 = vmatmul.f32.gmra.mxu1 %v8785_v0  ;;  %v1401_v42 = vadd.f32 %v1400_v53, %v1336_v43  ;;  %v13724_v53 = vld [vmem:[#allocation26_spill] sm:$0xff]  ;;  %v1598_v59 = vadd.f32 %v7087_v16, %v1280_v33  ;;  %v7088_v33 = vld [vmem:[#allocation2 + $0xf8] sm:$0xff] }
 0x264   :  { %v8791_v6 = vpop.eup %6524  ;;  %v1583_v4 = vadd.f32 %v7080_v44, %v1528_v23  ;;  %2248 = vmatmul.f32.gmra.mxu2 %v8787_v12  ;;  %v1593_v32 = vadd.f32 %v7082_v35, %v13724_v53  ;;  %v13730_v35 = vld [vmem:[#allocation52_spill] sm:$0xff]  ;;  %2353 = vmatpush.msrb.mxu0 %v1842_v19  ;;  %v1283_v19 = vadd.f32 %v8568_v50, %v8563_v25 }
 0x265   :  { %13721 = vst [vmem:[#allocation17_spill] sm:$0xff] %v8791_v6  ;;  %2307 = vmatmul.f32.gmra.mxu3 %v8791_v6  ;;  %v8803_v27 = vpop.eup %6526  ;;  %2483 = vmatpush.msrb.mxu2 %v1970_v41  ;;  %v13740_v25 = vld [vmem:[#allocation76_spill] sm:$0xff] }
 0x266   :  { %6532 = vtanh.f32 %v1583_v4  ;;  %13725 = vst [vmem:[#allocation68_spill] sm:$0xff] %v8803_v27  ;;  %v8806_v44 = vpop.eup %6528  ;;  %v1902_v50 = vunpack.c.h.bf16 %v13740_v25  ;;  %v7093_v25 = vld [vmem:[#allocation2 + $0x160] sm:$0xff] }
 0x267   :  { %v1465_v20 = vpop.f32.mrf.mxu2  ;;  %13726 = vst [vmem:[#allocation47_spill] sm:$0xff] %v8806_v44  ;;  %v8808_v51 = vpop.eup %6530  ;;  %6534 = vtanh.f32 %v1592_v36  ;;  %v2034_v36 = vunpack.c.h.bf16 %v13729_v13  ;;  %v1966_v13 = vunpack.c.h.bf16 %v8512_v37  ;;  %v7091_v37 = vld [vmem:[#allocation2 + $0x150] sm:$0xff] }
 0x268   :  { %v1466_v60 = vadd.f32 %v1465_v20, %v1401_v42  ;;  %v1338_v21 = vpop.f32.mrf.mxu0  ;;  %v1403_v43 = vpop.f32.mrf.mxu1  ;;  %13727 = vst [vmem:[#allocation18_spill] sm:$0xff] %v8808_v51  ;;  %6536 = vtanh.f32 %v1593_v32  ;;  %v7085_v20 = vld [vmem:[#allocation2 + $0x120] sm:$0xff]  ;;  %2419 = vmatpush.msrb.mxu1 %v1902_v50 }
 0x269   :  { %v1339_v61 = vadd.f32 %v1338_v21, %v8655_v47  ;;  %v1530_v23 = vpop.f32.mrf.mxu3  ;;  %6538 = vtanh.f32 %v1594_v58  ;;  %v1596_v53 = vadd.f32 %v7085_v20, %v13730_v35  ;;  %v13731_v21 = vld [vmem:[#allocation24_spill] sm:$0xff]  ;;  %2548 = vmatpush.msrb.mxu3 %v2034_v36  ;;  %v13736_v36 = vld [vmem:[#allocation74_spill] sm:$0xff]  ;;  %v13737_v35 = vld [vmem:[#allocation75_spill] sm:$0xff]  ;;  %2484 = vmatpush.msrb.mxu2 %v1966_v13 }
 0x26a   :  { %v1531_v4 = vadd.f32 %v1530_v23, %v1466_v60  ;;  %v7086_v60 = vld [vmem:[#allocation2 + $0x128] sm:$0xff]  ;;  %v1838_v20 = vunpack.c.h.bf16 %v13736_v36 }
 0x26b   :  { %2121 = vmatmul.f32.gmra.mxu0 %v8803_v27  ;;  %2186 = vmatmul.f32.gmra.mxu1 %v8806_v44  ;;  %v1404_v42 = vadd.f32 %v1403_v43, %v1339_v61  ;;  %v1597_v43 = vadd.f32 %v7086_v60, %v13731_v21  ;;  %v13738_v60 = vld [vmem:[#allocation53_spill] sm:$0xff] }
 0x26c   :  { %v8812_v28 = vpop.eup %6532  ;;  %v1587_v39 = vadd.f32 %v7084_v57, %v1531_v4  ;;  %2251 = vmatmul.f32.gmra.mxu2 %v8808_v51  ;;  %2354 = vmatpush.msrb.mxu0 %v1838_v20 }
 0x26d   :  { %13728 = vst [vmem:[#allocation69_spill] sm:$0xff] %v8812_v28  ;;  %2310 = vmatmul.f32.gmra.mxu3 %v8812_v28  ;;  %v8824_v7 = vpop.eup %6534 }
 0x26e   :  { %6540 = vtanh.f32 %v1587_v39  ;;  %13732 = vst [vmem:[#allocation48_spill] sm:$0xff] %v8824_v7  ;;  %v8827_v4 = vpop.eup %6536 }
 0x26f   :  { %v1468_v32 = vpop.f32.mrf.mxu2  ;;  %13733 = vst [vmem:[#allocation23_spill] sm:$0xff] %v8827_v4  ;;  %v8829_v39 = vpop.eup %6538  ;;  %6542 = vtanh.f32 %v1596_v53  ;;  %v2030_v53 = vunpack.c.h.bf16 %v13737_v35 }
 0x270   :  { %v1469_v49 = vadd.f32 %v1468_v32, %v1404_v42  ;;  %v1341_v62 = vpop.f32.mrf.mxu0  ;;  %v1406_v58 = vpop.f32.mrf.mxu1  ;;  %13734 = vst [vmem:[#allocation70_spill] sm:$0xff] %v8829_v39  ;;  %6544 = vtanh.f32 %v1597_v43  ;;  %v7089_v32 = vld [vmem:[#allocation2 + $0x140] sm:$0xff] }
 0x271   :  { %v1342_v61 = vadd.f32 %v1341_v62, %v8655_v47  ;;  %v1533_v23 = vpop.f32.mrf.mxu3  ;;  %6546 = vtanh.f32 %v1598_v59  ;;  %v1600_v21 = vadd.f32 %v7089_v32, %v13738_v60  ;;  %v13739_v62 = vld [vmem:[#allocation25_spill] sm:$0xff]  ;;  %2549 = vmatpush.msrb.mxu3 %v2030_v53  ;;  %v13745_v53 = vld [vmem:[#allocation91_spill] sm:$0xff] }
 0x272   :  { %v1534_v57 = vadd.f32 %v1533_v23, %v1469_v49  ;;  %v7090_v49 = vld [vmem:[#allocation2 + $0x148] sm:$0xff]  ;;  %v1602_v23 = vadd.f32 %v7091_v37, %v1283_v19  ;;  %v7092_v19 = vld [vmem:[#allocation2 + $0x118] sm:$0xff] }
 0x273   :  { %2124 = vmatmul.f32.gmra.mxu0 %v8824_v7  ;;  %2189 = vmatmul.f32.gmra.mxu1 %v8827_v4  ;;  %v1407_v42 = vadd.f32 %v1406_v58, %v1342_v61  ;;  %v1601_v58 = vadd.f32 %v7090_v49, %v13739_v62  ;;  %v13746_v32 = vld [vmem:[#allocation95_spill] sm:$0xff]  ;;  %v13748_v49 = vld [vmem:[#allocation78_spill] sm:$0xff] }
 0x274   :  { %v8833_v11 = vpop.eup %6540  ;;  %v1591_v41 = vadd.f32 %v7088_v33, %v1534_v57  ;;  %2254 = vmatmul.f32.gmra.mxu2 %v8829_v39  ;;  %v1286_v60 = vadd.f32 %v13746_v32, %v13745_v53  ;;  %v1834_v62 = vunpack.c.h.bf16 %v13748_v49  ;;  %v7094_v37 = vld [vmem:[#allocation2 + $0x168] sm:$0xff]  ;;  %v13752_v53 = vld [vmem:[#allocation80_spill] sm:$0xff] }
 0x275   :  { %13735 = vst [vmem:[#allocation49_spill] sm:$0xff] %v8833_v11  ;;  %2313 = vmatmul.f32.gmra.mxu3 %v8833_v11  ;;  %v8845_v61 = vpop.eup %6542 }
 0x276   :  { %6548 = vtanh.f32 %v1591_v41  ;;  %13741 = vst [vmem:[#allocation21_spill] sm:$0xff] %v8845_v61  ;;  %v8848_v41 = vpop.eup %6544  ;;  %2355 = vmatpush.msrb.mxu0 %v1834_v62 }
 0x277   :  { %v1471_v43 = vpop.f32.mrf.mxu2  ;;  %13742 = vst [vmem:[#allocation71_spill] sm:$0xff] %v8848_v41  ;;  %v8850_v35 = vpop.eup %6546  ;;  %6550 = vtanh.f32 %v1600_v21  ;;  %v13747_v21 = vld [vmem:[#allocation77_spill] sm:$0xff] }
 0x278   :  { %v1472_v8 = vadd.f32 %v1471_v43, %v1407_v42  ;;  %v1344_v16 = vpop.f32.mrf.mxu0  ;;  %v1409_v59 = vpop.f32.mrf.mxu1  ;;  %13743 = vst [vmem:[#allocation50_spill] sm:$0xff] %v8850_v35  ;;  %6552 = vtanh.f32 %v1601_v58  ;;  %v1962_v43 = vunpack.c.h.bf16 %v13747_v21  ;;  %v13750_v58 = vld [vmem:[#allocation57_spill] sm:$0xff]  ;;  %v7095_v21 = vld [vmem:[#allocation2 + $0x170] sm:$0xff] }
 0x279   :  { %v1345_v57 = vadd.f32 %v1344_v16, %v8655_v47  ;;  %v1536_v33 = vpop.f32.mrf.mxu3  ;;  %6554 = vtanh.f32 %v1602_v23  ;;  %v1606_v49 = vadd.f32 %v7095_v21, %v1286_v60  ;;  %v13758_v60 = vld [vmem:[#allocation31_spill] sm:$0xff] }
 0x27a   :  { %v1537_v36 = vadd.f32 %v1536_v33, %v1472_v8  ;;  %v13749_v8 = vld [vmem:[#allocation79_spill] sm:$0xff]  ;;  %2485 = vmatpush.msrb.mxu2 %v1962_v43  ;;  %v13757_v43 = vld [vmem:[#allocation30_spill] sm:$0xff] }
 0x27b   :  { %2127 = vmatmul.f32.gmra.mxu0 %v8845_v61  ;;  %2192 = vmatmul.f32.gmra.mxu1 %v8848_v41  ;;  %v1410_v13 = vadd.f32 %v1409_v59, %v1345_v57  ;;  %v2026_v16 = vunpack.c.h.bf16 %v13749_v8  ;;  %v1604_v59 = vadd.f32 %v7093_v25, %v13750_v58  ;;  %v13751_v57 = vld [vmem:[#allocation28_spill] sm:$0xff]  ;;  %v1289_v62 = vadd.f32 %v13758_v60, %v13757_v43  ;;  %v13782_v41 = vld [vmem:[#allocation93_spill] sm:$0xff] }
 0x27c   :  { %v8854_v42 = vpop.eup %6548  ;;  %v1595_v20 = vadd.f32 %v7092_v19, %v1537_v36  ;;  %2257 = vmatmul.f32.gmra.mxu2 %v8850_v35  ;;  %v1605_v33 = vadd.f32 %v7094_v37, %v13751_v57  ;;  %v7096_v57 = vld [vmem:[#allocation2 + $0x138] sm:$0xff]  ;;  %v13763_v43 = vld [vmem:[#allocation32_spill] sm:$0xff]  ;;  %v1882_v61 = vunpack.c.h.bf16 %v13782_v41  ;;  %v1295_v41 = vadd.f32 %v8648_v29, %v8643_v63 }
 0x27d   :  { %13744 = vst [vmem:[#allocation22_spill] sm:$0xff] %v8854_v42  ;;  %2316 = vmatmul.f32.gmra.mxu3 %v8854_v42  ;;  %v8866_v32 = vpop.eup %6550  ;;  %v7107_v63 = vld [vmem:[#allocation2 + $0x1d0] sm:$0xff] }
 0x27e   :  { %6556 = vtanh.f32 %v1595_v20  ;;  %v1898_v20 = vunpack.c.h.bf16 %v13752_v53  ;;  %13753 = vst [vmem:[#allocation72_spill] sm:$0xff] %v8866_v32  ;;  %2550 = vmatpush.msrb.mxu3 %v2026_v16  ;;  %v8869_v25 = vpop.eup %6552  ;;  %v1618_v29 = vadd.f32 %v7107_v63, %v1295_v41  ;;  %v1298_v41 = vadd.f32 %v8668_v26, %v8662_v22 }
 0x27f   :  { %v1474_v50 = vpop.f32.mrf.mxu2  ;;  %13754 = vst [vmem:[#allocation51_spill] sm:$0xff] %v8869_v25  ;;  %v8871_v37 = vpop.eup %6554  ;;  %6558 = vtanh.f32 %v1604_v59  ;;  %v13760_v59 = vld [vmem:[#allocation81_spill] sm:$0xff] }
 0x280   :  { %v1475_v23 = vadd.f32 %v1474_v50, %v1410_v13  ;;  %v1347_v36 = vpop.f32.mrf.mxu0  ;;  %v1412_v19 = vpop.f32.mrf.mxu1  ;;  %2420 = vmatpush.msrb.mxu1 %v1898_v20  ;;  %13755 = vst [vmem:[#allocation26_spill] sm:$0xff] %v8871_v37  ;;  %6560 = vtanh.f32 %v1605_v33  ;;  %v1958_v53 = vunpack.c.h.bf16 %v13760_v59  ;;  %v13761_v20 = vld [vmem:[#allocation82_spill] sm:$0xff]  ;;  %v13762_v33 = vld [vmem:[#allocation83_spill] sm:$0xff] }
 0x281   :  { %v1348_v8 = vadd.f32 %v1347_v36, %v8655_v47  ;;  %v1539_v42 = vpop.f32.mrf.mxu3  ;;  %6562 = vtanh.f32 %v1606_v49  ;;  %v1830_v21 = vunpack.c.h.bf16 %v13761_v20  ;;  %v13764_v49 = vld [vmem:[#allocation84_spill] sm:$0xff] }
 0x282   :  { %v1540_v58 = vadd.f32 %v1539_v42, %v1475_v23  ;;  %v7097_v42 = vld [vmem:[#allocation2 + $0x180] sm:$0xff]  ;;  %v13759_v23 = vld [vmem:[#allocation16_spill] sm:$0xff]  ;;  %2486 = vmatpush.msrb.mxu2 %v1958_v53  ;;  %v7100_v53 = vld [vmem:[#allocation2 + $0x158] sm:$0xff] }
 0x283   :  { %2130 = vmatmul.f32.gmra.mxu0 %v8866_v32  ;;  %2195 = vmatmul.f32.gmra.mxu1 %v8869_v25  ;;  %v1413_v50 = vadd.f32 %v1412_v19, %v1348_v8  ;;  %v1608_v36 = vadd.f32 %v7097_v42, %v13759_v23  ;;  %v2022_v25 = vunpack.c.h.bf16 %v13762_v33  ;;  %v7098_v32 = vld [vmem:[#allocation2 + $0x188] sm:$0xff]  ;;  %v1894_v42 = vunpack.c.h.bf16 %v13764_v49 }
 0x284   :  { %v8875_v13 = vpop.eup %6556  ;;  %v1599_v16 = vadd.f32 %v7096_v57, %v1540_v58  ;;  %2260 = vmatmul.f32.gmra.mxu2 %v8871_v37  ;;  %v1609_v19 = vadd.f32 %v7098_v32, %v13763_v43  ;;  %v7099_v58 = vld [vmem:[#allocation2 + $0x190] sm:$0xff]  ;;  %2356 = vmatpush.msrb.mxu0 %v1830_v21  ;;  %v13770_v21 = vld [vmem:[#allocation35_spill] sm:$0xff] }
 0x285   :  { %13756 = vst [vmem:[#allocation73_spill] sm:$0xff] %v8875_v13  ;;  %2319 = vmatmul.f32.gmra.mxu3 %v8875_v13  ;;  %v1610_v60 = vadd.f32 %v7099_v58, %v1289_v62  ;;  %2421 = vmatpush.msrb.mxu1 %v1894_v42  ;;  %v13771_v43 = vld [vmem:[#allocation27_spill] sm:$0xff] }
 0x286   :  { %6564 = vtanh.f32 %v1599_v16  ;;  %v8887_v16 = vpop.eup %6558  ;;  %2551 = vmatpush.msrb.mxu3 %v2022_v25  ;;  %v13769_v25 = vld [vmem:[#allocation33_spill] sm:$0xff]  ;;  %v13774_v42 = vld [vmem:[#allocation87_spill] sm:$0xff] }
 0x287   :  { %v1477_v8 = vpop.f32.mrf.mxu2  ;;  %13765 = vst [vmem:[#allocation52_spill] sm:$0xff] %v8887_v16  ;;  %v8890_v20 = vpop.eup %6560  ;;  %6566 = vtanh.f32 %v1608_v36  ;;  %v1292_v36 = vadd.f32 %v13770_v21, %v13769_v25  ;;  %v13777_v25 = vld [vmem:[#allocation89_spill] sm:$0xff] }
 0x288   :  { %v1478_v57 = vadd.f32 %v1477_v8, %v1413_v50  ;;  %v1350_v37 = vpop.f32.mrf.mxu0  ;;  %v1415_v35 = vpop.f32.mrf.mxu1  ;;  %13766 = vst [vmem:[#allocation24_spill] sm:$0xff] %v8890_v20  ;;  %6568 = vtanh.f32 %v1609_v19  ;;  %v1954_v8 = vunpack.c.h.bf16 %v13771_v43  ;;  %v13772_v19 = vld [vmem:[#allocation85_spill] sm:$0xff]  ;;  %v1886_v21 = vunpack.c.h.bf16 %v13777_v25 }
 0x289   :  { %v1351_v23 = vadd.f32 %v1350_v37, %v8655_v47  ;;  %v1542_v59 = vpop.f32.mrf.mxu3  ;;  %v8892_v33 = vpop.eup %6562  ;;  %6570 = vtanh.f32 %v1610_v60  ;;  %v1826_v58 = vunpack.c.h.bf16 %v13772_v19  ;;  %v7101_v60 = vld [vmem:[#allocation2 + $0x1a0] sm:$0xff]  ;;  %v7102_v19 = vld [vmem:[#allocation2 + $0x1a8] sm:$0xff] }
 0x28a   :  { %v1543_v32 = vadd.f32 %v1542_v59, %v1478_v57  ;;  %13767 = vst [vmem:[#allocation74_spill] sm:$0xff] %v8892_v33  ;;  %v13773_v57 = vld [vmem:[#allocation86_spill] sm:$0xff]  ;;  %v2018_v59 = vunpack.c.h.bf16 %v13774_v42  ;;  %2487 = vmatpush.msrb.mxu2 %v1954_v8  ;;  %v7103_v8 = vld [vmem:[#allocation2 + $0x1b0] sm:$0xff] }
 0x28b   :  { %2133 = vmatmul.f32.gmra.mxu0 %v8887_v16  ;;  %2198 = vmatmul.f32.gmra.mxu1 %v8890_v20  ;;  %v1416_v50 = vadd.f32 %v1415_v35, %v1351_v23  ;;  %v1890_v49 = vunpack.c.h.bf16 %v13773_v57  ;;  %v13775_v35 = vld [vmem:[#allocation12_spill] sm:$0xff]  ;;  %v13779_v16 = vld [vmem:[#allocation38_spill] sm:$0xff] }
 0x28c   :  { %v8896_v62 = vpop.eup %6564  ;;  %v1603_v37 = vadd.f32 %v7100_v53, %v1543_v32  ;;  %2263 = vmatmul.f32.gmra.mxu2 %v8892_v33  ;;  %v1612_v23 = vadd.f32 %v7101_v60, %v13775_v35  ;;  %2357 = vmatpush.msrb.mxu0 %v1826_v58  ;;  %v13776_v53 = vld [vmem:[#allocation88_spill] sm:$0xff]  ;;  %v1613_v57 = vadd.f32 %v7102_v19, %v13779_v16 }
 0x28d   :  { %13768 = vst [vmem:[#allocation75_spill] sm:$0xff] %v8896_v62  ;;  %2322 = vmatmul.f32.gmra.mxu3 %v8896_v62  ;;  %v1822_v33 = vunpack.c.h.bf16 %v13776_v53  ;;  %v13778_v62 = vld [vmem:[#allocation90_spill] sm:$0xff]  ;;  %v8910_v43 = vpop.eup %6566  ;;  %2422 = vmatpush.msrb.mxu1 %v1890_v49  ;;  %v1614_v58 = vadd.f32 %v7103_v8, %v1292_v36  ;;  %v13785_v49 = vld [vmem:[#allocation29_spill] sm:$0xff] }
 0x28e   :  { %6572 = vtanh.f32 %v1603_v37  ;;  %v1950_v20 = vunpack.c.h.bf16 %v13778_v62  ;;  %2552 = vmatpush.msrb.mxu3 %v2018_v59  ;;  %v8913_v60 = vpop.eup %6568  ;;  %v13781_v62 = vld [vmem:[#allocation92_spill] sm:$0xff] }
 0x28f   :  { %v1480_v32 = vpop.f32.mrf.mxu2  ;;  %13780 = vst [vmem:[#allocation53_spill] sm:$0xff] %v8913_v60  ;;  %2358 = vmatpush.msrb.mxu0 %v1822_v33  ;;  %v1818_v25 = vunpack.c.h.bf16 %v13781_v62  ;;  %v8918_v11 = vpop.eup %6570  ;;  %2423 = vmatpush.msrb.mxu1 %v1886_v21  ;;  %6574 = vtanh.f32 %v1612_v23  ;;  %v2014_v23 = vunpack.c.h.bf16 %v13785_v49  ;;  %v13786_v21 = vld [vmem:[#allocation15_spill] sm:$0xff] }
 0x290   :  { %v1481_v37 = vadd.f32 %v1480_v32, %v1416_v50  ;;  %v1353_v13 = vpop.f32.mrf.mxu0  ;;  %v1418_v42 = vpop.f32.mrf.mxu1  ;;  %2488 = vmatpush.msrb.mxu2 %v1950_v20  ;;  %v13783_v50 = vld [vmem:[#allocation94_spill] sm:$0xff]  ;;  %6576 = vtanh.f32 %v1613_v57  ;;  %v7104_v20 = vld [vmem:[#allocation2 + $0x178] sm:$0xff] }
 0x291   :  { %v1354_v35 = vadd.f32 %v1353_v13, %v8655_v47  ;;  %v1545_v53 = vpop.f32.mrf.mxu3  ;;  %v1946_v59 = vunpack.c.h.bf16 %v13783_v50  ;;  %2359 = vmatpush.msrb.mxu0 %v1818_v25  ;;  %6578 = vtanh.f32 %v1614_v58  ;;  %2424 = vmatpush.msrb.mxu1 %v1882_v61  ;;  %v7105_v32 = vld [vmem:[#allocation2 + $0x1c0] sm:$0xff] }
 0x292   :  { %v1546_v16 = vadd.f32 %v1545_v53, %v1481_v37  ;;  %v1616_v19 = vadd.f32 %v7105_v32, %v13786_v21  ;;  %v7106_v37 = vld [vmem:[#allocation2 + $0x1c8] sm:$0xff]  ;;  %2553 = vmatpush.msrb.mxu3 %v2014_v23  ;;  %v13789_v23 = vld [vmem:[#allocation34_spill] sm:$0xff] }
 0x293   :  { %2136 = vmatmul.f32.gmra.mxu0 %v8910_v43  ;;  %2201 = vmatmul.f32.gmra.mxu1 %v8913_v60  ;;  %v1419_v13 = vadd.f32 %v1418_v42, %v1354_v35  ;;  %v13787_v42 = vld [vmem:[#allocation59_spill] sm:$0xff]  ;;  %v2010_v32 = vunpack.c.h.bf16 %v13789_v23  ;;  %v7109_v21 = vld [vmem:[#allocation2 + $0x1e0] sm:$0xff] }
 0x294   :  { %v8923_v36 = vpop.eup %6572  ;;  %v1607_v33 = vadd.f32 %v7104_v20, %v1546_v16  ;;  %2266 = vmatmul.f32.gmra.mxu2 %v8918_v11  ;;  %v1617_v8 = vadd.f32 %v7106_v37, %v13787_v42  ;;  %v7110_v42 = vld [vmem:[#allocation2 + $0x1e8] sm:$0xff] }
 0x295   :  { %13784 = vst [vmem:[#allocation25_spill] sm:$0xff] %v8923_v36  ;;  %2325 = vmatmul.f32.gmra.mxu3 %v8923_v36  ;;  %2489 = vmatpush.msrb.mxu2 %v1946_v59  ;;  %v8932_v62 = vpop.eup %6574 }
 0x296   :  { %6580 = vtanh.f32 %v1607_v33  ;;  %v8935_v16 = vpop.eup %6576  ;;  %v7108_v33 = vld [vmem:[#allocation2 + $0x198] sm:$0xff]  ;;  %2554 = vmatpush.msrb.mxu3 %v2010_v32 }
 0x297   :  { %v1483_v57 = vpop.f32.mrf.mxu2  ;;  %v8937_v59 = vpop.eup %6578  ;;  %6582 = vtanh.f32 %v1616_v19  ;;  %v13790_v19 = vld [vmem:[#allocation13_spill] sm:$0xff] }
 0x298   :  { %v1484_v35 = vadd.f32 %v1483_v57, %v1419_v13  ;;  %v1356_v53 = vpop.f32.mrf.mxu0  ;;  %v1421_v58 = vpop.f32.mrf.mxu1  ;;  %6584 = vtanh.f32 %v1617_v8  ;;  %v1620_v57 = vadd.f32 %v7109_v21, %v13790_v19  ;;  %v13791_v8 = vld [vmem:[#allocation66_spill] sm:$0xff] }
 0x299   :  { %v1357_v61 = vadd.f32 %v1356_v53, %v8655_v47  ;;  %v1548_v25 = vpop.f32.mrf.mxu3  ;;  %6586 = vtanh.f32 %v1618_v29 }
 0x29a   :  { %v1549_v50 = vadd.f32 %v1548_v25, %v1484_v35  ;;  %v1621_v35 = vadd.f32 %v7110_v42, %v13791_v8 }
 0x29b   :  { %2139 = vmatmul.f32.gmra.mxu0 %v8932_v62  ;;  %2204 = vmatmul.f32.gmra.mxu1 %v8935_v16  ;;  %v1422_v20 = vadd.f32 %v1421_v58, %v1357_v61  ;;  %v7111_v61 = vld [vmem:[#allocation2 + $0x1f0] sm:$0xff] }
 0x29c   :  { %v8941_v13 = vpop.eup %6580  ;;  %v1611_v49 = vadd.f32 %v7108_v33, %v1549_v50  ;;  %2269 = vmatmul.f32.gmra.mxu2 %v8937_v59  ;;  %v1622_v22 = vadd.f32 %v7111_v61, %v1298_v41  ;;  %v7112_v41 = vld [vmem:[#allocation2 + $0x1b8] sm:$0xff] }
 0x29d   :  { %13788 = vst [vmem:[#allocation76_spill] sm:$0xff] %v8941_v13  ;;  %2328 = vmatmul.f32.gmra.mxu3 %v8941_v13  ;;  %v8950_v29 = vpop.eup %6582  ;;  %v8972_v61 = vld [vmem:[#allocation5 + $0x5f8] sm:$0xff] }
 0x29e   :  { %6588 = vtanh.f32 %v1611_v49  ;;  %13792 = vst [vmem:[#allocation91_spill] sm:$0xff] %v8950_v29  ;;  %v8953_v50 = vpop.eup %6584 }
 0x29f   :  { %v1486_v37 = vpop.f32.mrf.mxu2  ;;  %13793 = vst [vmem:[#allocation95_spill] sm:$0xff] %v8953_v50  ;;  %v8955_v49 = vpop.eup %6586  ;;  %6590 = vtanh.f32 %v1620_v57  ;;  %v8966_v57 = vld [vmem:[#allocation5 + $0x4f8] sm:$0xff] }
 0x2a0   :  { %v1487_v53 = vadd.f32 %v1486_v37, %v1422_v20  ;;  %v1359_v58 = vpop.f32.mrf.mxu0  ;;  %v1424_v63 = vpop.f32.mrf.mxu1  ;;  %13794 = vst [vmem:[#allocation77_spill] sm:$0xff] %v8955_v49  ;;  %v8959_v20 = vld [vmem:[#allocation5 + $0x6f8] sm:$0xff]  ;;  %6592 = vtanh.f32 %v1621_v35  ;;  %v1879_v42 = vunpack.c.l.bf16 %v8966_v57 }
 0x2a1   :  { %v1360_v26 = vadd.f32 %v1359_v58, %v8655_v47  ;;  %v1551_v25 = vpop.f32.mrf.mxu3  ;;  %v2007_v19 = vunpack.c.l.bf16 %v8959_v20  ;;  %6594 = vtanh.f32 %v1622_v22  ;;  %v8968_v37 = vld [vmem:[#allocation5 + $0x7f8] sm:$0xff]  ;;  %13797 = vst [vmem:[#allocation57_spill] sm:$0xff] %v8972_v61 }
 0x2a2   :  { %v1552_v33 = vadd.f32 %v1551_v25, %v1487_v53  ;;  %13796 = vst [vmem:[#allocation79_spill] sm:$0xff] %v8968_v37  ;;  %v2071_v8 = vunpack.c.l.bf16 %v8968_v37  ;;  %2604 = vmatpush.msra.mxu0 %v1879_v42 }
 0x2a3   :  { %2142 = vmatmul.f32.gmra.mxu0 %v8950_v29  ;;  %2207 = vmatmul.f32.gmra.mxu1 %v8953_v50  ;;  %v1425_v32 = vadd.f32 %v1424_v63, %v1360_v26 }
 0x2a4   :  { %v8961_v23 = vpop.eup %6588  ;;  %v1615_v21 = vadd.f32 %v7112_v41, %v1552_v33  ;;  %2272 = vmatmul.f32.gmra.mxu2 %v8955_v49  ;;  %2799 = vmatpush.msra.mxu3 %v2071_v8  ;;  %v1943_v33 = vunpack.c.l.bf16 %v8972_v61  ;;  %v7113_v8 = vld [vmem:[#allocation2 + $0x1d8] sm:$0xff] }
 0x2a5   :  { %13795 = vst [vmem:[#allocation78_spill] sm:$0xff] %v8961_v23  ;;  %2331 = vmatmul.f32.gmra.mxu3 %v8961_v23  ;;  %2734 = vmatpush.msra.mxu2 %v2007_v19  ;;  %v8974_v22 = vpop.eup %6590  ;;  %v8980_v19 = vld [vmem:[#allocation7 + $0x4] sm:$0xf] }
 0x2a6   :  { %6596 = vtanh.f32 %v1615_v21  ;;  %13798 = vst [vmem:[#allocation28_spill] sm:$0xff] %v8974_v22  ;;  %v8978_v41 = vpop.eup %6592  ;;  %2669 = vmatpush.msra.mxu1 %v1943_v33 }
 0x2a7   :  { %v1489_v35 = vpop.f32.mrf.mxu2  ;;  %13799 = vst [vmem:[#allocation80_spill] sm:$0xff] %v8978_v41  ;;  %v8982_v37 = vpop.eup %6594 }
 0x2a8   :  { %v1490_v53 = vadd.f32 %v1489_v35, %v1425_v32  ;;  %v1362_v58 = vpop.f32.mrf.mxu0  ;;  %v1427_v63 = vpop.f32.mrf.mxu1  ;;  %13800 = vst [vmem:[#allocation30_spill] sm:$0xff] %v8980_v19 }
 0x2a9   :  { %v1363_v26 = vadd.f32 %v1362_v58, %v8655_v47  ;;  %v1554_v25 = vpop.f32.mrf.mxu3  ;;  %13801 = vst [vmem:[#allocation31_spill] sm:$0xff] %v8982_v37  ;;  %v8991_v47 = vperm.slane %v8980_v19, 0  ;;  %v8995_v58 = vld [vmem:[#allocation5 + $0x4e8] sm:$0xff] }
 0x2aa   :  { %v1555_v21 = vadd.f32 %v1554_v25, %v1490_v53  ;;  %v8993_v53 = vld [vmem:[#allocation5 + $0x6e8] sm:$0xff] }
 0x2ab   :  { %2145 = vmatmul.f32.gmra.mxu0 %v8974_v22  ;;  %2210 = vmatmul.f32.gmra.mxu1 %v8978_v41  ;;  %v1428_v42 = vadd.f32 %v1427_v63, %v1363_v26  ;;  %v8997_v25 = vld [vmem:[#allocation5 + $0x7e8] sm:$0xff]  ;;  %v2003_v41 = vunpack.c.l.bf16 %v8993_v53  ;;  %v1875_v63 = vunpack.c.l.bf16 %v8995_v58 }
 0x2ac   :  { %v8986_v32 = vpop.eup %6596  ;;  %v1619_v35 = vadd.f32 %v7113_v8, %v1555_v21  ;;  %2275 = vmatmul.f32.gmra.mxu2 %v8982_v37  ;;  %13803 = vst [vmem:[#allocation81_spill] sm:$0xff] %v8997_v25  ;;  %v2067_v26 = vunpack.c.l.bf16 %v8997_v25  ;;  %v9002_v19 = vld [vmem:[#allocation5 + $0x5e8] sm:$0xff] }
 0x2ad   :  { %13802 = vst [vmem:[#allocation16_spill] sm:$0xff] %v8986_v32  ;;  %2334 = vmatmul.f32.gmra.mxu3 %v8986_v32  ;;  %2735 = vmatpush.msra.mxu2 %v2003_v41 }
 0x2ae   :  { %6598 = vtanh.f32 %v1619_v35  ;;  %2605 = vmatpush.msra.mxu0 %v1875_v63  ;;  %2800 = vmatpush.msra.mxu3 %v2067_v26  ;;  %v1939_v35 = vunpack.c.l.bf16 %v9002_v19  ;;  %v9012_v63 = vld [vmem:[#allocation5 + $0x6d8] sm:$0xff] }
 0x2af   :  { %v1492_v21 = vpop.f32.mrf.mxu2  ;;  %v9014_v26 = vld [vmem:[#allocation5 + $0x4d8] sm:$0xff] }
 0x2b0   :  { %v1493_v33 = vadd.f32 %v1492_v21, %v1428_v42  ;;  %v2101_v8 = vpop.f32.mrf.mxu0  ;;  %v2166_v32 = vpop.f32.mrf.mxu1  ;;  %v7114_v42 = vld [vmem:[#allocation2 + $0x1f8] sm:$0xff]  ;;  %2670 = vmatpush.msra.mxu1 %v1939_v35  ;;  %13805 = vst [vmem:[#allocation83_spill] sm:$0xff] %v9014_v26 }
 0x2b1   :  { %v1557_v37 = vpop.f32.mrf.mxu3  ;;  %v2102_v22 = vadd.f32 %v2101_v8, %v8991_v47  ;;  %v9016_v8 = vld [vmem:[#allocation5 + $0x7d8] sm:$0xff] }
 0x2b2   :  { %v1558_v61 = vadd.f32 %v1557_v37, %v1493_v33  ;;  %13806 = vst [vmem:[#allocation32_spill] sm:$0xff] %v9016_v8  ;;  %v1999_v37 = vunpack.c.l.bf16 %v9012_v63  ;;  %v1871_v33 = vunpack.c.l.bf16 %v9014_v26 }
 0x2b3   :  { %2360 = vmatmul.f32.vlgmr.msrb.gmra.mxu0 %v8665_v15  ;;  %2425 = vmatmul.f32.vlgmr.msrb.gmra.mxu1 %v8671_v18  ;;  %v2167_v41 = vadd.f32 %v2166_v32, %v2102_v22  ;;  %v2063_v18 = vunpack.c.l.bf16 %v9016_v8  ;;  %v9021_v22 = vld [vmem:[#allocation5 + $0x5d8] sm:$0xff] }
 0x2b4   :  { %v9008_v25 = vpop.eup %6598  ;;  %v1623_v21 = vadd.f32 %v7114_v42, %v1558_v61  ;;  %2490 = vmatmul.f32.vlgmr.msrb.gmra.mxu2 %v8673_v56  ;;  %2606 = vmatpush.msra.mxu0 %v1871_v33  ;;  %13807 = vst [vmem:[#allocation84_spill] sm:$0xff] %v9021_v22  ;;  %v1935_v32 = vunpack.c.l.bf16 %v9021_v22 }
 0x2b5   :  { %13804 = vst [vmem:[#allocation82_spill] sm:$0xff] %v9008_v25  ;;  %2337 = vmatmul.f32.gmra.mxu3 %v9008_v25  ;;  %2736 = vmatpush.msra.mxu2 %v1999_v37  ;;  %v9033_v37 = vld [vmem:[#allocation5 + $0x4c8] sm:$0xff] }
 0x2b6   :  { %6600 = vtanh.f32 %v1623_v21  ;;  %2801 = vmatpush.msra.mxu3 %v2063_v18  ;;  %2671 = vmatpush.msra.mxu1 %v1935_v32  ;;  %v9035_v18 = vld [vmem:[#allocation5 + $0x7c8] sm:$0xff] }
 0x2b7   :  { %v2231_v61 = vpop.f32.mrf.mxu2  ;;  %v9040_v32 = vld [vmem:[#allocation5 + $0x5c8] sm:$0xff] }
 0x2b8   :  { %v2232_v42 = vadd.f32 %v2231_v61, %v2167_v41  ;;  %v2104_v56 = vpop.f32.mrf.mxu0  ;;  %v2169_v35 = vpop.f32.mrf.mxu1  ;;  %v9031_v41 = vld [vmem:[#allocation5 + $0x6c8] sm:$0xff]  ;;  %v1867_v61 = vunpack.c.l.bf16 %v9033_v37  ;;  %13809 = vst [vmem:[#allocation35_spill] sm:$0xff] %v9040_v32 }
 0x2b9   :  { %v2105_v25 = vadd.f32 %v2104_v56, %v8991_v47  ;;  %v1995_v56 = vunpack.c.l.bf16 %v9031_v41 }
 0x2ba   :  { %2607 = vmatpush.msra.mxu0 %v1867_v61 }
 0x2bb   :  { %2363 = vmatmul.f32.gmra.mxu0 %v8684_v34  ;;  %2428 = vmatmul.f32.gmra.mxu1 %v8688_v2  ;;  %v2170_v33 = vadd.f32 %v2169_v35, %v2105_v25  ;;  %v2059_v2 = vunpack.c.l.bf16 %v9035_v18  ;;  %v9050_v25 = vld [vmem:[#allocation5 + $0x4b8] sm:$0xff] }
 0x2bc   :  { %v9027_v21 = vpop.eup %6600  ;;  %2493 = vmatmul.f32.gmra.mxu2 %v8690_v9  ;;  %v9052_v35 = vld [vmem:[#allocation5 + $0x7b8] sm:$0xff] }
 0x2bd   :  { %13808 = vst [vmem:[#allocation33_spill] sm:$0xff] %v9027_v21  ;;  %2340 = vmatmul.f32.gmra.mxu3 %v9027_v21  ;;  %2737 = vmatpush.msra.mxu2 %v1995_v56  ;;  %v1931_v21 = vunpack.c.l.bf16 %v9040_v32  ;;  %v2055_v56 = vunpack.c.l.bf16 %v9052_v35 }
 0x2be   :  { %2802 = vmatpush.msra.mxu3 %v2059_v2 }
 0x2bf   :  { %v2234_v34 = vpop.f32.mrf.mxu2  ;;  %2672 = vmatpush.msra.mxu1 %v1931_v21  ;;  %v9057_v21 = vld [vmem:[#allocation5 + $0x5b8] sm:$0xff] }
 0x2c0   :  { %v2235_v22 = vadd.f32 %v2234_v34, %v2170_v33  ;;  %v2107_v8 = vpop.f32.mrf.mxu0  ;;  %v2172_v9 = vpop.f32.mrf.mxu1  ;;  %v9048_v34 = vld [vmem:[#allocation5 + $0x6b8] sm:$0xff]  ;;  %2803 = vmatpush.msra.mxu3 %v2055_v56 }
 0x2c1   :  { %v2108_v26 = vadd.f32 %v2107_v8, %v8991_v47  ;;  %v1991_v33 = vunpack.c.l.bf16 %v9048_v34  ;;  %v1863_v8 = vunpack.c.l.bf16 %v9050_v25 }
 0x2c3   :  { %2366 = vmatmul.f32.gmra.mxu0 %v8701_v1  ;;  %2431 = vmatmul.f32.gmra.mxu1 %v8705_v45  ;;  %v2173_v2 = vadd.f32 %v2172_v9, %v2108_v26  ;;  %v1927_v9 = vunpack.c.l.bf16 %v9057_v21 }
 0x2c4   :  { %2496 = vmatmul.f32.gmra.mxu2 %v8707_v38  ;;  %2608 = vmatpush.msra.mxu0 %v1863_v8 }
 0x2c5   :  { %2555 = vmatmul.f32.vlgmr.msrb.gmra.mxu3 %v8711_v46  ;;  %2738 = vmatpush.msra.mxu2 %v1991_v33  ;;  %v9069_v33 = vld [vmem:[#allocation5 + $0x4a8] sm:$0xff] }
 0x2c6   :  { %2673 = vmatpush.msra.mxu1 %v1927_v9  ;;  %v9076_v9 = vld [vmem:[#allocation5 + $0x5a8] sm:$0xff] }
 0x2c7   :  { %v2237_v61 = vpop.f32.mrf.mxu2 }
 0x2c8   :  { %v2238_v45 = vadd.f32 %v2237_v61, %v2173_v2  ;;  %v2296_v1 = vpop.f32.mrf.mxu3  ;;  %v2110_v38 = vpop.f32.mrf.mxu0  ;;  %v9067_v2 = vld [vmem:[#allocation5 + $0x6a8] sm:$0xff] }
 0x2c9   :  { %v9059_v46 = vadd.f32 %v2296_v1, %v2232_v42  ;;  %v2175_v32 = vpop.f32.mrf.mxu1  ;;  %v2111_v26 = vadd.f32 %v2110_v38, %v8991_v47  ;;  %v9071_v1 = vld [vmem:[#allocation5 + $0x7a8] sm:$0xff]  ;;  %v1987_v8 = vunpack.c.l.bf16 %v9067_v2  ;;  %v1859_v38 = vunpack.c.l.bf16 %v9069_v33 }
 0x2ca   :  { %v2051_v56 = vunpack.c.l.bf16 %v9071_v1 }
 0x2cb   :  { %13810 = vst [vmem:[#allocation27_spill] sm:$0xff] %v9059_v46  ;;  %2369 = vmatmul.f32.gmra.mxu0 %v8721_v54  ;;  %2434 = vmatmul.f32.gmra.mxu1 %v8725_v14  ;;  %v2176_v42 = vadd.f32 %v2175_v32, %v2111_v26  ;;  %v1923_v32 = vunpack.c.l.bf16 %v9076_v9 }
 0x2cc   :  { %2499 = vmatmul.f32.gmra.mxu2 %v8727_v55  ;;  %2609 = vmatpush.msra.mxu0 %v1859_v38 }
 0x2cd   :  { %2558 = vmatmul.f32.gmra.mxu3 %v8731_v24  ;;  %2739 = vmatpush.msra.mxu2 %v1987_v8  ;;  %v9088_v8 = vld [vmem:[#allocation5 + $0x498] sm:$0xff] }
 0x2ce   :  { %2804 = vmatpush.msra.mxu3 %v2051_v56  ;;  %2674 = vmatpush.msra.mxu1 %v1923_v32  ;;  %v9095_v32 = vld [vmem:[#allocation5 + $0x598] sm:$0xff] }
 0x2cf   :  { %v2240_v61 = vpop.f32.mrf.mxu2 }
 0x2d0   :  { %v2241_v46 = vadd.f32 %v2240_v61, %v2176_v42  ;;  %v2299_v14 = vpop.f32.mrf.mxu3  ;;  %v2113_v55 = vpop.f32.mrf.mxu0  ;;  %v9086_v42 = vld [vmem:[#allocation5 + $0x698] sm:$0xff] }
 0x2d1   :  { %v9078_v24 = vadd.f32 %v2299_v14, %v2235_v22  ;;  %v2178_v54 = vpop.f32.mrf.mxu1  ;;  %v2114_v26 = vadd.f32 %v2113_v55, %v8991_v47  ;;  %v9090_v14 = vld [vmem:[#allocation5 + $0x798] sm:$0xff]  ;;  %v1983_v38 = vunpack.c.l.bf16 %v9086_v42  ;;  %v1855_v55 = vunpack.c.l.bf16 %v9088_v8 }
 0x2d2   :  { %v2047_v56 = vunpack.c.l.bf16 %v9090_v14 }
 0x2d3   :  { %13811 = vst [vmem:[#allocation85_spill] sm:$0xff] %v9078_v24  ;;  %2372 = vmatmul.f32.gmra.mxu0 %v8741_v31  ;;  %2437 = vmatmul.f32.gmra.mxu1 %v8745_v52  ;;  %v2179_v22 = vadd.f32 %v2178_v54, %v2114_v26  ;;  %v1919_v54 = vunpack.c.l.bf16 %v9095_v32 }
 0x2d4   :  { %2502 = vmatmul.f32.gmra.mxu2 %v8747_v5  ;;  %2610 = vmatpush.msra.mxu0 %v1855_v55 }
 0x2d5   :  { %2561 = vmatmul.f32.gmra.mxu3 %v8751_v10  ;;  %2740 = vmatpush.msra.mxu2 %v1983_v38  ;;  %v9107_v38 = vld [vmem:[#allocation5 + $0x488] sm:$0xff] }
 0x2d6   :  { %2805 = vmatpush.msra.mxu3 %v2047_v56  ;;  %2675 = vmatpush.msra.mxu1 %v1919_v54  ;;  %v9114_v54 = vld [vmem:[#allocation5 + $0x588] sm:$0xff] }
 0x2d7   :  { %v2243_v61 = vpop.f32.mrf.mxu2 }
 0x2d8   :  { %v2244_v24 = vadd.f32 %v2243_v61, %v2179_v22  ;;  %v2302_v52 = vpop.f32.mrf.mxu3  ;;  %v2116_v5 = vpop.f32.mrf.mxu0  ;;  %v9105_v22 = vld [vmem:[#allocation5 + $0x688] sm:$0xff] }
 0x2d9   :  { %v9097_v10 = vadd.f32 %v2302_v52, %v2238_v45  ;;  %v2181_v31 = vpop.f32.mrf.mxu1  ;;  %v2117_v26 = vadd.f32 %v2116_v5, %v8991_v47  ;;  %v9109_v45 = vld [vmem:[#allocation5 + $0x788] sm:$0xff]  ;;  %v1979_v55 = vunpack.c.l.bf16 %v9105_v22  ;;  %v1851_v5 = vunpack.c.l.bf16 %v9107_v38 }
 0x2da   :  { %v2043_v56 = vunpack.c.l.bf16 %v9109_v45 }
 0x2db   :  { %13812 = vst [vmem:[#allocation86_spill] sm:$0xff] %v9097_v10  ;;  %2375 = vmatmul.f32.gmra.mxu0 %v8761_v48  ;;  %2440 = vmatmul.f32.gmra.mxu1 %v8765_v30  ;;  %v2182_v52 = vadd.f32 %v2181_v31, %v2117_v26  ;;  %v1915_v31 = vunpack.c.l.bf16 %v9114_v54 }
 0x2dc   :  { %2505 = vmatmul.f32.gmra.mxu2 %v8767_v3  ;;  %2611 = vmatpush.msra.mxu0 %v1851_v5 }
 0x2dd   :  { %2564 = vmatmul.f32.gmra.mxu3 %v8771_v40  ;;  %2741 = vmatpush.msra.mxu2 %v1979_v55  ;;  %v9126_v55 = vld [vmem:[#allocation5 + $0x478] sm:$0xff] }
 0x2de   :  { %2806 = vmatpush.msra.mxu3 %v2043_v56  ;;  %2676 = vmatpush.msra.mxu1 %v1915_v31  ;;  %v9133_v31 = vld [vmem:[#allocation5 + $0x578] sm:$0xff] }
 0x2df   :  { %v2246_v61 = vpop.f32.mrf.mxu2 }
 0x2e0   :  { %v2247_v10 = vadd.f32 %v2246_v61, %v2182_v52  ;;  %v2305_v30 = vpop.f32.mrf.mxu3  ;;  %v2119_v3 = vpop.f32.mrf.mxu0  ;;  %v9124_v52 = vld [vmem:[#allocation5 + $0x678] sm:$0xff] }
 0x2e1   :  { %v9116_v40 = vadd.f32 %v2305_v30, %v2241_v46  ;;  %v2184_v48 = vpop.f32.mrf.mxu1  ;;  %v2120_v26 = vadd.f32 %v2119_v3, %v8991_v47  ;;  %v9128_v46 = vld [vmem:[#allocation5 + $0x778] sm:$0xff]  ;;  %v1975_v5 = vunpack.c.l.bf16 %v9124_v52  ;;  %v1847_v3 = vunpack.c.l.bf16 %v9126_v55 }
 0x2e2   :  { %v2039_v56 = vunpack.c.l.bf16 %v9128_v46 }
 0x2e3   :  { %13813 = vst [vmem:[#allocation87_spill] sm:$0xff] %v9116_v40  ;;  %2378 = vmatmul.f32.gmra.mxu0 %v8781_v17  ;;  %2443 = vmatmul.f32.gmra.mxu1 %v8785_v0  ;;  %v2185_v30 = vadd.f32 %v2184_v48, %v2120_v26  ;;  %v1911_v48 = vunpack.c.l.bf16 %v9133_v31 }
 0x2e4   :  { %2508 = vmatmul.f32.gmra.mxu2 %v8787_v12  ;;  %2612 = vmatpush.msra.mxu0 %v1847_v3 }
 0x2e5   :  { %2567 = vmatmul.f32.gmra.mxu3 %v8791_v6  ;;  %2742 = vmatpush.msra.mxu2 %v1975_v5  ;;  %v9145_v5 = vld [vmem:[#allocation5 + $0x468] sm:$0xff] }
 0x2e6   :  { %2807 = vmatpush.msra.mxu3 %v2039_v56  ;;  %2677 = vmatpush.msra.mxu1 %v1911_v48  ;;  %13815 = vst [vmem:[#allocation88_spill] sm:$0xff] %v9145_v5  ;;  %v9152_v48 = vld [vmem:[#allocation5 + $0x568] sm:$0xff] }
 0x2e7   :  { %v2249_v61 = vpop.f32.mrf.mxu2  ;;  %13817 = vst [vmem:[#allocation90_spill] sm:$0xff] %v9152_v48 }
 0x2e8   :  { %v2250_v40 = vadd.f32 %v2249_v61, %v2185_v30  ;;  %v2308_v0 = vpop.f32.mrf.mxu3  ;;  %v2122_v12 = vpop.f32.mrf.mxu0  ;;  %v9143_v30 = vld [vmem:[#allocation5 + $0x668] sm:$0xff] }
 0x2e9   :  { %v9135_v6 = vadd.f32 %v2308_v0, %v2244_v24  ;;  %v2187_v17 = vpop.f32.mrf.mxu1  ;;  %v2123_v26 = vadd.f32 %v2122_v12, %v8991_v47  ;;  %v9147_v24 = vld [vmem:[#allocation5 + $0x768] sm:$0xff]  ;;  %v1971_v3 = vunpack.c.l.bf16 %v9143_v30  ;;  %v1843_v12 = vunpack.c.l.bf16 %v9145_v5 }
 0x2ea   :  { %13816 = vst [vmem:[#allocation89_spill] sm:$0xff] %v9147_v24  ;;  %v2035_v56 = vunpack.c.l.bf16 %v9147_v24  ;;  %v9248_v5 = vld [vmem:[#allocation5 + $0x608] sm:$0xff] }
 0x2eb   :  { %13814 = vst [vmem:[#allocation12_spill] sm:$0xff] %v9135_v6  ;;  %2381 = vmatmul.f32.gmra.mxu0 %v8803_v27  ;;  %2446 = vmatmul.f32.gmra.mxu1 %v8806_v44  ;;  %v2188_v0 = vadd.f32 %v2187_v17, %v2123_v26  ;;  %v1907_v17 = vunpack.c.l.bf16 %v9152_v48 }
 0x2ec   :  { %2511 = vmatmul.f32.gmra.mxu2 %v8808_v51  ;;  %2613 = vmatpush.msra.mxu0 %v1843_v12  ;;  %v9164_v12 = vld [vmem:[#allocation5 + $0x458] sm:$0xff] }
 0x2ed   :  { %2570 = vmatmul.f32.gmra.mxu3 %v8812_v28  ;;  %2743 = vmatpush.msra.mxu2 %v1971_v3  ;;  %v9162_v3 = vld [vmem:[#allocation5 + $0x658] sm:$0xff]  ;;  %13821 = vst [vmem:[#allocation93_spill] sm:$0xff] %v9164_v12 }
 0x2ee   :  { %2808 = vmatpush.msra.mxu3 %v2035_v56  ;;  %2678 = vmatpush.msra.mxu1 %v1907_v17  ;;  %13820 = vst [vmem:[#allocation92_spill] sm:$0xff] %v9162_v3  ;;  %v1967_v56 = vunpack.c.l.bf16 %v9162_v3  ;;  %v9171_v17 = vld [vmem:[#allocation5 + $0x558] sm:$0xff] }
 0x2ef   :  { %v2252_v61 = vpop.f32.mrf.mxu2  ;;  %13823 = vst [vmem:[#allocation29_spill] sm:$0xff] %v9171_v17  ;;  %v13825_v3 = vld [vmem:[#allocation21_spill] sm:$0xff] }
 0x2f0   :  { %v2253_v6 = vadd.f32 %v2252_v61, %v2188_v0  ;;  %v2311_v44 = vpop.f32.mrf.mxu3  ;;  %v2125_v51 = vpop.f32.mrf.mxu0  ;;  %v13819_v0 = vld [vmem:[#allocation49_spill] sm:$0xff]  ;;  %2744 = vmatpush.msra.mxu2 %v1967_v56  ;;  %v9183_v56 = vld [vmem:[#allocation5 + $0x448] sm:$0xff] }
 0x2f1   :  { %v9154_v28 = vadd.f32 %v2311_v44, %v2247_v10  ;;  %v2190_v27 = vpop.f32.mrf.mxu1  ;;  %v2126_v26 = vadd.f32 %v2125_v51, %v8991_v47  ;;  %v9166_v10 = vld [vmem:[#allocation5 + $0x758] sm:$0xff]  ;;  %v1839_v51 = vunpack.c.l.bf16 %v9164_v12  ;;  %v13826_v12 = vld [vmem:[#allocation71_spill] sm:$0xff]  ;;  %13830 = vst [vmem:[#allocation34_spill] sm:$0xff] %v9183_v56 }
 0x2f2   :  { %13822 = vst [vmem:[#allocation94_spill] sm:$0xff] %v9166_v10  ;;  %v2031_v61 = vunpack.c.l.bf16 %v9166_v10  ;;  %v13827_v10 = vld [vmem:[#allocation50_spill] sm:$0xff] }
 0x2f3   :  { %13818 = vst [vmem:[#allocation38_spill] sm:$0xff] %v9154_v28  ;;  %2384 = vmatmul.f32.gmra.mxu0 %v8824_v7  ;;  %2449 = vmatmul.f32.gmra.mxu1 %v8827_v4  ;;  %v2191_v44 = vadd.f32 %v2190_v27, %v2126_v26  ;;  %v1903_v27 = vunpack.c.l.bf16 %v9171_v17 }
 0x2f4   :  { %2514 = vmatmul.f32.gmra.mxu2 %v8829_v39  ;;  %2614 = vmatpush.msra.mxu0 %v1839_v51 }
 0x2f5   :  { %2573 = vmatmul.f32.gmra.mxu3 %v13819_v0  ;;  %2679 = vmatpush.msra.mxu1 %v1903_v27 }
 0x2f6   :  { %2809 = vmatpush.msra.mxu3 %v2031_v61 }
 0x2f7   :  { %v2255_v28 = vpop.f32.mrf.mxu2 }
 0x2f8   :  { %v2256_v4 = vadd.f32 %v2255_v28, %v2191_v44  ;;  %v2314_v7 = vpop.f32.mrf.mxu3  ;;  %v2128_v39 = vpop.f32.mrf.mxu0  ;;  %v13828_v28 = vld [vmem:[#allocation22_spill] sm:$0xff]  ;;  %v9181_v44 = vld [vmem:[#allocation5 + $0x648] sm:$0xff] }
 0x2f9   :  { %v9173_v0 = vadd.f32 %v2314_v7, %v2250_v40  ;;  %v2193_v48 = vpop.f32.mrf.mxu1  ;;  %v2129_v26 = vadd.f32 %v2128_v39, %v8991_v47  ;;  %13829 = vst [vmem:[#allocation59_spill] sm:$0xff] %v9181_v44  ;;  %v9185_v40 = vld [vmem:[#allocation5 + $0x748] sm:$0xff]  ;;  %v1963_v51 = vunpack.c.l.bf16 %v9181_v44  ;;  %v1835_v39 = vunpack.c.l.bf16 %v9183_v56  ;;  %v13834_v56 = vld [vmem:[#allocation72_spill] sm:$0xff] }
 0x2fa   :  { %13831 = vst [vmem:[#allocation13_spill] sm:$0xff] %v9185_v40  ;;  %v2027_v61 = vunpack.c.l.bf16 %v9185_v40  ;;  %v13835_v40 = vld [vmem:[#allocation51_spill] sm:$0xff] }
 0x2fb   :  { %13824 = vst [vmem:[#allocation15_spill] sm:$0xff] %v9173_v0  ;;  %2387 = vmatmul.f32.gmra.mxu0 %v13825_v3  ;;  %2452 = vmatmul.f32.gmra.mxu1 %v13826_v12  ;;  %v2194_v7 = vadd.f32 %v2193_v48, %v2129_v26 }
 0x2fc   :  { %2517 = vmatmul.f32.gmra.mxu2 %v13827_v10  ;;  %2615 = vmatpush.msra.mxu0 %v1835_v39  ;;  %v9204_v39 = vld [vmem:[#allocation5 + $0x438] sm:$0xff] }
 0x2fd   :  { %2576 = vmatmul.f32.gmra.mxu3 %v13828_v28  ;;  %2745 = vmatpush.msra.mxu2 %v1963_v51  ;;  %v9192_v28 = vld [vmem:[#allocation5 + $0x548] sm:$0xff]  ;;  %v9202_v51 = vld [vmem:[#allocation5 + $0x638] sm:$0xff]  ;;  %13839 = vst [vmem:[#allocation98_spill] sm:$0xff] %v9204_v39 }
 0x2fe   :  { %13832 = vst [vmem:[#allocation66_spill] sm:$0xff] %v9192_v28  ;;  %2810 = vmatpush.msra.mxu3 %v2027_v61  ;;  %v1899_v48 = vunpack.c.l.bf16 %v9192_v28  ;;  %v1959_v61 = vunpack.c.l.bf16 %v9202_v51 }
 0x2ff   :  { %v2258_v0 = vpop.f32.mrf.mxu2  ;;  %13838 = vst [vmem:[#allocation97_spill] sm:$0xff] %v9202_v51 }
 0x300   :  { %v9190_v12 = vadd.f32 %v2258_v0, %v2194_v7  ;;  %v2317_v10 = vpop.f32.mrf.mxu3  ;;  %v2131_v27 = vpop.f32.mrf.mxu0  ;;  %v13836_v0 = vld [vmem:[#allocation26_spill] sm:$0xff]  ;;  %2680 = vmatpush.msra.mxu1 %v1899_v48  ;;  %v13837_v7 = vld [vmem:[#allocation73_spill] sm:$0xff]  ;;  %2746 = vmatpush.msra.mxu2 %v1959_v61  ;;  %v9224_v61 = vld [vmem:[#allocation5 + $0x428] sm:$0xff] }
 0x301   :  { %v9194_v3 = vadd.f32 %v2317_v10, %v2253_v6  ;;  %v2196_v17 = vpop.f32.mrf.mxu1  ;;  %v2132_v26 = vadd.f32 %v2131_v27, %v8991_v47  ;;  %v9206_v6 = vld [vmem:[#allocation5 + $0x738] sm:$0xff]  ;;  %v1831_v27 = vunpack.c.l.bf16 %v9204_v39  ;;  %v13843_v39 = vld [vmem:[#allocation52_spill] sm:$0xff]  ;;  %13847 = vst [vmem:[#allocation103_spill] sm:$0xff] %v9224_v61 }
 0x302   :  { %13840 = vst [vmem:[#allocation99_spill] sm:$0xff] %v9206_v6 }
 0x303   :  { %13833 = vst [vmem:[#allocation96_spill] sm:$0xff] %v9194_v3  ;;  %2390 = vmatmul.f32.gmra.mxu0 %v13834_v56  ;;  %2455 = vmatmul.f32.gmra.mxu1 %v13835_v40  ;;  %v2197_v10 = vadd.f32 %v2196_v17, %v2132_v26  ;;  %v2023_v3 = vunpack.c.l.bf16 %v9206_v6  ;;  %v13844_v6 = vld [vmem:[#allocation24_spill] sm:$0xff] }
 0x304   :  { %2520 = vmatmul.f32.gmra.mxu2 %v13836_v0  ;;  %2616 = vmatpush.msra.mxu0 %v1831_v27  ;;  %v9226_v27 = vld [vmem:[#allocation5 + $0x528] sm:$0xff] }
 0x305   :  { %2579 = vmatmul.f32.gmra.mxu3 %v13837_v7  ;;  %v9213_v7 = vld [vmem:[#allocation5 + $0x538] sm:$0xff]  ;;  %13848 = vst [vmem:[#allocation104_spill] sm:$0xff] %v9226_v27 }
 0x306   :  { %13841 = vst [vmem:[#allocation100_spill] sm:$0xff] %v9213_v7  ;;  %2811 = vmatpush.msra.mxu3 %v2023_v3  ;;  %v1895_v17 = vunpack.c.l.bf16 %v9213_v7  ;;  %v9239_v7 = vld [vmem:[#allocation5 + $0x618] sm:$0xff] }
 0x307   :  { %v2261_v56 = vpop.f32.mrf.mxu2 }
 0x308   :  { %v9211_v40 = vadd.f32 %v2261_v56, %v2197_v10  ;;  %v2320_v0 = vpop.f32.mrf.mxu3  ;;  %v2134_v48 = vpop.f32.mrf.mxu0  ;;  %v13845_v56 = vld [vmem:[#allocation74_spill] sm:$0xff]  ;;  %2681 = vmatpush.msra.mxu1 %v1895_v17  ;;  %v9222_v10 = vld [vmem:[#allocation5 + $0x628] sm:$0xff]  ;;  %v9235_v17 = vld [vmem:[#allocation5 + $0x418] sm:$0xff] }
 0x309   :  { %v9215_v28 = vadd.f32 %v2320_v0, %v2256_v4  ;;  %v2199_v44 = vpop.f32.mrf.mxu1  ;;  %v2135_v26 = vadd.f32 %v2134_v48, %v8991_v47  ;;  %13846 = vst [vmem:[#allocation102_spill] sm:$0xff] %v9222_v10  ;;  %v13849_v4 = vld [vmem:[#allocation75_spill] sm:$0xff]  ;;  %v1955_v3 = vunpack.c.l.bf16 %v9222_v10  ;;  %v1827_v0 = vunpack.c.l.bf16 %v9224_v61 }
 0x30a   :  { %v9231_v48 = vld [vmem:[#allocation5 + $0x728] sm:$0xff]  ;;  %v1823_v10 = vunpack.c.l.bf16 %v9235_v17 }
 0x30b   :  { %13842 = vst [vmem:[#allocation101_spill] sm:$0xff] %v9215_v28  ;;  %2393 = vmatmul.f32.gmra.mxu0 %v13843_v39  ;;  %2458 = vmatmul.f32.gmra.mxu1 %v13844_v6  ;;  %v1891_v28 = vunpack.c.l.bf16 %v9226_v27  ;;  %v2200_v6 = vadd.f32 %v2199_v44, %v2135_v26  ;;  %v9237_v39 = vld [vmem:[#allocation5 + $0x518] sm:$0xff]  ;;  %v9244_v26 = vld [vmem:[#allocation5 + $0x408] sm:$0xff] }
 0x30c   :  { %2523 = vmatmul.f32.gmra.mxu2 %v13845_v56  ;;  %13850 = vst [vmem:[#allocation105_spill] sm:$0xff] %v9231_v48  ;;  %v2019_v56 = vunpack.c.l.bf16 %v9231_v48  ;;  %2617 = vmatpush.msra.mxu0 %v1827_v0  ;;  %v1887_v61 = vunpack.c.l.bf16 %v9237_v39  ;;  %v9246_v48 = vld [vmem:[#allocation5 + $0x508] sm:$0xff] }
 0x30d   :  { %2582 = vmatmul.f32.gmra.mxu3 %v13849_v4  ;;  %13851 = vst [vmem:[#allocation106_spill] sm:$0xff] %v9237_v39  ;;  %2747 = vmatpush.msra.mxu2 %v1955_v3  ;;  %v1951_v4 = vunpack.c.l.bf16 %v9239_v7  ;;  %v1819_v39 = vunpack.c.l.bf16 %v9244_v26 }
 0x30e   :  { %2812 = vmatpush.msra.mxu3 %v2019_v56  ;;  %2682 = vmatpush.msra.mxu1 %v1891_v28  ;;  %v1947_v28 = vunpack.c.l.bf16 %v9248_v5 }
 0x30f   :  { %v2264_v51 = vpop.f32.mrf.mxu2  ;;  %2618 = vmatpush.msra.mxu0 %v1823_v10  ;;  %2748 = vmatpush.msra.mxu2 %v1951_v4 }
 0x310   :  { %v2265_v24 = vadd.f32 %v2264_v51, %v2200_v6  ;;  %v2323_v27 = vpop.f32.mrf.mxu3  ;;  %v2137_v44 = vpop.f32.mrf.mxu0  ;;  %v1883_v51 = vunpack.c.l.bf16 %v9246_v48  ;;  %2683 = vmatpush.msra.mxu1 %v1887_v61 }
 0x311   :  { %v9251_v3 = vadd.f32 %v2323_v27, %v9190_v12  ;;  %v2202_v0 = vpop.f32.mrf.mxu1  ;;  %v2138_v6 = vadd.f32 %v2137_v44, %v8991_v47  ;;  %2619 = vmatpush.msra.mxu0 %v1819_v39  ;;  %v9261_v12 = vld [vmem:[#allocation5 + $0x718] sm:$0xff]  ;;  %2749 = vmatpush.msra.mxu2 %v1947_v28 }
 0x312   :  { %2684 = vmatpush.msra.mxu1 %v1883_v51  ;;  %v2015_v10 = vunpack.c.l.bf16 %v9261_v12 }
 0x313   :  { %13852 = vst [vmem:[#allocation107_spill] sm:$0xff] %v9251_v3  ;;  %2396 = vmatmul.f32.gmra.mxu0 %v8910_v43  ;;  %2461 = vmatmul.f32.gmra.mxu1 %v8913_v60  ;;  %v2203_v56 = vadd.f32 %v2202_v0, %v2138_v6  ;;  %v9272_v0 = vld [vmem:[#allocation5 + $0x708] sm:$0xff] }
 0x314   :  { %2526 = vmatmul.f32.gmra.mxu2 %v8918_v11  ;;  %2813 = vmatpush.msra.mxu3 %v2015_v10  ;;  %v2011_v6 = vunpack.c.l.bf16 %v9272_v0 }
 0x315   :  { %2585 = vmatmul.f32.gmra.mxu3 %v8923_v36 }
 0x316   :  { %2814 = vmatpush.msra.mxu3 %v2011_v6 }
 0x317   :  { %v2267_v27 = vpop.f32.mrf.mxu2 }
 0x318   :  { %v2268_v61 = vadd.f32 %v2267_v27, %v2203_v56  ;;  %v2326_v4 = vpop.f32.mrf.mxu3  ;;  %v2140_v44 = vpop.f32.mrf.mxu0 }
 0x319   :  { %v9265_v3 = vadd.f32 %v2326_v4, %v9211_v40  ;;  %v2205_v60 = vpop.f32.mrf.mxu1  ;;  %v2141_v39 = vadd.f32 %v2140_v44, %v8991_v47 }
 0x31b   :  { %13853 = vst [vmem:[#allocation108_spill] sm:$0xff] %v9265_v3  ;;  %2399 = vmatmul.f32.gmra.mxu0 %v8932_v62  ;;  %2464 = vmatmul.f32.gmra.mxu1 %v8935_v16  ;;  %v2206_v51 = vadd.f32 %v2205_v60, %v2141_v39  ;;  %v2008_v60 = vunpack.c.h.bf16 %v8959_v20  ;;  %v1880_v39 = vunpack.c.h.bf16 %v8966_v57  ;;  %v13856_v3 = vld [vmem:[#allocation57_spill] sm:$0xff]  ;;  %v13858_v20 = vld [vmem:[#allocation28_spill] sm:$0xff] }
 0x31c   :  { %2529 = vmatmul.f32.gmra.mxu2 %v8937_v59  ;;  %v13859_v57 = vld [vmem:[#allocation80_spill] sm:$0xff] }
 0x31d   :  { %2588 = vmatmul.f32.gmra.mxu3 %v8941_v13  ;;  %2994 = vmatpush.msrb.mxu2 %v2008_v60  ;;  %v2004_v60 = vunpack.c.h.bf16 %v8993_v53 }
 0x31e   :  { %2864 = vmatpush.msrb.mxu0 %v1880_v39  ;;  %v1876_v39 = vunpack.c.h.bf16 %v8995_v58 }
 0x31f   :  { %v2270_v28 = vpop.f32.mrf.mxu2  ;;  %2995 = vmatpush.msrb.mxu2 %v2004_v60  ;;  %v13867_v60 = vld [vmem:[#allocation82_spill] sm:$0xff] }
 0x320   :  { %v2271_v56 = vadd.f32 %v2270_v28, %v2206_v51  ;;  %v2329_v40 = vpop.f32.mrf.mxu3  ;;  %v2143_v10 = vpop.f32.mrf.mxu0  ;;  %v13855_v51 = vld [vmem:[#allocation79_spill] sm:$0xff]  ;;  %2865 = vmatpush.msrb.mxu0 %v1876_v39  ;;  %v2000_v39 = vunpack.c.h.bf16 %v9012_v63 }
 0x321   :  { %v9275_v27 = vadd.f32 %v2329_v40, %v2265_v24  ;;  %v2208_v4 = vpop.f32.mrf.mxu1  ;;  %v2144_v44 = vadd.f32 %v2143_v10, %v8991_v47  ;;  %v2072_v28 = vunpack.c.h.bf16 %v13855_v51  ;;  %v13862_v51 = vld [vmem:[#allocation81_spill] sm:$0xff]  ;;  %v13872_v63 = vld [vmem:[#allocation39_spill] sm:$0xff] }
 0x322   :  { %2996 = vmatpush.msrb.mxu2 %v2000_v39  ;;  %v1996_v39 = vunpack.c.h.bf16 %v9031_v41  ;;  %v13878_v41 = vld [vmem:[#allocation42_spill] sm:$0xff] }
 0x323   :  { %13854 = vst [vmem:[#allocation109_spill] sm:$0xff] %v9275_v27  ;;  %2402 = vmatmul.f32.gmra.mxu0 %v8950_v29  ;;  %2467 = vmatmul.f32.gmra.mxu1 %v8953_v50  ;;  %v2209_v6 = vadd.f32 %v2208_v4, %v2144_v44  ;;  %v1944_v50 = vunpack.c.h.bf16 %v13856_v3  ;;  %v13860_v4 = vld [vmem:[#allocation31_spill] sm:$0xff]  ;;  %v13861_v44 = vld [vmem:[#allocation16_spill] sm:$0xff]  ;;  %v2068_v3 = vunpack.c.h.bf16 %v13862_v51 }
 0x324   :  { %2532 = vmatmul.f32.gmra.mxu2 %v8955_v49  ;;  %3059 = vmatpush.msrb.mxu3 %v2072_v28  ;;  %v13863_v28 = vld [vmem:[#allocation30_spill] sm:$0xff]  ;;  %v13868_v51 = vld [vmem:[#allocation83_spill] sm:$0xff] }
 0x325   :  { %2591 = vmatmul.f32.gmra.mxu3 %v8961_v23  ;;  %2929 = vmatpush.msrb.mxu1 %v1944_v50 }
 0x326   :  { %3060 = vmatpush.msrb.mxu3 %v2068_v3  ;;  %v1872_v3 = vunpack.c.h.bf16 %v13868_v51  ;;  %v13873_v51 = vld [vmem:[#allocation40_spill] sm:$0xff]  ;;  %2997 = vmatpush.msrb.mxu2 %v1996_v39  ;;  %v1864_v39 = vunpack.c.h.bf16 %v9050_v25  ;;  %v13884_v25 = vld [vmem:[#allocation19_spill] sm:$0xff] }
 0x327   :  { %v2273_v24 = vpop.f32.mrf.mxu2 }
 0x328   :  { %v2274_v40 = vadd.f32 %v2273_v24, %v2209_v6  ;;  %v2332_v10 = vpop.f32.mrf.mxu3  ;;  %v2146_v27 = vpop.f32.mrf.mxu0  ;;  %v9297_v6 = vperm.slane %v13863_v28, 1  ;;  %2866 = vmatpush.msrb.mxu0 %v1872_v3  ;;  %v1868_v3 = vunpack.c.h.bf16 %v9033_v37  ;;  %v13879_v37 = vld [vmem:[#allocation54_spill] sm:$0xff] }
 0x329   :  { %v9286_v29 = vadd.f32 %v2332_v10, %v2268_v61  ;;  %v2211_v49 = vpop.f32.mrf.mxu1  ;;  %v2147_v23 = vadd.f32 %v2146_v27, %v8991_v47  ;;  %v1940_v10 = vunpack.c.h.bf16 %v9002_v19 }
 0x32a   :  { %2867 = vmatpush.msrb.mxu0 %v1868_v3  ;;  %v2056_v3 = vunpack.c.h.bf16 %v9052_v35  ;;  %v13885_v35 = vld [vmem:[#allocation58_spill] sm:$0xff] }
 0x32b   :  { %13857 = vst [vmem:[#allocation79_spill] sm:$0xff] %v9286_v29  ;;  %2405 = vmatmul.f32.gmra.mxu0 %v13858_v20  ;;  %2470 = vmatmul.f32.gmra.mxu1 %v13859_v57  ;;  %v2212_v61 = vadd.f32 %v2211_v49, %v2147_v23  ;;  %v13865_v49 = vld [vmem:[#allocation36_spill] sm:$0xff]  ;;  %v13866_v23 = vld [vmem:[#allocation37_spill] sm:$0xff] }
 0x32c   :  { %2535 = vmatmul.f32.gmra.mxu2 %v13860_v4  ;;  %2930 = vmatpush.msrb.mxu1 %v1940_v10  ;;  %v13870_v10 = vld [vmem:[#allocation84_spill] sm:$0xff] }
 0x32d   :  { %2594 = vmatmul.f32.gmra.mxu3 %v13861_v44  ;;  %2868 = vmatpush.msrb.mxu0 %v1864_v39 }
 0x32f   :  { %v2276_v47 = vpop.f32.mrf.mxu2 }
 0x330   :  { %v2277_v50 = vadd.f32 %v2276_v47, %v2212_v61  ;;  %v2335_v27 = vpop.f32.mrf.mxu3  ;;  %v2361_v24 = vpop.f32.mrf.mxu0  ;;  %v13869_v61 = vld [vmem:[#allocation32_spill] sm:$0xff] }
 0x331   :  { %v9300_v29 = vadd.f32 %v2335_v27, %v2271_v56  ;;  %v2426_v53 = vpop.f32.mrf.mxu1  ;;  %v2362_v58 = vadd.f32 %v2361_v24, %v9297_v6  ;;  %v2064_v19 = vunpack.c.h.bf16 %v13869_v61  ;;  %v2060_v61 = vunpack.c.h.bf16 %v9035_v18  ;;  %v13880_v18 = vld [vmem:[#allocation55_spill] sm:$0xff] }
 0x333   :  { %13864 = vst [vmem:[#allocation57_spill] sm:$0xff] %v9300_v29  ;;  %2620 = vmatmul.f32.vlgmr.msra.gmra.mxu0 %v8665_v15  ;;  %2685 = vmatmul.f32.vlgmr.msra.gmra.mxu1 %v13865_v49  ;;  %v2427_v56 = vadd.f32 %v2426_v53, %v2362_v58  ;;  %v1936_v29 = vunpack.c.h.bf16 %v13870_v10  ;;  %v13874_v53 = vld [vmem:[#allocation41_spill] sm:$0xff] }
 0x334   :  { %2750 = vmatmul.f32.vlgmr.msra.gmra.mxu2 %v13866_v23  ;;  %3061 = vmatpush.msrb.mxu3 %v2064_v19  ;;  %v13875_v58 = vld [vmem:[#allocation33_spill] sm:$0xff] }
 0x335   :  { %2597 = vmatmul.f32.gmra.mxu3 %v13867_v60  ;;  %2931 = vmatpush.msrb.mxu1 %v1936_v29 }
 0x336   :  { %3062 = vmatpush.msrb.mxu3 %v2060_v61 }
 0x337   :  { %v2491_v28 = vpop.f32.mrf.mxu2 }
 0x338   :  { %v2492_v47 = vadd.f32 %v2491_v28, %v2427_v56  ;;  %v2338_v27 = vpop.f32.mrf.mxu3  ;;  %v2364_v24 = vpop.f32.mrf.mxu0  ;;  %3063 = vmatpush.msrb.mxu3 %v2056_v3 }
 0x339   :  { %v9311_v49 = vadd.f32 %v2338_v27, %v2274_v40  ;;  %v2429_v23 = vpop.f32.mrf.mxu1  ;;  %v2365_v60 = vadd.f32 %v2364_v24, %v9297_v6  ;;  %v13876_v27 = vld [vmem:[#allocation35_spill] sm:$0xff] }
 0x33a   :  { %v1932_v24 = vunpack.c.h.bf16 %v13876_v27 }
 0x33b   :  { %13871 = vst [vmem:[#allocation28_spill] sm:$0xff] %v9311_v49  ;;  %2623 = vmatmul.f32.gmra.mxu0 %v13872_v63  ;;  %2688 = vmatmul.f32.gmra.mxu1 %v13873_v51  ;;  %v2430_v40 = vadd.f32 %v2429_v23, %v2365_v60  ;;  %v13881_v23 = vld [vmem:[#allocation56_spill] sm:$0xff]  ;;  %v1992_v60 = vunpack.c.h.bf16 %v9048_v34  ;;  %v13883_v34 = vld [vmem:[#allocation43_spill] sm:$0xff] }
 0x33c   :  { %2753 = vmatmul.f32.gmra.mxu2 %v13874_v53  ;;  %2932 = vmatpush.msrb.mxu1 %v1932_v24 }
 0x33d   :  { %2600 = vmatmul.f32.gmra.mxu3 %v13875_v58  ;;  %2998 = vmatpush.msrb.mxu2 %v1992_v60  ;;  %v1860_v60 = vunpack.c.h.bf16 %v9069_v33  ;;  %v13889_v33 = vld [vmem:[#allocation62_spill] sm:$0xff] }
 0x33f   :  { %v2494_v19 = vpop.f32.mrf.mxu2  ;;  %2869 = vmatpush.msrb.mxu0 %v1860_v60 }
 0x340   :  { %v2495_v56 = vadd.f32 %v2494_v19, %v2430_v40  ;;  %v2341_v29 = vpop.f32.mrf.mxu3  ;;  %v2367_v28 = vpop.f32.mrf.mxu0 }
 0x341   :  { %v9322_v10 = vadd.f32 %v2341_v29, %v2277_v50  ;;  %v2432_v49 = vpop.f32.mrf.mxu1  ;;  %v2368_v58 = vadd.f32 %v2367_v28, %v9297_v6  ;;  %v1928_v28 = vunpack.c.h.bf16 %v9057_v21  ;;  %v2052_v21 = vunpack.c.h.bf16 %v9071_v1  ;;  %v13890_v1 = vld [vmem:[#allocation63_spill] sm:$0xff] }
 0x343   :  { %13877 = vst [vmem:[#allocation80_spill] sm:$0xff] %v9322_v10  ;;  %2626 = vmatmul.f32.gmra.mxu0 %v13878_v41  ;;  %2691 = vmatmul.f32.gmra.mxu1 %v13879_v37  ;;  %v2433_v50 = vadd.f32 %v2432_v49, %v2368_v58  ;;  %v13886_v49 = vld [vmem:[#allocation60_spill] sm:$0xff]  ;;  %v1988_v58 = vunpack.c.h.bf16 %v9067_v2  ;;  %v13888_v2 = vld [vmem:[#allocation61_spill] sm:$0xff] }
 0x344   :  { %2756 = vmatmul.f32.gmra.mxu2 %v13880_v18  ;;  %2933 = vmatpush.msrb.mxu1 %v1928_v28 }
 0x345   :  { %2815 = vmatmul.f32.vlgmr.msra.gmra.mxu3 %v13881_v23  ;;  %2999 = vmatpush.msrb.mxu2 %v1988_v58  ;;  %v1856_v58 = vunpack.c.h.bf16 %v9088_v8  ;;  %v13894_v8 = vld [vmem:[#allocation44_spill] sm:$0xff] }
 0x346   :  { %3064 = vmatpush.msrb.mxu3 %v2052_v21 }
 0x347   :  { %v2497_v61 = vpop.f32.mrf.mxu2  ;;  %2870 = vmatpush.msrb.mxu0 %v1856_v58 }
 0x348   :  { %v2498_v40 = vadd.f32 %v2497_v61, %v2433_v50  ;;  %v2556_v19 = vpop.f32.mrf.mxu3  ;;  %v2370_v29 = vpop.f32.mrf.mxu0 }
 0x349   :  { %v9333_v27 = vadd.f32 %v2556_v19, %v2492_v47  ;;  %v2435_v24 = vpop.f32.mrf.mxu1  ;;  %v2371_v10 = vadd.f32 %v2370_v29, %v9297_v6  ;;  %v1924_v19 = vunpack.c.h.bf16 %v9076_v9  ;;  %v2048_v9 = vunpack.c.h.bf16 %v9090_v14  ;;  %v13895_v14 = vld [vmem:[#allocation20_spill] sm:$0xff] }
 0x34b   :  { %13882 = vst [vmem:[#allocation31_spill] sm:$0xff] %v9333_v27  ;;  %2629 = vmatmul.f32.gmra.mxu0 %v13883_v34  ;;  %2694 = vmatmul.f32.gmra.mxu1 %v13884_v25  ;;  %v2436_v47 = vadd.f32 %v2435_v24, %v2371_v10  ;;  %v13891_v10 = vld [vmem:[#allocation64_spill] sm:$0xff]  ;;  %v1984_v24 = vunpack.c.h.bf16 %v9086_v42  ;;  %v13893_v42 = vld [vmem:[#allocation65_spill] sm:$0xff] }
 0x34c   :  { %2759 = vmatmul.f32.gmra.mxu2 %v13885_v35  ;;  %2934 = vmatpush.msrb.mxu1 %v1924_v19 }
 0x34d   :  { %2818 = vmatmul.f32.gmra.mxu3 %v13886_v49  ;;  %3000 = vmatpush.msrb.mxu2 %v1984_v24  ;;  %v1852_v24 = vunpack.c.h.bf16 %v9107_v38  ;;  %v13899_v38 = vld [vmem:[#allocation67_spill] sm:$0xff] }
 0x34e   :  { %3065 = vmatpush.msrb.mxu3 %v2048_v9 }
 0x34f   :  { %v2500_v39 = vpop.f32.mrf.mxu2  ;;  %2871 = vmatpush.msrb.mxu0 %v1852_v24 }
 0x350   :  { %v2501_v3 = vadd.f32 %v2500_v39, %v2436_v47  ;;  %v2559_v50 = vpop.f32.mrf.mxu3  ;;  %v2373_v61 = vpop.f32.mrf.mxu0 }
 0x351   :  { %v9344_v29 = vadd.f32 %v2559_v50, %v2495_v56  ;;  %v2438_v28 = vpop.f32.mrf.mxu1  ;;  %v2374_v27 = vadd.f32 %v2373_v61, %v9297_v6  ;;  %v1920_v50 = vunpack.c.h.bf16 %v9095_v32  ;;  %v2044_v32 = vunpack.c.h.bf16 %v9109_v45  ;;  %v13900_v45 = vld [vmem:[#allocation46_spill] sm:$0xff] }
 0x353   :  { %13887 = vst [vmem:[#allocation16_spill] sm:$0xff] %v9344_v29  ;;  %2632 = vmatmul.f32.gmra.mxu0 %v13888_v2  ;;  %2697 = vmatmul.f32.gmra.mxu1 %v13889_v33  ;;  %v2439_v56 = vadd.f32 %v2438_v28, %v2374_v27  ;;  %v13896_v27 = vld [vmem:[#allocation45_spill] sm:$0xff]  ;;  %v1980_v28 = vunpack.c.h.bf16 %v9105_v22  ;;  %v13898_v22 = vld [vmem:[#allocation14_spill] sm:$0xff] }
 0x354   :  { %2762 = vmatmul.f32.gmra.mxu2 %v13890_v1  ;;  %2935 = vmatpush.msrb.mxu1 %v1920_v50 }
 0x355   :  { %2821 = vmatmul.f32.gmra.mxu3 %v13891_v10  ;;  %3001 = vmatpush.msrb.mxu2 %v1980_v28  ;;  %v1848_v28 = vunpack.c.h.bf16 %v9126_v55  ;;  %v13904_v55 = vld [vmem:[#allocation47_spill] sm:$0xff] }
 0x356   :  { %3066 = vmatpush.msrb.mxu3 %v2044_v32 }
 0x357   :  { %v2503_v60 = vpop.f32.mrf.mxu2  ;;  %2872 = vmatpush.msrb.mxu0 %v1848_v28 }
 0x358   :  { %v2504_v21 = vadd.f32 %v2503_v60, %v2439_v56  ;;  %v2562_v47 = vpop.f32.mrf.mxu3  ;;  %v2376_v39 = vpop.f32.mrf.mxu0 }
 0x359   :  { %v9355_v61 = vadd.f32 %v2562_v47, %v2498_v40  ;;  %v2441_v19 = vpop.f32.mrf.mxu1  ;;  %v2377_v29 = vadd.f32 %v2376_v39, %v9297_v6  ;;  %v1916_v47 = vunpack.c.h.bf16 %v9114_v54  ;;  %v2040_v54 = vunpack.c.h.bf16 %v9128_v46  ;;  %v13905_v46 = vld [vmem:[#allocation18_spill] sm:$0xff] }
 0x35b   :  { %13892 = vst [vmem:[#allocation81_spill] sm:$0xff] %v9355_v61  ;;  %2635 = vmatmul.f32.gmra.mxu0 %v13893_v42  ;;  %2700 = vmatmul.f32.gmra.mxu1 %v13894_v8  ;;  %v2442_v40 = vadd.f32 %v2441_v19, %v2377_v29  ;;  %v13901_v29 = vld [vmem:[#allocation17_spill] sm:$0xff]  ;;  %v1976_v19 = vunpack.c.h.bf16 %v9124_v52  ;;  %v13903_v52 = vld [vmem:[#allocation68_spill] sm:$0xff] }
 0x35c   :  { %2765 = vmatmul.f32.gmra.mxu2 %v13895_v14  ;;  %2936 = vmatpush.msrb.mxu1 %v1916_v47 }
 0x35d   :  { %2824 = vmatmul.f32.gmra.mxu3 %v13896_v27  ;;  %3002 = vmatpush.msrb.mxu2 %v1976_v19  ;;  %v13907_v19 = vld [vmem:[#allocation88_spill] sm:$0xff] }
 0x35e   :  { %3067 = vmatpush.msrb.mxu3 %v2040_v54  ;;  %v1844_v28 = vunpack.c.h.bf16 %v13907_v19  ;;  %v13908_v54 = vld [vmem:[#allocation89_spill] sm:$0xff]  ;;  %v13912_v19 = vld [vmem:[#allocation23_spill] sm:$0xff] }
 0x35f   :  { %v2506_v58 = vpop.f32.mrf.mxu2 }
 0x360   :  { %v2507_v9 = vadd.f32 %v2506_v58, %v2442_v40  ;;  %v2565_v56 = vpop.f32.mrf.mxu3  ;;  %v2379_v60 = vpop.f32.mrf.mxu0  ;;  %2873 = vmatpush.msrb.mxu0 %v1844_v28 }
 0x361   :  { %v9366_v39 = vadd.f32 %v2565_v56, %v2501_v3  ;;  %v2444_v50 = vpop.f32.mrf.mxu1  ;;  %v2380_v61 = vadd.f32 %v2379_v60, %v9297_v6  ;;  %v1912_v56 = vunpack.c.h.bf16 %v9133_v31  ;;  %v2036_v31 = vunpack.c.h.bf16 %v13908_v54  ;;  %v13916_v54 = vld [vmem:[#allocation93_spill] sm:$0xff] }
 0x363   :  { %13897 = vst [vmem:[#allocation30_spill] sm:$0xff] %v9366_v39  ;;  %2638 = vmatmul.f32.gmra.mxu0 %v13898_v22  ;;  %2703 = vmatmul.f32.gmra.mxu1 %v13899_v38  ;;  %v2445_v3 = vadd.f32 %v2444_v50, %v2380_v61  ;;  %v13906_v61 = vld [vmem:[#allocation69_spill] sm:$0xff]  ;;  %v1972_v50 = vunpack.c.h.bf16 %v9143_v30  ;;  %v13911_v30 = vld [vmem:[#allocation48_spill] sm:$0xff] }
 0x364   :  { %2768 = vmatmul.f32.gmra.mxu2 %v13900_v45  ;;  %2937 = vmatpush.msrb.mxu1 %v1912_v56  ;;  %v13909_v56 = vld [vmem:[#allocation90_spill] sm:$0xff] }
 0x365   :  { %2827 = vmatmul.f32.gmra.mxu3 %v13901_v29  ;;  %3003 = vmatpush.msrb.mxu2 %v1972_v50  ;;  %v13915_v50 = vld [vmem:[#allocation92_spill] sm:$0xff] }
 0x366   :  { %3068 = vmatpush.msrb.mxu3 %v2036_v31  ;;  %v1968_v28 = vunpack.c.h.bf16 %v13915_v50  ;;  %v1840_v31 = vunpack.c.h.bf16 %v13916_v54  ;;  %v13920_v50 = vld [vmem:[#allocation21_spill] sm:$0xff]  ;;  %v13921_v54 = vld [vmem:[#allocation71_spill] sm:$0xff] }
 0x367   :  { %v2509_v24 = vpop.f32.mrf.mxu2 }
 0x368   :  { %v2510_v32 = vadd.f32 %v2509_v24, %v2445_v3  ;;  %v2568_v40 = vpop.f32.mrf.mxu3  ;;  %v2382_v58 = vpop.f32.mrf.mxu0  ;;  %3004 = vmatpush.msrb.mxu2 %v1968_v28  ;;  %2874 = vmatpush.msrb.mxu0 %v1840_v31  ;;  %v13924_v28 = vld [vmem:[#allocation59_spill] sm:$0xff] }
 0x369   :  { %v9377_v60 = vadd.f32 %v2568_v40, %v2504_v21  ;;  %v2447_v47 = vpop.f32.mrf.mxu1  ;;  %v2383_v39 = vadd.f32 %v2382_v58, %v9297_v6  ;;  %v1964_v31 = vunpack.c.h.bf16 %v13924_v28  ;;  %v13929_v28 = vld [vmem:[#allocation72_spill] sm:$0xff] }
 0x36b   :  { %13902 = vst [vmem:[#allocation83_spill] sm:$0xff] %v9377_v60  ;;  %2641 = vmatmul.f32.gmra.mxu0 %v13903_v52  ;;  %2706 = vmatmul.f32.gmra.mxu1 %v13904_v55  ;;  %v2448_v21 = vadd.f32 %v2447_v47, %v2383_v39  ;;  %v1908_v60 = vunpack.c.h.bf16 %v13909_v56  ;;  %v13913_v39 = vld [vmem:[#allocation70_spill] sm:$0xff]  ;;  %v13914_v47 = vld [vmem:[#allocation49_spill] sm:$0xff] }
 0x36c   :  { %2771 = vmatmul.f32.gmra.mxu2 %v13905_v46 }
 0x36d   :  { %2830 = vmatmul.f32.gmra.mxu3 %v13906_v61  ;;  %2938 = vmatpush.msrb.mxu1 %v1908_v60 }
 0x36e   :  { %3005 = vmatpush.msrb.mxu2 %v1964_v31  ;;  %v13933_v31 = vld [vmem:[#allocation97_spill] sm:$0xff] }
 0x36f   :  { %v2512_v3 = vpop.f32.mrf.mxu2 }
 0x370   :  { %v2513_v24 = vadd.f32 %v2512_v3, %v2448_v21  ;;  %v2571_v40 = vpop.f32.mrf.mxu3  ;;  %v2385_v58 = vpop.f32.mrf.mxu0  ;;  %v13917_v21 = vld [vmem:[#allocation94_spill] sm:$0xff] }
 0x371   :  { %v9388_v55 = vadd.f32 %v2571_v40, %v2507_v9  ;;  %v2450_v46 = vpop.f32.mrf.mxu1  ;;  %v2386_v61 = vadd.f32 %v2385_v58, %v9297_v6  ;;  %v2032_v3 = vunpack.c.h.bf16 %v13917_v21  ;;  %v13925_v21 = vld [vmem:[#allocation34_spill] sm:$0xff] }
 0x373   :  { %13910 = vst [vmem:[#allocation32_spill] sm:$0xff] %v9388_v55  ;;  %2644 = vmatmul.f32.gmra.mxu0 %v13911_v30  ;;  %2709 = vmatmul.f32.gmra.mxu1 %v13912_v19  ;;  %v2451_v9 = vadd.f32 %v2450_v46, %v2386_v61  ;;  %v13918_v55 = vld [vmem:[#allocation29_spill] sm:$0xff]  ;;  %v13922_v46 = vld [vmem:[#allocation50_spill] sm:$0xff] }
 0x374   :  { %2774 = vmatmul.f32.gmra.mxu2 %v13913_v39  ;;  %3069 = vmatpush.msrb.mxu3 %v2032_v3  ;;  %v1904_v19 = vunpack.c.h.bf16 %v13918_v55  ;;  %v13923_v61 = vld [vmem:[#allocation22_spill] sm:$0xff]  ;;  %v1836_v3 = vunpack.c.h.bf16 %v13925_v21  ;;  %v13930_v21 = vld [vmem:[#allocation51_spill] sm:$0xff] }
 0x375   :  { %2833 = vmatmul.f32.gmra.mxu3 %v13914_v47 }
 0x376   :  { %2939 = vmatpush.msrb.mxu1 %v1904_v19  ;;  %2875 = vmatpush.msrb.mxu0 %v1836_v3  ;;  %v1960_v3 = vunpack.c.h.bf16 %v13933_v31  ;;  %v13938_v31 = vld [vmem:[#allocation52_spill] sm:$0xff] }
 0x377   :  { %v2515_v40 = vpop.f32.mrf.mxu2 }
 0x378   :  { %v2516_v58 = vadd.f32 %v2515_v40, %v2451_v9  ;;  %v2574_v60 = vpop.f32.mrf.mxu3  ;;  %v2388_v56 = vpop.f32.mrf.mxu0  ;;  %v13926_v9 = vld [vmem:[#allocation13_spill] sm:$0xff]  ;;  %3006 = vmatpush.msrb.mxu2 %v1960_v3  ;;  %v13942_v3 = vld [vmem:[#allocation102_spill] sm:$0xff] }
 0x379   :  { %v9399_v30 = vadd.f32 %v2574_v60, %v2510_v32  ;;  %v2453_v39 = vpop.f32.mrf.mxu1  ;;  %v2389_v47 = vadd.f32 %v2388_v56, %v9297_v6  ;;  %v2028_v55 = vunpack.c.h.bf16 %v13926_v9  ;;  %v13934_v9 = vld [vmem:[#allocation98_spill] sm:$0xff] }
 0x37b   :  { %13919 = vst [vmem:[#allocation84_spill] sm:$0xff] %v9399_v30  ;;  %2647 = vmatmul.f32.gmra.mxu0 %v13920_v50  ;;  %2712 = vmatmul.f32.gmra.mxu1 %v13921_v54  ;;  %v2454_v32 = vadd.f32 %v2453_v39, %v2389_v47  ;;  %v13927_v30 = vld [vmem:[#allocation66_spill] sm:$0xff]  ;;  %v13932_v47 = vld [vmem:[#allocation73_spill] sm:$0xff] }
 0x37c   :  { %2777 = vmatmul.f32.gmra.mxu2 %v13922_v46  ;;  %3070 = vmatpush.msrb.mxu3 %v2028_v55  ;;  %v1900_v54 = vunpack.c.h.bf16 %v13927_v30  ;;  %v13931_v39 = vld [vmem:[#allocation26_spill] sm:$0xff]  ;;  %v1832_v55 = vunpack.c.h.bf16 %v13934_v9  ;;  %v13939_v9 = vld [vmem:[#allocation24_spill] sm:$0xff] }
 0x37d   :  { %2836 = vmatmul.f32.gmra.mxu3 %v13923_v61 }
 0x37e   :  { %2940 = vmatpush.msrb.mxu1 %v1900_v54  ;;  %2876 = vmatpush.msrb.mxu0 %v1832_v55  ;;  %v1956_v55 = vunpack.c.h.bf16 %v13942_v3 }
 0x37f   :  { %v2518_v40 = vpop.f32.mrf.mxu2 }
 0x380   :  { %v2519_v60 = vadd.f32 %v2518_v40, %v2454_v32  ;;  %v2577_v19 = vpop.f32.mrf.mxu3  ;;  %v2391_v56 = vpop.f32.mrf.mxu0  ;;  %v13935_v32 = vld [vmem:[#allocation99_spill] sm:$0xff]  ;;  %3007 = vmatpush.msrb.mxu2 %v1956_v55  ;;  %v1948_v55 = vunpack.c.h.bf16 %v9248_v5 }
 0x381   :  { %v9410_v50 = vadd.f32 %v2577_v19, %v2513_v24  ;;  %v2456_v46 = vpop.f32.mrf.mxu1  ;;  %v2392_v61 = vadd.f32 %v2391_v56, %v9297_v6  ;;  %v2024_v30 = vunpack.c.h.bf16 %v13935_v32  ;;  %v13943_v32 = vld [vmem:[#allocation103_spill] sm:$0xff] }
 0x383   :  { %13928 = vst [vmem:[#allocation39_spill] sm:$0xff] %v9410_v50  ;;  %2650 = vmatmul.f32.gmra.mxu0 %v13929_v28  ;;  %2715 = vmatmul.f32.gmra.mxu1 %v13930_v21  ;;  %v2457_v24 = vadd.f32 %v2456_v46, %v2392_v61  ;;  %v13936_v50 = vld [vmem:[#allocation100_spill] sm:$0xff]  ;;  %v13940_v46 = vld [vmem:[#allocation74_spill] sm:$0xff]  ;;  %v13941_v61 = vld [vmem:[#allocation75_spill] sm:$0xff] }
 0x384   :  { %2780 = vmatmul.f32.gmra.mxu2 %v13931_v39  ;;  %3071 = vmatpush.msrb.mxu3 %v2024_v30  ;;  %v1896_v21 = vunpack.c.h.bf16 %v13936_v50  ;;  %v1828_v30 = vunpack.c.h.bf16 %v13943_v32 }
 0x385   :  { %2839 = vmatmul.f32.gmra.mxu3 %v13932_v47 }
 0x386   :  { %2941 = vmatpush.msrb.mxu1 %v1896_v21  ;;  %2877 = vmatpush.msrb.mxu0 %v1828_v30  ;;  %v1824_v21 = vunpack.c.h.bf16 %v9235_v17 }
 0x387   :  { %v2521_v40 = vpop.f32.mrf.mxu2 }
 0x388   :  { %v2522_v19 = vadd.f32 %v2521_v40, %v2457_v24  ;;  %v2580_v54 = vpop.f32.mrf.mxu3  ;;  %v2394_v56 = vpop.f32.mrf.mxu0  ;;  %v13944_v24 = vld [vmem:[#allocation105_spill] sm:$0xff]  ;;  %v13945_v40 = vld [vmem:[#allocation104_spill] sm:$0xff]  ;;  %2878 = vmatpush.msrb.mxu0 %v1824_v21 }
 0x389   :  { %v9421_v28 = vadd.f32 %v2580_v54, %v2516_v58  ;;  %v2459_v39 = vpop.f32.mrf.mxu1  ;;  %v2395_v47 = vadd.f32 %v2394_v56, %v9297_v6  ;;  %v2020_v50 = vunpack.c.h.bf16 %v13944_v24  ;;  %v1892_v54 = vunpack.c.h.bf16 %v13945_v40  ;;  %v13946_v56 = vld [vmem:[#allocation106_spill] sm:$0xff] }
 0x38b   :  { %13937 = vst [vmem:[#allocation40_spill] sm:$0xff] %v9421_v28  ;;  %2653 = vmatmul.f32.gmra.mxu0 %v13938_v31  ;;  %2718 = vmatmul.f32.gmra.mxu1 %v13939_v9  ;;  %v2460_v58 = vadd.f32 %v2459_v39, %v2395_v47  ;;  %v1888_v9 = vunpack.c.h.bf16 %v13946_v56  ;;  %v1820_v39 = vunpack.c.h.bf16 %v9244_v26  ;;  %v1884_v47 = vunpack.c.h.bf16 %v9246_v48  ;;  %v13951_v56 = vld [vmem:[#allocation91_spill] sm:$0xff] }
 0x38c   :  { %2783 = vmatmul.f32.gmra.mxu2 %v13940_v46  ;;  %v1952_v46 = vunpack.c.h.bf16 %v9239_v7  ;;  %3072 = vmatpush.msrb.mxu3 %v2020_v50  ;;  %v13948_v7 = vld [vmem:[#allocation53_spill] sm:$0xff] }
 0x38d   :  { %2842 = vmatmul.f32.gmra.mxu3 %v13941_v61  ;;  %2942 = vmatpush.msrb.mxu1 %v1892_v54 }
 0x38e   :  { %3008 = vmatpush.msrb.mxu2 %v1952_v46  ;;  %2879 = vmatpush.msrb.mxu0 %v1820_v39  ;;  %v13953_v39 = vld [vmem:[#allocation77_spill] sm:$0xff] }
 0x38f   :  { %v2524_v28 = vpop.f32.mrf.mxu2  ;;  %2943 = vmatpush.msrb.mxu1 %v1888_v9 }
 0x390   :  { %v2525_v31 = vadd.f32 %v2524_v28, %v2460_v58  ;;  %v2583_v61 = vpop.f32.mrf.mxu3  ;;  %v2397_v52 = vpop.f32.mrf.mxu0  ;;  %3009 = vmatpush.msrb.mxu2 %v1948_v55 }
 0x391   :  { %v9435_v3 = vadd.f32 %v2583_v61, %v2519_v60  ;;  %v2462_v32 = vpop.f32.mrf.mxu1  ;;  %v2398_v17 = vadd.f32 %v2397_v52, %v9297_v6  ;;  %2944 = vmatpush.msrb.mxu1 %v1884_v47  ;;  %v2016_v60 = vunpack.c.h.bf16 %v9261_v12  ;;  %v2012_v12 = vunpack.c.h.bf16 %v9272_v0  ;;  %v13954_v47 = vld [vmem:[#allocation78_spill] sm:$0xff] }
 0x393   :  { %13947 = vst [vmem:[#allocation41_spill] sm:$0xff] %v9435_v3  ;;  %2656 = vmatmul.f32.gmra.mxu0 %v8910_v43  ;;  %2721 = vmatmul.f32.gmra.mxu1 %v13948_v7  ;;  %v2463_v26 = vadd.f32 %v2462_v32, %v2398_v17  ;;  %v13952_v32 = vld [vmem:[#allocation95_spill] sm:$0xff] }
 0x394   :  { %2786 = vmatmul.f32.gmra.mxu2 %v8918_v11  ;;  %3073 = vmatpush.msrb.mxu3 %v2016_v60 }
 0x395   :  { %2845 = vmatmul.f32.gmra.mxu3 %v8923_v36 }
 0x396   :  { %3074 = vmatpush.msrb.mxu3 %v2012_v12 }
 0x397   :  { %v2527_v48 = vpop.f32.mrf.mxu2 }
 0x398   :  { %v2528_v52 = vadd.f32 %v2527_v48, %v2463_v26  ;;  %v2586_v28 = vpop.f32.mrf.mxu3  ;;  %v2400_v9 = vpop.f32.mrf.mxu0 }
 0x399   :  { %v9446_v5 = vadd.f32 %v2586_v28, %v2522_v19  ;;  %v2465_v46 = vpop.f32.mrf.mxu1  ;;  %v2401_v61 = vadd.f32 %v2400_v9, %v9297_v6 }
 0x39b   :  { %13949 = vst [vmem:[#allocation35_spill] sm:$0xff] %v9446_v5  ;;  %2659 = vmatmul.f32.gmra.mxu0 %v8932_v62  ;;  %2724 = vmatmul.f32.gmra.mxu1 %v8935_v16  ;;  %v2466_v30 = vadd.f32 %v2465_v46, %v2401_v61  ;;  %v9468_v46 = vld [vmem:[#allocation7 + $0x4] sm:$0xf] }
 0x39c   :  { %2789 = vmatmul.f32.gmra.mxu2 %v8937_v59  ;;  %13956 = vst [vmem:[#allocation55_spill] sm:$0xff] %v9468_v46  ;;  %v9471_v61 = vperm.slane %v9468_v46, 2 }
 0x39d   :  { %2848 = vmatmul.f32.gmra.mxu3 %v8941_v13 }
 0x39f   :  { %v2530_v24 = vpop.f32.mrf.mxu2 }
 0x3a0   :  { %v2531_v50 = vadd.f32 %v2530_v24, %v2466_v30  ;;  %v2589_v58 = vpop.f32.mrf.mxu3  ;;  %v2403_v19 = vpop.f32.mrf.mxu0 }
 0x3a1   :  { %v9454_v40 = vadd.f32 %v2589_v58, %v2525_v31  ;;  %v2468_v54 = vpop.f32.mrf.mxu1  ;;  %v2404_v21 = vadd.f32 %v2403_v19, %v9297_v6 }
 0x3a3   :  { %13950 = vst [vmem:[#allocation42_spill] sm:$0xff] %v9454_v40  ;;  %2662 = vmatmul.f32.gmra.mxu0 %v13951_v56  ;;  %2727 = vmatmul.f32.gmra.mxu1 %v13952_v32  ;;  %v2469_v0 = vadd.f32 %v2468_v54, %v2404_v21  ;;  %v13958_v54 = vld [vmem:[#allocation36_spill] sm:$0xff]  ;;  %v13959_v21 = vld [vmem:[#allocation37_spill] sm:$0xff] }
 0x3a4   :  { %2792 = vmatmul.f32.gmra.mxu2 %v13953_v39 }
 0x3a5   :  { %2851 = vmatmul.f32.gmra.mxu3 %v13954_v47 }
 0x3a7   :  { %v2533_v17 = vpop.f32.mrf.mxu2 }
 0x3a8   :  { %v2534_v55 = vadd.f32 %v2533_v17, %v2469_v0  ;;  %v2592_v60 = vpop.f32.mrf.mxu3  ;;  %v2406_v26 = vpop.f32.mrf.mxu0  ;;  %v13960_v0 = vld [vmem:[#allocation82_spill] sm:$0xff]  ;;  %v9480_v17 = vld [vmem:[#allocation5 + $0xaf0] sm:$0xff] }
 0x3a9   :  { %v9461_v48 = vadd.f32 %v2592_v60, %v2528_v52  ;;  %v2471_v31 = vpop.f32.mrf.mxu1  ;;  %v2407_v28 = vadd.f32 %v2406_v26, %v9297_v6  ;;  %v9482_v60 = vld [vmem:[#allocation5 + $0x8f0] sm:$0xff] }
 0x3aa   :  { %13961 = vst [vmem:[#allocation19_spill] sm:$0xff] %v9482_v60  ;;  %v9484_v26 = vld [vmem:[#allocation5 + $0xbf0] sm:$0xff] }
 0x3ab   :  { %13955 = vst [vmem:[#allocation54_spill] sm:$0xff] %v9461_v48  ;;  %2665 = vmatmul.f32.gmra.mxu0 %v13858_v20  ;;  %2730 = vmatmul.f32.gmra.mxu1 %v13859_v57  ;;  %v2472_v9 = vadd.f32 %v2471_v31, %v2407_v28  ;;  %v3441_v28 = vunpack.c.l.bf16 %v9482_v60 }
 0x3ac   :  { %2795 = vmatmul.f32.gmra.mxu2 %v13860_v4  ;;  %13962 = vst [vmem:[#allocation58_spill] sm:$0xff] %v9484_v26 }
 0x3ad   :  { %2854 = vmatmul.f32.gmra.mxu3 %v13861_v44  ;;  %3648 = vmatpush.msra.mxu0 %v3441_v28 }
 0x3af   :  { %v2536_v12 = vpop.f32.mrf.mxu2 }
 0x3b0   :  { %v2537_v52 = vadd.f32 %v2536_v12, %v2472_v9  ;;  %v2595_v30 = vpop.f32.mrf.mxu3  ;;  %v2621_v24 = vpop.f32.mrf.mxu0  ;;  %v3633_v9 = vunpack.c.l.bf16 %v9484_v26  ;;  %v9489_v12 = vld [vmem:[#allocation5 + $0x9f0] sm:$0xff] }
 0x3b1   :  { %v9473_v58 = vadd.f32 %v2595_v30, %v2531_v50  ;;  %v2686_v6 = vpop.f32.mrf.mxu1  ;;  %v2622_v19 = vadd.f32 %v2621_v24, %v9471_v61  ;;  %v3569_v50 = vunpack.c.l.bf16 %v9480_v17  ;;  %13963 = vst [vmem:[#allocation61_spill] sm:$0xff] %v9489_v12  ;;  %v3505_v24 = vunpack.c.l.bf16 %v9489_v12 }
 0x3b2   :  { %3843 = vmatpush.msra.mxu3 %v3633_v9  ;;  %v9508_v9 = vld [vmem:[#allocation5 + $0x9e0] sm:$0xff] }
 0x3b3   :  { %13957 = vst [vmem:[#allocation43_spill] sm:$0xff] %v9473_v58  ;;  %2880 = vmatmul.f32.vlgmr.msrb.gmra.mxu0 %v8665_v15  ;;  %2945 = vmatmul.f32.vlgmr.msrb.gmra.mxu1 %v13958_v54  ;;  %v2687_v31 = vadd.f32 %v2686_v6, %v2622_v19  ;;  %v13965_v19 = vld [vmem:[#allocation33_spill] sm:$0xff] }
 0x3b4   :  { %3010 = vmatmul.f32.vlgmr.msrb.gmra.mxu2 %v13959_v21  ;;  %3713 = vmatpush.msra.mxu1 %v3505_v24  ;;  %13968 = vst [vmem:[#allocation44_spill] sm:$0xff] %v9508_v9 }
 0x3b5   :  { %2857 = vmatmul.f32.gmra.mxu3 %v13960_v0  ;;  %3778 = vmatpush.msra.mxu2 %v3569_v50  ;;  %v9503_v50 = vld [vmem:[#allocation5 + $0xbe0] sm:$0xff] }
 0x3b6   :  { %13967 = vst [vmem:[#allocation65_spill] sm:$0xff] %v9503_v50 }
 0x3b7   :  { %v2751_v30 = vpop.f32.mrf.mxu2 }
 0x3b8   :  { %v2752_v58 = vadd.f32 %v2751_v30, %v2687_v31  ;;  %v2598_v48 = vpop.f32.mrf.mxu3  ;;  %v2624_v40 = vpop.f32.mrf.mxu0  ;;  %v9499_v31 = vld [vmem:[#allocation5 + $0xae0] sm:$0xff] }
 0x3b9   :  { %v9492_v5 = vadd.f32 %v2598_v48, %v2534_v55  ;;  %v2689_v3 = vpop.f32.mrf.mxu1  ;;  %v2625_v6 = vadd.f32 %v2624_v40, %v9471_v61  ;;  %v9501_v30 = vld [vmem:[#allocation5 + $0x8e0] sm:$0xff]  ;;  %v3565_v48 = vunpack.c.l.bf16 %v9499_v31  ;;  %v3629_v40 = vunpack.c.l.bf16 %v9503_v50 }
 0x3ba   :  { %13966 = vst [vmem:[#allocation63_spill] sm:$0xff] %v9501_v30  ;;  %v3437_v28 = vunpack.c.l.bf16 %v9501_v30 }
 0x3bb   :  { %13964 = vst [vmem:[#allocation62_spill] sm:$0xff] %v9492_v5  ;;  %2883 = vmatmul.f32.gmra.mxu0 %v13872_v63  ;;  %2948 = vmatmul.f32.gmra.mxu1 %v13873_v51  ;;  %v2690_v55 = vadd.f32 %v2689_v3, %v2625_v6  ;;  %v3501_v5 = vunpack.c.l.bf16 %v9508_v9  ;;  %v9518_v6 = vld [vmem:[#allocation5 + $0xad0] sm:$0xff] }
 0x3bc   :  { %3013 = vmatmul.f32.gmra.mxu2 %v13874_v53  ;;  %3649 = vmatpush.msra.mxu0 %v3437_v28  ;;  %13970 = vst [vmem:[#allocation88_spill] sm:$0xff] %v9518_v6  ;;  %v9527_v28 = vld [vmem:[#allocation5 + $0x9d0] sm:$0xff] }
 0x3bd   :  { %2860 = vmatmul.f32.gmra.mxu3 %v13965_v19  ;;  %3779 = vmatpush.msra.mxu2 %v3565_v48  ;;  %v9522_v48 = vld [vmem:[#allocation5 + $0xbd0] sm:$0xff]  ;;  %13973 = vst [vmem:[#allocation92_spill] sm:$0xff] %v9527_v28 }
 0x3be   :  { %3844 = vmatpush.msra.mxu3 %v3629_v40  ;;  %3714 = vmatpush.msra.mxu1 %v3501_v5  ;;  %13972 = vst [vmem:[#allocation90_spill] sm:$0xff] %v9522_v48 }
 0x3bf   :  { %v2754_v24 = vpop.f32.mrf.mxu2 }
 0x3c0   :  { %v2755_v46 = vadd.f32 %v2754_v24, %v2690_v55  ;;  %v2601_v19 = vpop.f32.mrf.mxu3  ;;  %v2627_v12 = vpop.f32.mrf.mxu0  ;;  %v9520_v55 = vld [vmem:[#allocation5 + $0x8d0] sm:$0xff]  ;;  %v3497_v24 = vunpack.c.l.bf16 %v9527_v28 }
 0x3c1   :  { %v9511_v26 = vadd.f32 %v2601_v19, %v2537_v52  ;;  %v2692_v60 = vpop.f32.mrf.mxu1  ;;  %v2628_v3 = vadd.f32 %v2627_v12, %v9471_v61  ;;  %13971 = vst [vmem:[#allocation89_spill] sm:$0xff] %v9520_v55  ;;  %v3561_v19 = vunpack.c.l.bf16 %v9518_v6  ;;  %v3433_v5 = vunpack.c.l.bf16 %v9520_v55 }
 0x3c2   :  { %v3625_v12 = vunpack.c.l.bf16 %v9522_v48  ;;  %3715 = vmatpush.msra.mxu1 %v3497_v24 }
 0x3c3   :  { %13969 = vst [vmem:[#allocation20_spill] sm:$0xff] %v9511_v26  ;;  %2886 = vmatmul.f32.gmra.mxu0 %v13878_v41  ;;  %2951 = vmatmul.f32.gmra.mxu1 %v13879_v37  ;;  %v2693_v52 = vadd.f32 %v2692_v60, %v2628_v3  ;;  %v9537_v3 = vld [vmem:[#allocation5 + $0xac0] sm:$0xff] }
 0x3c4   :  { %3016 = vmatmul.f32.gmra.mxu2 %v13880_v18  ;;  %3650 = vmatpush.msra.mxu0 %v3433_v5  ;;  %13974 = vst [vmem:[#allocation93_spill] sm:$0xff] %v9537_v3 }
 0x3c5   :  { %3075 = vmatmul.f32.vlgmr.msrb.gmra.mxu3 %v13881_v23  ;;  %3780 = vmatpush.msra.mxu2 %v3561_v19  ;;  %v9541_v19 = vld [vmem:[#allocation5 + $0xbc0] sm:$0xff] }
 0x3c6   :  { %3845 = vmatpush.msra.mxu3 %v3625_v12  ;;  %13976 = vst [vmem:[#allocation29_spill] sm:$0xff] %v9541_v19  ;;  %v9546_v12 = vld [vmem:[#allocation5 + $0x9c0] sm:$0xff] }
 0x3c7   :  { %v2757_v40 = vpop.f32.mrf.mxu2  ;;  %13977 = vst [vmem:[#allocation59_spill] sm:$0xff] %v9546_v12  ;;  %v3493_v24 = vunpack.c.l.bf16 %v9546_v12 }
 0x3c8   :  { %v2758_v26 = vadd.f32 %v2757_v40, %v2693_v52  ;;  %v2816_v23 = vpop.f32.mrf.mxu3  ;;  %v2630_v9 = vpop.f32.mrf.mxu0  ;;  %v9539_v52 = vld [vmem:[#allocation5 + $0x8c0] sm:$0xff] }
 0x3c9   :  { %v9530_v50 = vadd.f32 %v2816_v23, %v2752_v58  ;;  %v2695_v30 = vpop.f32.mrf.mxu1  ;;  %v2631_v60 = vadd.f32 %v2630_v9, %v9471_v61  ;;  %13975 = vst [vmem:[#allocation94_spill] sm:$0xff] %v9539_v52  ;;  %v3557_v58 = vunpack.c.l.bf16 %v9537_v3  ;;  %v3429_v5 = vunpack.c.l.bf16 %v9539_v52  ;;  %3716 = vmatpush.msra.mxu1 %v3493_v24 }
 0x3ca   :  { %v3621_v9 = vunpack.c.l.bf16 %v9541_v19 }
 0x3cb   :  { %2889 = vmatmul.f32.gmra.mxu0 %v13883_v34  ;;  %2954 = vmatmul.f32.gmra.mxu1 %v13884_v25  ;;  %v2696_v23 = vadd.f32 %v2695_v30, %v2631_v60  ;;  %v9556_v60 = vld [vmem:[#allocation5 + $0xab0] sm:$0xff] }
 0x3cc   :  { %3019 = vmatmul.f32.gmra.mxu2 %v13885_v35  ;;  %3651 = vmatpush.msra.mxu0 %v3429_v5  ;;  %13978 = vst [vmem:[#allocation34_spill] sm:$0xff] %v9556_v60 }
 0x3cd   :  { %3078 = vmatmul.f32.gmra.mxu3 %v13886_v49  ;;  %3781 = vmatpush.msra.mxu2 %v3557_v58  ;;  %v9560_v58 = vld [vmem:[#allocation5 + $0xbb0] sm:$0xff] }
 0x3ce   :  { %3846 = vmatpush.msra.mxu3 %v3621_v9  ;;  %13980 = vst [vmem:[#allocation66_spill] sm:$0xff] %v9560_v58  ;;  %v9565_v9 = vld [vmem:[#allocation5 + $0x9b0] sm:$0xff] }
 0x3cf   :  { %v2760_v40 = vpop.f32.mrf.mxu2  ;;  %13981 = vst [vmem:[#allocation97_spill] sm:$0xff] %v9565_v9  ;;  %v3489_v24 = vunpack.c.l.bf16 %v9565_v9 }
 0x3d0   :  { %v2761_v28 = vadd.f32 %v2760_v40, %v2696_v23  ;;  %v2819_v49 = vpop.f32.mrf.mxu3  ;;  %v2633_v48 = vpop.f32.mrf.mxu0  ;;  %v9558_v23 = vld [vmem:[#allocation5 + $0x8b0] sm:$0xff] }
 0x3d1   :  { %v9549_v55 = vadd.f32 %v2819_v49, %v2755_v46  ;;  %v2698_v6 = vpop.f32.mrf.mxu1  ;;  %v2634_v30 = vadd.f32 %v2633_v48, %v9471_v61  ;;  %13979 = vst [vmem:[#allocation13_spill] sm:$0xff] %v9558_v23  ;;  %v3553_v46 = vunpack.c.l.bf16 %v9556_v60  ;;  %v3425_v5 = vunpack.c.l.bf16 %v9558_v23  ;;  %3717 = vmatpush.msra.mxu1 %v3489_v24 }
 0x3d2   :  { %v3617_v48 = vunpack.c.l.bf16 %v9560_v58 }
 0x3d3   :  { %2892 = vmatmul.f32.gmra.mxu0 %v13888_v2  ;;  %2957 = vmatmul.f32.gmra.mxu1 %v13889_v33  ;;  %v2699_v49 = vadd.f32 %v2698_v6, %v2634_v30  ;;  %v9575_v30 = vld [vmem:[#allocation5 + $0xaa0] sm:$0xff] }
 0x3d4   :  { %3022 = vmatmul.f32.gmra.mxu2 %v13890_v1  ;;  %3652 = vmatpush.msra.mxu0 %v3425_v5  ;;  %13982 = vst [vmem:[#allocation98_spill] sm:$0xff] %v9575_v30 }
 0x3d5   :  { %3081 = vmatmul.f32.gmra.mxu3 %v13891_v10  ;;  %3782 = vmatpush.msra.mxu2 %v3553_v46  ;;  %v9579_v46 = vld [vmem:[#allocation5 + $0xba0] sm:$0xff] }
 0x3d6   :  { %3847 = vmatpush.msra.mxu3 %v3617_v48  ;;  %13984 = vst [vmem:[#allocation100_spill] sm:$0xff] %v9579_v46  ;;  %v9584_v48 = vld [vmem:[#allocation5 + $0x9a0] sm:$0xff] }
 0x3d7   :  { %v2763_v40 = vpop.f32.mrf.mxu2  ;;  %13985 = vst [vmem:[#allocation102_spill] sm:$0xff] %v9584_v48  ;;  %v3485_v24 = vunpack.c.l.bf16 %v9584_v48 }
 0x3d8   :  { %v2764_v12 = vadd.f32 %v2763_v40, %v2699_v49  ;;  %v2822_v10 = vpop.f32.mrf.mxu3  ;;  %v2636_v19 = vpop.f32.mrf.mxu0  ;;  %v9577_v49 = vld [vmem:[#allocation5 + $0x8a0] sm:$0xff] }
 0x3d9   :  { %v9568_v52 = vadd.f32 %v2822_v10, %v2758_v26  ;;  %v2701_v3 = vpop.f32.mrf.mxu1  ;;  %v2637_v6 = vadd.f32 %v2636_v19, %v9471_v61  ;;  %13983 = vst [vmem:[#allocation99_spill] sm:$0xff] %v9577_v49  ;;  %v3549_v26 = vunpack.c.l.bf16 %v9575_v30  ;;  %v3421_v5 = vunpack.c.l.bf16 %v9577_v49  ;;  %3718 = vmatpush.msra.mxu1 %v3485_v24 }
 0x3da   :  { %v3613_v19 = vunpack.c.l.bf16 %v9579_v46 }
 0x3db   :  { %2895 = vmatmul.f32.gmra.mxu0 %v13893_v42  ;;  %2960 = vmatmul.f32.gmra.mxu1 %v13894_v8  ;;  %v2702_v10 = vadd.f32 %v2701_v3, %v2637_v6  ;;  %v9594_v6 = vld [vmem:[#allocation5 + $0xa90] sm:$0xff] }
 0x3dc   :  { %3025 = vmatmul.f32.gmra.mxu2 %v13895_v14  ;;  %3653 = vmatpush.msra.mxu0 %v3421_v5  ;;  %13986 = vst [vmem:[#allocation103_spill] sm:$0xff] %v9594_v6 }
 0x3dd   :  { %3084 = vmatmul.f32.gmra.mxu3 %v13896_v27  ;;  %3783 = vmatpush.msra.mxu2 %v3549_v26  ;;  %v9598_v26 = vld [vmem:[#allocation5 + $0xb90] sm:$0xff] }
 0x3de   :  { %3848 = vmatpush.msra.mxu3 %v3613_v19  ;;  %13988 = vst [vmem:[#allocation104_spill] sm:$0xff] %v9598_v26  ;;  %v9603_v19 = vld [vmem:[#allocation5 + $0x990] sm:$0xff] }
 0x3df   :  { %v2766_v40 = vpop.f32.mrf.mxu2  ;;  %13989 = vst [vmem:[#allocation106_spill] sm:$0xff] %v9603_v19  ;;  %v3481_v24 = vunpack.c.l.bf16 %v9603_v19 }
 0x3e0   :  { %v2767_v9 = vadd.f32 %v2766_v40, %v2702_v10  ;;  %v2825_v27 = vpop.f32.mrf.mxu3  ;;  %v2639_v58 = vpop.f32.mrf.mxu0  ;;  %v9596_v10 = vld [vmem:[#allocation5 + $0x890] sm:$0xff] }
 0x3e1   :  { %v9587_v23 = vadd.f32 %v2825_v27, %v2761_v28  ;;  %v2704_v60 = vpop.f32.mrf.mxu1  ;;  %v2640_v3 = vadd.f32 %v2639_v58, %v9471_v61  ;;  %13987 = vst [vmem:[#allocation105_spill] sm:$0xff] %v9596_v10  ;;  %v3545_v28 = vunpack.c.l.bf16 %v9594_v6  ;;  %v3417_v5 = vunpack.c.l.bf16 %v9596_v10  ;;  %3719 = vmatpush.msra.mxu1 %v3481_v24  ;;  %v13992_v10 = vld [vmem:[#allocation18_spill] sm:$0xff]  ;;  %v13993_v6 = vld [vmem:[#allocation69_spill] sm:$0xff] }
 0x3e2   :  { %v3609_v58 = vunpack.c.l.bf16 %v9598_v26  ;;  %v13991_v26 = vld [vmem:[#allocation47_spill] sm:$0xff] }
 0x3e3   :  { %2898 = vmatmul.f32.gmra.mxu0 %v13898_v22  ;;  %2963 = vmatmul.f32.gmra.mxu1 %v13899_v38  ;;  %v2705_v27 = vadd.f32 %v2704_v60, %v2640_v3  ;;  %v13990_v3 = vld [vmem:[#allocation68_spill] sm:$0xff] }
 0x3e4   :  { %3028 = vmatmul.f32.gmra.mxu2 %v13900_v45  ;;  %3654 = vmatpush.msra.mxu0 %v3417_v5  ;;  %v9727_v38 = vld [vmem:[#allocation5 + $0x910] sm:$0xff] }
 0x3e5   :  { %3087 = vmatmul.f32.gmra.mxu3 %v13901_v29  ;;  %3784 = vmatpush.msra.mxu2 %v3545_v28  ;;  %v9617_v28 = vld [vmem:[#allocation5 + $0xb80] sm:$0xff]  ;;  %14041 = vst [vmem:[#allocation137_spill] sm:$0xff] %v9727_v38 }
 0x3e6   :  { %3849 = vmatpush.msra.mxu3 %v3609_v58  ;;  %13996 = vst [vmem:[#allocation36_spill] sm:$0xff] %v9617_v28  ;;  %v9622_v58 = vld [vmem:[#allocation5 + $0x980] sm:$0xff] }
 0x3e7   :  { %v2769_v40 = vpop.f32.mrf.mxu2  ;;  %13997 = vst [vmem:[#allocation37_spill] sm:$0xff] %v9622_v58  ;;  %v3477_v19 = vunpack.c.l.bf16 %v9622_v58 }
 0x3e8   :  { %v2770_v48 = vadd.f32 %v2769_v40, %v2705_v27  ;;  %v2828_v29 = vpop.f32.mrf.mxu3  ;;  %v2642_v46 = vpop.f32.mrf.mxu0  ;;  %v9613_v27 = vld [vmem:[#allocation5 + $0xa80] sm:$0xff] }
 0x3e9   :  { %v9606_v49 = vadd.f32 %v2828_v29, %v2764_v12  ;;  %v2707_v30 = vpop.f32.mrf.mxu1  ;;  %v2643_v60 = vadd.f32 %v2642_v46, %v9471_v61  ;;  %13994 = vst [vmem:[#allocation53_spill] sm:$0xff] %v9613_v27  ;;  %v9615_v40 = vld [vmem:[#allocation5 + $0x880] sm:$0xff]  ;;  %v3541_v12 = vunpack.c.l.bf16 %v9613_v27  ;;  %v3605_v46 = vunpack.c.l.bf16 %v9617_v28  ;;  %3720 = vmatpush.msra.mxu1 %v3477_v19  ;;  %v13999_v28 = vld [vmem:[#allocation23_spill] sm:$0xff]  ;;  %v14001_v27 = vld [vmem:[#allocation49_spill] sm:$0xff] }
 0x3ea   :  { %13995 = vst [vmem:[#allocation91_spill] sm:$0xff] %v9615_v40  ;;  %v3413_v5 = vunpack.c.l.bf16 %v9615_v40  ;;  %v14000_v40 = vld [vmem:[#allocation70_spill] sm:$0xff] }
 0x3eb   :  { %2901 = vmatmul.f32.gmra.mxu0 %v13990_v3  ;;  %2966 = vmatmul.f32.gmra.mxu1 %v13991_v26  ;;  %v2708_v29 = vadd.f32 %v2707_v30, %v2643_v60  ;;  %v13998_v60 = vld [vmem:[#allocation48_spill] sm:$0xff] }
 0x3ec   :  { %3031 = vmatmul.f32.gmra.mxu2 %v13992_v10  ;;  %3655 = vmatpush.msra.mxu0 %v3413_v5  ;;  %v9641_v5 = vld [vmem:[#allocation5 + $0x970] sm:$0xff] }
 0x3ed   :  { %3090 = vmatmul.f32.gmra.mxu3 %v13993_v6  ;;  %3785 = vmatpush.msra.mxu2 %v3541_v12  ;;  %v9636_v12 = vld [vmem:[#allocation5 + $0xb70] sm:$0xff]  ;;  %14005 = vst [vmem:[#allocation113_spill] sm:$0xff] %v9641_v5  ;;  %v3473_v58 = vunpack.c.l.bf16 %v9641_v5  ;;  %v14011_v5 = vld [vmem:[#allocation22_spill] sm:$0xff] }
 0x3ee   :  { %3850 = vmatpush.msra.mxu3 %v3605_v46  ;;  %14004 = vst [vmem:[#allocation112_spill] sm:$0xff] %v9636_v12 }
 0x3ef   :  { %v2772_v24 = vpop.f32.mrf.mxu2  ;;  %3721 = vmatpush.msra.mxu1 %v3473_v58 }
 0x3f0   :  { %v2773_v10 = vadd.f32 %v2772_v24, %v2708_v29  ;;  %v2831_v6 = vpop.f32.mrf.mxu3  ;;  %v2645_v26 = vpop.f32.mrf.mxu0  ;;  %v9632_v29 = vld [vmem:[#allocation5 + $0xa70] sm:$0xff] }
 0x3f1   :  { %v9625_v3 = vadd.f32 %v2831_v6, %v2767_v9  ;;  %v2710_v45 = vpop.f32.mrf.mxu1  ;;  %v2646_v30 = vadd.f32 %v2645_v26, %v9471_v61  ;;  %14002 = vst [vmem:[#allocation110_spill] sm:$0xff] %v9632_v29  ;;  %v9634_v24 = vld [vmem:[#allocation5 + $0x870] sm:$0xff]  ;;  %v3537_v6 = vunpack.c.l.bf16 %v9632_v29  ;;  %v3601_v26 = vunpack.c.l.bf16 %v9636_v12  ;;  %v14009_v12 = vld [vmem:[#allocation71_spill] sm:$0xff]  ;;  %v14010_v29 = vld [vmem:[#allocation50_spill] sm:$0xff] }
 0x3f2   :  { %14003 = vst [vmem:[#allocation111_spill] sm:$0xff] %v9634_v24  ;;  %v3409_v19 = vunpack.c.l.bf16 %v9634_v24  ;;  %v14008_v24 = vld [vmem:[#allocation21_spill] sm:$0xff] }
 0x3f3   :  { %2904 = vmatmul.f32.gmra.mxu0 %v13998_v60  ;;  %2969 = vmatmul.f32.gmra.mxu1 %v13999_v28  ;;  %v2711_v9 = vadd.f32 %v2710_v45, %v2646_v30 }
 0x3f4   :  { %3034 = vmatmul.f32.gmra.mxu2 %v14000_v40  ;;  %3656 = vmatpush.msra.mxu0 %v3409_v19  ;;  %v9662_v19 = vld [vmem:[#allocation5 + $0x960] sm:$0xff] }
 0x3f5   :  { %3093 = vmatmul.f32.gmra.mxu3 %v14001_v27  ;;  %3786 = vmatpush.msra.mxu2 %v3537_v6  ;;  %v9657_v6 = vld [vmem:[#allocation5 + $0xb60] sm:$0xff]  ;;  %14015 = vst [vmem:[#allocation119_spill] sm:$0xff] %v9662_v19 }
 0x3f6   :  { %3851 = vmatpush.msra.mxu3 %v3601_v26  ;;  %14014 = vst [vmem:[#allocation118_spill] sm:$0xff] %v9657_v6 }
 0x3f7   :  { %v2775_v46 = vpop.f32.mrf.mxu2 }
 0x3f8   :  { %v9644_v40 = vadd.f32 %v2775_v46, %v2711_v9  ;;  %v2834_v27 = vpop.f32.mrf.mxu3  ;;  %v2648_v28 = vpop.f32.mrf.mxu0  ;;  %v9653_v9 = vld [vmem:[#allocation5 + $0xa60] sm:$0xff] }
 0x3f9   :  { %v9646_v60 = vadd.f32 %v2834_v27, %v2770_v48  ;;  %v2713_v45 = vpop.f32.mrf.mxu1  ;;  %v2649_v30 = vadd.f32 %v2648_v28, %v9471_v61  ;;  %14012 = vst [vmem:[#allocation116_spill] sm:$0xff] %v9653_v9  ;;  %v9655_v46 = vld [vmem:[#allocation5 + $0x860] sm:$0xff]  ;;  %v3533_v27 = vunpack.c.l.bf16 %v9653_v9  ;;  %v3597_v28 = vunpack.c.l.bf16 %v9657_v6  ;;  %v14019_v6 = vld [vmem:[#allocation51_spill] sm:$0xff] }
 0x3fa   :  { %14006 = vst [vmem:[#allocation114_spill] sm:$0xff] %v9644_v40  ;;  %v3405_v58 = vunpack.c.l.bf16 %v9655_v46  ;;  %v14020_v9 = vld [vmem:[#allocation26_spill] sm:$0xff] }
 0x3fb   :  { %14007 = vst [vmem:[#allocation115_spill] sm:$0xff] %v9646_v60  ;;  %2907 = vmatmul.f32.gmra.mxu0 %v14008_v24  ;;  %2972 = vmatmul.f32.gmra.mxu1 %v14009_v12  ;;  %v2714_v48 = vadd.f32 %v2713_v45, %v2649_v30  ;;  %v14040_v60 = vld [vmem:[#allocation75_spill] sm:$0xff] }
 0x3fc   :  { %3037 = vmatmul.f32.gmra.mxu2 %v14010_v29  ;;  %14013 = vst [vmem:[#allocation117_spill] sm:$0xff] %v9655_v46  ;;  %v3469_v29 = vunpack.c.l.bf16 %v9662_v19  ;;  %3657 = vmatpush.msra.mxu0 %v3405_v58  ;;  %v14018_v46 = vld [vmem:[#allocation72_spill] sm:$0xff]  ;;  %v14021_v19 = vld [vmem:[#allocation73_spill] sm:$0xff] }
 0x3fd   :  { %3096 = vmatmul.f32.gmra.mxu3 %v14011_v5  ;;  %3787 = vmatpush.msra.mxu2 %v3533_v27  ;;  %v9678_v27 = vld [vmem:[#allocation5 + $0xb50] sm:$0xff] }
 0x3fe   :  { %3852 = vmatpush.msra.mxu3 %v3597_v28  ;;  %3722 = vmatpush.msra.mxu1 %v3469_v29  ;;  %14024 = vst [vmem:[#allocation124_spill] sm:$0xff] %v9678_v27  ;;  %v9683_v58 = vld [vmem:[#allocation5 + $0x950] sm:$0xff] }
 0x3ff   :  { %v2778_v26 = vpop.f32.mrf.mxu2  ;;  %14025 = vst [vmem:[#allocation125_spill] sm:$0xff] %v9683_v58 }
 0x400   :  { %v9665_v12 = vadd.f32 %v2778_v26, %v2714_v48  ;;  %v2837_v5 = vpop.f32.mrf.mxu3  ;;  %v2651_v24 = vpop.f32.mrf.mxu0  ;;  %v9674_v48 = vld [vmem:[#allocation5 + $0xa50] sm:$0xff] }
 0x401   :  { %v9667_v40 = vadd.f32 %v2837_v5, %v2773_v10  ;;  %v2716_v45 = vpop.f32.mrf.mxu1  ;;  %v2652_v30 = vadd.f32 %v2651_v24, %v9471_v61  ;;  %14022 = vst [vmem:[#allocation122_spill] sm:$0xff] %v9674_v48  ;;  %v9676_v26 = vld [vmem:[#allocation5 + $0x850] sm:$0xff]  ;;  %v3529_v5 = vunpack.c.l.bf16 %v9674_v48  ;;  %v3593_v24 = vunpack.c.l.bf16 %v9678_v27 }
 0x402   :  { %14016 = vst [vmem:[#allocation120_spill] sm:$0xff] %v9665_v12  ;;  %v3401_v29 = vunpack.c.l.bf16 %v9676_v26  ;;  %v9690_v12 = vld [vmem:[#allocation5 + $0xa40] sm:$0xff]  ;;  %v9700_v48 = vld [vmem:[#allocation5 + $0x830] sm:$0xff] }
 0x403   :  { %14017 = vst [vmem:[#allocation121_spill] sm:$0xff] %v9667_v40  ;;  %2910 = vmatmul.f32.gmra.mxu0 %v14018_v46  ;;  %2975 = vmatmul.f32.gmra.mxu1 %v14019_v6  ;;  %v2717_v10 = vadd.f32 %v2716_v45, %v2652_v30  ;;  %v9692_v45 = vld [vmem:[#allocation5 + $0x840] sm:$0xff]  ;;  %v3525_v27 = vunpack.c.l.bf16 %v9690_v12 }
 0x404   :  { %3040 = vmatmul.f32.gmra.mxu2 %v14020_v9  ;;  %14023 = vst [vmem:[#allocation123_spill] sm:$0xff] %v9676_v26  ;;  %v3465_v9 = vunpack.c.l.bf16 %v9683_v58  ;;  %3658 = vmatpush.msra.mxu0 %v3401_v29  ;;  %v9694_v30 = vld [vmem:[#allocation5 + $0x940] sm:$0xff]  ;;  %v3397_v58 = vunpack.c.l.bf16 %v9692_v45  ;;  %v9704_v29 = vld [vmem:[#allocation5 + $0xa30] sm:$0xff] }
 0x405   :  { %3099 = vmatmul.f32.gmra.mxu3 %v14021_v19  ;;  %3788 = vmatpush.msra.mxu2 %v3529_v5  ;;  %14028 = vst [vmem:[#allocation128_spill] sm:$0xff] %v9690_v12  ;;  %v9702_v5 = vld [vmem:[#allocation5 + $0x930] sm:$0xff]  ;;  %v9714_v12 = vld [vmem:[#allocation5 + $0x920] sm:$0xff] }
 0x406   :  { %14029 = vst [vmem:[#allocation129_spill] sm:$0xff] %v9692_v45  ;;  %3853 = vmatpush.msra.mxu3 %v3593_v24  ;;  %3723 = vmatpush.msra.mxu1 %v3465_v9  ;;  %v3393_v9 = vunpack.c.l.bf16 %v9700_v48  ;;  %v14036_v24 = vld [vmem:[#allocation74_spill] sm:$0xff]  ;;  %v3457_v45 = vunpack.c.l.bf16 %v9702_v5 }
 0x407   :  { %v2781_v28 = vpop.f32.mrf.mxu2  ;;  %14030 = vst [vmem:[#allocation130_spill] sm:$0xff] %v9694_v30  ;;  %3659 = vmatpush.msra.mxu0 %v3397_v58  ;;  %v9716_v40 = vld [vmem:[#allocation5 + $0xa20] sm:$0xff]  ;;  %3789 = vmatpush.msra.mxu2 %v3525_v27  ;;  %v9729_v27 = vld [vmem:[#allocation5 + $0xa10] sm:$0xff] }
 0x408   :  { %v9686_v6 = vadd.f32 %v2781_v28, %v2717_v10  ;;  %v9688_v19 = vpop.f32.mrf.mxu3  ;;  %v2654_v46 = vpop.f32.mrf.mxu0  ;;  %v3461_v28 = vunpack.c.l.bf16 %v9694_v30  ;;  %14031 = vst [vmem:[#allocation131_spill] sm:$0xff] %v9700_v48  ;;  %v9712_v30 = vld [vmem:[#allocation5 + $0x820] sm:$0xff] }
 0x409   :  { %14027 = vst [vmem:[#allocation127_spill] sm:$0xff] %v9688_v19  ;;  %v2719_v26 = vpop.f32.mrf.mxu1  ;;  %v2655_v10 = vadd.f32 %v2654_v46, %v9471_v61  ;;  %v14035_v19 = vld [vmem:[#allocation24_spill] sm:$0xff]  ;;  %v3521_v46 = vunpack.c.l.bf16 %v9704_v29  ;;  %v3389_v48 = vunpack.c.l.bf16 %v9712_v30  ;;  %3660 = vmatpush.msra.mxu0 %v3393_v9 }
 0x40a   :  { %14026 = vst [vmem:[#allocation126_spill] sm:$0xff] %v9686_v6  ;;  %v14034_v6 = vld [vmem:[#allocation52_spill] sm:$0xff]  ;;  %3724 = vmatpush.msra.mxu1 %v3461_v28  ;;  %v9738_v28 = vld [vmem:[#allocation5 + $0x900] sm:$0xff] }
 0x40b   :  { %14032 = vst [vmem:[#allocation132_spill] sm:$0xff] %v9702_v5  ;;  %2913 = vmatmul.f32.gmra.mxu0 %v14034_v6  ;;  %2978 = vmatmul.f32.gmra.mxu1 %v14035_v19  ;;  %v9719_v6 = vld [vmem:[#allocation5 + $0xb40] sm:$0xff]  ;;  %v2720_v58 = vadd.f32 %v2719_v26, %v2655_v10  ;;  %v9725_v19 = vld [vmem:[#allocation5 + $0x810] sm:$0xff] }
 0x40c   :  { %14033 = vst [vmem:[#allocation133_spill] sm:$0xff] %v9704_v29  ;;  %3043 = vmatmul.f32.gmra.mxu2 %v14036_v24  ;;  %v3517_v24 = vunpack.c.l.bf16 %v9716_v40  ;;  %v3589_v5 = vunpack.c.l.bf16 %v9719_v6  ;;  %v3453_v29 = vunpack.c.l.bf16 %v9714_v12  ;;  %3725 = vmatpush.msra.mxu1 %v3457_v45  ;;  %v3385_v26 = vunpack.c.l.bf16 %v9725_v19  ;;  %v9736_v10 = vld [vmem:[#allocation5 + $0x800] sm:$0xff] }
 0x40d   :  { %14037 = vst [vmem:[#allocation134_spill] sm:$0xff] %v9712_v30  ;;  %3102 = vmatmul.f32.gmra.mxu3 %v14040_v60  ;;  %3790 = vmatpush.msra.mxu2 %v3521_v46  ;;  %v3449_v46 = vunpack.c.l.bf16 %v9727_v38  ;;  %v3381_v45 = vunpack.c.l.bf16 %v9736_v10 }
 0x40e   :  { %14038 = vst [vmem:[#allocation135_spill] sm:$0xff] %v9714_v12  ;;  %3854 = vmatpush.msra.mxu3 %v3589_v5  ;;  %3661 = vmatpush.msra.mxu0 %v3389_v48  ;;  %v9741_v12 = vld [vmem:[#allocation5 + $0xa00] sm:$0xff]  ;;  %v3445_v5 = vunpack.c.l.bf16 %v9738_v28 }
 0x40f   :  { %14039 = vst [vmem:[#allocation136_spill] sm:$0xff] %v9716_v40  ;;  %v2784_v22 = vpop.f32.mrf.mxu2  ;;  %3791 = vmatpush.msra.mxu2 %v3517_v24  ;;  %3726 = vmatpush.msra.mxu1 %v3453_v29  ;;  %v3509_v48 = vunpack.c.l.bf16 %v9741_v12 }
 0x410   :  { %14042 = vst [vmem:[#allocation138_spill] sm:$0xff] %v9729_v27  ;;  %v9731_v60 = vadd.f32 %v2784_v22, %v2720_v58  ;;  %v9733_v30 = vpop.f32.mrf.mxu3  ;;  %v2657_v40 = vpop.f32.mrf.mxu0  ;;  %v3513_v58 = vunpack.c.l.bf16 %v9729_v27  ;;  %3662 = vmatpush.msra.mxu0 %v3385_v26 }
 0x411   :  { %14043 = vst [vmem:[#allocation139_spill] sm:$0xff] %v9736_v10  ;;  %v2722_v9 = vpop.f32.mrf.mxu1  ;;  %v2658_v22 = vadd.f32 %v2657_v40, %v9471_v61  ;;  %3727 = vmatpush.msra.mxu1 %v3449_v46  ;;  %v9752_v40 = vld [vmem:[#allocation5 + $0xb30] sm:$0xff] }
 0x412   :  { %14044 = vst [vmem:[#allocation140_spill] sm:$0xff] %v9738_v28  ;;  %3792 = vmatpush.msra.mxu2 %v3513_v58  ;;  %3663 = vmatpush.msra.mxu0 %v3381_v45  ;;  %v3585_v24 = vunpack.c.l.bf16 %v9752_v40 }
 0x413   :  { %2916 = vmatmul.f32.gmra.mxu0 %v8910_v43  ;;  %2981 = vmatmul.f32.gmra.mxu1 %v13948_v7  ;;  %v2723_v29 = vadd.f32 %v2722_v9, %v2658_v22  ;;  %v9764_v9 = vld [vmem:[#allocation5 + $0xb20] sm:$0xff] }
 0x414   :  { %3046 = vmatmul.f32.gmra.mxu2 %v8918_v11  ;;  %3728 = vmatpush.msra.mxu1 %v3445_v5  ;;  %14045 = vst [vmem:[#allocation141_spill] sm:$0xff] %v9764_v9  ;;  %v3581_v46 = vunpack.c.l.bf16 %v9764_v9 }
 0x415   :  { %3105 = vmatmul.f32.gmra.mxu3 %v8923_v36  ;;  %3793 = vmatpush.msra.mxu2 %v3509_v48 }
 0x416   :  { %3855 = vmatpush.msra.mxu3 %v3585_v24 }
 0x417   :  { %v2787_v10 = vpop.f32.mrf.mxu2 }
 0x418   :  { %v9755_v27 = vadd.f32 %v2787_v10, %v2723_v29  ;;  %v9757_v28 = vpop.f32.mrf.mxu3  ;;  %v2660_v38 = vpop.f32.mrf.mxu0  ;;  %3856 = vmatpush.msra.mxu3 %v3581_v46 }
 0x419   :  { %v2725_v26 = vpop.f32.mrf.mxu1  ;;  %v2661_v36 = vadd.f32 %v2660_v38, %v9471_v61 }
 0x41b   :  { %2919 = vmatmul.f32.gmra.mxu0 %v8932_v62  ;;  %2984 = vmatmul.f32.gmra.mxu1 %v8935_v16  ;;  %v2726_v10 = vadd.f32 %v2725_v26, %v2661_v36  ;;  %v9776_v36 = vld [vmem:[#allocation5 + $0xb10] sm:$0xff]  ;;  %v14046_v26 = vld [vmem:[#allocation27_spill] sm:$0xff] }
 0x41c   :  { %3049 = vmatmul.f32.gmra.mxu2 %v8937_v59  ;;  %v3577_v24 = vunpack.c.l.bf16 %v9776_v36 }
 0x41d   :  { %3108 = vmatmul.f32.gmra.mxu3 %v8941_v13 }
 0x41e   :  { %3857 = vmatpush.msra.mxu3 %v3577_v24 }
 0x41f   :  { %v2790_v22 = vpop.f32.mrf.mxu2 }
 0x420   :  { %v9767_v58 = vadd.f32 %v2790_v22, %v2726_v10  ;;  %v9769_v45 = vpop.f32.mrf.mxu3  ;;  %v2663_v5 = vpop.f32.mrf.mxu0  ;;  %v3124_v10 = vadd.f32 %v8665_v15, %v14046_v26  ;;  %v14047_v22 = vld [vmem:[#allocation31_spill] sm:$0xff]  ;;  %v9794_v15 = vld [vmem:[#allocation5 + $0xb00] sm:$0xff] }
 0x421   :  { %v2728_v38 = vpop.f32.mrf.mxu1  ;;  %v2664_v48 = vadd.f32 %v2663_v5, %v9471_v61  ;;  %v3125_v5 = vadd.f32 %v13958_v54, %v14047_v22 }
 0x422   :  { %6602 = vtanh.f32 %v3124_v10 }
 0x423   :  { %2922 = vmatmul.f32.gmra.mxu0 %v13951_v56  ;;  %2987 = vmatmul.f32.gmra.mxu1 %v13952_v32  ;;  %v2729_v29 = vadd.f32 %v2728_v38, %v2664_v48  ;;  %6604 = vtanh.f32 %v3125_v5  ;;  %v3573_v48 = vunpack.c.l.bf16 %v9794_v15 }
 0x424   :  { %3052 = vmatmul.f32.gmra.mxu2 %v13953_v39 }
 0x425   :  { %3111 = vmatmul.f32.gmra.mxu3 %v13954_v47  ;;  %v3126_v47 = vadd.f32 %v13959_v21, %v9530_v50  ;;  %v14048_v21 = vld [vmem:[#allocation85_spill] sm:$0xff] }
 0x426   :  { %v3128_v50 = vadd.f32 %v13872_v63, %v14048_v21  ;;  %3858 = vmatpush.msra.mxu3 %v3573_v48  ;;  %v3570_v63 = vunpack.c.h.bf16 %v9480_v17  ;;  %v14055_v21 = vld [vmem:[#allocation61_spill] sm:$0xff] }
 0x427   :  { %v2793_v46 = vpop.f32.mrf.mxu2  ;;  %6606 = vtanh.f32 %v3126_v47 }
 0x428   :  { %v9783_v13 = vadd.f32 %v2793_v46, %v2729_v29  ;;  %v9785_v9 = vpop.f32.mrf.mxu3  ;;  %v2666_v32 = vpop.f32.mrf.mxu0  ;;  %6608 = vtanh.f32 %v3128_v50  ;;  %v3506_v50 = vunpack.c.h.bf16 %v14055_v21  ;;  %4038 = vmatpush.msrb.mxu2 %v3570_v63  ;;  %v3566_v63 = vunpack.c.h.bf16 %v9499_v31 }
 0x429   :  { %v2731_v39 = vpop.f32.mrf.mxu1  ;;  %v2667_v38 = vadd.f32 %v2666_v32, %v9471_v61  ;;  %v14049_v61 = vld [vmem:[#allocation16_spill] sm:$0xff]  ;;  %v9805_v47 = vpop.eup %6602  ;;  %v3138_v31 = vadd.f32 %v13885_v35, %v9587_v23 }
 0x42a   :  { %v3129_v29 = vadd.f32 %v13873_v51, %v14049_v61  ;;  %v9809_v22 = vpop.eup %6604  ;;  %v14052_v51 = vld [vmem:[#allocation19_spill] sm:$0xff]  ;;  %3973 = vmatpush.msrb.mxu1 %v3506_v50  ;;  %4039 = vmatpush.msrb.mxu2 %v3566_v63  ;;  %v14070_v23 = vld [vmem:[#allocation88_spill] sm:$0xff] }
 0x42b   :  { %2925 = vmatmul.f32.gmra.mxu0 %v13858_v20  ;;  %2990 = vmatmul.f32.gmra.mxu1 %v13859_v57  ;;  %v2732_v54 = vadd.f32 %v2731_v39, %v2667_v38  ;;  %v3130_v39 = vadd.f32 %v13874_v53, %v9549_v55  ;;  %14050 = vst [vmem:[#allocation27_spill] sm:$0xff] %v9809_v22  ;;  %v3442_v53 = vunpack.c.h.bf16 %v14052_v51  ;;  %v14053_v55 = vld [vmem:[#allocation58_spill] sm:$0xff]  ;;  %v14064_v50 = vld [vmem:[#allocation87_spill] sm:$0xff] }
 0x42c   :  { %3055 = vmatmul.f32.gmra.mxu2 %v13860_v4  ;;  %6610 = vtanh.f32 %v3129_v29  ;;  %v3634_v38 = vunpack.c.h.bf16 %v14053_v55 }
 0x42d   :  { %3114 = vmatmul.f32.gmra.mxu3 %v13861_v44  ;;  %v9811_v5 = vpop.eup %6606  ;;  %6612 = vtanh.f32 %v3130_v39  ;;  %3908 = vmatpush.msrb.mxu0 %v3442_v53  ;;  %v3134_v39 = vadd.f32 %v13880_v18, %v9568_v52  ;;  %v14061_v52 = vld [vmem:[#allocation33_spill] sm:$0xff]  ;;  %v14062_v53 = vld [vmem:[#allocation63_spill] sm:$0xff] }
 0x42e   :  { %14051 = vst [vmem:[#allocation31_spill] sm:$0xff] %v9811_v5  ;;  %4103 = vmatpush.msrb.mxu3 %v3634_v38  ;;  %v9829_v51 = vpop.eup %6608  ;;  %v3438_v38 = vunpack.c.h.bf16 %v14062_v53 }
 0x42f   :  { %v2796_v32 = vpop.f32.mrf.mxu2  ;;  %14057 = vst [vmem:[#allocation85_spill] sm:$0xff] %v9829_v51 }
 0x430   :  { %v9801_v24 = vadd.f32 %v2796_v32, %v2732_v54  ;;  %v9803_v26 = vpop.f32.mrf.mxu3  ;;  %v2881_v10 = vpop.f32.mrf.mxu0  ;;  %v14054_v54 = vld [vmem:[#allocation86_spill] sm:$0xff]  ;;  %v14056_v32 = vld [vmem:[#allocation81_spill] sm:$0xff]  ;;  %3909 = vmatpush.msrb.mxu0 %v3438_v38 }
 0x431   :  { %v2946_v46 = vpop.f32.mrf.mxu1  ;;  %v3132_v48 = vadd.f32 %v13878_v41, %v14054_v54  ;;  %v3133_v61 = vadd.f32 %v13879_v37, %v14056_v32  ;;  %v14060_v37 = vld [vmem:[#allocation55_spill] sm:$0xff]  ;;  %v3136_v32 = vadd.f32 %v13883_v34, %v14064_v50  ;;  %v14072_v38 = vld [vmem:[#allocation90_spill] sm:$0xff] }
 0x432   :  { %v9833_v41 = vpop.eup %6610  ;;  %v9841_v18 = vperm.slane %v14060_v37, 3 }
 0x433   :  { %3664 = vmatmul.f32.vlgmr.msra.gmra.mxu0 %v9805_v47  ;;  %3729 = vmatmul.f32.vlgmr.msra.gmra.mxu1 %v9809_v22  ;;  %14058 = vst [vmem:[#allocation16_spill] sm:$0xff] %v9833_v41  ;;  %6614 = vtanh.f32 %v3132_v48  ;;  %v9835_v54 = vpop.eup %6612  ;;  %v14063_v48 = vld [vmem:[#allocation65_spill] sm:$0xff] }
 0x434   :  { %3794 = vmatmul.f32.vlgmr.msra.gmra.mxu2 %v9811_v5  ;;  %14059 = vst [vmem:[#allocation19_spill] sm:$0xff] %v9835_v54  ;;  %6616 = vtanh.f32 %v3133_v61  ;;  %v3630_v21 = vunpack.c.h.bf16 %v14063_v48  ;;  %v14065_v61 = vld [vmem:[#allocation44_spill] sm:$0xff]  ;;  %v2882_v34 = vadd.f32 %v2881_v10, %v9841_v18  ;;  %v3626_v10 = vunpack.c.h.bf16 %v14072_v38 }
 0x435   :  { %3117 = vmatmul.f32.gmra.mxu3 %v13960_v0  ;;  %6618 = vtanh.f32 %v3134_v39  ;;  %v14074_v5 = vld [vmem:[#allocation92_spill] sm:$0xff] }
 0x436   :  { %4104 = vmatpush.msrb.mxu3 %v3630_v21  ;;  %6620 = vtanh.f32 %v3136_v32  ;;  %v2947_v35 = vadd.f32 %v2946_v46, %v2882_v34  ;;  %v14073_v21 = vld [vmem:[#allocation12_spill] sm:$0xff]  ;;  %v3498_v32 = vunpack.c.h.bf16 %v14074_v5  ;;  %v3142_v46 = vadd.f32 %v13890_v1, %v9606_v49  ;;  %v14080_v49 = vld [vmem:[#allocation93_spill] sm:$0xff] }
 0x437   :  { %v3011_v29 = vpop.f32.mrf.mxu2 }
 0x438   :  { %v9827_v0 = vpop.f32.mrf.mxu3  ;;  %v2884_v17 = vpop.f32.mrf.mxu0  ;;  %v3012_v22 = vadd.f32 %v3011_v29, %v2947_v35  ;;  %4105 = vmatpush.msrb.mxu3 %v3626_v10  ;;  %v14079_v29 = vld [vmem:[#allocation56_spill] sm:$0xff] }
 0x439   :  { %v9831_v55 = vpop.f32.mrf.mxu1  ;;  %v9852_v37 = vpop.eup %6614  ;;  %v2885_v34 = vadd.f32 %v2884_v17, %v9841_v18  ;;  %v14081_v17 = vld [vmem:[#allocation94_spill] sm:$0xff] }
 0x43a   :  { %14067 = vst [vmem:[#allocation58_spill] sm:$0xff] %v9852_v37  ;;  %v9858_v48 = vpop.eup %6616 }
 0x43b   :  { %3667 = vmatmul.f32.gmra.mxu0 %v9829_v51  ;;  %3732 = vmatmul.f32.gmra.mxu1 %v9833_v41  ;;  %v3502_v51 = vunpack.c.h.bf16 %v14065_v61  ;;  %v14066_v41 = vld [vmem:[#allocation30_spill] sm:$0xff]  ;;  %14068 = vst [vmem:[#allocation86_spill] sm:$0xff] %v9858_v48  ;;  %v3140_v61 = vadd.f32 %v13888_v2, %v14073_v21  ;;  %v2950_v1 = vadd.f32 %v9831_v55, %v2885_v34 }
 0x43c   :  { %3797 = vmatmul.f32.gmra.mxu2 %v9835_v54  ;;  %v3137_v39 = vadd.f32 %v13884_v25, %v14066_v41  ;;  %v9863_v25 = vpop.eup %6618  ;;  %v14071_v41 = vld [vmem:[#allocation89_spill] sm:$0xff]  ;;  %v14083_v21 = vld [vmem:[#allocation38_spill] sm:$0xff]  ;;  %v3146_v34 = vadd.f32 %v13895_v14, %v9625_v3 }
 0x43d   :  { %3120 = vmatmul.f32.gmra.mxu3 %v14061_v52  ;;  %3974 = vmatpush.msrb.mxu1 %v3502_v51  ;;  %14069 = vst [vmem:[#allocation61_spill] sm:$0xff] %v9863_v25  ;;  %v3562_v51 = vunpack.c.h.bf16 %v14070_v23  ;;  %v3434_v63 = vunpack.c.h.bf16 %v14071_v41  ;;  %v14091_v3 = vld [vmem:[#allocation34_spill] sm:$0xff] }
 0x43e   :  { %6622 = vtanh.f32 %v3137_v39  ;;  %v14075_v39 = vld [vmem:[#allocation83_spill] sm:$0xff] }
 0x43f   :  { %v3014_v54 = vpop.f32.mrf.mxu2  ;;  %6624 = vtanh.f32 %v3138_v31  ;;  %4040 = vmatpush.msrb.mxu2 %v3562_v51  ;;  %3910 = vmatpush.msrb.mxu0 %v3434_v63  ;;  %v9876_v31 = vpop.eup %6620  ;;  %v3430_v51 = vunpack.c.h.bf16 %v14081_v17  ;;  %v14082_v63 = vld [vmem:[#allocation29_spill] sm:$0xff] }
 0x440   :  { %v9856_v52 = vpop.f32.mrf.mxu3  ;;  %v2887_v53 = vpop.f32.mrf.mxu0  ;;  %14076 = vst [vmem:[#allocation81_spill] sm:$0xff] %v9876_v31  ;;  %3975 = vmatpush.msrb.mxu1 %v3498_v32  ;;  %6626 = vtanh.f32 %v3140_v61  ;;  %v3622_v10 = vunpack.c.h.bf16 %v14082_v63  ;;  %v14084_v61 = vld [vmem:[#allocation59_spill] sm:$0xff]  ;;  %v14092_v63 = vld [vmem:[#allocation13_spill] sm:$0xff] }
 0x441   :  { %v9861_v50 = vpop.f32.mrf.mxu1  ;;  %v3494_v32 = vunpack.c.h.bf16 %v14084_v61  ;;  %3911 = vmatpush.msrb.mxu0 %v3430_v51  ;;  %v14094_v61 = vld [vmem:[#allocation15_spill] sm:$0xff] }
 0x442   :  { %4106 = vmatpush.msrb.mxu3 %v3622_v10  ;;  %v3426_v10 = vunpack.c.h.bf16 %v14092_v63 }
 0x443   :  { %3670 = vmatmul.f32.gmra.mxu0 %v9852_v37  ;;  %3735 = vmatmul.f32.gmra.mxu1 %v9858_v48  ;;  %v3141_v37 = vadd.f32 %v13889_v33, %v14075_v39  ;;  %v14085_v39 = vld [vmem:[#allocation32_spill] sm:$0xff] }
 0x444   :  { %3800 = vmatmul.f32.gmra.mxu2 %v9863_v25  ;;  %v9881_v2 = vpop.eup %6622  ;;  %3976 = vmatpush.msrb.mxu1 %v3494_v32  ;;  %v14095_v32 = vld [vmem:[#allocation14_spill] sm:$0xff] }
 0x445   :  { %14077 = vst [vmem:[#allocation55_spill] sm:$0xff] %v9881_v2  ;;  %v9885_v33 = vpop.eup %6624  ;;  %6628 = vtanh.f32 %v3141_v37  ;;  %v3144_v37 = vadd.f32 %v13893_v42, %v14083_v21  ;;  %v14093_v21 = vld [vmem:[#allocation66_spill] sm:$0xff]  ;;  %3912 = vmatpush.msrb.mxu0 %v3426_v10  ;;  %v14105_v10 = vld [vmem:[#allocation64_spill] sm:$0xff] }
 0x446   :  { %14078 = vst [vmem:[#allocation63_spill] sm:$0xff] %v9885_v33  ;;  %6630 = vtanh.f32 %v3142_v46  ;;  %v3015_v46 = vadd.f32 %v3014_v54, %v2950_v1  ;;  %v9902_v55 = vpop.eup %6626 }
 0x447   :  { %v3017_v48 = vpop.f32.mrf.mxu2  ;;  %14086 = vst [vmem:[#allocation65_spill] sm:$0xff] %v9902_v55 }
 0x448   :  { %v3076_v23 = vpop.f32.mrf.mxu3  ;;  %v2890_v41 = vpop.f32.mrf.mxu0 }
 0x449   :  { %v3077_v5 = vadd.f32 %v3076_v23, %v3012_v22  ;;  %v9883_v38 = vpop.f32.mrf.mxu1  ;;  %v3558_v22 = vunpack.c.h.bf16 %v14080_v49  ;;  %v3145_v23 = vadd.f32 %v13894_v8, %v14085_v39  ;;  %v3148_v39 = vadd.f32 %v14095_v32, %v14094_v61 }
 0x44b   :  { %v3127_v35 = vadd.f32 %v14079_v29, %v3077_v5  ;;  %3673 = vmatmul.f32.gmra.mxu0 %v9876_v31  ;;  %3738 = vmatmul.f32.gmra.mxu1 %v9881_v2  ;;  %v2888_v29 = vadd.f32 %v2887_v53, %v9841_v18  ;;  %v9907_v42 = vpop.eup %6628  ;;  %v3554_v53 = vunpack.c.h.bf16 %v14091_v3  ;;  %v14101_v3 = vld [vmem:[#allocation46_spill] sm:$0xff] }
 0x44c   :  { %3803 = vmatmul.f32.gmra.mxu2 %v9885_v33  ;;  %14087 = vst [vmem:[#allocation87_spill] sm:$0xff] %v9907_v42  ;;  %v9911_v54 = vpop.eup %6630 }
 0x44d   :  { %6632 = vtanh.f32 %v3127_v35  ;;  %4041 = vmatpush.msrb.mxu2 %v3558_v22  ;;  %14088 = vst [vmem:[#allocation44_spill] sm:$0xff] %v9911_v54  ;;  %v14090_v22 = vld [vmem:[#allocation60_spill] sm:$0xff]  ;;  %v2953_v14 = vadd.f32 %v9861_v50, %v2888_v29 }
 0x44e   :  { %6634 = vtanh.f32 %v3144_v37  ;;  %v3618_v37 = vunpack.c.h.bf16 %v14093_v21  ;;  %v2891_v21 = vadd.f32 %v2890_v41, %v9841_v18 }
 0x44f   :  { %v9900_v5 = vpop.f32.mrf.mxu2  ;;  %6636 = vtanh.f32 %v3145_v23  ;;  %v14096_v23 = vld [vmem:[#allocation97_spill] sm:$0xff]  ;;  %v3018_v50 = vadd.f32 %v3017_v48, %v2953_v14  ;;  %4042 = vmatpush.msrb.mxu2 %v3554_v53 }
 0x450   :  { %v3079_v35 = vpop.f32.mrf.mxu3  ;;  %v2893_v49 = vpop.f32.mrf.mxu0  ;;  %6638 = vtanh.f32 %v3146_v34  ;;  %v14098_v34 = vld [vmem:[#allocation67_spill] sm:$0xff]  ;;  %4107 = vmatpush.msrb.mxu3 %v3618_v37  ;;  %v2956_v41 = vadd.f32 %v9883_v38, %v2891_v21 }
 0x451   :  { %v3080_v17 = vadd.f32 %v3079_v35, %v3015_v46  ;;  %v9909_v8 = vpop.f32.mrf.mxu1  ;;  %v3490_v46 = vunpack.c.h.bf16 %v14096_v23  ;;  %v14097_v35 = vld [vmem:[#allocation84_spill] sm:$0xff] }
 0x452   :  { %v3021_v38 = vadd.f32 %v9900_v5, %v2956_v41 }
 0x453   :  { %v9913_v1 = vpop.eup %6632  ;;  %v3131_v51 = vadd.f32 %v14090_v22, %v3080_v17  ;;  %3676 = vmatmul.f32.gmra.mxu0 %v9902_v55  ;;  %3741 = vmatmul.f32.gmra.mxu1 %v9907_v42  ;;  %v3149_v17 = vadd.f32 %v14098_v34, %v14097_v35  ;;  %v14108_v35 = vld [vmem:[#allocation100_spill] sm:$0xff] }
 0x454   :  { %14089 = vst [vmem:[#allocation30_spill] sm:$0xff] %v9913_v1  ;;  %3806 = vmatmul.f32.gmra.mxu2 %v9911_v54  ;;  %3859 = vmatmul.f32.vlgmr.msra.gmra.mxu3 %v9913_v1  ;;  %v9931_v22 = vpop.eup %6634  ;;  %v3614_v34 = vunpack.c.h.bf16 %v14108_v35  ;;  %v2894_v35 = vadd.f32 %v2893_v49, %v9841_v18  ;;  %v14121_v49 = vld [vmem:[#allocation114_spill] sm:$0xff] }
 0x455   :  { %6640 = vtanh.f32 %v3131_v51  ;;  %14099 = vst [vmem:[#allocation88_spill] sm:$0xff] %v9931_v22  ;;  %v14100_v51 = vld [vmem:[#allocation115_spill] sm:$0xff]  ;;  %3977 = vmatpush.msrb.mxu1 %v3490_v46  ;;  %v9938_v61 = vpop.eup %6636 }
 0x456   :  { %v3150_v63 = vadd.f32 %v14101_v3, %v14100_v51  ;;  %14102 = vst [vmem:[#allocation89_spill] sm:$0xff] %v9938_v61  ;;  %v9942_v14 = vpop.eup %6638  ;;  %6642 = vtanh.f32 %v3148_v39  ;;  %v14107_v39 = vld [vmem:[#allocation99_spill] sm:$0xff]  ;;  %v14111_v3 = vld [vmem:[#allocation102_spill] sm:$0xff]  ;;  %4108 = vmatpush.msrb.mxu3 %v3614_v34 }
 0x457   :  { %v9929_v29 = vpop.f32.mrf.mxu2  ;;  %14103 = vst [vmem:[#allocation90_spill] sm:$0xff] %v9942_v14  ;;  %6644 = vtanh.f32 %v3149_v17  ;;  %v3422_v46 = vunpack.c.h.bf16 %v14107_v39  ;;  %v14109_v17 = vld [vmem:[#allocation96_spill] sm:$0xff]  ;;  %v14116_v39 = vld [vmem:[#allocation18_spill] sm:$0xff]  ;;  %v14122_v34 = vld [vmem:[#allocation127_spill] sm:$0xff] }
 0x458   :  { %v3082_v1 = vpop.f32.mrf.mxu3  ;;  %v9936_v54 = vpop.f32.mrf.mxu0  ;;  %6646 = vtanh.f32 %v3150_v63  ;;  %v14113_v63 = vld [vmem:[#allocation47_spill] sm:$0xff] }
 0x459   :  { %v3083_v32 = vadd.f32 %v3082_v1, %v3018_v50  ;;  %v9940_v48 = vpop.f32.mrf.mxu1  ;;  %v14106_v1 = vld [vmem:[#allocation98_spill] sm:$0xff]  ;;  %v14110_v50 = vld [vmem:[#allocation68_spill] sm:$0xff]  ;;  %3913 = vmatpush.msrb.mxu0 %v3422_v46  ;;  %v14120_v46 = vld [vmem:[#allocation45_spill] sm:$0xff] }
 0x45a   :  { %v3550_v37 = vunpack.c.h.bf16 %v14106_v1  ;;  %v3152_v51 = vadd.f32 %v14110_v50, %v14109_v17  ;;  %v14115_v1 = vld [vmem:[#allocation121_spill] sm:$0xff] }
 0x45b   :  { %v9944_v53 = vpop.eup %6640  ;;  %v3135_v23 = vadd.f32 %v14105_v10, %v3083_v32  ;;  %3679 = vmatmul.f32.gmra.mxu0 %v9931_v22  ;;  %3744 = vmatmul.f32.gmra.mxu1 %v9938_v61  ;;  %v3486_v32 = vunpack.c.h.bf16 %v14111_v3  ;;  %v14112_v10 = vld [vmem:[#allocation39_spill] sm:$0xff]  ;;  %v14129_v22 = vld [vmem:[#allocation40_spill] sm:$0xff] }
 0x45c   :  { %14104 = vst [vmem:[#allocation12_spill] sm:$0xff] %v9944_v53  ;;  %3809 = vmatmul.f32.gmra.mxu2 %v9942_v14  ;;  %3862 = vmatmul.f32.gmra.mxu3 %v9944_v53  ;;  %v3153_v61 = vadd.f32 %v14113_v63, %v14112_v10  ;;  %v3154_v53 = vadd.f32 %v14116_v39, %v14115_v1  ;;  %v14125_v1 = vld [vmem:[#allocation104_spill] sm:$0xff] }
 0x45d   :  { %6648 = vtanh.f32 %v3135_v23  ;;  %4043 = vmatpush.msrb.mxu2 %v3550_v37  ;;  %v9963_v23 = vpop.eup %6642  ;;  %3978 = vmatpush.msrb.mxu1 %v3486_v32  ;;  %v2841_v32 = vadd.f32 %v14122_v34, %v14121_v49  ;;  %v3610_v39 = vunpack.c.h.bf16 %v14125_v1  ;;  %v14130_v49 = vld [vmem:[#allocation23_spill] sm:$0xff]  ;;  %v2897_v1 = vadd.f32 %v9936_v54, %v9841_v18  ;;  %v14137_v54 = vld [vmem:[#allocation120_spill] sm:$0xff] }
 0x45e   :  { %14114 = vst [vmem:[#allocation92_spill] sm:$0xff] %v9963_v23  ;;  %v9970_v50 = vpop.eup %6644  ;;  %6650 = vtanh.f32 %v3152_v51  ;;  %v14123_v51 = vld [vmem:[#allocation103_spill] sm:$0xff]  ;;  %v3157_v34 = vadd.f32 %v14130_v49, %v14129_v22 }
 0x45f   :  { %v9961_v21 = vpop.f32.mrf.mxu2  ;;  %14117 = vst [vmem:[#allocation83_spill] sm:$0xff] %v9970_v50  ;;  %v9974_v41 = vpop.eup %6646  ;;  %6652 = vtanh.f32 %v3153_v61  ;;  %v3546_v63 = vunpack.c.h.bf16 %v14123_v51  ;;  %v14124_v61 = vld [vmem:[#allocation105_spill] sm:$0xff]  ;;  %v14132_v51 = vld [vmem:[#allocation70_spill] sm:$0xff]  ;;  %4109 = vmatpush.msrb.mxu3 %v3610_v39 }
 0x460   :  { %v3085_v14 = vpop.f32.mrf.mxu3  ;;  %v9968_v17 = vpop.f32.mrf.mxu0  ;;  %14118 = vst [vmem:[#allocation56_spill] sm:$0xff] %v9974_v41  ;;  %6654 = vtanh.f32 %v3154_v53  ;;  %v14128_v53 = vld [vmem:[#allocation106_spill] sm:$0xff] }
 0x461   :  { %v3086_v3 = vadd.f32 %v3085_v14, %v3021_v38  ;;  %v9972_v5 = vpop.f32.mrf.mxu1  ;;  %v2959_v14 = vadd.f32 %v9909_v8, %v2894_v35  ;;  %v3418_v38 = vunpack.c.h.bf16 %v14124_v61  ;;  %4044 = vmatpush.msrb.mxu2 %v3546_v63  ;;  %v3158_v61 = vadd.f32 %v14132_v51, %v2841_v32  ;;  %v14136_v32 = vld [vmem:[#allocation17_spill] sm:$0xff]  ;;  %v14141_v51 = vld [vmem:[#allocation107_spill] sm:$0xff] }
 0x463   :  { %v9976_v37 = vpop.eup %6648  ;;  %v3139_v10 = vadd.f32 %v14120_v46, %v3086_v3  ;;  %3682 = vmatmul.f32.gmra.mxu0 %v9963_v23  ;;  %3747 = vmatmul.f32.gmra.mxu1 %v9970_v50  ;;  %v14126_v3 = vld [vmem:[#allocation101_spill] sm:$0xff]  ;;  %v14127_v46 = vld [vmem:[#allocation48_spill] sm:$0xff]  ;;  %v3482_v23 = vunpack.c.h.bf16 %v14128_v53  ;;  %v3024_v8 = vadd.f32 %v9929_v29, %v2959_v14  ;;  %v14139_v53 = vld [vmem:[#allocation91_spill] sm:$0xff] }
 0x464   :  { %14119 = vst [vmem:[#allocation93_spill] sm:$0xff] %v9976_v37  ;;  %3812 = vmatmul.f32.gmra.mxu2 %v9974_v41  ;;  %3865 = vmatmul.f32.gmra.mxu3 %v9976_v37  ;;  %v3156_v50 = vadd.f32 %v14127_v46, %v14126_v3  ;;  %v3414_v49 = vunpack.c.h.bf16 %v14139_v53 }
 0x465   :  { %6656 = vtanh.f32 %v3139_v10  ;;  %3914 = vmatpush.msrb.mxu0 %v3418_v38  ;;  %v9997_v10 = vpop.eup %6650  ;;  %3979 = vmatpush.msrb.mxu1 %v3482_v23  ;;  %v2844_v23 = vadd.f32 %v9733_v30, %v14137_v54  ;;  %v14145_v30 = vld [vmem:[#allocation71_spill] sm:$0xff] }
 0x466   :  { %14131 = vst [vmem:[#allocation94_spill] sm:$0xff] %v9997_v10  ;;  %v10004_v46 = vpop.eup %6652  ;;  %6658 = vtanh.f32 %v3156_v50  ;;  %v14138_v50 = vld [vmem:[#allocation53_spill] sm:$0xff] }
 0x467   :  { %v9995_v35 = vpop.f32.mrf.mxu2  ;;  %14133 = vst [vmem:[#allocation29_spill] sm:$0xff] %v10004_v46  ;;  %v10008_v14 = vpop.eup %6654  ;;  %6660 = vtanh.f32 %v3157_v34  ;;  %v3542_v39 = vunpack.c.h.bf16 %v14138_v50  ;;  %v14140_v34 = vld [vmem:[#allocation36_spill] sm:$0xff]  ;;  %3915 = vmatpush.msrb.mxu0 %v3414_v49  ;;  %v14147_v50 = vld [vmem:[#allocation50_spill] sm:$0xff] }
 0x468   :  { %v3088_v37 = vpop.f32.mrf.mxu3  ;;  %v10002_v3 = vpop.f32.mrf.mxu0  ;;  %14134 = vst [vmem:[#allocation38_spill] sm:$0xff] %v10008_v14  ;;  %6662 = vtanh.f32 %v3158_v61  ;;  %v14143_v61 = vld [vmem:[#allocation37_spill] sm:$0xff]  ;;  %v3162_v53 = vadd.f32 %v14147_v50, %v2844_v23  ;;  %v14156_v50 = vld [vmem:[#allocation108_spill] sm:$0xff] }
 0x469   :  { %v3089_v22 = vadd.f32 %v3088_v37, %v3024_v8  ;;  %v10006_v29 = vpop.f32.mrf.mxu1  ;;  %v2962_v37 = vadd.f32 %v9940_v48, %v2897_v1  ;;  %v3606_v8 = vunpack.c.h.bf16 %v14140_v34  ;;  %4045 = vmatpush.msrb.mxu2 %v3542_v39  ;;  %v2900_v34 = vadd.f32 %v9968_v17, %v9841_v18  ;;  %v14151_v23 = vld [vmem:[#allocation69_spill] sm:$0xff]  ;;  %v14152_v17 = vld [vmem:[#allocation126_spill] sm:$0xff] }
 0x46b   :  { %v10010_v63 = vpop.eup %6656  ;;  %v3143_v38 = vadd.f32 %v14136_v32, %v3089_v22  ;;  %3685 = vmatmul.f32.gmra.mxu0 %v9997_v10  ;;  %3750 = vmatmul.f32.gmra.mxu1 %v10004_v46  ;;  %v14142_v22 = vld [vmem:[#allocation21_spill] sm:$0xff]  ;;  %v3478_v46 = vunpack.c.h.bf16 %v14143_v61  ;;  %v3027_v48 = vadd.f32 %v9961_v21, %v2962_v37  ;;  %v14154_v61 = vld [vmem:[#allocation111_spill] sm:$0xff] }
 0x46c   :  { %14135 = vst [vmem:[#allocation59_spill] sm:$0xff] %v10010_v63  ;;  %3815 = vmatmul.f32.gmra.mxu2 %v10008_v14  ;;  %3868 = vmatmul.f32.gmra.mxu3 %v10010_v63  ;;  %v3160_v32 = vadd.f32 %v14142_v22, %v14141_v51  ;;  %v14144_v10 = vld [vmem:[#allocation41_spill] sm:$0xff] }
 0x46d   :  { %6664 = vtanh.f32 %v3143_v38  ;;  %v3161_v54 = vadd.f32 %v14145_v30, %v14144_v10  ;;  %v10031_v38 = vpop.eup %6658  ;;  %4110 = vmatpush.msrb.mxu3 %v3606_v8  ;;  %3980 = vmatpush.msrb.mxu1 %v3478_v46  ;;  %v2847_v46 = vadd.f32 %v9757_v28, %v14152_v17  ;;  %v14153_v8 = vld [vmem:[#allocation110_spill] sm:$0xff]  ;;  %v3410_v30 = vunpack.c.h.bf16 %v14154_v61  ;;  %v14160_v28 = vld [vmem:[#allocation51_spill] sm:$0xff] }
 0x46e   :  { %14146 = vst [vmem:[#allocation32_spill] sm:$0xff] %v10031_v38  ;;  %v10038_v22 = vpop.eup %6660  ;;  %6666 = vtanh.f32 %v3160_v32  ;;  %v3538_v32 = vunpack.c.h.bf16 %v14153_v8  ;;  %v14162_v8 = vld [vmem:[#allocation26_spill] sm:$0xff] }
 0x46f   :  { %v10029_v1 = vpop.f32.mrf.mxu2  ;;  %14148 = vst [vmem:[#allocation60_spill] sm:$0xff] %v10038_v22  ;;  %v10042_v37 = vpop.eup %6662  ;;  %6668 = vtanh.f32 %v3161_v54  ;;  %v14155_v54 = vld [vmem:[#allocation112_spill] sm:$0xff]  ;;  %3916 = vmatpush.msrb.mxu0 %v3410_v30  ;;  %v3166_v61 = vadd.f32 %v14162_v8, %v2847_v46  ;;  %v14166_v46 = vld [vmem:[#allocation49_spill] sm:$0xff] }
 0x470   :  { %v3091_v63 = vpop.f32.mrf.mxu3  ;;  %v10036_v51 = vpop.f32.mrf.mxu0  ;;  %14149 = vst [vmem:[#allocation34_spill] sm:$0xff] %v10042_v37  ;;  %6670 = vtanh.f32 %v3162_v53  ;;  %v14158_v53 = vld [vmem:[#allocation113_spill] sm:$0xff]  ;;  %4046 = vmatpush.msrb.mxu2 %v3538_v32  ;;  %v14171_v8 = vld [vmem:[#allocation52_spill] sm:$0xff] }
 0x471   :  { %v3092_v10 = vadd.f32 %v3091_v63, %v3027_v48  ;;  %v10040_v21 = vpop.f32.mrf.mxu1  ;;  %v2965_v63 = vadd.f32 %v9972_v5, %v2900_v34  ;;  %v3602_v48 = vunpack.c.h.bf16 %v14155_v54  ;;  %v2903_v54 = vadd.f32 %v10002_v3, %v9841_v18 }
 0x472   :  { %v2850_v3 = vadd.f32 %v9769_v45, %v9731_v60  ;;  %v14174_v60 = vld [vmem:[#allocation24_spill] sm:$0xff] }
 0x473   :  { %v10044_v39 = vpop.eup %6664  ;;  %v3147_v49 = vadd.f32 %v14151_v23, %v3092_v10  ;;  %3688 = vmatmul.f32.gmra.mxu0 %v10031_v38  ;;  %3753 = vmatmul.f32.gmra.mxu1 %v10038_v22  ;;  %v14157_v10 = vld [vmem:[#allocation72_spill] sm:$0xff]  ;;  %v3474_v22 = vunpack.c.h.bf16 %v14158_v53  ;;  %v14159_v38 = vld [vmem:[#allocation35_spill] sm:$0xff]  ;;  %v3030_v5 = vadd.f32 %v9995_v35, %v2965_v63 }
 0x474   :  { %14150 = vst [vmem:[#allocation13_spill] sm:$0xff] %v10044_v39  ;;  %3818 = vmatmul.f32.gmra.mxu2 %v10042_v37  ;;  %3871 = vmatmul.f32.gmra.mxu3 %v10044_v39  ;;  %v3164_v23 = vadd.f32 %v14157_v10, %v14156_v50  ;;  %v3165_v17 = vadd.f32 %v14160_v28, %v14159_v38  ;;  %v14169_v28 = vld [vmem:[#allocation118_spill] sm:$0xff] }
 0x475   :  { %6672 = vtanh.f32 %v3147_v49  ;;  %v10065_v49 = vpop.eup %6666  ;;  %4111 = vmatpush.msrb.mxu3 %v3602_v48  ;;  %3981 = vmatpush.msrb.mxu1 %v3474_v22  ;;  %v2968_v22 = vadd.f32 %v10006_v29, %v2903_v54 }
 0x476   :  { %14161 = vst [vmem:[#allocation66_spill] sm:$0xff] %v10065_v49  ;;  %v10072_v10 = vpop.eup %6668  ;;  %6674 = vtanh.f32 %v3164_v23  ;;  %v14168_v23 = vld [vmem:[#allocation117_spill] sm:$0xff] }
 0x477   :  { %v10063_v34 = vpop.f32.mrf.mxu2  ;;  %14163 = vst [vmem:[#allocation15_spill] sm:$0xff] %v10072_v10  ;;  %v10076_v63 = vpop.eup %6670  ;;  %6676 = vtanh.f32 %v3165_v17  ;;  %v3406_v53 = vunpack.c.h.bf16 %v14168_v23  ;;  %v3598_v17 = vunpack.c.h.bf16 %v14169_v28  ;;  %v3033_v29 = vadd.f32 %v10029_v1, %v2968_v22 }
 0x478   :  { %v3094_v39 = vpop.f32.mrf.mxu3  ;;  %v10070_v50 = vpop.f32.mrf.mxu0  ;;  %14164 = vst [vmem:[#allocation14_spill] sm:$0xff] %v10076_v63  ;;  %6678 = vtanh.f32 %v3166_v61  ;;  %v14172_v61 = vld [vmem:[#allocation119_spill] sm:$0xff]  ;;  %v2906_v28 = vadd.f32 %v10036_v51, %v9841_v18  ;;  %v2853_v51 = vadd.f32 %v9785_v9, %v9755_v27 }
 0x479   :  { %v3095_v38 = vadd.f32 %v3094_v39, %v3030_v5  ;;  %v10074_v35 = vpop.f32.mrf.mxu1  ;;  %v14167_v39 = vld [vmem:[#allocation116_spill] sm:$0xff]  ;;  %v14170_v5 = vld [vmem:[#allocation109_spill] sm:$0xff]  ;;  %3917 = vmatpush.msrb.mxu0 %v3406_v53  ;;  %4112 = vmatpush.msrb.mxu3 %v3598_v17  ;;  %v14181_v17 = vld [vmem:[#allocation122_spill] sm:$0xff] }
 0x47a   :  { %v3534_v48 = vunpack.c.h.bf16 %v14167_v39  ;;  %v14176_v39 = vld [vmem:[#allocation74_spill] sm:$0xff] }
 0x47b   :  { %v10078_v32 = vpop.eup %6672  ;;  %v3151_v30 = vadd.f32 %v14166_v46, %v3095_v38  ;;  %3691 = vmatmul.f32.gmra.mxu0 %v10065_v49  ;;  %3756 = vmatmul.f32.gmra.mxu1 %v10072_v10  ;;  %v3168_v38 = vadd.f32 %v14171_v8, %v14170_v5  ;;  %v3470_v46 = vunpack.c.h.bf16 %v14172_v61  ;;  %v14173_v10 = vld [vmem:[#allocation42_spill] sm:$0xff]  ;;  %v3170_v23 = vadd.f32 %v14176_v39, %v2850_v3  ;;  %v14182_v61 = vld [vmem:[#allocation123_spill] sm:$0xff] }
 0x47c   :  { %14165 = vst [vmem:[#allocation97_spill] sm:$0xff] %v10078_v32  ;;  %3821 = vmatmul.f32.gmra.mxu2 %v10076_v63  ;;  %3874 = vmatmul.f32.gmra.mxu3 %v10078_v32  ;;  %v3169_v45 = vadd.f32 %v14174_v60, %v14173_v10  ;;  %v14180_v3 = vld [vmem:[#allocation22_spill] sm:$0xff]  ;;  %v14183_v60 = vld [vmem:[#allocation124_spill] sm:$0xff] }
 0x47d   :  { %6680 = vtanh.f32 %v3151_v30  ;;  %4047 = vmatpush.msrb.mxu2 %v3534_v48  ;;  %v10099_v30 = vpop.eup %6674  ;;  %3982 = vmatpush.msrb.mxu1 %v3470_v46  ;;  %v3402_v46 = vunpack.c.h.bf16 %v14182_v61 }
 0x47e   :  { %14175 = vst [vmem:[#allocation84_spill] sm:$0xff] %v10099_v30  ;;  %v10106_v8 = vpop.eup %6676  ;;  %6682 = vtanh.f32 %v3168_v38  ;;  %v3530_v38 = vunpack.c.h.bf16 %v14181_v17 }
 0x47f   :  { %v10097_v54 = vpop.f32.mrf.mxu2  ;;  %14177 = vst [vmem:[#allocation67_spill] sm:$0xff] %v10106_v8  ;;  %v10110_v22 = vpop.eup %6678  ;;  %6684 = vtanh.f32 %v3169_v45  ;;  %v3594_v45 = vunpack.c.h.bf16 %v14183_v60  ;;  %3918 = vmatpush.msrb.mxu0 %v3402_v46  ;;  %v14190_v46 = vld [vmem:[#allocation129_spill] sm:$0xff] }
 0x480   :  { %v3097_v32 = vpop.f32.mrf.mxu3  ;;  %v10104_v5 = vpop.f32.mrf.mxu0  ;;  %14178 = vst [vmem:[#allocation115_spill] sm:$0xff] %v10110_v22  ;;  %6686 = vtanh.f32 %v3170_v23  ;;  %v14185_v23 = vld [vmem:[#allocation125_spill] sm:$0xff]  ;;  %4048 = vmatpush.msrb.mxu2 %v3530_v38 }
 0x481   :  { %v3098_v10 = vadd.f32 %v3097_v32, %v3033_v29  ;;  %v10108_v1 = vpop.f32.mrf.mxu1  ;;  %v2971_v32 = vadd.f32 %v10040_v21, %v2906_v28  ;;  %v14184_v29 = vld [vmem:[#allocation79_spill] sm:$0xff]  ;;  %4113 = vmatpush.msrb.mxu3 %v3594_v45  ;;  %v14194_v45 = vld [vmem:[#allocation73_spill] sm:$0xff] }
 0x482   :  { %v3172_v39 = vadd.f32 %v8910_v43, %v14184_v29  ;;  %v3398_v29 = vunpack.c.h.bf16 %v14190_v46  ;;  %v14197_v46 = vld [vmem:[#allocation133_spill] sm:$0xff] }
 0x483   :  { %v10112_v48 = vpop.eup %6680  ;;  %v3155_v53 = vadd.f32 %v14180_v3, %v3098_v10  ;;  %3694 = vmatmul.f32.gmra.mxu0 %v10099_v30  ;;  %3759 = vmatmul.f32.gmra.mxu1 %v10106_v8  ;;  %v3466_v10 = vunpack.c.h.bf16 %v14185_v23  ;;  %v14186_v3 = vld [vmem:[#allocation54_spill] sm:$0xff]  ;;  %v3036_v9 = vadd.f32 %v10063_v34, %v2971_v32  ;;  %v14189_v32 = vld [vmem:[#allocation128_spill] sm:$0xff] }
 0x484   :  { %14179 = vst [vmem:[#allocation46_spill] sm:$0xff] %v10112_v48  ;;  %3824 = vmatmul.f32.gmra.mxu2 %v10110_v22  ;;  %3877 = vmatmul.f32.gmra.mxu3 %v10112_v48  ;;  %v3173_v27 = vadd.f32 %v13948_v7, %v14186_v3  ;;  %v10133_v28 = vpop.eup %6682  ;;  %v2909_v7 = vadd.f32 %v10070_v50, %v9841_v18  ;;  %v3526_v38 = vunpack.c.h.bf16 %v14189_v32  ;;  %v14195_v50 = vld [vmem:[#allocation131_spill] sm:$0xff] }
 0x485   :  { %6688 = vtanh.f32 %v3155_v53  ;;  %14187 = vst [vmem:[#allocation64_spill] sm:$0xff] %v10133_v28  ;;  %v3174_v53 = vadd.f32 %v8918_v11, %v2853_v51  ;;  %3983 = vmatpush.msrb.mxu1 %v3466_v10  ;;  %v10138_v43 = vpop.eup %6684  ;;  %v14192_v11 = vld [vmem:[#allocation130_spill] sm:$0xff]  ;;  %3919 = vmatpush.msrb.mxu0 %v3398_v29 }
 0x486   :  { %14188 = vst [vmem:[#allocation98_spill] sm:$0xff] %v10138_v43  ;;  %v10146_v23 = vpop.eup %6686  ;;  %6690 = vtanh.f32 %v3172_v39  ;;  %v3462_v51 = vunpack.c.h.bf16 %v14192_v11  ;;  %v14196_v39 = vld [vmem:[#allocation132_spill] sm:$0xff]  ;;  %4049 = vmatpush.msrb.mxu2 %v3526_v38  ;;  %v3590_v11 = vunpack.c.h.bf16 %v9719_v6 }
 0x487   :  { %v10131_v21 = vpop.f32.mrf.mxu2  ;;  %14191 = vst [vmem:[#allocation99_spill] sm:$0xff] %v10146_v23  ;;  %6692 = vtanh.f32 %v3173_v27  ;;  %v3458_v32 = vunpack.c.h.bf16 %v14196_v39  ;;  %v3522_v27 = vunpack.c.h.bf16 %v14197_v46  ;;  %v14202_v39 = vld [vmem:[#allocation43_spill] sm:$0xff] }
 0x488   :  { %v3100_v17 = vpop.f32.mrf.mxu3  ;;  %v10136_v61 = vpop.f32.mrf.mxu0  ;;  %6694 = vtanh.f32 %v3174_v53  ;;  %3984 = vmatpush.msrb.mxu1 %v3462_v51  ;;  %v3177_v46 = vadd.f32 %v8935_v16, %v14202_v39  ;;  %4114 = vmatpush.msrb.mxu3 %v3590_v11  ;;  %v2912_v16 = vadd.f32 %v10104_v5, %v9841_v18  ;;  %v14210_v39 = vld [vmem:[#allocation28_spill] sm:$0xff] }
 0x489   :  { %v3101_v60 = vadd.f32 %v3100_v17, %v3036_v9  ;;  %v10142_v34 = vpop.f32.mrf.mxu1  ;;  %v3394_v9 = vunpack.c.h.bf16 %v14195_v50  ;;  %v2856_v17 = vadd.f32 %v9803_v26, %v9767_v58  ;;  %v14199_v50 = vld [vmem:[#allocation57_spill] sm:$0xff]  ;;  %v14200_v26 = vld [vmem:[#allocation135_spill] sm:$0xff]  ;;  %4050 = vmatpush.msrb.mxu2 %v3522_v27 }
 0x48a   :  { %v3176_v58 = vadd.f32 %v8932_v62, %v14199_v50  ;;  %3985 = vmatpush.msrb.mxu1 %v3458_v32  ;;  %v14207_v27 = vld [vmem:[#allocation75_spill] sm:$0xff] }
 0x48b   :  { %v10149_v3 = vpop.eup %6688  ;;  %v3159_v10 = vadd.f32 %v14194_v45, %v3101_v60  ;;  %3697 = vmatmul.f32.gmra.mxu0 %v10133_v28  ;;  %3762 = vmatmul.f32.gmra.mxu1 %v10138_v43  ;;  %v2974_v60 = vadd.f32 %v10074_v35, %v2909_v7  ;;  %v14198_v45 = vld [vmem:[#allocation134_spill] sm:$0xff]  ;;  %v3178_v38 = vadd.f32 %v8937_v59, %v2856_v17 }
 0x48c   :  { %14193 = vst [vmem:[#allocation100_spill] sm:$0xff] %v10149_v3  ;;  %3827 = vmatmul.f32.gmra.mxu2 %v10146_v23  ;;  %3880 = vmatmul.f32.gmra.mxu3 %v10149_v3  ;;  %v3390_v53 = vunpack.c.h.bf16 %v14198_v45  ;;  %v3454_v23 = vunpack.c.h.bf16 %v14200_v26  ;;  %v14201_v3 = vld [vmem:[#allocation136_spill] sm:$0xff]  ;;  %v10173_v6 = vpop.eup %6690  ;;  %v14205_v59 = vld [vmem:[#allocation138_spill] sm:$0xff]  ;;  %v14208_v45 = vld [vmem:[#allocation139_spill] sm:$0xff]  ;;  %v3586_v26 = vunpack.c.h.bf16 %v9752_v40 }
 0x48d   :  { %6696 = vtanh.f32 %v3159_v10  ;;  %v3518_v43 = vunpack.c.h.bf16 %v14201_v3  ;;  %v3039_v35 = vadd.f32 %v10097_v54, %v2974_v60  ;;  %3920 = vmatpush.msrb.mxu0 %v3394_v9  ;;  %v10178_v51 = vpop.eup %6692  ;;  %v3386_v10 = vunpack.c.h.bf16 %v9725_v19  ;;  %v14203_v9 = vld [vmem:[#allocation137_spill] sm:$0xff] }
 0x48e   :  { %v3450_v60 = vunpack.c.h.bf16 %v14203_v9  ;;  %v10186_v11 = vpop.eup %6694  ;;  %6698 = vtanh.f32 %v3176_v58  ;;  %3986 = vmatpush.msrb.mxu1 %v3454_v23  ;;  %v3514_v17 = vunpack.c.h.bf16 %v14205_v59  ;;  %v3382_v19 = vunpack.c.h.bf16 %v14208_v45  ;;  %4115 = vmatpush.msrb.mxu3 %v3586_v26  ;;  %v14216_v45 = vld [vmem:[#allocation141_spill] sm:$0xff] }
 0x48f   :  { %v10171_v7 = vpop.f32.mrf.mxu2  ;;  %3921 = vmatpush.msrb.mxu0 %v3390_v53  ;;  %14204 = vst [vmem:[#allocation96_spill] sm:$0xff] %v10186_v11  ;;  %4051 = vmatpush.msrb.mxu2 %v3518_v43  ;;  %6700 = vtanh.f32 %v3177_v46  ;;  %v14209_v53 = vld [vmem:[#allocation140_spill] sm:$0xff]  ;;  %v2859_v23 = vadd.f32 %v9827_v0, %v9783_v13  ;;  %v3510_v43 = vunpack.c.h.bf16 %v9741_v12  ;;  %v2977_v58 = vadd.f32 %v10108_v1, %v2912_v16  ;;  %v14213_v1 = vld [vmem:[#allocation77_spill] sm:$0xff] }
 0x490   :  { %v3103_v29 = vpop.f32.mrf.mxu3  ;;  %v10176_v62 = vpop.f32.mrf.mxu0  ;;  %v3446_v50 = vunpack.c.h.bf16 %v14209_v53  ;;  %6702 = vtanh.f32 %v3178_v38  ;;  %3987 = vmatpush.msrb.mxu1 %v3450_v60  ;;  %v3180_v46 = vadd.f32 %v13951_v56, %v14210_v39  ;;  %v14212_v38 = vld [vmem:[#allocation95_spill] sm:$0xff]  ;;  %v2915_v56 = vadd.f32 %v10136_v61, %v9841_v18  ;;  %v14217_v53 = vld [vmem:[#allocation80_spill] sm:$0xff] }
 0x491   :  { %v3104_v3 = vadd.f32 %v3103_v29, %v3039_v35  ;;  %v10182_v54 = vpop.f32.mrf.mxu1  ;;  %3922 = vmatpush.msrb.mxu0 %v3386_v10  ;;  %4052 = vmatpush.msrb.mxu2 %v3514_v17  ;;  %v14211_v35 = vld [vmem:[#allocation62_spill] sm:$0xff]  ;;  %v3042_v0 = vadd.f32 %v10131_v21, %v2977_v58  ;;  %v3182_v16 = vadd.f32 %v14213_v1, %v2859_v23  ;;  %v14215_v17 = vld [vmem:[#allocation25_spill] sm:$0xff]  ;;  %v14218_v23 = vld [vmem:[#allocation20_spill] sm:$0xff] }
 0x492   :  { %v3181_v13 = vadd.f32 %v14212_v38, %v14211_v35  ;;  %3988 = vmatpush.msrb.mxu1 %v3446_v50  ;;  %v2980_v61 = vadd.f32 %v10142_v34, %v2915_v56  ;;  %v3184_v50 = vadd.f32 %v13858_v20, %v14217_v53  ;;  %v2918_v35 = vadd.f32 %v10176_v62, %v9841_v18 }
 0x493   :  { %v10189_v32 = vpop.eup %6696  ;;  %v3163_v5 = vadd.f32 %v14207_v27, %v3104_v3  ;;  %3700 = vmatmul.f32.gmra.mxu0 %v10173_v6  ;;  %3765 = vmatmul.f32.gmra.mxu1 %v10178_v51  ;;  %v3578_v62 = vunpack.c.h.bf16 %v9776_v36  ;;  %v10263_v36 = vld [vmem:[#allocation7 + $0x8] sm:$0xf] }
 0x494   :  { %14206 = vst [vmem:[#allocation68_spill] sm:$0xff] %v10189_v32  ;;  %3830 = vmatmul.f32.gmra.mxu2 %v10186_v11  ;;  %3883 = vmatmul.f32.gmra.mxu3 %v10189_v32  ;;  %v10208_v12 = vpop.eup %6698  ;;  %v3045_v58 = vadd.f32 %v10171_v7, %v2980_v61  ;;  %v14220_v7 = vld [vmem:[#allocation76_spill] sm:$0xff] }
 0x495   :  { %6704 = vtanh.f32 %v3163_v5  ;;  %3923 = vmatpush.msrb.mxu0 %v3382_v19  ;;  %4053 = vmatpush.msrb.mxu2 %v3510_v43  ;;  %v10211_v40 = vpop.eup %6700  ;;  %v2862_v5 = vadd.f32 %v9856_v52, %v9801_v24  ;;  %v3582_v19 = vunpack.c.h.bf16 %v14216_v45  ;;  %v3185_v43 = vadd.f32 %v13859_v57, %v14218_v23 }
 0x496   :  { %v10215_v59 = vpop.eup %6702  ;;  %6706 = vtanh.f32 %v3180_v46 }
 0x497   :  { %v3047_v29 = vpop.f32.mrf.mxu2  ;;  %6708 = vtanh.f32 %v3181_v13  ;;  %4116 = vmatpush.msrb.mxu3 %v3582_v19  ;;  %v3186_v52 = vadd.f32 %v13860_v4, %v2862_v5  ;;  %v2983_v4 = vadd.f32 %v10182_v54, %v2918_v35  ;;  %v14225_v54 = vld [vmem:[#allocation78_spill] sm:$0xff] }
 0x498   :  { %v3106_v3 = vpop.f32.mrf.mxu3  ;;  %v2920_v10 = vpop.f32.mrf.mxu0  ;;  %6710 = vtanh.f32 %v3182_v16 }
 0x499   :  { %v3107_v9 = vadd.f32 %v3106_v3, %v3042_v0  ;;  %v2985_v60 = vpop.f32.mrf.mxu1  ;;  %v3048_v1 = vadd.f32 %v3047_v29, %v2983_v4  ;;  %4117 = vmatpush.msrb.mxu3 %v3578_v62  ;;  %v3574_v29 = vunpack.c.h.bf16 %v9794_v15  ;;  %v10278_v4 = vld [vmem:[#allocation5 + $0xaf8] sm:$0xff] }
 0x49a   :  { %v3571_v62 = vunpack.c.l.bf16 %v10278_v4 }
 0x49b   :  { %v10217_v21 = vpop.eup %6704  ;;  %v3167_v27 = vadd.f32 %v14215_v17, %v3107_v9  ;;  %3703 = vmatmul.f32.gmra.mxu0 %v10208_v12  ;;  %3768 = vmatmul.f32.gmra.mxu1 %v10211_v40 }
 0x49c   :  { %14214 = vst [vmem:[#allocation102_spill] sm:$0xff] %v10217_v21  ;;  %3833 = vmatmul.f32.gmra.mxu2 %v10215_v59  ;;  %3886 = vmatmul.f32.gmra.mxu3 %v10217_v21  ;;  %v10233_v24 = vpop.eup %6706 }
 0x49d   :  { %6712 = vtanh.f32 %v3167_v27  ;;  %v10236_v34 = vpop.eup %6708  ;;  %v2921_v27 = vadd.f32 %v2920_v10, %v9841_v18  ;;  %4118 = vmatpush.msrb.mxu3 %v3574_v29  ;;  %4298 = vmatpush.msra.mxu2 %v3571_v62  ;;  %v10305_v62 = vld [vmem:[#allocation5 + $0x8e8] sm:$0xff] }
 0x49e   :  { %v10240_v13 = vpop.eup %6710  ;;  %6714 = vtanh.f32 %v3184_v50  ;;  %v10269_v50 = vperm.slane %v10263_v36, 0  ;;  %14237 = vst [vmem:[#allocation101_spill] sm:$0xff] %v10305_v62 }
 0x49f   :  { %v3050_v26 = vpop.f32.mrf.mxu2  ;;  %6716 = vtanh.f32 %v3185_v43  ;;  %v2986_v10 = vadd.f32 %v2985_v60, %v2921_v27  ;;  %v14227_v60 = vld [vmem:[#allocation27_spill] sm:$0xff]  ;;  %v10287_v27 = vld [vmem:[#allocation5 + $0x9f8] sm:$0xff] }
 0x4a0   :  { %v3109_v39 = vpop.f32.mrf.mxu3  ;;  %v2923_v46 = vpop.f32.mrf.mxu0  ;;  %6718 = vtanh.f32 %v3186_v52  ;;  %14230 = vst [vmem:[#allocation103_spill] sm:$0xff] %v10287_v27 }
 0x4a1   :  { %v3110_v38 = vadd.f32 %v3109_v39, %v3045_v58  ;;  %v2988_v20 = vpop.f32.mrf.mxu1  ;;  %v3051_v23 = vadd.f32 %v3050_v26, %v2986_v10  ;;  %v2924_v58 = vadd.f32 %v2923_v46, %v9841_v18  ;;  %v14228_v46 = vld [vmem:[#allocation31_spill] sm:$0xff] }
 0x4a3   :  { %v10242_v57 = vpop.eup %6712  ;;  %v3171_v0 = vadd.f32 %v14220_v7, %v3110_v38  ;;  %3706 = vmatmul.f32.gmra.mxu0 %v10233_v24  ;;  %3771 = vmatmul.f32.gmra.mxu1 %v10236_v34  ;;  %v2989_v26 = vadd.f32 %v2988_v20, %v2924_v58 }
 0x4a4   :  { %14219 = vst [vmem:[#allocation39_spill] sm:$0xff] %v10242_v57  ;;  %3836 = vmatmul.f32.gmra.mxu2 %v10240_v13  ;;  %3889 = vmatmul.f32.gmra.mxu3 %v10242_v57  ;;  %v10251_v3 = vpop.eup %6714 }
 0x4a5   :  { %6720 = vtanh.f32 %v3171_v0  ;;  %14221 = vst [vmem:[#allocation47_spill] sm:$0xff] %v10251_v3  ;;  %v10253_v17 = vpop.eup %6716 }
 0x4a6   :  { %14222 = vst [vmem:[#allocation121_spill] sm:$0xff] %v10253_v17  ;;  %v10256_v45 = vpop.eup %6718 }
 0x4a7   :  { %v3053_v16 = vpop.f32.mrf.mxu2  ;;  %14223 = vst [vmem:[#allocation18_spill] sm:$0xff] %v10256_v45 }
 0x4a8   :  { %v3112_v56 = vpop.f32.mrf.mxu3  ;;  %v2926_v9 = vpop.f32.mrf.mxu0 }
 0x4a9   :  { %v3113_v5 = vadd.f32 %v3112_v56, %v3048_v1  ;;  %v2991_v61 = vpop.f32.mrf.mxu1  ;;  %v10283_v1 = vld [vmem:[#allocation5 + $0x8f8] sm:$0xff]  ;;  %v2927_v10 = vadd.f32 %v2926_v9, %v9841_v18  ;;  %v14235_v18 = vld [vmem:[#allocation19_spill] sm:$0xff] }
 0x4aa   :  { %v10285_v56 = vld [vmem:[#allocation5 + $0xbf8] sm:$0xff]  ;;  %v10303_v9 = vld [vmem:[#allocation5 + $0xae8] sm:$0xff] }
 0x4ab   :  { %v10258_v19 = vpop.eup %6720  ;;  %v3175_v53 = vadd.f32 %v14225_v54, %v3113_v5  ;;  %3709 = vmatmul.f32.gmra.mxu0 %v10251_v3  ;;  %3774 = vmatmul.f32.gmra.mxu1 %v10253_v17  ;;  %14229 = vst [vmem:[#allocation127_spill] sm:$0xff] %v10285_v56  ;;  %v3635_v5 = vunpack.c.l.bf16 %v10285_v56  ;;  %v3507_v54 = vunpack.c.l.bf16 %v10287_v27  ;;  %v14232_v27 = vld [vmem:[#allocation82_spill] sm:$0xff] }
 0x4ac   :  { %14224 = vst [vmem:[#allocation45_spill] sm:$0xff] %v10258_v19  ;;  %3839 = vmatmul.f32.gmra.mxu2 %v10256_v45  ;;  %3892 = vmatmul.f32.gmra.mxu3 %v10258_v19 }
 0x4ad   :  { %6722 = vtanh.f32 %v3175_v53  ;;  %v3054_v53 = vadd.f32 %v3053_v16, %v2989_v26  ;;  %4363 = vmatpush.msra.mxu3 %v3635_v5  ;;  %4233 = vmatpush.msra.mxu1 %v3507_v54  ;;  %v14234_v16 = vld [vmem:[#allocation16_spill] sm:$0xff]  ;;  %v2992_v26 = vadd.f32 %v2991_v61, %v2927_v10  ;;  %14236 = vst [vmem:[#allocation104_spill] sm:$0xff] %v10303_v9  ;;  %v3567_v5 = vunpack.c.l.bf16 %v10303_v9 }
 0x4af   :  { %v3056_v43 = vpop.f32.mrf.mxu2  ;;  %4299 = vmatpush.msra.mxu2 %v3567_v5  ;;  %v10327_v5 = vld [vmem:[#allocation5 + $0x8d8] sm:$0xff] }
 0x4b0   :  { %v3115_v52 = vpop.f32.mrf.mxu3  ;;  %v3665_v39 = vpop.f32.mrf.mxu0 }
 0x4b1   :  { %v3116_v35 = vadd.f32 %v3115_v52, %v3051_v23  ;;  %v3730_v38 = vpop.f32.mrf.mxu1  ;;  %v3666_v7 = vadd.f32 %v3665_v39, %v10269_v50 }
 0x4b3   :  { %v10273_v0 = vpop.eup %6722  ;;  %v3179_v15 = vadd.f32 %v13861_v44, %v3116_v35  ;;  %3924 = vmatmul.f32.vlgmr.msrb.gmra.mxu0 %v9805_v47  ;;  %3989 = vmatmul.f32.vlgmr.msrb.gmra.mxu1 %v14227_v60  ;;  %v3443_v44 = vunpack.c.l.bf16 %v10283_v1  ;;  %v3731_v20 = vadd.f32 %v3730_v38, %v3666_v7  ;;  %v14233_v7 = vld [vmem:[#allocation85_spill] sm:$0xff] }
 0x4b4   :  { %14226 = vst [vmem:[#allocation114_spill] sm:$0xff] %v10273_v0  ;;  %3895 = vmatmul.f32.gmra.mxu3 %v10273_v0  ;;  %4054 = vmatmul.f32.vlgmr.msrb.gmra.mxu2 %v14228_v46 }
 0x4b5   :  { %6724 = vtanh.f32 %v3179_v15  ;;  %4168 = vmatpush.msra.mxu0 %v3443_v44  ;;  %v10307_v44 = vld [vmem:[#allocation5 + $0xbe8] sm:$0xff] }
 0x4b6   :  { %14238 = vst [vmem:[#allocation48_spill] sm:$0xff] %v10307_v44  ;;  %v3631_v54 = vunpack.c.l.bf16 %v10307_v44 }
 0x4b7   :  { %v3795_v29 = vpop.f32.mrf.mxu2 }
 0x4b8   :  { %v10293_v23 = vadd.f32 %v3795_v29, %v3731_v20  ;;  %v3118_v58 = vpop.f32.mrf.mxu3  ;;  %v3668_v52 = vpop.f32.mrf.mxu0  ;;  %v10312_v20 = vld [vmem:[#allocation5 + $0x9e8] sm:$0xff]  ;;  %v3057_v29 = vadd.f32 %v3056_v43, %v2992_v26  ;;  %4364 = vmatpush.msra.mxu3 %v3631_v54  ;;  %v14242_v43 = vld [vmem:[#allocation86_spill] sm:$0xff]  ;;  %v10325_v26 = vld [vmem:[#allocation5 + $0xad8] sm:$0xff] }
 0x4b9   :  { %v3119_v39 = vadd.f32 %v3118_v58, %v3054_v53  ;;  %v3733_v35 = vpop.f32.mrf.mxu1  ;;  %v3669_v15 = vadd.f32 %v3668_v52, %v10269_v50  ;;  %v3503_v53 = vunpack.c.l.bf16 %v10312_v20  ;;  %14243 = vst [vmem:[#allocation40_spill] sm:$0xff] %v10325_v26  ;;  %v3563_v54 = vunpack.c.l.bf16 %v10325_v26 }
 0x4bb   :  { %v10296_v56 = vpop.eup %6724  ;;  %v3183_v38 = vadd.f32 %v14232_v27, %v3119_v39  ;;  %3927 = vmatmul.f32.gmra.mxu0 %v14233_v7  ;;  %3992 = vmatmul.f32.gmra.mxu1 %v14234_v16  ;;  %v3439_v27 = vunpack.c.l.bf16 %v10305_v62  ;;  %v3734_v61 = vadd.f32 %v3733_v35, %v3669_v15  ;;  %v14241_v15 = vld [vmem:[#allocation58_spill] sm:$0xff] }
 0x4bc   :  { %14231 = vst [vmem:[#allocation105_spill] sm:$0xff] %v10296_v56  ;;  %3898 = vmatmul.f32.gmra.mxu3 %v10296_v56  ;;  %4057 = vmatmul.f32.gmra.mxu2 %v14235_v18  ;;  %v14240_v18 = vld [vmem:[#allocation33_spill] sm:$0xff] }
 0x4bd   :  { %6726 = vtanh.f32 %v3183_v38  ;;  %4169 = vmatpush.msra.mxu0 %v3439_v27  ;;  %4234 = vmatpush.msra.mxu1 %v3503_v53  ;;  %v10329_v27 = vld [vmem:[#allocation5 + $0xbd8] sm:$0xff] }
 0x4be   :  { %v10334_v53 = vld [vmem:[#allocation5 + $0x9d8] sm:$0xff]  ;;  %4300 = vmatpush.msra.mxu2 %v3563_v54  ;;  %v10350_v54 = vld [vmem:[#allocation5 + $0xbc8] sm:$0xff] }
 0x4bf   :  { %v3798_v10 = vpop.f32.mrf.mxu2  ;;  %14247 = vst [vmem:[#allocation120_spill] sm:$0xff] %v10350_v54 }
 0x4c0   :  { %v10315_v58 = vadd.f32 %v3798_v10, %v3734_v61  ;;  %v3121_v52 = vpop.f32.mrf.mxu3  ;;  %v3671_v39 = vpop.f32.mrf.mxu0  ;;  %v3435_v61 = vunpack.c.l.bf16 %v10327_v5  ;;  %v3499_v10 = vunpack.c.l.bf16 %v10334_v53 }
 0x4c1   :  { %v3122_v38 = vadd.f32 %v3121_v52, %v3057_v29  ;;  %v3736_v9 = vpop.f32.mrf.mxu1  ;;  %v3672_v62 = vadd.f32 %v3671_v39, %v10269_v50 }
 0x4c2   :  { %4170 = vmatpush.msra.mxu0 %v3435_v61  ;;  %4235 = vmatpush.msra.mxu1 %v3499_v10  ;;  %v10355_v10 = vld [vmem:[#allocation5 + $0x9c8] sm:$0xff] }
 0x4c3   :  { %v10318_v44 = vpop.eup %6726  ;;  %v3187_v35 = vadd.f32 %v14240_v18, %v3122_v38  ;;  %3930 = vmatmul.f32.gmra.mxu0 %v14241_v15  ;;  %3995 = vmatmul.f32.gmra.mxu1 %v14242_v43  ;;  %v3627_v18 = vunpack.c.l.bf16 %v10329_v27  ;;  %v3737_v29 = vadd.f32 %v3736_v9, %v3672_v62  ;;  %v10346_v9 = vld [vmem:[#allocation5 + $0xac8] sm:$0xff]  ;;  %14248 = vst [vmem:[#allocation53_spill] sm:$0xff] %v10355_v10 }
 0x4c4   :  { %14239 = vst [vmem:[#allocation106_spill] sm:$0xff] %v10318_v44  ;;  %3901 = vmatmul.f32.gmra.mxu3 %v10318_v44  ;;  %4060 = vmatmul.f32.gmra.mxu2 %v9863_v25  ;;  %v10348_v62 = vld [vmem:[#allocation5 + $0x8c8] sm:$0xff]  ;;  %v3559_v61 = vunpack.c.l.bf16 %v10346_v9 }
 0x4c5   :  { %6728 = vtanh.f32 %v3187_v35  ;;  %4365 = vmatpush.msra.mxu3 %v3627_v18  ;;  %14245 = vst [vmem:[#allocation70_spill] sm:$0xff] %v10346_v9  ;;  %v3431_v18 = vunpack.c.l.bf16 %v10348_v62 }
 0x4c6   :  { %14246 = vst [vmem:[#allocation17_spill] sm:$0xff] %v10348_v62  ;;  %4301 = vmatpush.msra.mxu2 %v3559_v61  ;;  %v10367_v61 = vld [vmem:[#allocation5 + $0x8b8] sm:$0xff] }
 0x4c7   :  { %v3801_v52 = vpop.f32.mrf.mxu2  ;;  %4171 = vmatpush.msra.mxu0 %v3431_v18  ;;  %14252 = vst [vmem:[#allocation36_spill] sm:$0xff] %v10367_v61 }
 0x4c8   :  { %v10337_v39 = vadd.f32 %v3801_v52, %v3737_v29  ;;  %v3674_v38 = vpop.f32.mrf.mxu0  ;;  %v3623_v29 = vunpack.c.l.bf16 %v10350_v54  ;;  %v14249_v54 = vld [vmem:[#allocation44_spill] sm:$0xff] }
 0x4c9   :  { %v3739_v35 = vpop.f32.mrf.mxu1  ;;  %v3675_v26 = vadd.f32 %v3674_v38, %v10269_v50  ;;  %v3495_v38 = vunpack.c.l.bf16 %v10355_v10 }
 0x4ca   :  { %4366 = vmatpush.msra.mxu3 %v3623_v29  ;;  %v3427_v29 = vunpack.c.l.bf16 %v10367_v61 }
 0x4cb   :  { %v10340_v25 = vpop.eup %6728  ;;  %3933 = vmatmul.f32.gmra.mxu0 %v9876_v31  ;;  %3998 = vmatmul.f32.gmra.mxu1 %v9881_v2  ;;  %v3740_v52 = vadd.f32 %v3739_v35, %v3675_v26  ;;  %v14250_v26 = vld [vmem:[#allocation30_spill] sm:$0xff]  ;;  %v10365_v35 = vld [vmem:[#allocation5 + $0xab8] sm:$0xff] }
 0x4cc   :  { %14244 = vst [vmem:[#allocation23_spill] sm:$0xff] %v10340_v25  ;;  %3904 = vmatmul.f32.gmra.mxu3 %v10340_v25  ;;  %4063 = vmatmul.f32.gmra.mxu2 %v9885_v33  ;;  %v3555_v18 = vunpack.c.l.bf16 %v10365_v35 }
 0x4cd   :  { %4236 = vmatpush.msra.mxu1 %v3495_v38  ;;  %14251 = vst [vmem:[#allocation91_spill] sm:$0xff] %v10365_v35  ;;  %4172 = vmatpush.msra.mxu0 %v3427_v29  ;;  %v14256_v35 = vld [vmem:[#allocation88_spill] sm:$0xff]  ;;  %v10396_v29 = vld [vmem:[#allocation5 + $0x9a8] sm:$0xff] }
 0x4ce   :  { %4302 = vmatpush.msra.mxu2 %v3555_v18  ;;  %v10387_v18 = vld [vmem:[#allocation5 + $0xaa8] sm:$0xff] }
 0x4cf   :  { %v3804_v25 = vpop.f32.mrf.mxu2  ;;  %14260 = vst [vmem:[#allocation41_spill] sm:$0xff] %v10387_v18 }
 0x4d0   :  { %v10358_v33 = vadd.f32 %v3804_v25, %v3740_v52  ;;  %v3677_v2 = vpop.f32.mrf.mxu0  ;;  %v10369_v25 = vld [vmem:[#allocation5 + $0xbb8] sm:$0xff] }
 0x4d1   :  { %v3742_v31 = vpop.f32.mrf.mxu1  ;;  %v3678_v9 = vadd.f32 %v3677_v2, %v10269_v50  ;;  %14253 = vst [vmem:[#allocation107_spill] sm:$0xff] %v10369_v25  ;;  %v3619_v2 = vunpack.c.l.bf16 %v10369_v25  ;;  %v10374_v52 = vld [vmem:[#allocation5 + $0x9b8] sm:$0xff] }
 0x4d2   :  { %14254 = vst [vmem:[#allocation21_spill] sm:$0xff] %v10374_v52 }
 0x4d3   :  { %3936 = vmatmul.f32.gmra.mxu0 %v9902_v55  ;;  %4001 = vmatmul.f32.gmra.mxu1 %v9907_v42  ;;  %v3743_v38 = vadd.f32 %v3742_v31, %v3678_v9  ;;  %v3491_v42 = vunpack.c.l.bf16 %v10374_v52  ;;  %v14257_v31 = vld [vmem:[#allocation89_spill] sm:$0xff]  ;;  %v14258_v9 = vld [vmem:[#allocation90_spill] sm:$0xff]  ;;  %v14259_v52 = vld [vmem:[#allocation12_spill] sm:$0xff] }
 0x4d4   :  { %4066 = vmatmul.f32.gmra.mxu2 %v14249_v54  ;;  %4119 = vmatmul.f32.vlgmr.msrb.gmra.mxu3 %v14250_v26 }
 0x4d5   :  { %4367 = vmatpush.msra.mxu3 %v3619_v2  ;;  %4237 = vmatpush.msra.mxu1 %v3491_v42 }
 0x4d7   :  { %v3807_v54 = vpop.f32.mrf.mxu2  ;;  %v3860_v55 = vpop.f32.mrf.mxu3 }
 0x4d8   :  { %v10377_v26 = vadd.f32 %v3807_v54, %v3743_v38  ;;  %v10380_v10 = vadd.f32 %v3860_v55, %v10293_v23  ;;  %v3680_v62 = vpop.f32.mrf.mxu0  ;;  %v10389_v54 = vld [vmem:[#allocation5 + $0x8a8] sm:$0xff]  ;;  %v3551_v23 = vunpack.c.l.bf16 %v10387_v18  ;;  %v3487_v38 = vunpack.c.l.bf16 %v10396_v29  ;;  %v14264_v18 = vld [vmem:[#allocation92_spill] sm:$0xff] }
 0x4d9   :  { %v3745_v61 = vpop.f32.mrf.mxu1  ;;  %v3681_v25 = vadd.f32 %v3680_v62, %v10269_v50  ;;  %14261 = vst [vmem:[#allocation71_spill] sm:$0xff] %v10389_v54  ;;  %v10391_v55 = vld [vmem:[#allocation5 + $0xba8] sm:$0xff]  ;;  %v3423_v42 = vunpack.c.l.bf16 %v10389_v54 }
 0x4da   :  { %14255 = vst [vmem:[#allocation37_spill] sm:$0xff] %v10380_v10  ;;  %v3615_v62 = vunpack.c.l.bf16 %v10391_v55  ;;  %4303 = vmatpush.msra.mxu2 %v3551_v23  ;;  %4238 = vmatpush.msra.mxu1 %v3487_v38  ;;  %v10409_v23 = vld [vmem:[#allocation5 + $0xa98] sm:$0xff] }
 0x4db   :  { %3939 = vmatmul.f32.gmra.mxu0 %v14256_v35  ;;  %4004 = vmatmul.f32.gmra.mxu1 %v14257_v31  ;;  %14262 = vst [vmem:[#allocation50_spill] sm:$0xff] %v10391_v55  ;;  %v3746_v2 = vadd.f32 %v3745_v61, %v3681_v25  ;;  %v14265_v61 = vld [vmem:[#allocation83_spill] sm:$0xff]  ;;  %v14266_v25 = vld [vmem:[#allocation93_spill] sm:$0xff] }
 0x4dc   :  { %4069 = vmatmul.f32.gmra.mxu2 %v14258_v9  ;;  %4122 = vmatmul.f32.gmra.mxu3 %v14259_v52  ;;  %14267 = vst [vmem:[#allocation126_spill] sm:$0xff] %v10409_v23 }
 0x4dd   :  { %4173 = vmatpush.msra.mxu0 %v3423_v42  ;;  %4368 = vmatpush.msra.mxu3 %v3615_v62  ;;  %v10418_v62 = vld [vmem:[#allocation5 + $0x998] sm:$0xff] }
 0x4de   :  { %v3483_v38 = vunpack.c.l.bf16 %v10418_v62 }
 0x4df   :  { %v3810_v10 = vpop.f32.mrf.mxu2  ;;  %v3863_v9 = vpop.f32.mrf.mxu3 }
 0x4e0   :  { %v10399_v52 = vadd.f32 %v3810_v10, %v3746_v2  ;;  %v10402_v31 = vadd.f32 %v3863_v9, %v10315_v58  ;;  %v3683_v35 = vpop.f32.mrf.mxu0  ;;  %v10411_v10 = vld [vmem:[#allocation5 + $0x898] sm:$0xff]  ;;  %v3547_v9 = vunpack.c.l.bf16 %v10409_v23  ;;  %4239 = vmatpush.msra.mxu1 %v3483_v38  ;;  %v14271_v23 = vld [vmem:[#allocation94_spill] sm:$0xff] }
 0x4e1   :  { %v3748_v54 = vpop.f32.mrf.mxu1  ;;  %v3684_v55 = vadd.f32 %v3683_v35, %v10269_v50  ;;  %14268 = vst [vmem:[#allocation110_spill] sm:$0xff] %v10411_v10  ;;  %v10413_v58 = vld [vmem:[#allocation5 + $0xb98] sm:$0xff]  ;;  %v3419_v42 = vunpack.c.l.bf16 %v10411_v10 }
 0x4e2   :  { %14263 = vst [vmem:[#allocation69_spill] sm:$0xff] %v10402_v31  ;;  %v3611_v35 = vunpack.c.l.bf16 %v10413_v58  ;;  %4304 = vmatpush.msra.mxu2 %v3547_v9  ;;  %v10431_v9 = vld [vmem:[#allocation5 + $0xa88] sm:$0xff] }
 0x4e3   :  { %3942 = vmatmul.f32.gmra.mxu0 %v14264_v18  ;;  %4007 = vmatmul.f32.gmra.mxu1 %v14265_v61  ;;  %14269 = vst [vmem:[#allocation111_spill] sm:$0xff] %v10413_v58  ;;  %v3749_v2 = vadd.f32 %v3748_v54, %v3684_v55  ;;  %v14272_v54 = vld [vmem:[#allocation29_spill] sm:$0xff]  ;;  %v14273_v55 = vld [vmem:[#allocation59_spill] sm:$0xff] }
 0x4e4   :  { %4072 = vmatmul.f32.gmra.mxu2 %v9974_v41  ;;  %4125 = vmatmul.f32.gmra.mxu3 %v14266_v25  ;;  %14274 = vst [vmem:[#allocation108_spill] sm:$0xff] %v10431_v9 }
 0x4e5   :  { %4174 = vmatpush.msra.mxu0 %v3419_v42  ;;  %4369 = vmatpush.msra.mxu3 %v3611_v35  ;;  %v10440_v35 = vld [vmem:[#allocation5 + $0x988] sm:$0xff] }
 0x4e6   :  { %v3479_v38 = vunpack.c.l.bf16 %v10440_v35 }
 0x4e7   :  { %v3813_v31 = vpop.f32.mrf.mxu2  ;;  %v3866_v41 = vpop.f32.mrf.mxu3 }
 0x4e8   :  { %v10421_v25 = vadd.f32 %v3813_v31, %v3749_v2  ;;  %v10424_v61 = vadd.f32 %v3866_v41, %v10337_v39  ;;  %v3686_v18 = vpop.f32.mrf.mxu0  ;;  %v10433_v31 = vld [vmem:[#allocation5 + $0x888] sm:$0xff]  ;;  %v3543_v39 = vunpack.c.l.bf16 %v10431_v9  ;;  %4240 = vmatpush.msra.mxu1 %v3479_v38  ;;  %v14278_v9 = vld [vmem:[#allocation32_spill] sm:$0xff] }
 0x4e9   :  { %v3751_v10 = vpop.f32.mrf.mxu1  ;;  %v3687_v58 = vadd.f32 %v3686_v18, %v10269_v50  ;;  %14275 = vst [vmem:[#allocation72_spill] sm:$0xff] %v10433_v31  ;;  %v10435_v41 = vld [vmem:[#allocation5 + $0xb88] sm:$0xff]  ;;  %v3415_v42 = vunpack.c.l.bf16 %v10433_v31 }
 0x4ea   :  { %14270 = vst [vmem:[#allocation112_spill] sm:$0xff] %v10424_v61  ;;  %v3607_v18 = vunpack.c.l.bf16 %v10435_v41  ;;  %4305 = vmatpush.msra.mxu2 %v3543_v39  ;;  %v10453_v39 = vld [vmem:[#allocation5 + $0xa78] sm:$0xff] }
 0x4eb   :  { %3945 = vmatmul.f32.gmra.mxu0 %v14271_v23  ;;  %4010 = vmatmul.f32.gmra.mxu1 %v14272_v54  ;;  %14276 = vst [vmem:[#allocation113_spill] sm:$0xff] %v10435_v41  ;;  %v3752_v2 = vadd.f32 %v3751_v10, %v3687_v58  ;;  %v14279_v10 = vld [vmem:[#allocation60_spill] sm:$0xff]  ;;  %v14280_v58 = vld [vmem:[#allocation13_spill] sm:$0xff] }
 0x4ec   :  { %4075 = vmatmul.f32.gmra.mxu2 %v10008_v14  ;;  %4128 = vmatmul.f32.gmra.mxu3 %v14273_v55 }
 0x4ed   :  { %4175 = vmatpush.msra.mxu0 %v3415_v42  ;;  %4370 = vmatpush.msra.mxu3 %v3607_v18  ;;  %v10462_v18 = vld [vmem:[#allocation5 + $0x978] sm:$0xff] }
 0x4ee   :  { %v3475_v38 = vunpack.c.l.bf16 %v10462_v18 }
 0x4ef   :  { %v3816_v61 = vpop.f32.mrf.mxu2  ;;  %v3869_v14 = vpop.f32.mrf.mxu3 }
 0x4f0   :  { %v10443_v55 = vadd.f32 %v3816_v61, %v3752_v2  ;;  %v10446_v54 = vadd.f32 %v3869_v14, %v10358_v33  ;;  %v3689_v23 = vpop.f32.mrf.mxu0  ;;  %v10455_v61 = vld [vmem:[#allocation5 + $0x878] sm:$0xff]  ;;  %v3539_v14 = vunpack.c.l.bf16 %v10453_v39  ;;  %4241 = vmatpush.msra.mxu1 %v3475_v38 }
 0x4f1   :  { %v3754_v31 = vpop.f32.mrf.mxu1  ;;  %v3690_v41 = vadd.f32 %v3689_v23, %v10269_v50  ;;  %14281 = vst [vmem:[#allocation51_spill] sm:$0xff] %v10455_v61  ;;  %v10457_v33 = vld [vmem:[#allocation5 + $0xb78] sm:$0xff]  ;;  %v3411_v42 = vunpack.c.l.bf16 %v10455_v61 }
 0x4f2   :  { %14277 = vst [vmem:[#allocation35_spill] sm:$0xff] %v10446_v54  ;;  %v3603_v23 = vunpack.c.l.bf16 %v10457_v33  ;;  %4306 = vmatpush.msra.mxu2 %v3539_v14  ;;  %v10475_v14 = vld [vmem:[#allocation5 + $0xa68] sm:$0xff] }
 0x4f3   :  { %3948 = vmatmul.f32.gmra.mxu0 %v14278_v9  ;;  %4013 = vmatmul.f32.gmra.mxu1 %v14279_v10  ;;  %14282 = vst [vmem:[#allocation26_spill] sm:$0xff] %v10457_v33  ;;  %v3755_v2 = vadd.f32 %v3754_v31, %v3690_v41  ;;  %v14284_v31 = vld [vmem:[#allocation15_spill] sm:$0xff]  ;;  %v14285_v41 = vld [vmem:[#allocation97_spill] sm:$0xff] }
 0x4f4   :  { %4078 = vmatmul.f32.gmra.mxu2 %v10042_v37  ;;  %4131 = vmatmul.f32.gmra.mxu3 %v14280_v58  ;;  %14286 = vst [vmem:[#allocation116_spill] sm:$0xff] %v10475_v14 }
 0x4f5   :  { %4176 = vmatpush.msra.mxu0 %v3411_v42  ;;  %4371 = vmatpush.msra.mxu3 %v3603_v23  ;;  %v10484_v23 = vld [vmem:[#allocation5 + $0x968] sm:$0xff] }
 0x4f6   :  { %14289 = vst [vmem:[#allocation109_spill] sm:$0xff] %v10484_v23  ;;  %v3471_v38 = vunpack.c.l.bf16 %v10484_v23 }
 0x4f7   :  { %v3819_v54 = vpop.f32.mrf.mxu2  ;;  %v3872_v37 = vpop.f32.mrf.mxu3 }
 0x4f8   :  { %v10465_v58 = vadd.f32 %v3819_v54, %v3755_v2  ;;  %v10468_v10 = vadd.f32 %v3872_v37, %v10377_v26  ;;  %v3692_v9 = vpop.f32.mrf.mxu0  ;;  %v10477_v54 = vld [vmem:[#allocation5 + $0x868] sm:$0xff]  ;;  %v3535_v26 = vunpack.c.l.bf16 %v10475_v14  ;;  %4242 = vmatpush.msra.mxu1 %v3471_v38 }
 0x4f9   :  { %v3757_v61 = vpop.f32.mrf.mxu1  ;;  %v3693_v33 = vadd.f32 %v3692_v9, %v10269_v50  ;;  %14287 = vst [vmem:[#allocation117_spill] sm:$0xff] %v10477_v54  ;;  %v10479_v37 = vld [vmem:[#allocation5 + $0xb68] sm:$0xff]  ;;  %v3407_v42 = vunpack.c.l.bf16 %v10477_v54 }
 0x4fa   :  { %14283 = vst [vmem:[#allocation49_spill] sm:$0xff] %v10468_v10  ;;  %v3599_v9 = vunpack.c.l.bf16 %v10479_v37  ;;  %4307 = vmatpush.msra.mxu2 %v3535_v26  ;;  %v10506_v26 = vld [vmem:[#allocation5 + $0x958] sm:$0xff] }
 0x4fb   :  { %3951 = vmatmul.f32.gmra.mxu0 %v10065_v49  ;;  %4016 = vmatmul.f32.gmra.mxu1 %v14284_v31  ;;  %14288 = vst [vmem:[#allocation118_spill] sm:$0xff] %v10479_v37  ;;  %v3758_v2 = vadd.f32 %v3757_v61, %v3693_v33  ;;  %v10497_v61 = vld [vmem:[#allocation5 + $0xa58] sm:$0xff] }
 0x4fc   :  { %4081 = vmatmul.f32.gmra.mxu2 %v10076_v63  ;;  %4134 = vmatmul.f32.gmra.mxu3 %v14285_v41  ;;  %14291 = vst [vmem:[#allocation119_spill] sm:$0xff] %v10497_v61 }
 0x4fd   :  { %4177 = vmatpush.msra.mxu0 %v3407_v42  ;;  %4372 = vmatpush.msra.mxu3 %v3599_v9  ;;  %14294 = vst [vmem:[#allocation74_spill] sm:$0xff] %v10506_v26  ;;  %v3467_v9 = vunpack.c.l.bf16 %v10506_v26  ;;  %v10539_v26 = vld [vmem:[#allocation5 + $0x828] sm:$0xff] }
 0x4fe   :  { %14305 = vst [vmem:[#allocation128_spill] sm:$0xff] %v10539_v26 }
 0x4ff   :  { %v3822_v10 = vpop.f32.mrf.mxu2  ;;  %v3875_v63 = vpop.f32.mrf.mxu3  ;;  %4243 = vmatpush.msra.mxu1 %v3467_v9  ;;  %v14302_v9 = vld [vmem:[#allocation98_spill] sm:$0xff] }
 0x500   :  { %v10487_v41 = vadd.f32 %v3822_v10, %v3758_v2  ;;  %v10490_v31 = vadd.f32 %v3875_v63, %v10399_v52  ;;  %v3695_v49 = vpop.f32.mrf.mxu0  ;;  %v10499_v10 = vld [vmem:[#allocation5 + $0x858] sm:$0xff]  ;;  %v3531_v52 = vunpack.c.l.bf16 %v10497_v61  ;;  %v10518_v61 = vld [vmem:[#allocation5 + $0x948] sm:$0xff] }
 0x501   :  { %v3760_v54 = vpop.f32.mrf.mxu1  ;;  %v3696_v37 = vadd.f32 %v3695_v49, %v10269_v50  ;;  %14292 = vst [vmem:[#allocation42_spill] sm:$0xff] %v10499_v10  ;;  %v10501_v63 = vld [vmem:[#allocation5 + $0xb58] sm:$0xff]  ;;  %v3403_v33 = vunpack.c.l.bf16 %v10499_v10  ;;  %v10514_v10 = vld [vmem:[#allocation5 + $0xa48] sm:$0xff] }
 0x502   :  { %14290 = vst [vmem:[#allocation52_spill] sm:$0xff] %v10490_v31  ;;  %v3595_v49 = vunpack.c.l.bf16 %v10501_v63  ;;  %4308 = vmatpush.msra.mxu2 %v3531_v52 }
 0x503   :  { %3954 = vmatmul.f32.gmra.mxu0 %v10099_v30  ;;  %4019 = vmatmul.f32.gmra.mxu1 %v10106_v8  ;;  %14293 = vst [vmem:[#allocation24_spill] sm:$0xff] %v10501_v63  ;;  %v3761_v42 = vadd.f32 %v3760_v54, %v3696_v37  ;;  %v10516_v63 = vld [vmem:[#allocation5 + $0x848] sm:$0xff]  ;;  %v3527_v37 = vunpack.c.l.bf16 %v10514_v10  ;;  %v10549_v30 = vld [vmem:[#allocation5 + $0x818] sm:$0xff] }
 0x504   :  { %4084 = vmatmul.f32.gmra.mxu2 %v10110_v22  ;;  %4137 = vmatmul.f32.gmra.mxu3 %v10112_v48  ;;  %14296 = vst [vmem:[#allocation122_spill] sm:$0xff] %v10514_v10  ;;  %v3399_v52 = vunpack.c.l.bf16 %v10516_v63  ;;  %v14304_v10 = vld [vmem:[#allocation100_spill] sm:$0xff]  ;;  %v10541_v8 = vld [vmem:[#allocation5 + $0x928] sm:$0xff] }
 0x505   :  { %4178 = vmatpush.msra.mxu0 %v3403_v33  ;;  %4373 = vmatpush.msra.mxu3 %v3595_v49  ;;  %14297 = vst [vmem:[#allocation123_spill] sm:$0xff] %v10516_v63  ;;  %v10528_v49 = vld [vmem:[#allocation5 + $0xa38] sm:$0xff]  ;;  %v10535_v63 = vld [vmem:[#allocation5 + $0xb48] sm:$0xff] }
 0x506   :  { %14298 = vst [vmem:[#allocation124_spill] sm:$0xff] %v10518_v61  ;;  %4309 = vmatpush.msra.mxu2 %v3527_v37  ;;  %v10553_v37 = vld [vmem:[#allocation5 + $0xa18] sm:$0xff] }
 0x507   :  { %v3825_v2 = vpop.f32.mrf.mxu2  ;;  %v3878_v38 = vpop.f32.mrf.mxu3  ;;  %14301 = vst [vmem:[#allocation54_spill] sm:$0xff] %v10528_v49  ;;  %4179 = vmatpush.msra.mxu0 %v3399_v52 }
 0x508   :  { %v10509_v31 = vadd.f32 %v3825_v2, %v3761_v42  ;;  %v10512_v48 = vadd.f32 %v3878_v38, %v10421_v25  ;;  %v3698_v22 = vpop.f32.mrf.mxu0  ;;  %v3463_v42 = vunpack.c.l.bf16 %v10518_v61  ;;  %v10524_v25 = vld [vmem:[#allocation5 + $0x838] sm:$0xff]  ;;  %v3523_v61 = vunpack.c.l.bf16 %v10528_v49  ;;  %14306 = vst [vmem:[#allocation129_spill] sm:$0xff] %v10541_v8 }
 0x509   :  { %v3763_v54 = vpop.f32.mrf.mxu1  ;;  %v3699_v33 = vadd.f32 %v3698_v22, %v10269_v50  ;;  %14299 = vst [vmem:[#allocation79_spill] sm:$0xff] %v10524_v25  ;;  %v10526_v2 = vld [vmem:[#allocation5 + $0x938] sm:$0xff]  ;;  %v3395_v38 = vunpack.c.l.bf16 %v10524_v25  ;;  %v3391_v25 = vunpack.c.l.bf16 %v10539_v26 }
 0x50a   :  { %14295 = vst [vmem:[#allocation22_spill] sm:$0xff] %v10512_v48  ;;  %v14303_v48 = vld [vmem:[#allocation99_spill] sm:$0xff]  ;;  %v3459_v22 = vunpack.c.l.bf16 %v10526_v2  ;;  %4244 = vmatpush.msra.mxu1 %v3463_v42  ;;  %v10551_v49 = vld [vmem:[#allocation5 + $0x918] sm:$0xff]  ;;  %4310 = vmatpush.msra.mxu2 %v3523_v61 }
 0x50b   :  { %14300 = vst [vmem:[#allocation125_spill] sm:$0xff] %v10526_v2  ;;  %3957 = vmatmul.f32.gmra.mxu0 %v10133_v28  ;;  %4022 = vmatmul.f32.gmra.mxu1 %v14302_v9  ;;  %v3591_v9 = vunpack.c.l.bf16 %v10535_v63  ;;  %v10545_v28 = vld [vmem:[#allocation5 + $0xa28] sm:$0xff] }
 0x50c   :  { %4087 = vmatmul.f32.gmra.mxu2 %v14303_v48  ;;  %4140 = vmatmul.f32.gmra.mxu3 %v14304_v10  ;;  %14307 = vst [vmem:[#allocation130_spill] sm:$0xff] %v10545_v28  ;;  %v3764_v48 = vadd.f32 %v3763_v54, %v3699_v33  ;;  %v3455_v10 = vunpack.c.l.bf16 %v10541_v8  ;;  %v3519_v2 = vunpack.c.l.bf16 %v10545_v28  ;;  %v10560_v33 = vld [vmem:[#allocation5 + $0x808] sm:$0xff]  ;;  %v3387_v28 = vunpack.c.l.bf16 %v10549_v30 }
 0x50d   :  { %4374 = vmatpush.msra.mxu3 %v3591_v9  ;;  %4180 = vmatpush.msra.mxu0 %v3395_v38  ;;  %v10562_v42 = vld [vmem:[#allocation5 + $0x908] sm:$0xff]  ;;  %v3451_v9 = vunpack.c.l.bf16 %v10551_v49 }
 0x50e   :  { %4245 = vmatpush.msra.mxu1 %v3459_v22  ;;  %v10566_v38 = vld [vmem:[#allocation5 + $0xa08] sm:$0xff]  ;;  %4311 = vmatpush.msra.mxu2 %v3519_v2 }
 0x50f   :  { %v3828_v23 = vpop.f32.mrf.mxu2  ;;  %v3881_v14 = vpop.f32.mrf.mxu3  ;;  %4181 = vmatpush.msra.mxu0 %v3391_v25  ;;  %14309 = vst [vmem:[#allocation131_spill] sm:$0xff] %v10566_v38  ;;  %v3511_v61 = vunpack.c.l.bf16 %v10566_v38  ;;  %v10577_v25 = vld [vmem:[#allocation5 + $0xb38] sm:$0xff] }
 0x510   :  { %v10555_v52 = vadd.f32 %v3828_v23, %v3764_v48  ;;  %v10558_v26 = vadd.f32 %v3881_v14, %v10443_v55  ;;  %v3701_v54 = vpop.f32.mrf.mxu0  ;;  %4246 = vmatpush.msra.mxu1 %v3455_v10  ;;  %v3515_v55 = vunpack.c.l.bf16 %v10553_v37  ;;  %v3383_v14 = vunpack.c.l.bf16 %v10560_v33 }
 0x511   :  { %v3766_v8 = vpop.f32.mrf.mxu1  ;;  %v3702_v48 = vadd.f32 %v3701_v54, %v10269_v50  ;;  %v3447_v23 = vunpack.c.l.bf16 %v10562_v42  ;;  %4182 = vmatpush.msra.mxu0 %v3387_v28  ;;  %v3587_v10 = vunpack.c.l.bf16 %v10577_v25 }
 0x512   :  { %14308 = vst [vmem:[#allocation73_spill] sm:$0xff] %v10558_v26  ;;  %4247 = vmatpush.msra.mxu1 %v3451_v9  ;;  %4312 = vmatpush.msra.mxu2 %v3515_v55 }
 0x513   :  { %3960 = vmatmul.f32.gmra.mxu0 %v10173_v6  ;;  %4025 = vmatmul.f32.gmra.mxu1 %v10178_v51  ;;  %v3767_v2 = vadd.f32 %v3766_v8, %v3702_v48  ;;  %v10590_v8 = vld [vmem:[#allocation5 + $0xb28] sm:$0xff] }
 0x514   :  { %4090 = vmatmul.f32.gmra.mxu2 %v10186_v11  ;;  %4143 = vmatmul.f32.gmra.mxu3 %v10189_v32  ;;  %v3583_v9 = vunpack.c.l.bf16 %v10590_v8 }
 0x515   :  { %4183 = vmatpush.msra.mxu0 %v3383_v14  ;;  %4248 = vmatpush.msra.mxu1 %v3447_v23 }
 0x516   :  { %4313 = vmatpush.msra.mxu2 %v3511_v61  ;;  %4375 = vmatpush.msra.mxu3 %v3587_v10 }
 0x517   :  { %v3831_v22 = vpop.f32.mrf.mxu2  ;;  %v3884_v54 = vpop.f32.mrf.mxu3 }
 0x518   :  { %v10580_v26 = vadd.f32 %v3831_v22, %v3767_v2  ;;  %v10583_v11 = vadd.f32 %v3884_v54, %v10465_v58  ;;  %v3704_v32 = vpop.f32.mrf.mxu0  ;;  %4376 = vmatpush.msra.mxu3 %v3583_v9 }
 0x519   :  { %v3769_v38 = vpop.f32.mrf.mxu1  ;;  %v3705_v28 = vadd.f32 %v3704_v32, %v10269_v50 }
 0x51a   :  { %14310 = vst [vmem:[#allocation132_spill] sm:$0xff] %v10583_v11 }
 0x51b   :  { %3963 = vmatmul.f32.gmra.mxu0 %v10208_v12  ;;  %4028 = vmatmul.f32.gmra.mxu1 %v10211_v40  ;;  %v3770_v58 = vadd.f32 %v3769_v38, %v3705_v28  ;;  %v10603_v38 = vld [vmem:[#allocation5 + $0xb18] sm:$0xff] }
 0x51c   :  { %4093 = vmatmul.f32.gmra.mxu2 %v10215_v59  ;;  %4146 = vmatmul.f32.gmra.mxu3 %v10217_v21  ;;  %v3579_v2 = vunpack.c.l.bf16 %v10603_v38 }
 0x51e   :  { %4377 = vmatpush.msra.mxu3 %v3579_v2 }
 0x51f   :  { %v3834_v48 = vpop.f32.mrf.mxu2  ;;  %v3887_v55 = vpop.f32.mrf.mxu3 }
 0x520   :  { %v10593_v14 = vadd.f32 %v3834_v48, %v3770_v58  ;;  %v10596_v32 = vadd.f32 %v3887_v55, %v10487_v41  ;;  %v3707_v23 = vpop.f32.mrf.mxu0 }
 0x521   :  { %v3772_v61 = vpop.f32.mrf.mxu1  ;;  %v3708_v10 = vadd.f32 %v3707_v23, %v10269_v50  ;;  %v10616_v23 = vld [vmem:[#allocation5 + $0xb08] sm:$0xff] }
 0x522   :  { %14311 = vst [vmem:[#allocation133_spill] sm:$0xff] %v10596_v32 }
 0x523   :  { %3966 = vmatmul.f32.gmra.mxu0 %v10233_v24  ;;  %4031 = vmatmul.f32.gmra.mxu1 %v10236_v34  ;;  %v3773_v22 = vadd.f32 %v3772_v61, %v3708_v10  ;;  %v3575_v61 = vunpack.c.l.bf16 %v10616_v23 }
 0x524   :  { %4096 = vmatmul.f32.gmra.mxu2 %v10240_v13  ;;  %4149 = vmatmul.f32.gmra.mxu3 %v10242_v57 }
 0x525   :  { %4378 = vmatpush.msra.mxu3 %v3575_v61 }
 0x527   :  { %v3837_v54 = vpop.f32.mrf.mxu2  ;;  %v3890_v41 = vpop.f32.mrf.mxu3 }
 0x528   :  { %v10606_v28 = vadd.f32 %v3837_v54, %v3773_v22  ;;  %v10609_v9 = vadd.f32 %v3890_v41, %v10509_v31  ;;  %v3710_v58 = vpop.f32.mrf.mxu0  ;;  %v10620_v31 = vperm.slane %v10263_v36, 1  ;;  %v3572_v36 = vunpack.c.h.bf16 %v10278_v4 }
 0x529   :  { %v3775_v48 = vpop.f32.mrf.mxu1  ;;  %v3711_v55 = vadd.f32 %v3710_v58, %v10269_v50 }
 0x52a   :  { %14312 = vst [vmem:[#allocation134_spill] sm:$0xff] %v10609_v9  ;;  %4558 = vmatpush.msrb.mxu2 %v3572_v36 }
 0x52b   :  { %3969 = vmatmul.f32.gmra.mxu0 %v10251_v3  ;;  %4034 = vmatmul.f32.gmra.mxu1 %v10253_v17  ;;  %v3776_v10 = vadd.f32 %v3775_v48, %v3711_v55  ;;  %v3444_v48 = vunpack.c.h.bf16 %v10283_v1  ;;  %v14314_v55 = vld [vmem:[#allocation127_spill] sm:$0xff] }
 0x52c   :  { %4099 = vmatmul.f32.gmra.mxu2 %v10256_v45  ;;  %4152 = vmatmul.f32.gmra.mxu3 %v10258_v19  ;;  %v3636_v61 = vunpack.c.h.bf16 %v14314_v55 }
 0x52d   :  { %4428 = vmatpush.msrb.mxu0 %v3444_v48  ;;  %v14319_v48 = vld [vmem:[#allocation101_spill] sm:$0xff] }
 0x52e   :  { %4623 = vmatpush.msrb.mxu3 %v3636_v61  ;;  %v3440_v55 = vunpack.c.h.bf16 %v14319_v48 }
 0x52f   :  { %v3840_v2 = vpop.f32.mrf.mxu2  ;;  %v3893_v22 = vpop.f32.mrf.mxu3 }
 0x530   :  { %v10622_v50 = vadd.f32 %v3840_v2, %v3776_v10  ;;  %v10625_v54 = vadd.f32 %v3893_v22, %v10555_v52  ;;  %v3925_v41 = vpop.f32.mrf.mxu0  ;;  %v14315_v52 = vld [vmem:[#allocation103_spill] sm:$0xff]  ;;  %4429 = vmatpush.msrb.mxu0 %v3440_v55  ;;  %v3500_v55 = vunpack.c.h.bf16 %v10334_v53 }
 0x531   :  { %v3990_v58 = vpop.f32.mrf.mxu1  ;;  %v3926_v9 = vadd.f32 %v3925_v41, %v10620_v31  ;;  %v3508_v10 = vunpack.c.h.bf16 %v14315_v52  ;;  %v3504_v52 = vunpack.c.h.bf16 %v10312_v20  ;;  %v14322_v20 = vld [vmem:[#allocation61_spill] sm:$0xff]  ;;  %v14327_v53 = vld [vmem:[#allocation23_spill] sm:$0xff] }
 0x532   :  { %14313 = vst [vmem:[#allocation57_spill] sm:$0xff] %v10625_v54 }
 0x533   :  { %4184 = vmatmul.f32.vlgmr.msra.gmra.mxu0 %v9805_v47  ;;  %4249 = vmatmul.f32.vlgmr.msra.gmra.mxu1 %v14227_v60  ;;  %v3991_v2 = vadd.f32 %v3990_v58, %v3926_v9  ;;  %v14317_v9 = vld [vmem:[#allocation19_spill] sm:$0xff]  ;;  %v14318_v58 = vld [vmem:[#allocation104_spill] sm:$0xff] }
 0x534   :  { %4155 = vmatmul.f32.gmra.mxu3 %v10273_v0  ;;  %4314 = vmatmul.f32.vlgmr.msra.gmra.mxu2 %v14228_v46  ;;  %v3568_v36 = vunpack.c.h.bf16 %v14318_v58 }
 0x535   :  { %4493 = vmatpush.msrb.mxu1 %v3508_v10 }
 0x536   :  { %4559 = vmatpush.msrb.mxu2 %v3568_v36  ;;  %v3436_v36 = vunpack.c.h.bf16 %v10327_v5 }
 0x537   :  { %v3896_v22 = vpop.f32.mrf.mxu3  ;;  %v4055_v41 = vpop.f32.mrf.mxu2  ;;  %4494 = vmatpush.msrb.mxu1 %v3504_v52 }
 0x538   :  { %v10637_v54 = vadd.f32 %v3896_v22, %v10580_v26  ;;  %v10639_v32 = vadd.f32 %v4055_v41, %v3991_v2  ;;  %v3928_v11 = vpop.f32.mrf.mxu0  ;;  %v14320_v26 = vld [vmem:[#allocation48_spill] sm:$0xff]  ;;  %4430 = vmatpush.msrb.mxu0 %v3436_v36  ;;  %v14330_v36 = vld [vmem:[#allocation17_spill] sm:$0xff] }
 0x539   :  { %v3993_v4 = vpop.f32.mrf.mxu1  ;;  %v3929_v1 = vadd.f32 %v3928_v11, %v10620_v31  ;;  %v3632_v61 = vunpack.c.h.bf16 %v14320_v26  ;;  %4495 = vmatpush.msrb.mxu1 %v3500_v55 }
 0x53a   :  { %14316 = vst [vmem:[#allocation135_spill] sm:$0xff] %v10637_v54 }
 0x53b   :  { %4187 = vmatmul.f32.gmra.mxu0 %v14233_v7  ;;  %4252 = vmatmul.f32.gmra.mxu1 %v14234_v16  ;;  %v3994_v10 = vadd.f32 %v3993_v4, %v3929_v1  ;;  %v14323_v4 = vld [vmem:[#allocation40_spill] sm:$0xff] }
 0x53c   :  { %4158 = vmatmul.f32.gmra.mxu3 %v10296_v56  ;;  %4317 = vmatmul.f32.gmra.mxu2 %v14317_v9  ;;  %v3564_v1 = vunpack.c.h.bf16 %v14323_v4  ;;  %v14325_v4 = vld [vmem:[#allocation81_spill] sm:$0xff] }
 0x53d   :  { %4624 = vmatpush.msrb.mxu3 %v3632_v61 }
 0x53e   :  { %4560 = vmatpush.msrb.mxu2 %v3564_v1 }
 0x53f   :  { %v3899_v11 = vpop.f32.mrf.mxu3  ;;  %v4058_v2 = vpop.f32.mrf.mxu2 }
 0x540   :  { %v10651_v22 = vadd.f32 %v3899_v11, %v10593_v14  ;;  %v10653_v41 = vadd.f32 %v4058_v2, %v3994_v10  ;;  %v3931_v54 = vpop.f32.mrf.mxu0  ;;  %v3628_v14 = vunpack.c.h.bf16 %v10329_v27  ;;  %v14326_v27 = vld [vmem:[#allocation55_spill] sm:$0xff] }
 0x541   :  { %v3996_v58 = vpop.f32.mrf.mxu1  ;;  %v3932_v48 = vadd.f32 %v3931_v54, %v10620_v31 }
 0x542   :  { %14321 = vst [vmem:[#allocation136_spill] sm:$0xff] %v10651_v22  ;;  %4625 = vmatpush.msrb.mxu3 %v3628_v14  ;;  %v3432_v14 = vunpack.c.h.bf16 %v14330_v36 }
 0x543   :  { %4190 = vmatmul.f32.gmra.mxu0 %v14241_v15  ;;  %4255 = vmatmul.f32.gmra.mxu1 %v14242_v43  ;;  %v3997_v26 = vadd.f32 %v3996_v58, %v3932_v48  ;;  %v14328_v58 = vld [vmem:[#allocation63_spill] sm:$0xff]  ;;  %v14329_v48 = vld [vmem:[#allocation70_spill] sm:$0xff] }
 0x544   :  { %4161 = vmatmul.f32.gmra.mxu3 %v10318_v44  ;;  %4320 = vmatmul.f32.gmra.mxu2 %v14322_v20  ;;  %v3560_v1 = vunpack.c.h.bf16 %v14329_v48 }
 0x545   :  { %4431 = vmatpush.msrb.mxu0 %v3432_v14 }
 0x546   :  { %4561 = vmatpush.msrb.mxu2 %v3560_v1  ;;  %v14338_v1 = vld [vmem:[#allocation91_spill] sm:$0xff] }
 0x547   :  { %v3902_v54 = vpop.f32.mrf.mxu3  ;;  %v4061_v61 = vpop.f32.mrf.mxu2  ;;  %v3556_v14 = vunpack.c.h.bf16 %v14338_v1 }
 0x548   :  { %v10665_v52 = vadd.f32 %v3902_v54, %v10606_v28  ;;  %v10667_v10 = vadd.f32 %v4061_v61, %v3997_v26  ;;  %v3934_v11 = vpop.f32.mrf.mxu0  ;;  %v14331_v28 = vld [vmem:[#allocation120_spill] sm:$0xff]  ;;  %v14332_v26 = vld [vmem:[#allocation53_spill] sm:$0xff] }
 0x549   :  { %v3999_v2 = vpop.f32.mrf.mxu1  ;;  %v3935_v5 = vadd.f32 %v3934_v11, %v10620_v31  ;;  %v3624_v55 = vunpack.c.h.bf16 %v14331_v28  ;;  %v3496_v54 = vunpack.c.h.bf16 %v14332_v26  ;;  %v14335_v28 = vld [vmem:[#allocation87_spill] sm:$0xff]  ;;  %4562 = vmatpush.msrb.mxu2 %v3556_v14  ;;  %v14347_v14 = vld [vmem:[#allocation41_spill] sm:$0xff] }
 0x54a   :  { %14324 = vst [vmem:[#allocation43_spill] sm:$0xff] %v10665_v52 }
 0x54b   :  { %4193 = vmatmul.f32.gmra.mxu0 %v14325_v4  ;;  %4258 = vmatmul.f32.gmra.mxu1 %v14326_v27  ;;  %v4000_v61 = vadd.f32 %v3999_v2, %v3935_v5  ;;  %v14334_v27 = vld [vmem:[#allocation65_spill] sm:$0xff]  ;;  %v14336_v2 = vld [vmem:[#allocation44_spill] sm:$0xff]  ;;  %v14337_v5 = vld [vmem:[#allocation30_spill] sm:$0xff] }
 0x54c   :  { %4164 = vmatmul.f32.gmra.mxu3 %v14327_v53  ;;  %4323 = vmatmul.f32.gmra.mxu2 %v14328_v58 }
 0x54d   :  { %4626 = vmatpush.msrb.mxu3 %v3624_v55  ;;  %4496 = vmatpush.msrb.mxu1 %v3496_v54  ;;  %v14339_v55 = vld [vmem:[#allocation36_spill] sm:$0xff] }
 0x54e   :  { %v3428_v26 = vunpack.c.h.bf16 %v14339_v55 }
 0x54f   :  { %v3905_v11 = vpop.f32.mrf.mxu3  ;;  %v4064_v52 = vpop.f32.mrf.mxu2 }
 0x550   :  { %v10679_v22 = vadd.f32 %v3905_v11, %v10622_v50  ;;  %v10681_v53 = vadd.f32 %v4064_v52, %v4000_v61  ;;  %v3937_v58 = vpop.f32.mrf.mxu0  ;;  %v14340_v50 = vld [vmem:[#allocation107_spill] sm:$0xff]  ;;  %v14341_v52 = vld [vmem:[#allocation21_spill] sm:$0xff]  ;;  %4432 = vmatpush.msrb.mxu0 %v3428_v26  ;;  %v3552_v26 = vunpack.c.h.bf16 %v14347_v14 }
 0x551   :  { %v4002_v48 = vpop.f32.mrf.mxu1  ;;  %v3938_v36 = vadd.f32 %v3937_v58, %v10620_v31  ;;  %v3620_v54 = vunpack.c.h.bf16 %v14340_v50  ;;  %v3492_v61 = vunpack.c.h.bf16 %v14341_v52  ;;  %v14344_v50 = vld [vmem:[#allocation89_spill] sm:$0xff] }
 0x552   :  { %14333 = vst [vmem:[#allocation137_spill] sm:$0xff] %v10679_v22  ;;  %4563 = vmatpush.msrb.mxu2 %v3552_v26 }
 0x553   :  { %4196 = vmatmul.f32.gmra.mxu0 %v14334_v27  ;;  %4261 = vmatmul.f32.gmra.mxu1 %v14335_v28  ;;  %v4003_v11 = vadd.f32 %v4002_v48, %v3938_v36  ;;  %v14343_v27 = vld [vmem:[#allocation88_spill] sm:$0xff]  ;;  %v14345_v48 = vld [vmem:[#allocation90_spill] sm:$0xff] }
 0x554   :  { %4326 = vmatmul.f32.gmra.mxu2 %v14336_v2  ;;  %4379 = vmatmul.f32.vlgmr.msra.gmra.mxu3 %v14337_v5  ;;  %v14346_v36 = vld [vmem:[#allocation12_spill] sm:$0xff] }
 0x555   :  { %4627 = vmatpush.msrb.mxu3 %v3620_v54  ;;  %4497 = vmatpush.msrb.mxu1 %v3492_v61  ;;  %v14348_v54 = vld [vmem:[#allocation71_spill] sm:$0xff]  ;;  %v14349_v61 = vld [vmem:[#allocation50_spill] sm:$0xff] }
 0x556   :  { %v3424_v52 = vunpack.c.h.bf16 %v14348_v54 }
 0x557   :  { %v4067_v58 = vpop.f32.mrf.mxu2  ;;  %v4120_v22 = vpop.f32.mrf.mxu3 }
 0x558   :  { %v10692_v28 = vadd.f32 %v4067_v58, %v4003_v11  ;;  %v10695_v2 = vadd.f32 %v4120_v22, %v10639_v32  ;;  %v3940_v5 = vpop.f32.mrf.mxu0  ;;  %v3616_v11 = vunpack.c.h.bf16 %v14349_v61  ;;  %v3488_v32 = vunpack.c.h.bf16 %v10396_v29  ;;  %4433 = vmatpush.msrb.mxu0 %v3424_v52  ;;  %v14352_v61 = vld [vmem:[#allocation83_spill] sm:$0xff]  ;;  %v14353_v29 = vld [vmem:[#allocation56_spill] sm:$0xff]  ;;  %v14356_v52 = vld [vmem:[#allocation110_spill] sm:$0xff] }
 0x559   :  { %v4005_v1 = vpop.f32.mrf.mxu1  ;;  %v3941_v55 = vadd.f32 %v3940_v5, %v10620_v31 }
 0x55a   :  { %14342 = vst [vmem:[#allocation138_spill] sm:$0xff] %v10695_v2  ;;  %4628 = vmatpush.msrb.mxu3 %v3616_v11  ;;  %4498 = vmatpush.msrb.mxu1 %v3488_v32  ;;  %v3420_v11 = vunpack.c.h.bf16 %v14356_v52  ;;  %v14357_v32 = vld [vmem:[#allocation111_spill] sm:$0xff] }
 0x55b   :  { %4199 = vmatmul.f32.gmra.mxu0 %v14343_v27  ;;  %4264 = vmatmul.f32.gmra.mxu1 %v14344_v50  ;;  %v4006_v22 = vadd.f32 %v4005_v1, %v3941_v55  ;;  %v14351_v50 = vld [vmem:[#allocation92_spill] sm:$0xff]  ;;  %v14354_v1 = vld [vmem:[#allocation93_spill] sm:$0xff]  ;;  %v14355_v55 = vld [vmem:[#allocation126_spill] sm:$0xff] }
 0x55c   :  { %4329 = vmatmul.f32.gmra.mxu2 %v14345_v48  ;;  %4382 = vmatmul.f32.gmra.mxu3 %v14346_v36  ;;  %v3548_v26 = vunpack.c.h.bf16 %v14355_v55 }
 0x55d   :  { %4434 = vmatpush.msrb.mxu0 %v3420_v11  ;;  %v14364_v11 = vld [vmem:[#allocation72_spill] sm:$0xff] }
 0x55e   :  { %4564 = vmatpush.msrb.mxu2 %v3548_v26 }
 0x55f   :  { %v4070_v5 = vpop.f32.mrf.mxu2  ;;  %v4123_v58 = vpop.f32.mrf.mxu3 }
 0x560   :  { %v10706_v2 = vadd.f32 %v4070_v5, %v4006_v22  ;;  %v10709_v48 = vadd.f32 %v4123_v58, %v10653_v41  ;;  %v3943_v36 = vpop.f32.mrf.mxu0  ;;  %v3612_v22 = vunpack.c.h.bf16 %v14357_v32  ;;  %v3484_v41 = vunpack.c.h.bf16 %v10418_v62  ;;  %v14360_v32 = vld [vmem:[#allocation29_spill] sm:$0xff]  ;;  %v14361_v62 = vld [vmem:[#allocation38_spill] sm:$0xff] }
 0x561   :  { %v4008_v14 = vpop.f32.mrf.mxu1  ;;  %v3944_v54 = vadd.f32 %v3943_v36, %v10620_v31 }
 0x562   :  { %14350 = vst [vmem:[#allocation75_spill] sm:$0xff] %v10709_v48  ;;  %4629 = vmatpush.msrb.mxu3 %v3612_v22  ;;  %4499 = vmatpush.msrb.mxu1 %v3484_v41  ;;  %v3416_v22 = vunpack.c.h.bf16 %v14364_v11  ;;  %v14365_v41 = vld [vmem:[#allocation113_spill] sm:$0xff] }
 0x563   :  { %4202 = vmatmul.f32.gmra.mxu0 %v14351_v50  ;;  %4267 = vmatmul.f32.gmra.mxu1 %v14352_v61  ;;  %v4009_v5 = vadd.f32 %v4008_v14, %v3944_v54  ;;  %v14359_v61 = vld [vmem:[#allocation94_spill] sm:$0xff]  ;;  %v14362_v14 = vld [vmem:[#allocation59_spill] sm:$0xff]  ;;  %v14363_v54 = vld [vmem:[#allocation108_spill] sm:$0xff] }
 0x564   :  { %4332 = vmatmul.f32.gmra.mxu2 %v14353_v29  ;;  %4385 = vmatmul.f32.gmra.mxu3 %v14354_v1  ;;  %v3544_v26 = vunpack.c.h.bf16 %v14363_v54 }
 0x565   :  { %4435 = vmatpush.msrb.mxu0 %v3416_v22 }
 0x566   :  { %4565 = vmatpush.msrb.mxu2 %v3544_v26  ;;  %v14371_v26 = vld [vmem:[#allocation51_spill] sm:$0xff] }
 0x567   :  { %v4073_v36 = vpop.f32.mrf.mxu2  ;;  %v4126_v58 = vpop.f32.mrf.mxu3  ;;  %v3412_v22 = vunpack.c.h.bf16 %v14371_v26 }
 0x568   :  { %v10720_v48 = vadd.f32 %v4073_v36, %v4009_v5  ;;  %v10723_v29 = vadd.f32 %v4126_v58, %v10667_v10  ;;  %v3946_v1 = vpop.f32.mrf.mxu0  ;;  %v3608_v5 = vunpack.c.h.bf16 %v14365_v41  ;;  %v3480_v10 = vunpack.c.h.bf16 %v10440_v35  ;;  %v14368_v41 = vld [vmem:[#allocation60_spill] sm:$0xff]  ;;  %v14369_v35 = vld [vmem:[#allocation34_spill] sm:$0xff] }
 0x569   :  { %v4011_v55 = vpop.f32.mrf.mxu1  ;;  %v3947_v52 = vadd.f32 %v3946_v1, %v10620_v31  ;;  %4436 = vmatpush.msrb.mxu0 %v3412_v22  ;;  %v14379_v22 = vld [vmem:[#allocation117_spill] sm:$0xff] }
 0x56a   :  { %14358 = vst [vmem:[#allocation139_spill] sm:$0xff] %v10723_v29  ;;  %4630 = vmatpush.msrb.mxu3 %v3608_v5  ;;  %4500 = vmatpush.msrb.mxu1 %v3480_v10  ;;  %v14372_v5 = vld [vmem:[#allocation26_spill] sm:$0xff] }
 0x56b   :  { %4205 = vmatmul.f32.gmra.mxu0 %v14359_v61  ;;  %4270 = vmatmul.f32.gmra.mxu1 %v14360_v32  ;;  %v4012_v36 = vadd.f32 %v4011_v55, %v3947_v52  ;;  %v14367_v32 = vld [vmem:[#allocation32_spill] sm:$0xff]  ;;  %v14370_v55 = vld [vmem:[#allocation13_spill] sm:$0xff]  ;;  %v3540_v52 = vunpack.c.h.bf16 %v10453_v39  ;;  %v3604_v10 = vunpack.c.h.bf16 %v14372_v5  ;;  %v14375_v5 = vld [vmem:[#allocation15_spill] sm:$0xff] }
 0x56c   :  { %4335 = vmatmul.f32.gmra.mxu2 %v14361_v62  ;;  %4388 = vmatmul.f32.gmra.mxu3 %v14362_v14 }
 0x56d   :  { %4566 = vmatpush.msrb.mxu2 %v3540_v52  ;;  %4631 = vmatpush.msrb.mxu3 %v3604_v10  ;;  %v3408_v10 = vunpack.c.h.bf16 %v14379_v22 }
 0x56f   :  { %v4076_v1 = vpop.f32.mrf.mxu2  ;;  %v4129_v58 = vpop.f32.mrf.mxu3  ;;  %4437 = vmatpush.msrb.mxu0 %v3408_v10 }
 0x570   :  { %v10734_v29 = vadd.f32 %v4076_v1, %v4012_v36  ;;  %v10737_v62 = vadd.f32 %v4129_v58, %v10681_v53  ;;  %v3949_v14 = vpop.f32.mrf.mxu0  ;;  %v3476_v53 = vunpack.c.h.bf16 %v10462_v18  ;;  %v14376_v18 = vld [vmem:[#allocation14_spill] sm:$0xff] }
 0x571   :  { %v4014_v54 = vpop.f32.mrf.mxu1  ;;  %v3950_v11 = vadd.f32 %v3949_v14, %v10620_v31 }
 0x572   :  { %14366 = vst [vmem:[#allocation140_spill] sm:$0xff] %v10737_v62  ;;  %4501 = vmatpush.msrb.mxu1 %v3476_v53  ;;  %v14380_v53 = vld [vmem:[#allocation118_spill] sm:$0xff] }
 0x573   :  { %4208 = vmatmul.f32.gmra.mxu0 %v14367_v32  ;;  %4273 = vmatmul.f32.gmra.mxu1 %v14368_v41  ;;  %v4015_v36 = vadd.f32 %v4014_v54, %v3950_v11  ;;  %v14377_v54 = vld [vmem:[#allocation97_spill] sm:$0xff]  ;;  %v14378_v11 = vld [vmem:[#allocation116_spill] sm:$0xff]  ;;  %v14393_v41 = vld [vmem:[#allocation123_spill] sm:$0xff] }
 0x574   :  { %4338 = vmatmul.f32.gmra.mxu2 %v14369_v35  ;;  %4391 = vmatmul.f32.gmra.mxu3 %v14370_v55  ;;  %v14374_v35 = vld [vmem:[#allocation66_spill] sm:$0xff]  ;;  %v3536_v52 = vunpack.c.h.bf16 %v14378_v11 }
 0x575   :  { %v14403_v32 = vld [vmem:[#allocation130_spill] sm:$0xff] }
 0x576   :  { %4567 = vmatpush.msrb.mxu2 %v3536_v52  ;;  %v14387_v52 = vld [vmem:[#allocation119_spill] sm:$0xff] }
 0x577   :  { %v4079_v14 = vpop.f32.mrf.mxu2  ;;  %v4132_v1 = vpop.f32.mrf.mxu3  ;;  %v3532_v10 = vunpack.c.h.bf16 %v14387_v52 }
 0x578   :  { %v10748_v58 = vadd.f32 %v4079_v14, %v4015_v36  ;;  %v10751_v62 = vadd.f32 %v4132_v1, %v10692_v28  ;;  %v3952_v55 = vpop.f32.mrf.mxu0  ;;  %v3600_v36 = vunpack.c.h.bf16 %v14380_v53  ;;  %v14381_v28 = vld [vmem:[#allocation109_spill] sm:$0xff]  ;;  %v14384_v53 = vld [vmem:[#allocation67_spill] sm:$0xff] }
 0x579   :  { %v4017_v39 = vpop.f32.mrf.mxu1  ;;  %v3953_v26 = vadd.f32 %v3952_v55, %v10620_v31  ;;  %v3472_v14 = vunpack.c.h.bf16 %v14381_v28  ;;  %4568 = vmatpush.msrb.mxu2 %v3532_v10  ;;  %v14395_v10 = vld [vmem:[#allocation64_spill] sm:$0xff] }
 0x57a   :  { %14373 = vst [vmem:[#allocation28_spill] sm:$0xff] %v10751_v62  ;;  %4632 = vmatpush.msrb.mxu3 %v3600_v36  ;;  %v14388_v36 = vld [vmem:[#allocation42_spill] sm:$0xff] }
 0x57b   :  { %4211 = vmatmul.f32.gmra.mxu0 %v14374_v35  ;;  %4276 = vmatmul.f32.gmra.mxu1 %v14375_v5  ;;  %v4018_v1 = vadd.f32 %v4017_v39, %v3953_v26  ;;  %v14383_v35 = vld [vmem:[#allocation84_spill] sm:$0xff]  ;;  %v14385_v39 = vld [vmem:[#allocation115_spill] sm:$0xff]  ;;  %v14386_v26 = vld [vmem:[#allocation46_spill] sm:$0xff]  ;;  %v3404_v28 = vunpack.c.h.bf16 %v14388_v36 }
 0x57c   :  { %4341 = vmatmul.f32.gmra.mxu2 %v14376_v18  ;;  %4394 = vmatmul.f32.gmra.mxu3 %v14377_v54 }
 0x57d   :  { %4502 = vmatpush.msrb.mxu1 %v3472_v14  ;;  %v14389_v14 = vld [vmem:[#allocation24_spill] sm:$0xff]  ;;  %4438 = vmatpush.msrb.mxu0 %v3404_v28  ;;  %v14396_v28 = vld [vmem:[#allocation98_spill] sm:$0xff] }
 0x57f   :  { %v4082_v55 = vpop.f32.mrf.mxu2  ;;  %v4135_v62 = vpop.f32.mrf.mxu3 }
 0x580   :  { %v10762_v5 = vadd.f32 %v4082_v55, %v4018_v1  ;;  %v10765_v18 = vadd.f32 %v4135_v62, %v10706_v2  ;;  %v3955_v54 = vpop.f32.mrf.mxu0  ;;  %v3596_v1 = vunpack.c.h.bf16 %v14389_v14  ;;  %v14390_v2 = vld [vmem:[#allocation74_spill] sm:$0xff]  ;;  %v3400_v14 = vunpack.c.h.bf16 %v14393_v41 }
 0x581   :  { %v4020_v11 = vpop.f32.mrf.mxu1  ;;  %v3956_v22 = vadd.f32 %v3955_v54, %v10620_v31  ;;  %v3468_v62 = vunpack.c.h.bf16 %v14390_v2 }
 0x582   :  { %14382 = vst [vmem:[#allocation62_spill] sm:$0xff] %v10765_v18  ;;  %4633 = vmatpush.msrb.mxu3 %v3596_v1  ;;  %v14397_v1 = vld [vmem:[#allocation79_spill] sm:$0xff]  ;;  %4439 = vmatpush.msrb.mxu0 %v3400_v14 }
 0x583   :  { %4214 = vmatmul.f32.gmra.mxu0 %v14383_v35  ;;  %4279 = vmatmul.f32.gmra.mxu1 %v14384_v53  ;;  %v4021_v55 = vadd.f32 %v4020_v11, %v3956_v22  ;;  %v14392_v35 = vld [vmem:[#allocation122_spill] sm:$0xff]  ;;  %v14394_v11 = vld [vmem:[#allocation124_spill] sm:$0xff] }
 0x584   :  { %4344 = vmatmul.f32.gmra.mxu2 %v14385_v39  ;;  %4397 = vmatmul.f32.gmra.mxu3 %v14386_v26  ;;  %v3528_v36 = vunpack.c.h.bf16 %v14392_v35  ;;  %v3464_v22 = vunpack.c.h.bf16 %v14394_v11  ;;  %v3592_v35 = vunpack.c.h.bf16 %v10535_v63 }
 0x585   :  { %4503 = vmatpush.msrb.mxu1 %v3468_v62  ;;  %v3396_v62 = vunpack.c.h.bf16 %v14397_v1  ;;  %v14404_v1 = vld [vmem:[#allocation129_spill] sm:$0xff] }
 0x586   :  { %4569 = vmatpush.msrb.mxu2 %v3528_v36  ;;  %4634 = vmatpush.msrb.mxu3 %v3592_v35 }
 0x587   :  { %v4085_v54 = vpop.f32.mrf.mxu2  ;;  %v4138_v18 = vpop.f32.mrf.mxu3  ;;  %4504 = vmatpush.msrb.mxu1 %v3464_v22  ;;  %4440 = vmatpush.msrb.mxu0 %v3396_v62  ;;  %v14407_v22 = vld [vmem:[#allocation68_spill] sm:$0xff] }
 0x588   :  { %v10776_v53 = vadd.f32 %v4085_v54, %v4021_v55  ;;  %v10779_v39 = vadd.f32 %v4138_v18, %v10720_v48  ;;  %v3958_v26 = vpop.f32.mrf.mxu0  ;;  %v14398_v55 = vld [vmem:[#allocation54_spill] sm:$0xff]  ;;  %v14399_v48 = vld [vmem:[#allocation99_spill] sm:$0xff]  ;;  %v14400_v18 = vld [vmem:[#allocation100_spill] sm:$0xff] }
 0x589   :  { %v4023_v52 = vpop.f32.mrf.mxu1  ;;  %v3959_v2 = vadd.f32 %v3958_v26, %v10620_v31  ;;  %v3524_v54 = vunpack.c.h.bf16 %v14398_v55  ;;  %v14402_v26 = vld [vmem:[#allocation128_spill] sm:$0xff] }
 0x58a   :  { %14391 = vst [vmem:[#allocation95_spill] sm:$0xff] %v10779_v39  ;;  %v14401_v39 = vld [vmem:[#allocation125_spill] sm:$0xff]  ;;  %v3392_v11 = vunpack.c.h.bf16 %v14402_v26 }
 0x58b   :  { %4217 = vmatmul.f32.gmra.mxu0 %v14395_v10  ;;  %4282 = vmatmul.f32.gmra.mxu1 %v14396_v28  ;;  %v3460_v41 = vunpack.c.h.bf16 %v14401_v39  ;;  %v3520_v10 = vunpack.c.h.bf16 %v14403_v32  ;;  %v4024_v61 = vadd.f32 %v4023_v52, %v3959_v2  ;;  %v3456_v28 = vunpack.c.h.bf16 %v14404_v1 }
 0x58c   :  { %4347 = vmatmul.f32.gmra.mxu2 %v14399_v48  ;;  %4400 = vmatmul.f32.gmra.mxu3 %v14400_v18  ;;  %v3388_v32 = vunpack.c.h.bf16 %v10549_v30  ;;  %v3452_v52 = vunpack.c.h.bf16 %v10551_v49  ;;  %v3516_v2 = vunpack.c.h.bf16 %v10553_v37  ;;  %v14408_v30 = vld [vmem:[#allocation131_spill] sm:$0xff]  ;;  %v3588_v49 = vunpack.c.h.bf16 %v10577_v25 }
 0x58d   :  { %4570 = vmatpush.msrb.mxu2 %v3524_v54  ;;  %4505 = vmatpush.msrb.mxu1 %v3460_v41  ;;  %v3584_v25 = vunpack.c.h.bf16 %v10590_v8  ;;  %v3580_v8 = vunpack.c.h.bf16 %v10603_v38  ;;  %v3576_v38 = vunpack.c.h.bf16 %v10616_v23 }
 0x58e   :  { %4441 = vmatpush.msrb.mxu0 %v3392_v11  ;;  %4635 = vmatpush.msrb.mxu3 %v3588_v49 }
 0x58f   :  { %v4088_v55 = vpop.f32.mrf.mxu2  ;;  %v4141_v50 = vpop.f32.mrf.mxu3  ;;  %4571 = vmatpush.msrb.mxu2 %v3520_v10  ;;  %4506 = vmatpush.msrb.mxu1 %v3456_v28  ;;  %v3512_v10 = vunpack.c.h.bf16 %v14408_v30 }
 0x590   :  { %v10796_v18 = vadd.f32 %v4088_v55, %v4024_v61  ;;  %v10799_v63 = vadd.f32 %v4141_v50, %v10734_v29  ;;  %v3961_v39 = vpop.f32.mrf.mxu0  ;;  %v3384_v50 = vunpack.c.h.bf16 %v10560_v33  ;;  %v3448_v61 = vunpack.c.h.bf16 %v10562_v42  ;;  %v14406_v29 = vld [vmem:[#allocation96_spill] sm:$0xff]  ;;  %4442 = vmatpush.msrb.mxu0 %v3388_v32  ;;  %4636 = vmatpush.msrb.mxu3 %v3584_v25 }
 0x591   :  { %v4026_v36 = vpop.f32.mrf.mxu1  ;;  %v3962_v14 = vadd.f32 %v3961_v39, %v10620_v31  ;;  %4507 = vmatpush.msrb.mxu1 %v3452_v52  ;;  %4572 = vmatpush.msrb.mxu2 %v3516_v2 }
 0x592   :  { %14405 = vst [vmem:[#allocation77_spill] sm:$0xff] %v10799_v63  ;;  %4443 = vmatpush.msrb.mxu0 %v3384_v50  ;;  %4637 = vmatpush.msrb.mxu3 %v3580_v8  ;;  %v14428_v63 = vld [vmem:[#allocation30_spill] sm:$0xff] }
 0x593   :  { %4220 = vmatmul.f32.gmra.mxu0 %v10173_v6  ;;  %4285 = vmatmul.f32.gmra.mxu1 %v10178_v51  ;;  %v4027_v28 = vadd.f32 %v4026_v36, %v3962_v14 }
 0x594   :  { %4350 = vmatmul.f32.gmra.mxu2 %v14406_v29  ;;  %4403 = vmatmul.f32.gmra.mxu3 %v14407_v22 }
 0x595   :  { %4508 = vmatpush.msrb.mxu1 %v3448_v61  ;;  %4573 = vmatpush.msrb.mxu2 %v3512_v10 }
 0x596   :  { %4638 = vmatpush.msrb.mxu3 %v3576_v38  ;;  %v10873_v38 = vld [vmem:[#allocation5 + $0xef0] sm:$0xff] }
 0x597   :  { %v4091_v37 = vpop.f32.mrf.mxu2  ;;  %v4144_v62 = vpop.f32.mrf.mxu3 }
 0x598   :  { %v4092_v33 = vadd.f32 %v4091_v37, %v4027_v28  ;;  %v10814_v42 = vadd.f32 %v4144_v62, %v10748_v58  ;;  %v3964_v54 = vpop.f32.mrf.mxu0  ;;  %v10840_v28 = vld [vmem:[#allocation7 + $0x8] sm:$0xf] }
 0x599   :  { %v4029_v35 = vpop.f32.mrf.mxu1  ;;  %v3965_v41 = vadd.f32 %v3964_v54, %v10620_v31  ;;  %14412 = vst [vmem:[#allocation20_spill] sm:$0xff] %v10840_v28 }
 0x59a   :  { %14409 = vst [vmem:[#allocation25_spill] sm:$0xff] %v10814_v42  ;;  %v14425_v42 = vld [vmem:[#allocation65_spill] sm:$0xff] }
 0x59b   :  { %4223 = vmatmul.f32.gmra.mxu0 %v10208_v12  ;;  %4288 = vmatmul.f32.gmra.mxu1 %v10211_v40  ;;  %v4030_v26 = vadd.f32 %v4029_v35, %v3965_v41 }
 0x59c   :  { %4353 = vmatmul.f32.gmra.mxu2 %v10215_v59  ;;  %4406 = vmatmul.f32.gmra.mxu3 %v10217_v21 }
 0x59f   :  { %v4094_v11 = vpop.f32.mrf.mxu2  ;;  %v4147_v58 = vpop.f32.mrf.mxu3 }
 0x5a0   :  { %v4095_v1 = vadd.f32 %v4094_v11, %v4030_v26  ;;  %v10823_v55 = vadd.f32 %v4147_v58, %v10762_v5  ;;  %v3967_v39 = vpop.f32.mrf.mxu0 }
 0x5a1   :  { %v4032_v36 = vpop.f32.mrf.mxu1  ;;  %v3968_v32 = vadd.f32 %v3967_v39, %v10620_v31 }
 0x5a2   :  { %14410 = vst [vmem:[#allocation141_spill] sm:$0xff] %v10823_v55 }
 0x5a3   :  { %4226 = vmatmul.f32.gmra.mxu0 %v10233_v24  ;;  %4291 = vmatmul.f32.gmra.mxu1 %v10236_v34  ;;  %v4033_v52 = vadd.f32 %v4032_v36, %v3968_v32 }
 0x5a4   :  { %4356 = vmatmul.f32.gmra.mxu2 %v10240_v13  ;;  %4409 = vmatmul.f32.gmra.mxu3 %v10242_v57 }
 0x5a7   :  { %v4097_v14 = vpop.f32.mrf.mxu2  ;;  %v4150_v2 = vpop.f32.mrf.mxu3 }
 0x5a8   :  { %v4098_v5 = vadd.f32 %v4097_v14, %v4033_v52  ;;  %v10832_v50 = vadd.f32 %v4150_v2, %v10776_v53  ;;  %v3970_v61 = vpop.f32.mrf.mxu0  ;;  %v10843_v53 = vperm.slane %v10840_v28, 2 }
 0x5a9   :  { %v4035_v30 = vpop.f32.mrf.mxu1  ;;  %v3971_v10 = vadd.f32 %v3970_v61, %v10620_v31 }
 0x5aa   :  { %14411 = vst [vmem:[#allocation80_spill] sm:$0xff] %v10832_v50 }
 0x5ab   :  { %4229 = vmatmul.f32.gmra.mxu0 %v10251_v3  ;;  %4294 = vmatmul.f32.gmra.mxu1 %v10253_v17  ;;  %v4036_v49 = vadd.f32 %v4035_v30, %v3971_v10 }
 0x5ac   :  { %4359 = vmatmul.f32.gmra.mxu2 %v10256_v45  ;;  %4412 = vmatmul.f32.gmra.mxu3 %v10258_v19 }
 0x5af   :  { %v4100_v37 = vpop.f32.mrf.mxu2  ;;  %v4153_v62 = vpop.f32.mrf.mxu3 }
 0x5b0   :  { %v10845_v31 = vadd.f32 %v4100_v37, %v4036_v49  ;;  %v10848_v54 = vadd.f32 %v4153_v62, %v10796_v18  ;;  %v4185_v35 = vpop.f32.mrf.mxu0  ;;  %v10875_v49 = vld [vmem:[#allocation5 + $0xcf0] sm:$0xff]  ;;  %v5133_v37 = vunpack.c.l.bf16 %v10873_v38 }
 0x5b1   :  { %v4250_v41 = vpop.f32.mrf.mxu1  ;;  %v4186_v25 = vadd.f32 %v4185_v35, %v10843_v53  ;;  %v5005_v62 = vunpack.c.l.bf16 %v10875_v49 }
 0x5b2   :  { %14413 = vst [vmem:[#allocation76_spill] sm:$0xff] %v10848_v54  ;;  %5342 = vmatpush.msra.mxu2 %v5133_v37  ;;  %v10898_v37 = vld [vmem:[#allocation5 + $0xfe0] sm:$0xff] }
 0x5b3   :  { %4444 = vmatmul.f32.vlgmr.msrb.gmra.mxu0 %v9805_v47  ;;  %4509 = vmatmul.f32.vlgmr.msrb.gmra.mxu1 %v14227_v60  ;;  %v4251_v23 = vadd.f32 %v4250_v41, %v4186_v25  ;;  %v10882_v41 = vld [vmem:[#allocation5 + $0xdf0] sm:$0xff]  ;;  %14422 = vst [vmem:[#allocation16_spill] sm:$0xff] %v10898_v37 }
 0x5b4   :  { %4415 = vmatmul.f32.gmra.mxu3 %v10273_v0  ;;  %4574 = vmatmul.f32.vlgmr.msrb.gmra.mxu2 %v14228_v46 }
 0x5b5   :  { %5212 = vmatpush.msra.mxu0 %v5005_v62 }
 0x5b7   :  { %v4156_v26 = vpop.f32.mrf.mxu3  ;;  %v4315_v11 = vpop.f32.mrf.mxu2 }
 0x5b8   :  { %v10855_v58 = vadd.f32 %v4156_v26, %v4092_v33  ;;  %v10857_v39 = vadd.f32 %v4315_v11, %v4251_v23  ;;  %v4188_v18 = vpop.f32.mrf.mxu0  ;;  %v5069_v23 = vunpack.c.l.bf16 %v10882_v41 }
 0x5b9   :  { %v4253_v36 = vpop.f32.mrf.mxu1  ;;  %v4189_v32 = vadd.f32 %v4188_v18, %v10843_v53 }
 0x5ba   :  { %14414 = vst [vmem:[#allocation78_spill] sm:$0xff] %v10855_v58  ;;  %5277 = vmatpush.msra.mxu1 %v5069_v23  ;;  %v10903_v23 = vld [vmem:[#allocation5 + $0xde0] sm:$0xff] }
 0x5bb   :  { %4447 = vmatmul.f32.gmra.mxu0 %v14233_v7  ;;  %4512 = vmatmul.f32.gmra.mxu1 %v14234_v16  ;;  %v4254_v8 = vadd.f32 %v4253_v36, %v4189_v32  ;;  %14423 = vst [vmem:[#allocation33_spill] sm:$0xff] %v10903_v23 }
 0x5bc   :  { %4418 = vmatmul.f32.gmra.mxu3 %v10296_v56  ;;  %4577 = vmatmul.f32.gmra.mxu2 %v14317_v9 }
 0x5bf   :  { %v4159_v52 = vpop.f32.mrf.mxu3  ;;  %v4318_v14 = vpop.f32.mrf.mxu2 }
 0x5c0   :  { %v10864_v2 = vadd.f32 %v4159_v52, %v4095_v1  ;;  %v10866_v33 = vadd.f32 %v4318_v14, %v4254_v8  ;;  %v4191_v61 = vpop.f32.mrf.mxu0  ;;  %v10877_v1 = vld [vmem:[#allocation5 + $0xff0] sm:$0xff]  ;;  %v14417_v14 = vld [vmem:[#allocation55_spill] sm:$0xff] }
 0x5c1   :  { %v4256_v30 = vpop.f32.mrf.mxu1  ;;  %v4192_v10 = vadd.f32 %v4191_v61, %v10843_v53  ;;  %v5197_v35 = vunpack.c.l.bf16 %v10877_v1  ;;  %v14418_v61 = vld [vmem:[#allocation23_spill] sm:$0xff] }
 0x5c2   :  { %14415 = vst [vmem:[#allocation27_spill] sm:$0xff] %v10864_v2 }
 0x5c3   :  { %4450 = vmatmul.f32.gmra.mxu0 %v14241_v15  ;;  %4515 = vmatmul.f32.gmra.mxu1 %v14242_v43  ;;  %v4257_v25 = vadd.f32 %v4256_v30, %v4192_v10  ;;  %v14419_v30 = vld [vmem:[#allocation63_spill] sm:$0xff]  ;;  %v10894_v10 = vld [vmem:[#allocation5 + $0xee0] sm:$0xff] }
 0x5c4   :  { %4421 = vmatmul.f32.gmra.mxu3 %v10318_v44  ;;  %4580 = vmatmul.f32.gmra.mxu2 %v14322_v20  ;;  %14420 = vst [vmem:[#allocation82_spill] sm:$0xff] %v10894_v10  ;;  %v5129_v62 = vunpack.c.l.bf16 %v10894_v10 }
 0x5c5   :  { %5407 = vmatpush.msra.mxu3 %v5197_v35 }
 0x5c6   :  { %5343 = vmatpush.msra.mxu2 %v5129_v62  ;;  %v10916_v62 = vld [vmem:[#allocation5 + $0xed0] sm:$0xff] }
 0x5c7   :  { %v4162_v26 = vpop.f32.mrf.mxu3  ;;  %v4321_v11 = vpop.f32.mrf.mxu2  ;;  %14429 = vst [vmem:[#allocation86_spill] sm:$0xff] %v10916_v62 }
 0x5c8   :  { %v10885_v18 = vadd.f32 %v4162_v26, %v4098_v5  ;;  %v10887_v36 = vadd.f32 %v4321_v11, %v4257_v25  ;;  %v4194_v32 = vpop.f32.mrf.mxu0  ;;  %v10896_v5 = vld [vmem:[#allocation5 + $0xce0] sm:$0xff]  ;;  %v5193_v25 = vunpack.c.l.bf16 %v10898_v37  ;;  %v5065_v11 = vunpack.c.l.bf16 %v10903_v23 }
 0x5c9   :  { %v4259_v8 = vpop.f32.mrf.mxu1  ;;  %v4195_v52 = vadd.f32 %v4194_v32, %v10843_v53  ;;  %14421 = vst [vmem:[#allocation85_spill] sm:$0xff] %v10896_v5  ;;  %v5001_v35 = vunpack.c.l.bf16 %v10896_v5 }
 0x5ca   :  { %14416 = vst [vmem:[#allocation31_spill] sm:$0xff] %v10885_v18  ;;  %5408 = vmatpush.msra.mxu3 %v5193_v25  ;;  %5278 = vmatpush.msra.mxu1 %v5065_v11 }
 0x5cb   :  { %4453 = vmatmul.f32.gmra.mxu0 %v14325_v4  ;;  %4518 = vmatmul.f32.gmra.mxu1 %v14417_v14  ;;  %v4260_v26 = vadd.f32 %v4259_v8, %v4195_v52  ;;  %v14426_v8 = vld [vmem:[#allocation87_spill] sm:$0xff]  ;;  %v14427_v52 = vld [vmem:[#allocation44_spill] sm:$0xff] }
 0x5cc   :  { %4424 = vmatmul.f32.gmra.mxu3 %v14418_v61  ;;  %4583 = vmatmul.f32.gmra.mxu2 %v14419_v30 }
 0x5cd   :  { %5213 = vmatpush.msra.mxu0 %v5001_v35  ;;  %v5125_v35 = vunpack.c.l.bf16 %v10916_v62 }
 0x5cf   :  { %v4165_v32 = vpop.f32.mrf.mxu3  ;;  %v4324_v18 = vpop.f32.mrf.mxu2  ;;  %5344 = vmatpush.msra.mxu2 %v5125_v35  ;;  %v10938_v35 = vld [vmem:[#allocation5 + $0xec0] sm:$0xff] }
 0x5d0   :  { %v10907_v2 = vadd.f32 %v4165_v32, %v10845_v31  ;;  %v10909_v58 = vadd.f32 %v4324_v18, %v4260_v26  ;;  %v4197_v54 = vpop.f32.mrf.mxu0  ;;  %v10918_v31 = vld [vmem:[#allocation5 + $0xcd0] sm:$0xff]  ;;  %14436 = vst [vmem:[#allocation104_spill] sm:$0xff] %v10938_v35 }
 0x5d1   :  { %v4262_v50 = vpop.f32.mrf.mxu1  ;;  %v4198_v55 = vadd.f32 %v4197_v54, %v10843_v53  ;;  %14430 = vst [vmem:[#allocation127_spill] sm:$0xff] %v10918_v31  ;;  %v10920_v18 = vld [vmem:[#allocation5 + $0xfd0] sm:$0xff]  ;;  %v4997_v25 = vunpack.c.l.bf16 %v10918_v31 }
 0x5d2   :  { %14424 = vst [vmem:[#allocation58_spill] sm:$0xff] %v10907_v2  ;;  %v5189_v54 = vunpack.c.l.bf16 %v10920_v18  ;;  %v10925_v26 = vld [vmem:[#allocation5 + $0xdd0] sm:$0xff] }
 0x5d3   :  { %4456 = vmatmul.f32.gmra.mxu0 %v14425_v42  ;;  %4521 = vmatmul.f32.gmra.mxu1 %v14426_v8  ;;  %14431 = vst [vmem:[#allocation103_spill] sm:$0xff] %v10920_v18  ;;  %v4263_v11 = vadd.f32 %v4262_v50, %v4198_v55  ;;  %v5061_v32 = vunpack.c.l.bf16 %v10925_v26  ;;  %v14433_v55 = vld [vmem:[#allocation89_spill] sm:$0xff]  ;;  %v14434_v50 = vld [vmem:[#allocation90_spill] sm:$0xff] }
 0x5d4   :  { %4586 = vmatmul.f32.gmra.mxu2 %v14427_v52  ;;  %4639 = vmatmul.f32.vlgmr.msrb.gmra.mxu3 %v14428_v63  ;;  %14432 = vst [vmem:[#allocation19_spill] sm:$0xff] %v10925_v26  ;;  %v14435_v26 = vld [vmem:[#allocation12_spill] sm:$0xff]  ;;  %v11085_v52 = vld [vmem:[#allocation5 + $0xd40] sm:$0xff] }
 0x5d5   :  { %5214 = vmatpush.msra.mxu0 %v4997_v25  ;;  %5409 = vmatpush.msra.mxu3 %v5189_v54  ;;  %v10947_v54 = vld [vmem:[#allocation5 + $0xdc0] sm:$0xff]  ;;  %14493 = vst [vmem:[#allocation54_spill] sm:$0xff] %v11085_v52 }
 0x5d6   :  { %5279 = vmatpush.msra.mxu1 %v5061_v32  ;;  %14439 = vst [vmem:[#allocation61_spill] sm:$0xff] %v10947_v54  ;;  %v5057_v32 = vunpack.c.l.bf16 %v10947_v54  ;;  %v14443_v54 = vld [vmem:[#allocation93_spill] sm:$0xff] }
 0x5d7   :  { %v4327_v2 = vpop.f32.mrf.mxu2  ;;  %v4380_v23 = vpop.f32.mrf.mxu3 }
 0x5d8   :  { %v10928_v63 = vadd.f32 %v4327_v2, %v4263_v11  ;;  %v10931_v37 = vadd.f32 %v4380_v23, %v10857_v39  ;;  %v4200_v5 = vpop.f32.mrf.mxu0  ;;  %v10940_v2 = vld [vmem:[#allocation5 + $0xcc0] sm:$0xff]  ;;  %v5121_v23 = vunpack.c.l.bf16 %v10938_v35  ;;  %5280 = vmatpush.msra.mxu1 %v5057_v32  ;;  %v14440_v35 = vld [vmem:[#allocation92_spill] sm:$0xff] }
 0x5d9   :  { %v4265_v31 = vpop.f32.mrf.mxu1  ;;  %v4201_v18 = vadd.f32 %v4200_v5, %v10843_v53  ;;  %14437 = vst [vmem:[#allocation101_spill] sm:$0xff] %v10940_v2  ;;  %v10942_v39 = vld [vmem:[#allocation5 + $0xfc0] sm:$0xff]  ;;  %v4993_v25 = vunpack.c.l.bf16 %v10940_v2 }
 0x5da   :  { %14438 = vst [vmem:[#allocation48_spill] sm:$0xff] %v10942_v39  ;;  %v5185_v5 = vunpack.c.l.bf16 %v10942_v39  ;;  %5345 = vmatpush.msra.mxu2 %v5121_v23  ;;  %v10960_v23 = vld [vmem:[#allocation5 + $0xeb0] sm:$0xff] }
 0x5db   :  { %4459 = vmatmul.f32.gmra.mxu0 %v14343_v27  ;;  %4524 = vmatmul.f32.gmra.mxu1 %v14433_v55  ;;  %v4266_v11 = vadd.f32 %v4265_v31, %v4201_v18  ;;  %v14441_v31 = vld [vmem:[#allocation83_spill] sm:$0xff]  ;;  %v14442_v18 = vld [vmem:[#allocation56_spill] sm:$0xff]  ;;  %14444 = vst [vmem:[#allocation40_spill] sm:$0xff] %v10960_v23 }
 0x5dc   :  { %4589 = vmatmul.f32.gmra.mxu2 %v14434_v50  ;;  %4642 = vmatmul.f32.gmra.mxu3 %v14435_v26 }
 0x5dd   :  { %5215 = vmatpush.msra.mxu0 %v4993_v25  ;;  %5410 = vmatpush.msra.mxu3 %v5185_v5  ;;  %v10969_v5 = vld [vmem:[#allocation5 + $0xdb0] sm:$0xff] }
 0x5de   :  { %14447 = vst [vmem:[#allocation17_spill] sm:$0xff] %v10969_v5  ;;  %v5053_v32 = vunpack.c.l.bf16 %v10969_v5  ;;  %v14451_v5 = vld [vmem:[#allocation59_spill] sm:$0xff] }
 0x5df   :  { %v4330_v62 = vpop.f32.mrf.mxu2  ;;  %v4383_v50 = vpop.f32.mrf.mxu3 }
 0x5e0   :  { %v10950_v26 = vadd.f32 %v4330_v62, %v4266_v11  ;;  %v10953_v55 = vadd.f32 %v4383_v50, %v10866_v33  ;;  %v4203_v27 = vpop.f32.mrf.mxu0  ;;  %v10962_v62 = vld [vmem:[#allocation5 + $0xcb0] sm:$0xff]  ;;  %v5117_v50 = vunpack.c.l.bf16 %v10960_v23  ;;  %5281 = vmatpush.msra.mxu1 %v5053_v32  ;;  %v14448_v23 = vld [vmem:[#allocation94_spill] sm:$0xff] }
 0x5e1   :  { %v4268_v2 = vpop.f32.mrf.mxu1  ;;  %v4204_v39 = vadd.f32 %v4203_v27, %v10843_v53  ;;  %14445 = vst [vmem:[#allocation81_spill] sm:$0xff] %v10962_v62  ;;  %v10964_v33 = vld [vmem:[#allocation5 + $0xfb0] sm:$0xff]  ;;  %v4989_v25 = vunpack.c.l.bf16 %v10962_v62 }
 0x5e2   :  { %14446 = vst [vmem:[#allocation70_spill] sm:$0xff] %v10964_v33  ;;  %v5181_v27 = vunpack.c.l.bf16 %v10964_v33  ;;  %5346 = vmatpush.msra.mxu2 %v5117_v50  ;;  %v10982_v50 = vld [vmem:[#allocation5 + $0xea0] sm:$0xff] }
 0x5e3   :  { %4462 = vmatmul.f32.gmra.mxu0 %v14440_v35  ;;  %4527 = vmatmul.f32.gmra.mxu1 %v14441_v31  ;;  %v4269_v11 = vadd.f32 %v4268_v2, %v4204_v39  ;;  %v14449_v2 = vld [vmem:[#allocation29_spill] sm:$0xff]  ;;  %v14450_v39 = vld [vmem:[#allocation38_spill] sm:$0xff]  ;;  %14452 = vst [vmem:[#allocation120_spill] sm:$0xff] %v10982_v50 }
 0x5e4   :  { %4592 = vmatmul.f32.gmra.mxu2 %v14442_v18  ;;  %4645 = vmatmul.f32.gmra.mxu3 %v14443_v54 }
 0x5e5   :  { %5216 = vmatpush.msra.mxu0 %v4989_v25  ;;  %5411 = vmatpush.msra.mxu3 %v5181_v27  ;;  %v10991_v27 = vld [vmem:[#allocation5 + $0xda0] sm:$0xff] }
 0x5e6   :  { %14455 = vst [vmem:[#allocation36_spill] sm:$0xff] %v10991_v27  ;;  %v5049_v32 = vunpack.c.l.bf16 %v10991_v27  ;;  %v14459_v27 = vld [vmem:[#allocation13_spill] sm:$0xff] }
 0x5e7   :  { %v4333_v18 = vpop.f32.mrf.mxu2  ;;  %v4386_v31 = vpop.f32.mrf.mxu3 }
 0x5e8   :  { %v10972_v54 = vadd.f32 %v4333_v18, %v4269_v11  ;;  %v10975_v35 = vadd.f32 %v4386_v31, %v10887_v36  ;;  %v4206_v10 = vpop.f32.mrf.mxu0  ;;  %v10984_v18 = vld [vmem:[#allocation5 + $0xca0] sm:$0xff]  ;;  %v5113_v31 = vunpack.c.l.bf16 %v10982_v50  ;;  %5282 = vmatpush.msra.mxu1 %v5049_v32  ;;  %v14456_v50 = vld [vmem:[#allocation32_spill] sm:$0xff] }
 0x5e9   :  { %v4271_v62 = vpop.f32.mrf.mxu1  ;;  %v4207_v33 = vadd.f32 %v4206_v10, %v10843_v53  ;;  %14453 = vst [vmem:[#allocation53_spill] sm:$0xff] %v10984_v18  ;;  %v10986_v36 = vld [vmem:[#allocation5 + $0xfa0] sm:$0xff]  ;;  %v4985_v25 = vunpack.c.l.bf16 %v10984_v18 }
 0x5ea   :  { %14454 = vst [vmem:[#allocation91_spill] sm:$0xff] %v10986_v36  ;;  %v5177_v10 = vunpack.c.l.bf16 %v10986_v36  ;;  %5347 = vmatpush.msra.mxu2 %v5113_v31  ;;  %v11004_v31 = vld [vmem:[#allocation5 + $0xe90] sm:$0xff] }
 0x5eb   :  { %4465 = vmatmul.f32.gmra.mxu0 %v14448_v23  ;;  %4530 = vmatmul.f32.gmra.mxu1 %v14449_v2  ;;  %v4272_v11 = vadd.f32 %v4271_v62, %v4207_v33  ;;  %v14457_v62 = vld [vmem:[#allocation60_spill] sm:$0xff]  ;;  %v14458_v33 = vld [vmem:[#allocation34_spill] sm:$0xff]  ;;  %14460 = vst [vmem:[#allocation107_spill] sm:$0xff] %v11004_v31 }
 0x5ec   :  { %4595 = vmatmul.f32.gmra.mxu2 %v14450_v39  ;;  %4648 = vmatmul.f32.gmra.mxu3 %v14451_v5 }
 0x5ed   :  { %5217 = vmatpush.msra.mxu0 %v4985_v25  ;;  %5412 = vmatpush.msra.mxu3 %v5177_v10  ;;  %v11013_v10 = vld [vmem:[#allocation5 + $0xd90] sm:$0xff] }
 0x5ee   :  { %14463 = vst [vmem:[#allocation71_spill] sm:$0xff] %v11013_v10  ;;  %v5045_v32 = vunpack.c.l.bf16 %v11013_v10  ;;  %v14469_v10 = vld [vmem:[#allocation97_spill] sm:$0xff] }
 0x5ef   :  { %v4336_v39 = vpop.f32.mrf.mxu2  ;;  %v4389_v2 = vpop.f32.mrf.mxu3 }
 0x5f0   :  { %v10994_v5 = vadd.f32 %v4336_v39, %v4272_v11  ;;  %v10997_v23 = vadd.f32 %v4389_v2, %v10909_v58  ;;  %v4209_v61 = vpop.f32.mrf.mxu0  ;;  %v11006_v39 = vld [vmem:[#allocation5 + $0xc90] sm:$0xff]  ;;  %v5109_v2 = vunpack.c.l.bf16 %v11004_v31  ;;  %5283 = vmatpush.msra.mxu1 %v5045_v32  ;;  %v14466_v31 = vld [vmem:[#allocation66_spill] sm:$0xff] }
 0x5f1   :  { %v4274_v18 = vpop.f32.mrf.mxu1  ;;  %v4210_v36 = vadd.f32 %v4209_v61, %v10843_v53  ;;  %14461 = vst [vmem:[#allocation21_spill] sm:$0xff] %v11006_v39  ;;  %v11008_v58 = vld [vmem:[#allocation5 + $0xf90] sm:$0xff]  ;;  %v4981_v25 = vunpack.c.l.bf16 %v11006_v39 }
 0x5f2   :  { %14462 = vst [vmem:[#allocation41_spill] sm:$0xff] %v11008_v58  ;;  %v5173_v61 = vunpack.c.l.bf16 %v11008_v58  ;;  %5348 = vmatpush.msra.mxu2 %v5109_v2  ;;  %v11026_v2 = vld [vmem:[#allocation5 + $0xe80] sm:$0xff] }
 0x5f3   :  { %4468 = vmatmul.f32.gmra.mxu0 %v14456_v50  ;;  %4533 = vmatmul.f32.gmra.mxu1 %v14457_v62  ;;  %v4275_v11 = vadd.f32 %v4274_v18, %v4210_v36  ;;  %v14467_v18 = vld [vmem:[#allocation15_spill] sm:$0xff]  ;;  %v14468_v36 = vld [vmem:[#allocation14_spill] sm:$0xff]  ;;  %14470 = vst [vmem:[#allocation110_spill] sm:$0xff] %v11026_v2 }
 0x5f4   :  { %4598 = vmatmul.f32.gmra.mxu2 %v14458_v33  ;;  %4651 = vmatmul.f32.gmra.mxu3 %v14459_v27 }
 0x5f5   :  { %5218 = vmatpush.msra.mxu0 %v4981_v25  ;;  %5413 = vmatpush.msra.mxu3 %v5173_v61  ;;  %v11035_v61 = vld [vmem:[#allocation5 + $0xd80] sm:$0xff] }
 0x5f6   :  { %14473 = vst [vmem:[#allocation72_spill] sm:$0xff] %v11035_v61  ;;  %v5041_v32 = vunpack.c.l.bf16 %v11035_v61  ;;  %v14479_v61 = vld [vmem:[#allocation84_spill] sm:$0xff] }
 0x5f7   :  { %v4339_v33 = vpop.f32.mrf.mxu2  ;;  %v4392_v62 = vpop.f32.mrf.mxu3 }
 0x5f8   :  { %v11016_v27 = vadd.f32 %v4339_v33, %v4275_v11  ;;  %v11019_v50 = vadd.f32 %v4392_v62, %v10928_v63  ;;  %v4212_v28 = vpop.f32.mrf.mxu0  ;;  %v11028_v33 = vld [vmem:[#allocation5 + $0xc80] sm:$0xff]  ;;  %v5105_v62 = vunpack.c.l.bf16 %v11026_v2  ;;  %5284 = vmatpush.msra.mxu1 %v5041_v32  ;;  %v11044_v2 = vld [vmem:[#allocation5 + $0xe70] sm:$0xff] }
 0x5f9   :  { %v4277_v39 = vpop.f32.mrf.mxu1  ;;  %v4213_v58 = vadd.f32 %v4212_v28, %v10843_v53  ;;  %14471 = vst [vmem:[#allocation111_spill] sm:$0xff] %v11028_v33  ;;  %v11030_v63 = vld [vmem:[#allocation5 + $0xf80] sm:$0xff]  ;;  %v4977_v25 = vunpack.c.l.bf16 %v11028_v33 }
 0x5fa   :  { %14464 = vst [vmem:[#allocation50_spill] sm:$0xff] %v11016_v27  ;;  %v5169_v28 = vunpack.c.l.bf16 %v11030_v63  ;;  %5349 = vmatpush.msra.mxu2 %v5105_v62  ;;  %v14480_v62 = vld [vmem:[#allocation67_spill] sm:$0xff]  ;;  %v11061_v32 = vld [vmem:[#allocation5 + $0xd60] sm:$0xff] }
 0x5fb   :  { %14465 = vst [vmem:[#allocation126_spill] sm:$0xff] %v11019_v50  ;;  %4471 = vmatmul.f32.gmra.mxu0 %v14466_v31  ;;  %4536 = vmatmul.f32.gmra.mxu1 %v14467_v18  ;;  %v4278_v11 = vadd.f32 %v4277_v39, %v4213_v58  ;;  %v11046_v39 = vld [vmem:[#allocation5 + $0xc70] sm:$0xff] }
 0x5fc   :  { %4601 = vmatmul.f32.gmra.mxu2 %v14468_v36  ;;  %4654 = vmatmul.f32.gmra.mxu3 %v14469_v10  ;;  %14472 = vst [vmem:[#allocation108_spill] sm:$0xff] %v11030_v63  ;;  %v11048_v58 = vld [vmem:[#allocation5 + $0xd70] sm:$0xff] }
 0x5fd   :  { %5219 = vmatpush.msra.mxu0 %v4977_v25  ;;  %5414 = vmatpush.msra.mxu3 %v5169_v28  ;;  %14476 = vst [vmem:[#allocation26_spill] sm:$0xff] %v11044_v2  ;;  %v14481_v25 = vld [vmem:[#allocation115_spill] sm:$0xff]  ;;  %v14482_v28 = vld [vmem:[#allocation46_spill] sm:$0xff] }
 0x5fe   :  { %14477 = vst [vmem:[#allocation116_spill] sm:$0xff] %v11046_v39 }
 0x5ff   :  { %v4342_v36 = vpop.f32.mrf.mxu2  ;;  %v4395_v18 = vpop.f32.mrf.mxu3  ;;  %14478 = vst [vmem:[#allocation117_spill] sm:$0xff] %v11048_v58 }
 0x600   :  { %v11038_v10 = vadd.f32 %v4342_v36, %v4278_v11  ;;  %v11041_v31 = vadd.f32 %v4395_v18, %v10950_v26  ;;  %v4215_v27 = vpop.f32.mrf.mxu0  ;;  %v5101_v36 = vunpack.c.l.bf16 %v11044_v2  ;;  %v4973_v26 = vunpack.c.l.bf16 %v11046_v39  ;;  %v11059_v11 = vld [vmem:[#allocation5 + $0xc60] sm:$0xff]  ;;  %14485 = vst [vmem:[#allocation119_spill] sm:$0xff] %v11061_v32 }
 0x601   :  { %v4280_v33 = vpop.f32.mrf.mxu1  ;;  %v4216_v63 = vadd.f32 %v4215_v27, %v10843_v53  ;;  %v5037_v18 = vunpack.c.l.bf16 %v11048_v58  ;;  %v11057_v27 = vld [vmem:[#allocation5 + $0xf70] sm:$0xff]  ;;  %14484 = vst [vmem:[#allocation109_spill] sm:$0xff] %v11059_v11  ;;  %v4969_v2 = vunpack.c.l.bf16 %v11059_v11  ;;  %v5033_v39 = vunpack.c.l.bf16 %v11061_v32 }
 0x602   :  { %14474 = vst [vmem:[#allocation113_spill] sm:$0xff] %v11038_v10  ;;  %5350 = vmatpush.msra.mxu2 %v5101_v36  ;;  %5220 = vmatpush.msra.mxu0 %v4973_v26  ;;  %v11071_v10 = vld [vmem:[#allocation5 + $0xd50] sm:$0xff] }
 0x603   :  { %14475 = vst [vmem:[#allocation51_spill] sm:$0xff] %v11041_v31  ;;  %4474 = vmatmul.f32.gmra.mxu0 %v14479_v61  ;;  %4539 = vmatmul.f32.gmra.mxu1 %v14480_v62  ;;  %v5165_v62 = vunpack.c.l.bf16 %v11057_v27  ;;  %v11066_v61 = vld [vmem:[#allocation5 + $0xe60] sm:$0xff]  ;;  %v4281_v58 = vadd.f32 %v4280_v33, %v4216_v63  ;;  %v11073_v31 = vld [vmem:[#allocation5 + $0xe50] sm:$0xff]  ;;  %v5029_v32 = vunpack.c.l.bf16 %v11071_v10 }
 0x604   :  { %4604 = vmatmul.f32.gmra.mxu2 %v14481_v25  ;;  %4657 = vmatmul.f32.gmra.mxu3 %v14482_v28  ;;  %14483 = vst [vmem:[#allocation118_spill] sm:$0xff] %v11057_v27  ;;  %v5097_v28 = vunpack.c.l.bf16 %v11066_v61  ;;  %v11069_v25 = vld [vmem:[#allocation5 + $0xc50] sm:$0xff]  ;;  %v5093_v27 = vunpack.c.l.bf16 %v11073_v31 }
 0x605   :  { %14486 = vst [vmem:[#allocation42_spill] sm:$0xff] %v11066_v61  ;;  %5285 = vmatpush.msra.mxu1 %v5037_v18  ;;  %5415 = vmatpush.msra.mxu3 %v5165_v62  ;;  %v4965_v11 = vunpack.c.l.bf16 %v11069_v25  ;;  %v11083_v61 = vld [vmem:[#allocation5 + $0xc40] sm:$0xff] }
 0x606   :  { %14487 = vst [vmem:[#allocation24_spill] sm:$0xff] %v11069_v25  ;;  %5221 = vmatpush.msra.mxu0 %v4969_v2  ;;  %5351 = vmatpush.msra.mxu2 %v5097_v28  ;;  %v11087_v62 = vld [vmem:[#allocation5 + $0xe40] sm:$0xff]  ;;  %v11095_v28 = vld [vmem:[#allocation5 + $0xd30] sm:$0xff] }
 0x607   :  { %14488 = vst [vmem:[#allocation74_spill] sm:$0xff] %v11071_v10  ;;  %v4345_v36 = vpop.f32.mrf.mxu2  ;;  %v4398_v26 = vpop.f32.mrf.mxu3  ;;  %5286 = vmatpush.msra.mxu1 %v5033_v39  ;;  %v4961_v10 = vunpack.c.l.bf16 %v11083_v61  ;;  %v11093_v39 = vld [vmem:[#allocation5 + $0xc30] sm:$0xff]  ;;  %v14499_v25 = vld [vmem:[#allocation98_spill] sm:$0xff] }
 0x608   :  { %14489 = vst [vmem:[#allocation122_spill] sm:$0xff] %v11073_v31  ;;  %v11078_v33 = vadd.f32 %v4345_v36, %v4281_v58  ;;  %v11081_v63 = vadd.f32 %v4398_v26, %v10972_v54  ;;  %v4218_v18 = vpop.f32.mrf.mxu0  ;;  %5222 = vmatpush.msra.mxu0 %v4965_v11  ;;  %v5025_v31 = vunpack.c.l.bf16 %v11085_v52  ;;  %5352 = vmatpush.msra.mxu2 %v5093_v27  ;;  %v5089_v54 = vunpack.c.l.bf16 %v11087_v62  ;;  %v11097_v36 = vld [vmem:[#allocation5 + $0xe30] sm:$0xff] }
 0x609   :  { %14492 = vst [vmem:[#allocation79_spill] sm:$0xff] %v11083_v61  ;;  %v4283_v2 = vpop.f32.mrf.mxu1  ;;  %v4219_v58 = vadd.f32 %v4218_v18, %v10843_v53  ;;  %5287 = vmatpush.msra.mxu1 %v5029_v32  ;;  %v14498_v26 = vld [vmem:[#allocation64_spill] sm:$0xff]  ;;  %v4957_v11 = vunpack.c.l.bf16 %v11093_v39  ;;  %v11104_v32 = vld [vmem:[#allocation5 + $0xf60] sm:$0xff]  ;;  %v5021_v27 = vunpack.c.l.bf16 %v11095_v28  ;;  %v5085_v18 = vunpack.c.l.bf16 %v11097_v36 }
 0x60a   :  { %14490 = vst [vmem:[#allocation123_spill] sm:$0xff] %v11078_v33  ;;  %v14500_v52 = vld [vmem:[#allocation100_spill] sm:$0xff]  ;;  %v11110_v61 = vld [vmem:[#allocation5 + $0xd20] sm:$0xff]  ;;  %5223 = vmatpush.msra.mxu0 %v4961_v10  ;;  %5353 = vmatpush.msra.mxu2 %v5089_v54 }
 0x60b   :  { %14491 = vst [vmem:[#allocation124_spill] sm:$0xff] %v11081_v63  ;;  %4477 = vmatmul.f32.gmra.mxu0 %v14498_v26  ;;  %4542 = vmatmul.f32.gmra.mxu1 %v14499_v25  ;;  %v5161_v25 = vunpack.c.l.bf16 %v11104_v32  ;;  %v11114_v26 = vld [vmem:[#allocation5 + $0xe20] sm:$0xff]  ;;  %v11118_v33 = vld [vmem:[#allocation5 + $0xc10] sm:$0xff] }
 0x60c   :  { %14494 = vst [vmem:[#allocation125_spill] sm:$0xff] %v11087_v62  ;;  %4607 = vmatmul.f32.gmra.mxu2 %v14399_v48  ;;  %4660 = vmatmul.f32.gmra.mxu3 %v14500_v52  ;;  %v11108_v62 = vld [vmem:[#allocation5 + $0xc20] sm:$0xff]  ;;  %v4284_v48 = vadd.f32 %v4283_v2, %v4219_v58  ;;  %v5017_v52 = vunpack.c.l.bf16 %v11110_v61 }
 0x60d   :  { %14495 = vst [vmem:[#allocation128_spill] sm:$0xff] %v11093_v39  ;;  %5288 = vmatpush.msra.mxu1 %v5025_v31  ;;  %v4953_v39 = vunpack.c.l.bf16 %v11108_v62  ;;  %5416 = vmatpush.msra.mxu3 %v5161_v25  ;;  %v11122_v31 = vld [vmem:[#allocation5 + $0xe10] sm:$0xff]  ;;  %v11129_v58 = vld [vmem:[#allocation5 + $0xc00] sm:$0xff] }
 0x60e   :  { %14496 = vst [vmem:[#allocation130_spill] sm:$0xff] %v11095_v28  ;;  %v5081_v28 = vunpack.c.l.bf16 %v11114_v26  ;;  %5224 = vmatpush.msra.mxu0 %v4957_v11  ;;  %5354 = vmatpush.msra.mxu2 %v5085_v18  ;;  %v11131_v54 = vld [vmem:[#allocation5 + $0xd00] sm:$0xff] }
 0x60f   :  { %14497 = vst [vmem:[#allocation129_spill] sm:$0xff] %v11097_v36  ;;  %v11120_v36 = vld [vmem:[#allocation5 + $0xd10] sm:$0xff]  ;;  %v4348_v63 = vpop.f32.mrf.mxu2  ;;  %v4401_v50 = vpop.f32.mrf.mxu3  ;;  %5289 = vmatpush.msra.mxu1 %v5021_v27  ;;  %v11135_v11 = vld [vmem:[#allocation5 + $0xe00] sm:$0xff] }
 0x610   :  { %14501 = vst [vmem:[#allocation96_spill] sm:$0xff] %v11108_v62  ;;  %v11124_v10 = vadd.f32 %v4348_v63, %v4284_v48  ;;  %v11127_v62 = vadd.f32 %v4401_v50, %v10994_v5  ;;  %v4221_v2 = vpop.f32.mrf.mxu0  ;;  %5225 = vmatpush.msra.mxu0 %v4953_v39  ;;  %v5013_v25 = vunpack.c.l.bf16 %v11120_v36  ;;  %5355 = vmatpush.msra.mxu2 %v5081_v28  ;;  %v5077_v5 = vunpack.c.l.bf16 %v11122_v31  ;;  %v11146_v27 = vld [vmem:[#allocation5 + $0xf50] sm:$0xff] }
 0x611   :  { %14502 = vst [vmem:[#allocation131_spill] sm:$0xff] %v11110_v61  ;;  %v4949_v61 = vunpack.c.l.bf16 %v11118_v33  ;;  %v4222_v48 = vadd.f32 %v4221_v2, %v10843_v53  ;;  %5290 = vmatpush.msra.mxu1 %v5017_v52  ;;  %v4945_v50 = vunpack.c.l.bf16 %v11129_v58  ;;  %v5009_v63 = vunpack.c.l.bf16 %v11131_v54 }
 0x612   :  { %14503 = vst [vmem:[#allocation55_spill] sm:$0xff] %v11114_v26  ;;  %v4286_v26 = vpop.f32.mrf.mxu1  ;;  %v5073_v39 = vunpack.c.l.bf16 %v11135_v11  ;;  %v5157_v52 = vunpack.c.l.bf16 %v11146_v27  ;;  %5356 = vmatpush.msra.mxu2 %v5077_v5 }
 0x613   :  { %14504 = vst [vmem:[#allocation63_spill] sm:$0xff] %v11129_v58  ;;  %4480 = vmatmul.f32.gmra.mxu0 %v10173_v6  ;;  %4545 = vmatmul.f32.gmra.mxu1 %v10178_v51  ;;  %v4287_v28 = vadd.f32 %v4286_v26, %v4222_v48 }
 0x614   :  { %14505 = vst [vmem:[#allocation65_spill] sm:$0xff] %v11131_v54  ;;  %4610 = vmatmul.f32.gmra.mxu2 %v14406_v29  ;;  %4663 = vmatmul.f32.gmra.mxu3 %v14407_v22 }
 0x615   :  { %14506 = vst [vmem:[#allocation87_spill] sm:$0xff] %v11135_v11  ;;  %5226 = vmatpush.msra.mxu0 %v4949_v61  ;;  %5291 = vmatpush.msra.mxu1 %v5013_v25  ;;  %v11158_v61 = vld [vmem:[#allocation5 + $0xf40] sm:$0xff] }
 0x616   :  { %5357 = vmatpush.msra.mxu2 %v5073_v39  ;;  %5417 = vmatpush.msra.mxu3 %v5157_v52  ;;  %14507 = vst [vmem:[#allocation142_spill] sm:$0xff] %v11158_v61  ;;  %v5153_v26 = vunpack.c.l.bf16 %v11158_v61  ;;  %v11173_v39 = vld [vmem:[#allocation5 + $0xf30] sm:$0xff] }
 0x617   :  { %v4351_v18 = vpop.f32.mrf.mxu2  ;;  %v11149_v2 = vpop.f32.mrf.mxu3  ;;  %5227 = vmatpush.msra.mxu0 %v4945_v50  ;;  %5292 = vmatpush.msra.mxu1 %v5009_v63  ;;  %14508 = vst [vmem:[#allocation143_spill] sm:$0xff] %v11173_v39 }
 0x618   :  { %v11151_v54 = vadd.f32 %v4351_v18, %v4287_v28  ;;  %v4224_v58 = vpop.f32.mrf.mxu0  ;;  %5418 = vmatpush.msra.mxu3 %v5153_v26  ;;  %v14510_v26 = vld [vmem:[#allocation138_spill] sm:$0xff] }
 0x619   :  { %v4225_v11 = vadd.f32 %v4224_v58, %v10843_v53 }
 0x61a   :  { %v4289_v22 = vpop.f32.mrf.mxu1 }
 0x61b   :  { %4483 = vmatmul.f32.gmra.mxu0 %v10208_v12  ;;  %4548 = vmatmul.f32.gmra.mxu1 %v10211_v40  ;;  %v4290_v25 = vadd.f32 %v4289_v22, %v4225_v11  ;;  %v5149_v22 = vunpack.c.l.bf16 %v11173_v39  ;;  %v14509_v11 = vld [vmem:[#allocation37_spill] sm:$0xff] }
 0x61c   :  { %4613 = vmatmul.f32.gmra.mxu2 %v10215_v59  ;;  %4666 = vmatmul.f32.gmra.mxu3 %v10217_v21  ;;  %v4688_v52 = vadd.f32 %v9805_v47, %v14509_v11  ;;  %v11194_v47 = vld [vmem:[#allocation5 + $0xf20] sm:$0xff] }
 0x61d   :  { %5419 = vmatpush.msra.mxu3 %v5149_v22  ;;  %14511 = vst [vmem:[#allocation37_spill] sm:$0xff] %v11194_v47  ;;  %v14512_v22 = vld [vmem:[#allocation69_spill] sm:$0xff] }
 0x61e   :  { %6730 = vtanh.f32 %v4688_v52  ;;  %v14513_v52 = vld [vmem:[#allocation75_spill] sm:$0xff] }
 0x61f   :  { %v4354_v48 = vpop.f32.mrf.mxu2  ;;  %v11161_v5 = vpop.f32.mrf.mxu3 }
 0x620   :  { %v11163_v50 = vadd.f32 %v4354_v48, %v4290_v25  ;;  %v11165_v58 = vpop.f32.mrf.mxu0  ;;  %v4689_v25 = vadd.f32 %v14227_v60, %v14510_v26  ;;  %v5145_v60 = vunpack.c.l.bf16 %v11194_v47  ;;  %v4693_v26 = vadd.f32 %v14234_v16, %v14513_v52  ;;  %v11221_v16 = vld [vmem:[#allocation5 + $0xf10] sm:$0xff]  ;;  %v14519_v52 = vld [vmem:[#allocation139_spill] sm:$0xff] }
 0x621   :  { %14517 = vst [vmem:[#allocation144_spill] sm:$0xff] %v11221_v16 }
 0x622   :  { %v11167_v63 = vpop.f32.mrf.mxu1  ;;  %6732 = vtanh.f32 %v4689_v25  ;;  %5420 = vmatpush.msra.mxu3 %v5145_v60 }
 0x623   :  { %4486 = vmatmul.f32.gmra.mxu0 %v10233_v24  ;;  %4551 = vmatmul.f32.gmra.mxu1 %v10236_v34 }
 0x624   :  { %4616 = vmatmul.f32.gmra.mxu2 %v10240_v13  ;;  %4669 = vmatmul.f32.gmra.mxu3 %v10242_v57  ;;  %v4690_v57 = vadd.f32 %v14228_v46, %v10931_v37  ;;  %v4692_v46 = vadd.f32 %v14233_v7, %v14512_v22  ;;  %v11207_v39 = vpop.eup %6730 }
 0x625   :  { %14514 = vst [vmem:[#allocation138_spill] sm:$0xff] %v11207_v39 }
 0x626   :  { %6734 = vtanh.f32 %v4690_v57  ;;  %v4694_v57 = vadd.f32 %v14317_v9, %v10953_v55  ;;  %v5141_v9 = vunpack.c.l.bf16 %v11221_v16  ;;  %v14518_v55 = vld [vmem:[#allocation112_spill] sm:$0xff] }
 0x627   :  { %v11178_v28 = vpop.f32.mrf.mxu2  ;;  %v11180_v18 = vpop.f32.mrf.mxu3  ;;  %6736 = vtanh.f32 %v4692_v46  ;;  %v4696_v60 = vadd.f32 %v14241_v15, %v14518_v55 }
 0x628   :  { %v11184_v48 = vpop.f32.mrf.mxu0  ;;  %v11213_v47 = vpop.eup %6732  ;;  %6738 = vtanh.f32 %v4693_v26  ;;  %5421 = vmatpush.msra.mxu3 %v5141_v9  ;;  %v4697_v26 = vadd.f32 %v14242_v43, %v14519_v52  ;;  %v11248_v43 = vld [vmem:[#allocation5 + $0xf00] sm:$0xff]  ;;  %v14525_v52 = vld [vmem:[#allocation140_spill] sm:$0xff] }
 0x629   :  { %14515 = vst [vmem:[#allocation69_spill] sm:$0xff] %v11213_v47  ;;  %6740 = vtanh.f32 %v4694_v57  ;;  %v4698_v57 = vadd.f32 %v14322_v20, %v10975_v35  ;;  %v5137_v20 = vunpack.c.l.bf16 %v11248_v43  ;;  %v14524_v35 = vld [vmem:[#allocation35_spill] sm:$0xff] }
 0x62a   :  { %v11188_v21 = vpop.f32.mrf.mxu1  ;;  %6742 = vtanh.f32 %v4696_v60  ;;  %14523 = vst [vmem:[#allocation146_spill] sm:$0xff] %v11248_v43  ;;  %v4700_v9 = vadd.f32 %v14325_v4, %v14524_v35  ;;  %v14529_v35 = vld [vmem:[#allocation49_spill] sm:$0xff] }
 0x62b   :  { %4489 = vmatmul.f32.gmra.mxu0 %v10251_v3  ;;  %4554 = vmatmul.f32.gmra.mxu1 %v10253_v17  ;;  %6744 = vtanh.f32 %v4697_v26  ;;  %v4701_v26 = vadd.f32 %v14417_v14, %v14525_v52  ;;  %v5134_v14 = vunpack.c.h.bf16 %v10873_v38  ;;  %v14530_v52 = vld [vmem:[#allocation28_spill] sm:$0xff]  ;;  %v14554_v17 = vld [vmem:[#allocation103_spill] sm:$0xff]  ;;  %v14556_v3 = vld [vmem:[#allocation22_spill] sm:$0xff] }
 0x62c   :  { %4619 = vmatmul.f32.gmra.mxu2 %v10256_v45  ;;  %4672 = vmatmul.f32.gmra.mxu3 %v10258_v19  ;;  %v11215_v7 = vpop.eup %6734  ;;  %6746 = vtanh.f32 %v4698_v57  ;;  %v4702_v57 = vadd.f32 %v14419_v30, %v10997_v23  ;;  %v5006_v30 = vunpack.c.h.bf16 %v10875_v49  ;;  %v5198_v23 = vunpack.c.h.bf16 %v10877_v1  ;;  %v14532_v1 = vld [vmem:[#allocation126_spill] sm:$0xff] }
 0x62d   :  { %14516 = vst [vmem:[#allocation75_spill] sm:$0xff] %v11215_v7  ;;  %5422 = vmatpush.msra.mxu3 %v5137_v20  ;;  %6748 = vtanh.f32 %v4700_v9  ;;  %v5070_v20 = vunpack.c.h.bf16 %v10882_v41  ;;  %v4704_v9 = vadd.f32 %v14425_v42, %v14529_v35  ;;  %5602 = vmatpush.msrb.mxu2 %v5134_v14  ;;  %v14533_v41 = vld [vmem:[#allocation44_spill] sm:$0xff] }
 0x62e   :  { %6750 = vtanh.f32 %v4701_v26  ;;  %5472 = vmatpush.msrb.mxu0 %v5006_v30  ;;  %v4705_v26 = vadd.f32 %v14426_v8, %v14530_v52  ;;  %v14536_v8 = vld [vmem:[#allocation20_spill] sm:$0xff]  ;;  %v14539_v52 = vld [vmem:[#allocation85_spill] sm:$0xff] }
 0x62f   :  { %v11199_v37 = vpop.f32.mrf.mxu2  ;;  %v11201_v11 = vpop.f32.mrf.mxu3  ;;  %6752 = vtanh.f32 %v4702_v57  ;;  %5667 = vmatpush.msrb.mxu3 %v5198_v23  ;;  %5537 = vmatpush.msrb.mxu1 %v5070_v20  ;;  %v4706_v57 = vadd.f32 %v14533_v41, %v14532_v1  ;;  %v11302_v30 = vperm.slane %v14536_v8, 3  ;;  %v14537_v23 = vld [vmem:[#allocation23_spill] sm:$0xff]  ;;  %v14538_v20 = vld [vmem:[#allocation82_spill] sm:$0xff]  ;;  %v5002_v1 = vunpack.c.h.bf16 %v14539_v52  ;;  %v14540_v41 = vld [vmem:[#allocation16_spill] sm:$0xff] }
 0x630   :  { %v11205_v25 = vpop.f32.mrf.mxu0  ;;  %6754 = vtanh.f32 %v4704_v9  ;;  %v5130_v35 = vunpack.c.h.bf16 %v14538_v20  ;;  %v5194_v9 = vunpack.c.h.bf16 %v14540_v41  ;;  %v14544_v8 = vld [vmem:[#allocation62_spill] sm:$0xff] }
 0x631   :  { %6756 = vtanh.f32 %v4705_v26  ;;  %5473 = vmatpush.msrb.mxu0 %v5002_v1 }
 0x632   :  { %v11211_v19 = vpop.f32.mrf.mxu1  ;;  %6758 = vtanh.f32 %v4706_v57  ;;  %5603 = vmatpush.msrb.mxu2 %v5130_v35  ;;  %5668 = vmatpush.msrb.mxu3 %v5194_v9  ;;  %v4446_v57 = vadd.f32 %v11205_v25, %v11302_v30  ;;  %v14552_v25 = vld [vmem:[#allocation86_spill] sm:$0xff] }
 0x633   :  { %5228 = vmatmul.f32.vlgmr.msra.gmra.mxu0 %v11207_v39  ;;  %5293 = vmatmul.f32.vlgmr.msra.gmra.mxu1 %v11213_v47  ;;  %v5126_v9 = vunpack.c.h.bf16 %v14552_v25 }
 0x634   :  { %4675 = vmatmul.f32.gmra.mxu3 %v10273_v0  ;;  %5358 = vmatmul.f32.vlgmr.msra.gmra.mxu2 %v11215_v7  ;;  %v11234_v0 = vpop.eup %6736  ;;  %v4511_v41 = vadd.f32 %v11211_v19, %v4446_v57  ;;  %v14559_v19 = vld [vmem:[#allocation83_spill] sm:$0xff] }
 0x635   :  { %14520 = vst [vmem:[#allocation112_spill] sm:$0xff] %v11234_v0  ;;  %v11240_v16 = vpop.eup %6738  ;;  %5604 = vmatpush.msrb.mxu2 %v5126_v9 }
 0x636   :  { %14521 = vst [vmem:[#allocation139_spill] sm:$0xff] %v11240_v16  ;;  %v11242_v15 = vpop.eup %6740 }
 0x637   :  { %v11226_v22 = vpop.f32.mrf.mxu3  ;;  %v11228_v46 = vpop.f32.mrf.mxu2  ;;  %14522 = vst [vmem:[#allocation145_spill] sm:$0xff] %v11242_v15 }
 0x638   :  { %v11232_v47 = vpop.f32.mrf.mxu0 }
 0x639   :  { %v4449_v25 = vadd.f32 %v11232_v47, %v11302_v30 }
 0x63a   :  { %v11238_v7 = vpop.f32.mrf.mxu1 }
 0x63b   :  { %5231 = vmatmul.f32.gmra.mxu0 %v11234_v0  ;;  %5296 = vmatmul.f32.gmra.mxu1 %v11240_v16  ;;  %v14542_v0 = vld [vmem:[#allocation52_spill] sm:$0xff] }
 0x63c   :  { %4678 = vmatmul.f32.gmra.mxu3 %v10296_v56  ;;  %5361 = vmatmul.f32.gmra.mxu2 %v11242_v15  ;;  %v11261_v56 = vpop.eup %6742 }
 0x63d   :  { %14526 = vst [vmem:[#allocation35_spill] sm:$0xff] %v11261_v56  ;;  %v11267_v43 = vpop.eup %6744 }
 0x63e   :  { %14527 = vst [vmem:[#allocation140_spill] sm:$0xff] %v11267_v43  ;;  %v11269_v4 = vpop.eup %6746 }
 0x63f   :  { %v11253_v55 = vpop.f32.mrf.mxu3  ;;  %v11255_v60 = vpop.f32.mrf.mxu2  ;;  %14528 = vst [vmem:[#allocation147_spill] sm:$0xff] %v11269_v4 }
 0x640   :  { %v11259_v16 = vpop.f32.mrf.mxu0  ;;  %v11289_v49 = vpop.eup %6748 }
 0x641   :  { %14531 = vst [vmem:[#allocation49_spill] sm:$0xff] %v11289_v49  ;;  %v11295_v42 = vpop.eup %6750 }
 0x642   :  { %v11265_v15 = vpop.f32.mrf.mxu1  ;;  %14534 = vst [vmem:[#allocation28_spill] sm:$0xff] %v11295_v42  ;;  %v11297_v14 = vpop.eup %6752 }
 0x643   :  { %5234 = vmatmul.f32.gmra.mxu0 %v11261_v56  ;;  %5299 = vmatmul.f32.gmra.mxu1 %v11267_v43  ;;  %14535 = vst [vmem:[#allocation126_spill] sm:$0xff] %v11297_v14  ;;  %v14541_v56 = vld [vmem:[#allocation33_spill] sm:$0xff]  ;;  %v11318_v20 = vpop.eup %6754 }
 0x644   :  { %4681 = vmatmul.f32.gmra.mxu3 %v10318_v44  ;;  %5364 = vmatmul.f32.gmra.mxu2 %v11269_v4  ;;  %v5066_v26 = vunpack.c.h.bf16 %v14541_v56  ;;  %14547 = vst [vmem:[#allocation20_spill] sm:$0xff] %v11318_v20  ;;  %v11324_v52 = vpop.eup %6756 }
 0x645   :  { %14548 = vst [vmem:[#allocation82_spill] sm:$0xff] %v11324_v52 }
 0x646   :  { %5538 = vmatpush.msrb.mxu1 %v5066_v26  ;;  %v14553_v26 = vld [vmem:[#allocation127_spill] sm:$0xff] }
 0x647   :  { %v11283_v44 = vpop.f32.mrf.mxu3  ;;  %v11285_v4 = vpop.f32.mrf.mxu2 }
 0x648   :  { %v11287_v38 = vpop.f32.mrf.mxu0 }
 0x64a   :  { %v11293_v43 = vpop.f32.mrf.mxu1 }
 0x64b   :  { %5237 = vmatmul.f32.gmra.mxu0 %v11289_v49  ;;  %5302 = vmatmul.f32.gmra.mxu1 %v11295_v42  ;;  %v14543_v49 = vld [vmem:[#allocation88_spill] sm:$0xff]  ;;  %v14545_v42 = vld [vmem:[#allocation89_spill] sm:$0xff] }
 0x64c   :  { %4684 = vmatmul.f32.gmra.mxu3 %v14537_v23  ;;  %5367 = vmatmul.f32.gmra.mxu2 %v11297_v14  ;;  %v4708_v39 = vadd.f32 %v14543_v49, %v14542_v0  ;;  %v4709_v45 = vadd.f32 %v14545_v42, %v14544_v8  ;;  %v14549_v0 = vld [vmem:[#allocation51_spill] sm:$0xff]  ;;  %v14550_v49 = vld [vmem:[#allocation90_spill] sm:$0xff]  ;;  %v11330_v42 = vpop.eup %6758  ;;  %v4998_v8 = vunpack.c.h.bf16 %v14553_v26 }
 0x64d   :  { %v4710_v35 = vadd.f32 %v14550_v49, %v14549_v0  ;;  %14551 = vst [vmem:[#allocation85_spill] sm:$0xff] %v11330_v42  ;;  %v5190_v0 = vunpack.c.h.bf16 %v14554_v17  ;;  %v14555_v49 = vld [vmem:[#allocation19_spill] sm:$0xff] }
 0x64e   :  { %6760 = vtanh.f32 %v4708_v39  ;;  %v5062_v39 = vunpack.c.h.bf16 %v14555_v49  ;;  %5474 = vmatpush.msrb.mxu0 %v4998_v8 }
 0x64f   :  { %v11314_v23 = vpop.f32.mrf.mxu3  ;;  %v11316_v14 = vpop.f32.mrf.mxu2  ;;  %6762 = vtanh.f32 %v4709_v45  ;;  %5669 = vmatpush.msrb.mxu3 %v5190_v0  ;;  %v4514_v0 = vadd.f32 %v11238_v7, %v4449_v25  ;;  %v14572_v25 = vld [vmem:[#allocation77_spill] sm:$0xff] }
 0x650   :  { %14546 = vst [vmem:[#allocation44_spill] sm:$0xff] %v11314_v23  ;;  %v11322_v56 = vpop.f32.mrf.mxu0  ;;  %6764 = vtanh.f32 %v4710_v35  ;;  %v14557_v23 = vld [vmem:[#allocation92_spill] sm:$0xff]  ;;  %5539 = vmatpush.msrb.mxu1 %v5062_v39 }
 0x651   :  { %v4712_v45 = vadd.f32 %v14557_v23, %v14556_v3  ;;  %v14563_v23 = vld [vmem:[#allocation56_spill] sm:$0xff]  ;;  %v4579_v7 = vadd.f32 %v11255_v60, %v4514_v0  ;;  %v14576_v60 = vld [vmem:[#allocation38_spill] sm:$0xff] }
 0x652   :  { %v11328_v1 = vpop.f32.mrf.mxu1  ;;  %v4718_v0 = vadd.f32 %v14576_v60, %v11127_v62  ;;  %v14580_v62 = vld [vmem:[#allocation40_spill] sm:$0xff] }
 0x653   :  { %5240 = vmatmul.f32.gmra.mxu0 %v11318_v20  ;;  %5305 = vmatmul.f32.gmra.mxu1 %v11324_v52  ;;  %v4576_v20 = vadd.f32 %v11228_v46, %v4511_v41  ;;  %v14558_v52 = vld [vmem:[#allocation95_spill] sm:$0xff]  ;;  %v14562_v46 = vld [vmem:[#allocation124_spill] sm:$0xff]  ;;  %6766 = vtanh.f32 %v4712_v45 }
 0x654   :  { %5370 = vmatmul.f32.gmra.mxu2 %v11330_v42  ;;  %v4713_v57 = vadd.f32 %v14559_v19, %v14558_v52  ;;  %v11349_v17 = vpop.eup %6760  ;;  %v4714_v41 = vadd.f32 %v14563_v23, %v14562_v46  ;;  %v14564_v52 = vld [vmem:[#allocation30_spill] sm:$0xff]  ;;  %v14567_v19 = vld [vmem:[#allocation101_spill] sm:$0xff]  ;;  %v14568_v46 = vld [vmem:[#allocation48_spill] sm:$0xff] }
 0x655   :  { %14560 = vst [vmem:[#allocation16_spill] sm:$0xff] %v11349_v17  ;;  %v11353_v3 = vpop.eup %6762  ;;  %v5186_v45 = vunpack.c.h.bf16 %v14568_v46  ;;  %v14585_v60 = vld [vmem:[#allocation132_spill] sm:$0xff] }
 0x656   :  { %14561 = vst [vmem:[#allocation33_spill] sm:$0xff] %v11353_v3  ;;  %v11360_v8 = vpop.eup %6764  ;;  %6768 = vtanh.f32 %v4713_v57  ;;  %v14571_v57 = vld [vmem:[#allocation94_spill] sm:$0xff] }
 0x657   :  { %v11347_v42 = vpop.f32.mrf.mxu2  ;;  %v4640_v26 = vpop.f32.mrf.mxu3  ;;  %14565 = vst [vmem:[#allocation52_spill] sm:$0xff] %v11360_v8  ;;  %5670 = vmatpush.msrb.mxu3 %v5186_v45 }
 0x658   :  { %v4641_v35 = vadd.f32 %v4640_v26, %v4576_v20  ;;  %v11351_v49 = vpop.f32.mrf.mxu0  ;;  %v14566_v20 = vld [vmem:[#allocation104_spill] sm:$0xff]  ;;  %v4994_v26 = vunpack.c.h.bf16 %v14567_v19 }
 0x659   :  { %v5122_v39 = vunpack.c.h.bf16 %v14566_v20  ;;  %v4452_v20 = vadd.f32 %v11259_v16, %v11302_v30  ;;  %v14578_v16 = vld [vmem:[#allocation12_spill] sm:$0xff] }
 0x65a   :  { %v11357_v9 = vpop.f32.mrf.mxu1  ;;  %v4691_v47 = vadd.f32 %v14564_v52, %v4641_v35  ;;  %v14569_v35 = vld [vmem:[#allocation61_spill] sm:$0xff]  ;;  %5475 = vmatpush.msrb.mxu0 %v4994_v26 }
 0x65b   :  { %5243 = vmatmul.f32.gmra.mxu0 %v11349_v17  ;;  %5308 = vmatmul.f32.gmra.mxu1 %v11353_v3  ;;  %v5058_v23 = vunpack.c.h.bf16 %v14569_v35  ;;  %v14570_v52 = vld [vmem:[#allocation73_spill] sm:$0xff]  ;;  %v4517_v45 = vadd.f32 %v11265_v15, %v4452_v20 }
 0x65c   :  { %6770 = vtanh.f32 %v4691_v47  ;;  %5373 = vmatmul.f32.gmra.mxu2 %v11360_v8  ;;  %v4716_v61 = vadd.f32 %v14571_v57, %v14570_v52  ;;  %v14573_v47 = vld [vmem:[#allocation29_spill] sm:$0xff] }
 0x65d   :  { %6772 = vtanh.f32 %v4714_v41  ;;  %5605 = vmatpush.msrb.mxu2 %v5122_v39  ;;  %v4717_v3 = vadd.f32 %v14573_v47, %v14572_v25  ;;  %5540 = vmatpush.msrb.mxu1 %v5058_v23  ;;  %v11379_v41 = vpop.eup %6766  ;;  %v5118_v23 = vunpack.c.h.bf16 %v14580_v62  ;;  %v14582_v47 = vld [vmem:[#allocation70_spill] sm:$0xff]  ;;  %v14584_v15 = vld [vmem:[#allocation17_spill] sm:$0xff] }
 0x65e   :  { %14574 = vst [vmem:[#allocation88_spill] sm:$0xff] %v11379_v41  ;;  %v11383_v52 = vpop.eup %6768  ;;  %6774 = vtanh.f32 %v4716_v61  ;;  %v5054_v20 = vunpack.c.h.bf16 %v14584_v15 }
 0x65f   :  { %v11377_v8 = vpop.f32.mrf.mxu2  ;;  %v4643_v19 = vpop.f32.mrf.mxu3  ;;  %14575 = vst [vmem:[#allocation62_spill] sm:$0xff] %v11383_v52  ;;  %6776 = vtanh.f32 %v4717_v3  ;;  %5606 = vmatpush.msrb.mxu2 %v5118_v23 }
 0x660   :  { %v4644_v46 = vadd.f32 %v4643_v19, %v4579_v7  ;;  %v11381_v35 = vpop.f32.mrf.mxu0  ;;  %v14581_v7 = vld [vmem:[#allocation81_spill] sm:$0xff]  ;;  %v5182_v19 = vunpack.c.h.bf16 %v14582_v47  ;;  %5541 = vmatpush.msrb.mxu1 %v5054_v20 }
 0x661   :  { %v4990_v61 = vunpack.c.h.bf16 %v14581_v7  ;;  %v4455_v7 = vadd.f32 %v11287_v38, %v11302_v30  ;;  %v14593_v38 = vld [vmem:[#allocation93_spill] sm:$0xff] }
 0x662   :  { %v11387_v39 = vpop.f32.mrf.mxu1  ;;  %v11389_v26 = vpop.eup %6770  ;;  %v4695_v57 = vadd.f32 %v14578_v16, %v4644_v46  ;;  %v14583_v46 = vld [vmem:[#allocation50_spill] sm:$0xff]  ;;  %v14586_v16 = vld [vmem:[#allocation32_spill] sm:$0xff]  ;;  %5671 = vmatpush.msrb.mxu3 %v5182_v19 }
 0x663   :  { %14577 = vst [vmem:[#allocation89_spill] sm:$0xff] %v11389_v26  ;;  %v11392_v25 = vpop.eup %6772  ;;  %5423 = vmatmul.f32.vlgmr.msra.gmra.mxu3 %v11389_v26  ;;  %5246 = vmatmul.f32.gmra.mxu0 %v11379_v41  ;;  %v4405_v3 = vadd.f32 %v11149_v2, %v14583_v46  ;;  %v4720_v41 = vadd.f32 %v14586_v16, %v14585_v60  ;;  %v14596_v16 = vld [vmem:[#allocation53_spill] sm:$0xff] }
 0x664   :  { %14579 = vst [vmem:[#allocation51_spill] sm:$0xff] %v11392_v25  ;;  %6778 = vtanh.f32 %v4695_v57  ;;  %5311 = vmatmul.f32.gmra.mxu1 %v11383_v52  ;;  %5376 = vmatmul.f32.gmra.mxu2 %v11392_v25  ;;  %v4582_v57 = vadd.f32 %v11285_v4, %v4517_v45  ;;  %v14587_v25 = vld [vmem:[#allocation25_spill] sm:$0xff]  ;;  %v14588_v52 = vld [vmem:[#allocation60_spill] sm:$0xff]  ;;  %v11414_v2 = vpop.eup %6774  ;;  %v14591_v4 = vld [vmem:[#allocation34_spill] sm:$0xff]  ;;  %v4520_v19 = vadd.f32 %v11293_v43, %v4455_v7 }
 0x665   :  { %6780 = vtanh.f32 %v4718_v0  ;;  %5476 = vmatpush.msrb.mxu0 %v4990_v61  ;;  %v4721_v62 = vadd.f32 %v14588_v52, %v14587_v25  ;;  %14589 = vst [vmem:[#allocation90_spill] sm:$0xff] %v11414_v2  ;;  %v11418_v60 = vpop.eup %6776  ;;  %v4722_v45 = vadd.f32 %v14591_v4, %v4405_v3  ;;  %v14595_v3 = vld [vmem:[#allocation120_spill] sm:$0xff]  ;;  %v14600_v4 = vld [vmem:[#allocation133_spill] sm:$0xff] }
 0x666   :  { %14590 = vst [vmem:[#allocation86_spill] sm:$0xff] %v11418_v60  ;;  %6782 = vtanh.f32 %v4720_v41  ;;  %v5114_v20 = vunpack.c.h.bf16 %v14595_v3  ;;  %v4986_v41 = vunpack.c.h.bf16 %v14596_v16  ;;  %v14599_v43 = vld [vmem:[#allocation36_spill] sm:$0xff]  ;;  %v4458_v16 = vadd.f32 %v11322_v56, %v11302_v30  ;;  %v14608_v56 = vld [vmem:[#allocation59_spill] sm:$0xff] }
 0x667   :  { %v11412_v47 = vpop.f32.mrf.mxu2  ;;  %v4646_v0 = vpop.f32.mrf.mxu3  ;;  %6784 = vtanh.f32 %v4721_v62  ;;  %v5050_v7 = vunpack.c.h.bf16 %v14599_v43 }
 0x668   :  { %v4647_v46 = vadd.f32 %v4646_v0, %v4582_v57  ;;  %v11416_v15 = vpop.f32.mrf.mxu0  ;;  %v14597_v57 = vld [vmem:[#allocation91_spill] sm:$0xff]  ;;  %5607 = vmatpush.msrb.mxu2 %v5114_v20  ;;  %5477 = vmatpush.msrb.mxu0 %v4986_v41 }
 0x669   :  { %v5178_v0 = vunpack.c.h.bf16 %v14597_v57  ;;  %5542 = vmatpush.msrb.mxu1 %v5050_v7 }
 0x66a   :  { %v11421_v23 = vpop.f32.mrf.mxu1  ;;  %v11423_v52 = vpop.eup %6778  ;;  %v4699_v25 = vadd.f32 %v14593_v38, %v4647_v46  ;;  %v14598_v46 = vld [vmem:[#allocation113_spill] sm:$0xff]  ;;  %v14601_v38 = vld [vmem:[#allocation66_spill] sm:$0xff] }
 0x66b   :  { %14592 = vst [vmem:[#allocation127_spill] sm:$0xff] %v11423_v52  ;;  %v11426_v61 = vpop.eup %6780  ;;  %5426 = vmatmul.f32.gmra.mxu3 %v11423_v52  ;;  %5249 = vmatmul.f32.gmra.mxu0 %v11414_v2  ;;  %v4408_v62 = vadd.f32 %v11161_v5, %v14598_v46  ;;  %v4724_v2 = vadd.f32 %v14601_v38, %v14600_v4  ;;  %v14611_v38 = vld [vmem:[#allocation21_spill] sm:$0xff] }
 0x66c   :  { %14594 = vst [vmem:[#allocation103_spill] sm:$0xff] %v11426_v61  ;;  %6786 = vtanh.f32 %v4699_v25  ;;  %5314 = vmatmul.f32.gmra.mxu1 %v11418_v60  ;;  %5379 = vmatmul.f32.gmra.mxu2 %v11426_v61  ;;  %v4585_v25 = vadd.f32 %v11316_v14, %v4520_v19  ;;  %v14602_v61 = vld [vmem:[#allocation141_spill] sm:$0xff]  ;;  %v14603_v60 = vld [vmem:[#allocation15_spill] sm:$0xff]  ;;  %v11448_v5 = vpop.eup %6782  ;;  %v14606_v14 = vld [vmem:[#allocation14_spill] sm:$0xff] }
 0x66d   :  { %6788 = vtanh.f32 %v4722_v45  ;;  %v4725_v3 = vadd.f32 %v14603_v60, %v14602_v61  ;;  %5672 = vmatpush.msrb.mxu3 %v5178_v0  ;;  %14604 = vst [vmem:[#allocation19_spill] sm:$0xff] %v11448_v5  ;;  %v11452_v4 = vpop.eup %6784  ;;  %v4726_v19 = vadd.f32 %v14606_v14, %v4408_v62  ;;  %v4523_v0 = vadd.f32 %v11328_v1, %v4458_v16  ;;  %v14610_v62 = vld [vmem:[#allocation107_spill] sm:$0xff]  ;;  %v14615_v14 = vld [vmem:[#allocation134_spill] sm:$0xff] }
 0x66e   :  { %14605 = vst [vmem:[#allocation22_spill] sm:$0xff] %v11452_v4  ;;  %6790 = vtanh.f32 %v4724_v2  ;;  %v5110_v7 = vunpack.c.h.bf16 %v14610_v62  ;;  %v4982_v2 = vunpack.c.h.bf16 %v14611_v38  ;;  %v14614_v1 = vld [vmem:[#allocation71_spill] sm:$0xff]  ;;  %v4461_v38 = vadd.f32 %v11351_v49, %v11302_v30  ;;  %v14623_v49 = vld [vmem:[#allocation13_spill] sm:$0xff] }
 0x66f   :  { %v11446_v57 = vpop.f32.mrf.mxu2  ;;  %v4649_v45 = vpop.f32.mrf.mxu3  ;;  %6792 = vtanh.f32 %v4725_v3  ;;  %v5046_v16 = vunpack.c.h.bf16 %v14614_v1 }
 0x670   :  { %v4650_v46 = vadd.f32 %v4649_v45, %v4585_v25  ;;  %v11450_v43 = vpop.f32.mrf.mxu0  ;;  %v14612_v25 = vld [vmem:[#allocation41_spill] sm:$0xff]  ;;  %5608 = vmatpush.msrb.mxu2 %v5110_v7  ;;  %5478 = vmatpush.msrb.mxu0 %v4982_v2 }
 0x671   :  { %v5174_v45 = vunpack.c.h.bf16 %v14612_v25  ;;  %5543 = vmatpush.msrb.mxu1 %v5046_v16  ;;  %v4526_v16 = vadd.f32 %v11357_v9, %v4461_v38  ;;  %v14631_v38 = vld [vmem:[#allocation76_spill] sm:$0xff] }
 0x672   :  { %v11455_v20 = vpop.f32.mrf.mxu1  ;;  %v11457_v60 = vpop.eup %6786  ;;  %v4703_v61 = vadd.f32 %v14608_v56, %v4650_v46  ;;  %v14613_v46 = vld [vmem:[#allocation123_spill] sm:$0xff]  ;;  %v14616_v56 = vld [vmem:[#allocation84_spill] sm:$0xff] }
 0x673   :  { %14607 = vst [vmem:[#allocation92_spill] sm:$0xff] %v11457_v60  ;;  %v11460_v41 = vpop.eup %6788  ;;  %5429 = vmatmul.f32.gmra.mxu3 %v11457_v60  ;;  %5252 = vmatmul.f32.gmra.mxu0 %v11448_v5  ;;  %v4411_v3 = vadd.f32 %v11180_v18, %v14613_v46  ;;  %v4728_v5 = vadd.f32 %v14616_v56, %v14615_v14  ;;  %v14626_v56 = vld [vmem:[#allocation111_spill] sm:$0xff] }
 0x674   :  { %14609 = vst [vmem:[#allocation95_spill] sm:$0xff] %v11460_v41  ;;  %6794 = vtanh.f32 %v4703_v61  ;;  %5317 = vmatmul.f32.gmra.mxu1 %v11452_v4  ;;  %5382 = vmatmul.f32.gmra.mxu2 %v11460_v41  ;;  %v4588_v61 = vadd.f32 %v11347_v42, %v4523_v0  ;;  %v14617_v41 = vld [vmem:[#allocation80_spill] sm:$0xff]  ;;  %v14618_v4 = vld [vmem:[#allocation67_spill] sm:$0xff]  ;;  %v11482_v18 = vpop.eup %6790 }
 0x675   :  { %6796 = vtanh.f32 %v4726_v19  ;;  %v4729_v62 = vadd.f32 %v14618_v4, %v14617_v41  ;;  %5673 = vmatpush.msrb.mxu3 %v5174_v45  ;;  %14619 = vst [vmem:[#allocation83_spill] sm:$0xff] %v11482_v18  ;;  %v11486_v14 = vpop.eup %6792  ;;  %v14621_v42 = vld [vmem:[#allocation115_spill] sm:$0xff]  ;;  %v4414_v45 = vadd.f32 %v11201_v11, %v11124_v10  ;;  %v14630_v11 = vld [vmem:[#allocation72_spill] sm:$0xff] }
 0x676   :  { %14620 = vst [vmem:[#allocation124_spill] sm:$0xff] %v11486_v14  ;;  %v4730_v0 = vadd.f32 %v14621_v42, %v4411_v3  ;;  %6798 = vtanh.f32 %v4728_v5  ;;  %v14625_v5 = vld [vmem:[#allocation110_spill] sm:$0xff]  ;;  %v14629_v42 = vld [vmem:[#allocation64_spill] sm:$0xff]  ;;  %v5042_v9 = vunpack.c.h.bf16 %v14630_v11 }
 0x677   :  { %v11480_v25 = vpop.f32.mrf.mxu2  ;;  %v4652_v19 = vpop.f32.mrf.mxu3  ;;  %6800 = vtanh.f32 %v4729_v62  ;;  %v5106_v3 = vunpack.c.h.bf16 %v14625_v5 }
 0x678   :  { %v4653_v46 = vadd.f32 %v4652_v19, %v4588_v61  ;;  %v11484_v1 = vpop.f32.mrf.mxu0  ;;  %v4978_v61 = vunpack.c.h.bf16 %v14626_v56  ;;  %v14627_v19 = vld [vmem:[#allocation108_spill] sm:$0xff]  ;;  %5544 = vmatpush.msrb.mxu1 %v5042_v9 }
 0x679   :  { %v5170_v62 = vunpack.c.h.bf16 %v14627_v19  ;;  %5609 = vmatpush.msrb.mxu2 %v5106_v3 }
 0x67a   :  { %v11489_v7 = vpop.f32.mrf.mxu1  ;;  %v11491_v4 = vpop.eup %6794  ;;  %v4707_v41 = vadd.f32 %v14623_v49, %v4653_v46  ;;  %v14628_v46 = vld [vmem:[#allocation57_spill] sm:$0xff]  ;;  %v14632_v49 = vld [vmem:[#allocation98_spill] sm:$0xff]  ;;  %5479 = vmatpush.msrb.mxu0 %v4978_v61 }
 0x67b   :  { %14622 = vst [vmem:[#allocation56_spill] sm:$0xff] %v11491_v4  ;;  %v11494_v2 = vpop.eup %6796  ;;  %5432 = vmatmul.f32.gmra.mxu3 %v11491_v4  ;;  %5255 = vmatmul.f32.gmra.mxu0 %v11482_v18  ;;  %v4732_v10 = vadd.f32 %v14629_v42, %v14628_v46  ;;  %v4733_v18 = vadd.f32 %v14632_v49, %v14631_v38  ;;  %v14641_v38 = vld [vmem:[#allocation117_spill] sm:$0xff] }
 0x67c   :  { %14624 = vst [vmem:[#allocation30_spill] sm:$0xff] %v11494_v2  ;;  %6802 = vtanh.f32 %v4707_v41  ;;  %5320 = vmatmul.f32.gmra.mxu1 %v11486_v14  ;;  %5385 = vmatmul.f32.gmra.mxu2 %v11494_v2  ;;  %v4591_v41 = vadd.f32 %v11377_v8, %v4526_v16  ;;  %v14633_v2 = vld [vmem:[#allocation99_spill] sm:$0xff]  ;;  %v11515_v19 = vpop.eup %6798 }
 0x67d   :  { %6804 = vtanh.f32 %v4730_v0  ;;  %v4734_v14 = vadd.f32 %v14633_v2, %v4414_v45  ;;  %5674 = vmatpush.msrb.mxu3 %v5170_v62  ;;  %14634 = vst [vmem:[#allocation104_spill] sm:$0xff] %v11515_v19  ;;  %v4464_v0 = vadd.f32 %v11381_v35, %v11302_v30  ;;  %v11521_v11 = vpop.eup %6800  ;;  %v14637_v2 = vld [vmem:[#allocation97_spill] sm:$0xff]  ;;  %v14639_v35 = vld [vmem:[#allocation26_spill] sm:$0xff]  ;;  %v14640_v62 = vld [vmem:[#allocation116_spill] sm:$0xff] }
 0x67e   :  { %14635 = vst [vmem:[#allocation101_spill] sm:$0xff] %v11521_v11  ;;  %6806 = vtanh.f32 %v4732_v10  ;;  %v5102_v61 = vunpack.c.h.bf16 %v14639_v35  ;;  %v4974_v9 = vunpack.c.h.bf16 %v14640_v62  ;;  %v5038_v10 = vunpack.c.h.bf16 %v14641_v38  ;;  %v14645_v62 = vld [vmem:[#allocation42_spill] sm:$0xff] }
 0x67f   :  { %v11513_v5 = vpop.f32.mrf.mxu2  ;;  %v4655_v56 = vpop.f32.mrf.mxu3  ;;  %6808 = vtanh.f32 %v4733_v18  ;;  %v4529_v49 = vadd.f32 %v11387_v39, %v4464_v0  ;;  %v14642_v18 = vld [vmem:[#allocation118_spill] sm:$0xff]  ;;  %v5098_v38 = vunpack.c.h.bf16 %v14645_v62 }
 0x680   :  { %v4656_v46 = vadd.f32 %v4655_v56, %v4591_v41  ;;  %v11519_v42 = vpop.f32.mrf.mxu0  ;;  %6810 = vtanh.f32 %v4734_v14  ;;  %v5166_v41 = vunpack.c.h.bf16 %v14642_v18  ;;  %v4417_v14 = vadd.f32 %v11226_v22, %v11151_v54  ;;  %5610 = vmatpush.msrb.mxu2 %v5102_v61  ;;  %5480 = vmatpush.msrb.mxu0 %v4974_v9  ;;  %v14643_v56 = vld [vmem:[#allocation109_spill] sm:$0xff]  ;;  %v14647_v18 = vld [vmem:[#allocation78_spill] sm:$0xff]  ;;  %v14648_v9 = vld [vmem:[#allocation24_spill] sm:$0xff] }
 0x681   :  { %v4594_v0 = vadd.f32 %v11412_v47, %v4529_v49  ;;  %5545 = vmatpush.msrb.mxu1 %v5038_v10  ;;  %v4737_v54 = vadd.f32 %v10178_v51, %v14647_v18  ;;  %v4467_v47 = vadd.f32 %v11416_v15, %v11302_v30  ;;  %v14656_v15 = vld [vmem:[#allocation46_spill] sm:$0xff] }
 0x682   :  { %v11523_v8 = vpop.f32.mrf.mxu1  ;;  %v11525_v16 = vpop.eup %6802  ;;  %v4711_v45 = vadd.f32 %v14637_v2, %v4656_v46  ;;  %v4970_v46 = vunpack.c.h.bf16 %v14643_v56  ;;  %v14644_v2 = vld [vmem:[#allocation119_spill] sm:$0xff]  ;;  %5675 = vmatpush.msrb.mxu3 %v5166_v41  ;;  %5611 = vmatpush.msrb.mxu2 %v5098_v38  ;;  %v4966_v56 = vunpack.c.h.bf16 %v14648_v9  ;;  %v4738_v41 = vadd.f32 %v14406_v29, %v4417_v14  ;;  %v14658_v14 = vld [vmem:[#allocation128_spill] sm:$0xff] }
 0x683   :  { %14636 = vst [vmem:[#allocation48_spill] sm:$0xff] %v11525_v16  ;;  %v11528_v3 = vpop.eup %6804  ;;  %5435 = vmatmul.f32.gmra.mxu3 %v11525_v16  ;;  %5258 = vmatmul.f32.gmra.mxu0 %v11515_v19  ;;  %v5034_v35 = vunpack.c.h.bf16 %v14644_v2  ;;  %v14646_v19 = vld [vmem:[#allocation135_spill] sm:$0xff]  ;;  %v14649_v2 = vld [vmem:[#allocation74_spill] sm:$0xff]  ;;  %v4228_v29 = vadd.f32 %v11165_v58, %v10843_v53  ;;  %v4420_v58 = vadd.f32 %v11253_v55, %v11163_v50 }
 0x684   :  { %14638 = vst [vmem:[#allocation61_spill] sm:$0xff] %v11528_v3  ;;  %6812 = vtanh.f32 %v4711_v45  ;;  %5323 = vmatmul.f32.gmra.mxu1 %v11521_v11  ;;  %5388 = vmatmul.f32.gmra.mxu2 %v11528_v3  ;;  %v4736_v39 = vadd.f32 %v10173_v6, %v14646_v19  ;;  %v11547_v45 = vpop.eup %6806  ;;  %v5030_v62 = vunpack.c.h.bf16 %v14649_v2  ;;  %v14650_v3 = vld [vmem:[#allocation122_spill] sm:$0xff]  ;;  %v14653_v38 = vld [vmem:[#allocation79_spill] sm:$0xff] }
 0x685   :  { %5481 = vmatpush.msrb.mxu0 %v4970_v46  ;;  %v5094_v6 = vunpack.c.h.bf16 %v14650_v3  ;;  %v11556_v19 = vpop.eup %6808  ;;  %5546 = vmatpush.msrb.mxu1 %v5034_v35  ;;  %v4962_v18 = vunpack.c.h.bf16 %v14653_v38  ;;  %v14654_v3 = vld [vmem:[#allocation54_spill] sm:$0xff] }
 0x686   :  { %14651 = vst [vmem:[#allocation73_spill] sm:$0xff] %v11556_v19  ;;  %v11562_v51 = vpop.eup %6810  ;;  %v5026_v9 = vunpack.c.h.bf16 %v14654_v3  ;;  %6814 = vtanh.f32 %v4736_v39  ;;  %v4532_v3 = vadd.f32 %v11421_v23, %v4467_v47  ;;  %v5162_v39 = vunpack.c.h.bf16 %v11104_v32  ;;  %v14663_v23 = vld [vmem:[#allocation136_spill] sm:$0xff]  ;;  %v14664_v32 = vld [vmem:[#allocation55_spill] sm:$0xff] }
 0x687   :  { %v11551_v22 = vpop.f32.mrf.mxu2  ;;  %v4658_v61 = vpop.f32.mrf.mxu3  ;;  %14652 = vst [vmem:[#allocation94_spill] sm:$0xff] %v11562_v51  ;;  %5482 = vmatpush.msrb.mxu0 %v4966_v56  ;;  %5612 = vmatpush.msrb.mxu2 %v5094_v6  ;;  %6816 = vtanh.f32 %v4737_v54  ;;  %v4958_v56 = vunpack.c.h.bf16 %v14658_v14  ;;  %v14659_v6 = vld [vmem:[#allocation130_spill] sm:$0xff]  ;;  %v14660_v54 = vld [vmem:[#allocation129_spill] sm:$0xff]  ;;  %v4740_v47 = vadd.f32 %v10208_v12, %v14663_v23 }
 0x688   :  { %v4659_v10 = vadd.f32 %v4658_v61, %v4594_v0  ;;  %v11560_v49 = vpop.f32.mrf.mxu0  ;;  %5547 = vmatpush.msrb.mxu1 %v5030_v62  ;;  %v14657_v61 = vld [vmem:[#allocation125_spill] sm:$0xff]  ;;  %v5022_v38 = vunpack.c.h.bf16 %v14659_v6  ;;  %v5086_v62 = vunpack.c.h.bf16 %v14660_v54  ;;  %5676 = vmatpush.msrb.mxu3 %v5162_v39  ;;  %v5082_v6 = vunpack.c.h.bf16 %v14664_v32  ;;  %v14665_v54 = vld [vmem:[#allocation27_spill] sm:$0xff] }
 0x689   :  { %v5090_v35 = vunpack.c.h.bf16 %v14657_v61  ;;  %5483 = vmatpush.msrb.mxu0 %v4962_v18  ;;  %v14662_v61 = vld [vmem:[#allocation131_spill] sm:$0xff]  ;;  %v4470_v18 = vadd.f32 %v11450_v43, %v11302_v30  ;;  %v14668_v43 = vld [vmem:[#allocation100_spill] sm:$0xff] }
 0x68a   :  { %v11565_v46 = vpop.f32.mrf.mxu1  ;;  %v11569_v2 = vpop.eup %6812  ;;  %v4715_v0 = vadd.f32 %v14656_v15, %v4659_v10  ;;  %5548 = vmatpush.msrb.mxu1 %v5026_v9  ;;  %v14661_v10 = vld [vmem:[#allocation96_spill] sm:$0xff]  ;;  %v5018_v14 = vunpack.c.h.bf16 %v14662_v61  ;;  %v14674_v32 = vld [vmem:[#allocation31_spill] sm:$0xff] }
 0x68b   :  { %14655 = vst [vmem:[#allocation77_spill] sm:$0xff] %v11569_v2  ;;  %5438 = vmatmul.f32.gmra.mxu3 %v11569_v2  ;;  %5261 = vmatmul.f32.gmra.mxu0 %v11547_v45  ;;  %v4954_v15 = vunpack.c.h.bf16 %v14661_v10 }
 0x68c   :  { %6818 = vtanh.f32 %v4715_v0  ;;  %5326 = vmatmul.f32.gmra.mxu1 %v11556_v19  ;;  %5391 = vmatmul.f32.gmra.mxu2 %v11562_v51  ;;  %v4597_v0 = vadd.f32 %v11446_v57, %v4532_v3  ;;  %v11596_v55 = vpop.eup %6814 }
 0x68d   :  { %6820 = vtanh.f32 %v4738_v41  ;;  %5613 = vmatpush.msrb.mxu2 %v5090_v35  ;;  %v4741_v41 = vadd.f32 %v10211_v40, %v14665_v54  ;;  %5484 = vmatpush.msrb.mxu0 %v4958_v56  ;;  %v11602_v57 = vpop.eup %6816  ;;  %v4293_v35 = vadd.f32 %v11167_v63, %v4228_v29  ;;  %v4742_v40 = vadd.f32 %v10215_v59, %v4420_v58 }
 0x68e   :  { %5549 = vmatpush.msrb.mxu1 %v5022_v38  ;;  %14666 = vst [vmem:[#allocation29_spill] sm:$0xff] %v11602_v57  ;;  %v4950_v56 = vunpack.c.h.bf16 %v11118_v33  ;;  %v5014_v38 = vunpack.c.h.bf16 %v11120_v36  ;;  %6822 = vtanh.f32 %v4740_v47  ;;  %v14670_v33 = vld [vmem:[#allocation63_spill] sm:$0xff]  ;;  %v14671_v36 = vld [vmem:[#allocation65_spill] sm:$0xff]  ;;  %v4535_v58 = vadd.f32 %v11455_v20, %v4470_v18 }
 0x68f   :  { %v11594_v51 = vpop.f32.mrf.mxu2  ;;  %v4661_v50 = vpop.f32.mrf.mxu3  ;;  %5614 = vmatpush.msrb.mxu2 %v5086_v62  ;;  %5485 = vmatpush.msrb.mxu0 %v4954_v15  ;;  %v5078_v62 = vunpack.c.h.bf16 %v11122_v31  ;;  %6824 = vtanh.f32 %v4741_v41  ;;  %v4358_v59 = vadd.f32 %v11178_v28, %v4293_v35  ;;  %v4946_v63 = vunpack.c.h.bf16 %v14670_v33  ;;  %v14672_v31 = vld [vmem:[#allocation87_spill] sm:$0xff]  ;;  %v14680_v33 = vld [vmem:[#allocation58_spill] sm:$0xff] }
 0x690   :  { %v4662_v12 = vadd.f32 %v4661_v50, %v4597_v0  ;;  %v11600_v9 = vpop.f32.mrf.mxu0  ;;  %5550 = vmatpush.msrb.mxu1 %v5018_v14  ;;  %v5010_v29 = vunpack.c.h.bf16 %v14671_v36  ;;  %v5074_v15 = vunpack.c.h.bf16 %v14672_v31  ;;  %v5158_v14 = vunpack.c.h.bf16 %v11146_v27  ;;  %v14673_v47 = vld [vmem:[#allocation43_spill] sm:$0xff] }
 0x691   :  { %5615 = vmatpush.msrb.mxu2 %v5082_v6  ;;  %v4231_v28 = vadd.f32 %v11184_v48, %v10843_v53  ;;  %v4423_v23 = vadd.f32 %v11283_v44, %v4358_v59  ;;  %5486 = vmatpush.msrb.mxu0 %v4950_v56  ;;  %v4744_v20 = vadd.f32 %v10233_v24, %v14673_v47 }
 0x692   :  { %v11606_v3 = vpop.f32.mrf.mxu1  ;;  %v11610_v39 = vpop.eup %6818  ;;  %v4719_v10 = vadd.f32 %v14668_v43, %v4662_v12  ;;  %5551 = vmatpush.msrb.mxu1 %v5014_v38  ;;  %v4600_v0 = vadd.f32 %v11480_v25, %v4535_v58  ;;  %5677 = vmatpush.msrb.mxu3 %v5158_v14  ;;  %v4745_v6 = vadd.f32 %v10236_v34, %v14674_v32  ;;  %v14675_v12 = vld [vmem:[#allocation68_spill] sm:$0xff] }
 0x693   :  { %14667 = vst [vmem:[#allocation38_spill] sm:$0xff] %v11610_v39  ;;  %v11614_v61 = vpop.eup %6820  ;;  %5441 = vmatmul.f32.gmra.mxu3 %v11610_v39  ;;  %5264 = vmatmul.f32.gmra.mxu0 %v11596_v55  ;;  %v4473_v44 = vadd.f32 %v11484_v1, %v11302_v30  ;;  %v4296_v25 = vadd.f32 %v11188_v21, %v4231_v28  ;;  %v14677_v38 = vld [vmem:[#allocation44_spill] sm:$0xff] }
 0x694   :  { %14669 = vst [vmem:[#allocation12_spill] sm:$0xff] %v11614_v61  ;;  %6826 = vtanh.f32 %v4719_v10  ;;  %5329 = vmatmul.f32.gmra.mxu1 %v11602_v57  ;;  %5394 = vmatmul.f32.gmra.mxu2 %v11614_v61  ;;  %v11636_v53 = vpop.eup %6822  ;;  %v4746_v34 = vadd.f32 %v10240_v13, %v4423_v23  ;;  %v14676_v13 = vld [vmem:[#allocation142_spill] sm:$0xff]  ;;  %v14678_v10 = vld [vmem:[#allocation137_spill] sm:$0xff]  ;;  %v4476_v31 = vadd.f32 %v11519_v42, %v11302_v30 }
 0x695   :  { %6828 = vtanh.f32 %v4742_v40  ;;  %5616 = vmatpush.msrb.mxu2 %v5078_v62  ;;  %5487 = vmatpush.msrb.mxu0 %v4946_v63  ;;  %v11642_v24 = vpop.eup %6824  ;;  %v4361_v1 = vadd.f32 %v11199_v37, %v4296_v25  ;;  %v4538_v21 = vadd.f32 %v11489_v7, %v4473_v44  ;;  %v5154_v56 = vunpack.c.h.bf16 %v14676_v13  ;;  %v14679_v62 = vld [vmem:[#allocation47_spill] sm:$0xff]  ;;  %v14681_v63 = vld [vmem:[#allocation121_spill] sm:$0xff]  ;;  %v14683_v23 = vld [vmem:[#allocation18_spill] sm:$0xff] }
 0x696   :  { %5552 = vmatpush.msrb.mxu1 %v5010_v29  ;;  %6830 = vtanh.f32 %v4744_v20  ;;  %v4748_v59 = vadd.f32 %v14679_v62, %v14678_v10  ;;  %v4749_v36 = vadd.f32 %v14681_v63, %v14680_v33  ;;  %v4541_v42 = vadd.f32 %v11523_v8, %v4476_v31 }
 0x697   :  { %v11634_v54 = vpop.f32.mrf.mxu2  ;;  %v4664_v27 = vpop.f32.mrf.mxu3  ;;  %5617 = vmatpush.msrb.mxu2 %v5074_v15  ;;  %6832 = vtanh.f32 %v4745_v6  ;;  %v4426_v43 = vadd.f32 %v14677_v38, %v4361_v1  ;;  %v4603_v37 = vadd.f32 %v11513_v5, %v4538_v21  ;;  %5678 = vmatpush.msrb.mxu3 %v5154_v56  ;;  %v14690_v38 = vld [vmem:[#allocation39_spill] sm:$0xff]  ;;  %v4482_v63 = vadd.f32 %v11600_v9, %v11302_v30  ;;  %v14698_v9 = vld [vmem:[#allocation144_spill] sm:$0xff] }
 0x698   :  { %v4665_v48 = vadd.f32 %v4664_v27, %v4600_v0  ;;  %v11640_v41 = vpop.f32.mrf.mxu0  ;;  %v14685_v0 = vld [vmem:[#allocation102_spill] sm:$0xff]  ;;  %v14687_v27 = vld [vmem:[#allocation143_spill] sm:$0xff] }
 0x699   :  { %v4750_v47 = vadd.f32 %v14683_v23, %v4426_v43  ;;  %v5150_v44 = vunpack.c.h.bf16 %v14687_v27 }
 0x69a   :  { %v11646_v50 = vpop.f32.mrf.mxu1  ;;  %v11648_v18 = vpop.eup %6826  ;;  %v4723_v35 = vadd.f32 %v14675_v12, %v4665_v48  ;;  %v4606_v48 = vadd.f32 %v11551_v22, %v4541_v42  ;;  %v5142_v42 = vunpack.c.h.bf16 %v14698_v9 }
 0x69b   :  { %v11651_v40 = vpop.eup %6828  ;;  %5444 = vmatmul.f32.gmra.mxu3 %v11648_v18  ;;  %5267 = vmatmul.f32.gmra.mxu0 %v11636_v53 }
 0x69c   :  { %6834 = vtanh.f32 %v4723_v35  ;;  %5332 = vmatmul.f32.gmra.mxu1 %v11642_v24  ;;  %5397 = vmatmul.f32.gmra.mxu2 %v11651_v40  ;;  %v11668_v58 = vpop.eup %6830  ;;  %v4479_v35 = vadd.f32 %v11560_v49, %v11302_v30  ;;  %v14692_v49 = vld [vmem:[#allocation37_spill] sm:$0xff] }
 0x69d   :  { %6836 = vtanh.f32 %v4746_v34  ;;  %v11674_v28 = vpop.eup %6832  ;;  %5679 = vmatpush.msrb.mxu3 %v5150_v44  ;;  %v5146_v62 = vunpack.c.h.bf16 %v14692_v49  ;;  %v14701_v49 = vld [vmem:[#allocation112_spill] sm:$0xff] }
 0x69e   :  { %14682 = vst [vmem:[#allocation40_spill] sm:$0xff] %v11674_v28  ;;  %6838 = vtanh.f32 %v4748_v59  ;;  %v4544_v10 = vadd.f32 %v11565_v46, %v4479_v35 }
 0x69f   :  { %v11666_v7 = vpop.f32.mrf.mxu2  ;;  %v4667_v29 = vpop.f32.mrf.mxu3  ;;  %6840 = vtanh.f32 %v4749_v36  ;;  %5680 = vmatpush.msrb.mxu3 %v5146_v62 }
 0x6a0   :  { %v4668_v15 = vadd.f32 %v4667_v29, %v4603_v37  ;;  %v11672_v14 = vpop.f32.mrf.mxu0  ;;  %v4609_v59 = vadd.f32 %v11594_v51, %v4544_v10  ;;  %v4547_v51 = vadd.f32 %v11606_v3, %v4482_v63 }
 0x6a1   :  { %5681 = vmatpush.msrb.mxu3 %v5142_v42 }
 0x6a2   :  { %v11677_v5 = vpop.f32.mrf.mxu1  ;;  %v11679_v20 = vpop.eup %6834  ;;  %v4727_v32 = vadd.f32 %v14685_v0, %v4668_v15  ;;  %v14694_v15 = vld [vmem:[#allocation45_spill] sm:$0xff]  ;;  %v4612_v27 = vadd.f32 %v11634_v54, %v4547_v51  ;;  %v14702_v54 = vld [vmem:[#allocation146_spill] sm:$0xff] }
 0x6a3   :  { %14684 = vst [vmem:[#allocation81_spill] sm:$0xff] %v11679_v20  ;;  %v11682_v6 = vpop.eup %6836  ;;  %5447 = vmatmul.f32.gmra.mxu3 %v11679_v20  ;;  %5270 = vmatmul.f32.gmra.mxu0 %v11668_v58  ;;  %v14696_v0 = vld [vmem:[#allocation69_spill] sm:$0xff]  ;;  %v5138_v62 = vunpack.c.h.bf16 %v14702_v54  ;;  %v14712_v54 = vld [vmem:[#allocation147_spill] sm:$0xff] }
 0x6a4   :  { %14686 = vst [vmem:[#allocation70_spill] sm:$0xff] %v11682_v6  ;;  %6842 = vtanh.f32 %v4727_v32  ;;  %5335 = vmatmul.f32.gmra.mxu1 %v11674_v28  ;;  %5400 = vmatmul.f32.gmra.mxu2 %v11682_v6  ;;  %v11693_v12 = vpop.eup %6838  ;;  %v14697_v32 = vld [vmem:[#allocation75_spill] sm:$0xff] }
 0x6a5   :  { %6844 = vtanh.f32 %v4750_v47  ;;  %v11699_v21 = vpop.eup %6840  ;;  %v14695_v47 = vld [vmem:[#allocation138_spill] sm:$0xff]  ;;  %5682 = vmatpush.msrb.mxu3 %v5138_v62 }
 0x6a6   :  { %14688 = vst [vmem:[#allocation50_spill] sm:$0xff] %v11699_v21 }
 0x6a7   :  { %v11691_v25 = vpop.f32.mrf.mxu2  ;;  %v4670_v34 = vpop.f32.mrf.mxu3 }
 0x6a8   :  { %v4671_v8 = vadd.f32 %v4670_v34, %v4606_v48  ;;  %v11697_v1 = vpop.f32.mrf.mxu0  ;;  %v4485_v34 = vadd.f32 %v11640_v41, %v11302_v30  ;;  %v14704_v41 = vld [vmem:[#allocation145_spill] sm:$0xff] }
 0x6aa   :  { %v11701_v13 = vpop.f32.mrf.mxu1  ;;  %v11703_v56 = vpop.eup %6842  ;;  %v4731_v22 = vadd.f32 %v14690_v38, %v4671_v8 }
 0x6ab   :  { %14689 = vst [vmem:[#allocation17_spill] sm:$0xff] %v11703_v56  ;;  %v11706_v43 = vpop.eup %6844  ;;  %5450 = vmatmul.f32.gmra.mxu3 %v11703_v56  ;;  %5273 = vmatmul.f32.gmra.mxu0 %v11693_v12 }
 0x6ac   :  { %14691 = vst [vmem:[#allocation132_spill] sm:$0xff] %v11706_v43  ;;  %6846 = vtanh.f32 %v4731_v22  ;;  %5338 = vmatmul.f32.gmra.mxu1 %v11699_v21  ;;  %5403 = vmatmul.f32.gmra.mxu2 %v11706_v43  ;;  %v14700_v22 = vld [vmem:[#allocation114_spill] sm:$0xff] }
 0x6af   :  { %v11715_v37 = vpop.f32.mrf.mxu2  ;;  %v4673_v33 = vpop.f32.mrf.mxu3 }
 0x6b0   :  { %v4674_v36 = vadd.f32 %v4673_v33, %v4609_v59  ;;  %v11719_v29 = vpop.f32.mrf.mxu0  ;;  %v4550_v59 = vadd.f32 %v11646_v50, %v4485_v34  ;;  %v14703_v33 = vld [vmem:[#allocation139_spill] sm:$0xff] }
 0x6b2   :  { %v11721_v46 = vpop.f32.mrf.mxu1  ;;  %v11723_v31 = vpop.eup %6846  ;;  %v4735_v23 = vadd.f32 %v14694_v15, %v4674_v36  ;;  %v4615_v63 = vadd.f32 %v11666_v7, %v4550_v59  ;;  %v4488_v36 = vadd.f32 %v11672_v14, %v11302_v30  ;;  %v14707_v7 = vld [vmem:[#allocation35_spill] sm:$0xff]  ;;  %v11767_v14 = vld [vmem:[#allocation5 + $0xcf8] sm:$0xff] }
 0x6b3   :  { %14693 = vst [vmem:[#allocation32_spill] sm:$0xff] %v11723_v31  ;;  %5453 = vmatmul.f32.gmra.mxu3 %v11723_v31  ;;  %5488 = vmatmul.f32.vlgmr.msrb.gmra.mxu0 %v14695_v47  ;;  %v5007_v59 = vunpack.c.l.bf16 %v11767_v14 }
 0x6b4   :  { %6848 = vtanh.f32 %v4735_v23  ;;  %5553 = vmatmul.f32.vlgmr.msrb.gmra.mxu1 %v14696_v0  ;;  %5618 = vmatmul.f32.vlgmr.msrb.gmra.mxu2 %v14697_v32  ;;  %v4553_v34 = vadd.f32 %v11677_v5, %v4488_v36  ;;  %14709 = vst [vmem:[#allocation93_spill] sm:$0xff] %v11767_v14  ;;  %v14741_v32 = vld [vmem:[#allocation62_spill] sm:$0xff]  ;;  %v14742_v0 = vld [vmem:[#allocation51_spill] sm:$0xff] }
 0x6b5   :  { %5732 = vmatpush.msra.mxu0 %v5007_v59  ;;  %v14718_v59 = vld [vmem:[#allocation126_spill] sm:$0xff] }
 0x6b7   :  { %v4676_v44 = vpop.f32.mrf.mxu3  ;;  %v11733_v48 = vpop.f32.mrf.mxu2 }
 0x6b8   :  { %v4677_v35 = vadd.f32 %v4676_v44, %v4612_v27  ;;  %v11737_v8 = vpop.f32.mrf.mxu0  ;;  %v14706_v27 = vld [vmem:[#allocation105_spill] sm:$0xff] }
 0x6ba   :  { %v11739_v3 = vpop.f32.mrf.mxu1  ;;  %v11741_v38 = vpop.eup %6848  ;;  %v4739_v10 = vadd.f32 %v14700_v22, %v4677_v35  ;;  %v11765_v35 = vld [vmem:[#allocation5 + $0xef8] sm:$0xff] }
 0x6bb   :  { %14699 = vst [vmem:[#allocation25_spill] sm:$0xff] %v11741_v38  ;;  %5456 = vmatmul.f32.gmra.mxu3 %v11741_v38  ;;  %5491 = vmatmul.f32.gmra.mxu0 %v14701_v49  ;;  %v11769_v22 = vld [vmem:[#allocation5 + $0xff8] sm:$0xff]  ;;  %v5135_v62 = vunpack.c.l.bf16 %v11765_v35 }
 0x6bc   :  { %6850 = vtanh.f32 %v4739_v10  ;;  %5556 = vmatmul.f32.gmra.mxu1 %v14703_v33  ;;  %5621 = vmatmul.f32.gmra.mxu2 %v14704_v41  ;;  %14708 = vst [vmem:[#allocation34_spill] sm:$0xff] %v11765_v35  ;;  %v14711_v10 = vld [vmem:[#allocation140_spill] sm:$0xff]  ;;  %v5199_v5 = vunpack.c.l.bf16 %v11769_v22  ;;  %v14734_v41 = vld [vmem:[#allocation33_spill] sm:$0xff] }
 0x6bd   :  { %14710 = vst [vmem:[#allocation120_spill] sm:$0xff] %v11769_v22  ;;  %5862 = vmatpush.msra.mxu2 %v5135_v62  ;;  %v14717_v62 = vld [vmem:[#allocation28_spill] sm:$0xff] }
 0x6be   :  { %5927 = vmatpush.msra.mxu3 %v5199_v5  ;;  %v14735_v33 = vld [vmem:[#allocation52_spill] sm:$0xff] }
 0x6bf   :  { %v4679_v15 = vpop.f32.mrf.mxu3  ;;  %v11753_v23 = vpop.f32.mrf.mxu2 }
 0x6c0   :  { %v4680_v51 = vadd.f32 %v4679_v15, %v4615_v63  ;;  %v11755_v9 = vpop.f32.mrf.mxu0  ;;  %v11776_v63 = vld [vmem:[#allocation5 + $0xdf8] sm:$0xff]  ;;  %v4618_v15 = vadd.f32 %v11691_v25, %v4553_v34 }
 0x6c1   :  { %14713 = vst [vmem:[#allocation53_spill] sm:$0xff] %v11776_v63  ;;  %v5071_v36 = vunpack.c.l.bf16 %v11776_v63  ;;  %v14715_v63 = vld [vmem:[#allocation106_spill] sm:$0xff]  ;;  %v14716_v25 = vld [vmem:[#allocation49_spill] sm:$0xff] }
 0x6c2   :  { %v11757_v42 = vpop.f32.mrf.mxu1  ;;  %v11759_v50 = vpop.eup %6850  ;;  %v4743_v44 = vadd.f32 %v14706_v27, %v4680_v51 }
 0x6c3   :  { %14705 = vst [vmem:[#allocation60_spill] sm:$0xff] %v11759_v50  ;;  %5459 = vmatmul.f32.gmra.mxu3 %v11759_v50  ;;  %5494 = vmatmul.f32.gmra.mxu0 %v14707_v7 }
 0x6c4   :  { %6852 = vtanh.f32 %v4743_v44  ;;  %5559 = vmatmul.f32.gmra.mxu1 %v14711_v10  ;;  %5624 = vmatmul.f32.gmra.mxu2 %v14712_v54  ;;  %v4491_v44 = vadd.f32 %v11697_v1, %v11302_v30 }
 0x6c5   :  { %5797 = vmatpush.msra.mxu1 %v5071_v36 }
 0x6c6   :  { %v4556_v34 = vadd.f32 %v11701_v13, %v4491_v44  ;;  %v11806_v13 = vld [vmem:[#allocation5 + $0xee8] sm:$0xff] }
 0x6c7   :  { %v4682_v51 = vpop.f32.mrf.mxu3  ;;  %v11780_v27 = vpop.f32.mrf.mxu2  ;;  %14721 = vst [vmem:[#allocation36_spill] sm:$0xff] %v11806_v13  ;;  %v11810_v44 = vld [vmem:[#allocation5 + $0xfe8] sm:$0xff] }
 0x6c8   :  { %v4683_v35 = vadd.f32 %v4682_v51, %v4618_v15  ;;  %v11784_v14 = vpop.f32.mrf.mxu0  ;;  %v4621_v30 = vadd.f32 %v11715_v37, %v4556_v34  ;;  %v14720_v51 = vld [vmem:[#allocation23_spill] sm:$0xff]  ;;  %14723 = vst [vmem:[#allocation66_spill] sm:$0xff] %v11810_v44  ;;  %v14724_v37 = vld [vmem:[#allocation20_spill] sm:$0xff]  ;;  %v5131_v34 = vunpack.c.l.bf16 %v11806_v13 }
 0x6c9   :  { %v11824_v13 = vld [vmem:[#allocation7 + $0xc] sm:$0xf] }
 0x6ca   :  { %v11786_v22 = vpop.f32.mrf.mxu1  ;;  %v11788_v54 = vpop.eup %6852  ;;  %v4747_v10 = vadd.f32 %v14715_v63, %v4683_v35  ;;  %5863 = vmatpush.msra.mxu2 %v5131_v34  ;;  %14728 = vst [vmem:[#allocation15_spill] sm:$0xff] %v11824_v13  ;;  %v11839_v34 = vperm.slane %v11824_v13, 0 }
 0x6cb   :  { %14714 = vst [vmem:[#allocation91_spill] sm:$0xff] %v11788_v54  ;;  %5462 = vmatmul.f32.gmra.mxu3 %v11788_v54  ;;  %5497 = vmatmul.f32.gmra.mxu0 %v14716_v25 }
 0x6cc   :  { %6854 = vtanh.f32 %v4747_v10  ;;  %5562 = vmatmul.f32.gmra.mxu1 %v14717_v62  ;;  %5627 = vmatmul.f32.gmra.mxu2 %v14718_v59  ;;  %v11808_v10 = vld [vmem:[#allocation5 + $0xce8] sm:$0xff] }
 0x6cd   :  { %14722 = vst [vmem:[#allocation133_spill] sm:$0xff] %v11808_v10  ;;  %v11817_v59 = vld [vmem:[#allocation5 + $0xde8] sm:$0xff] }
 0x6ce   :  { %14725 = vst [vmem:[#allocation141_spill] sm:$0xff] %v11817_v59  ;;  %v5067_v62 = vunpack.c.l.bf16 %v11817_v59  ;;  %v11846_v59 = vld [vmem:[#allocation5 + $0xdd8] sm:$0xff] }
 0x6cf   :  { %v4685_v1 = vpop.f32.mrf.mxu3  ;;  %v11797_v5 = vpop.f32.mrf.mxu2  ;;  %14733 = vst [vmem:[#allocation41_spill] sm:$0xff] %v11846_v59  ;;  %v5063_v38 = vunpack.c.l.bf16 %v11846_v59  ;;  %v11871_v59 = vld [vmem:[#allocation5 + $0xdc8] sm:$0xff] }
 0x6d0   :  { %v4686_v36 = vadd.f32 %v4685_v1, %v4621_v30  ;;  %v11799_v15 = vpop.f32.mrf.mxu0  ;;  %v5003_v30 = vunpack.c.l.bf16 %v11808_v10  ;;  %v5195_v1 = vunpack.c.l.bf16 %v11810_v44  ;;  %5798 = vmatpush.msra.mxu1 %v5067_v62  ;;  %14740 = vst [vmem:[#allocation84_spill] sm:$0xff] %v11871_v59  ;;  %v5059_v31 = vunpack.c.l.bf16 %v11871_v59  ;;  %v11886_v59 = vld [vmem:[#allocation5 + $0xeb8] sm:$0xff] }
 0x6d1   :  { %14743 = vst [vmem:[#allocation80_spill] sm:$0xff] %v11886_v59 }
 0x6d2   :  { %v11801_v35 = vpop.f32.mrf.mxu1  ;;  %v11803_v63 = vpop.eup %6854  ;;  %v4751_v54 = vadd.f32 %v14720_v51, %v4686_v36  ;;  %v14726_v36 = vld [vmem:[#allocation82_spill] sm:$0xff]  ;;  %v14727_v51 = vld [vmem:[#allocation85_spill] sm:$0xff]  ;;  %5733 = vmatpush.msra.mxu0 %v5003_v30  ;;  %5928 = vmatpush.msra.mxu3 %v5195_v1 }
 0x6d3   :  { %14719 = vst [vmem:[#allocation113_spill] sm:$0xff] %v11803_v63  ;;  %5465 = vmatmul.f32.gmra.mxu3 %v11803_v63  ;;  %5500 = vmatmul.f32.gmra.mxu0 %v14724_v37 }
 0x6d4   :  { %6856 = vtanh.f32 %v4751_v54  ;;  %5565 = vmatmul.f32.gmra.mxu1 %v14726_v36  ;;  %5630 = vmatmul.f32.gmra.mxu2 %v14727_v51  ;;  %v11832_v54 = vld [vmem:[#allocation5 + $0xed8] sm:$0xff] }
 0x6d5   :  { %14730 = vst [vmem:[#allocation59_spill] sm:$0xff] %v11832_v54  ;;  %v11834_v36 = vld [vmem:[#allocation5 + $0xcd8] sm:$0xff]  ;;  %v5127_v62 = vunpack.c.l.bf16 %v11832_v54  ;;  %5799 = vmatpush.msra.mxu1 %v5063_v38  ;;  %v11859_v54 = vld [vmem:[#allocation5 + $0xec8] sm:$0xff]  ;;  %v14739_v38 = vld [vmem:[#allocation88_spill] sm:$0xff] }
 0x6d6   :  { %14731 = vst [vmem:[#allocation107_spill] sm:$0xff] %v11834_v36  ;;  %v11836_v51 = vld [vmem:[#allocation5 + $0xfd8] sm:$0xff]  ;;  %v4999_v30 = vunpack.c.l.bf16 %v11834_v36 }
 0x6d7   :  { %v11822_v63 = vpop.f32.mrf.mxu2  ;;  %14732 = vst [vmem:[#allocation21_spill] sm:$0xff] %v11836_v51  ;;  %v5191_v1 = vunpack.c.l.bf16 %v11836_v51  ;;  %5864 = vmatpush.msra.mxu2 %v5127_v62  ;;  %5800 = vmatpush.msra.mxu1 %v5059_v31 }
 0x6d8   :  { %v11826_v10 = vpop.f32.mrf.mxu0  ;;  %5734 = vmatpush.msra.mxu0 %v4999_v30  ;;  %14736 = vst [vmem:[#allocation123_spill] sm:$0xff] %v11859_v54 }
 0x6d9   :  { %5929 = vmatpush.msra.mxu3 %v5191_v1 }
 0x6da   :  { %v11828_v44 = vpop.f32.mrf.mxu1  ;;  %v11830_v50 = vpop.eup %6856 }
 0x6db   :  { %14729 = vst [vmem:[#allocation14_spill] sm:$0xff] %v11830_v50  ;;  %5468 = vmatmul.f32.gmra.mxu3 %v11830_v50  ;;  %5503 = vmatmul.f32.gmra.mxu0 %v11349_v17  ;;  %v5230_v50 = vadd.f32 %v11719_v29, %v11839_v34  ;;  %v5123_v29 = vunpack.c.l.bf16 %v11859_v54 }
 0x6dc   :  { %5568 = vmatmul.f32.gmra.mxu1 %v14734_v41  ;;  %5633 = vmatmul.f32.gmra.mxu2 %v14735_v33  ;;  %v11861_v41 = vld [vmem:[#allocation5 + $0xcc8] sm:$0xff] }
 0x6dd   :  { %14737 = vst [vmem:[#allocation71_spill] sm:$0xff] %v11861_v41  ;;  %v11863_v33 = vld [vmem:[#allocation5 + $0xfc8] sm:$0xff]  ;;  %v5295_v62 = vadd.f32 %v11721_v46, %v5230_v50  ;;  %v4995_v30 = vunpack.c.l.bf16 %v11861_v41  ;;  %5865 = vmatpush.msra.mxu2 %v5123_v29  ;;  %v5119_v29 = vunpack.c.l.bf16 %v11886_v59 }
 0x6de   :  { %14738 = vst [vmem:[#allocation134_spill] sm:$0xff] %v11863_v33  ;;  %v5187_v1 = vunpack.c.l.bf16 %v11863_v33 }
 0x6df   :  { %v11853_v13 = vpop.f32.mrf.mxu2  ;;  %v5360_v46 = vadd.f32 %v11733_v48, %v5295_v62  ;;  %5735 = vmatpush.msra.mxu0 %v4995_v30  ;;  %v11888_v48 = vld [vmem:[#allocation5 + $0xcb8] sm:$0xff]  ;;  %5866 = vmatpush.msra.mxu2 %v5119_v29  ;;  %v11917_v29 = vld [vmem:[#allocation5 + $0xfa8] sm:$0xff] }
 0x6e0   :  { %v11855_v36 = vpop.f32.mrf.mxu0  ;;  %5930 = vmatpush.msra.mxu3 %v5187_v1  ;;  %14744 = vst [vmem:[#allocation67_spill] sm:$0xff] %v11888_v48  ;;  %v11890_v62 = vld [vmem:[#allocation5 + $0xfb8] sm:$0xff]  ;;  %v4991_v30 = vunpack.c.l.bf16 %v11888_v48  ;;  %v14748_v1 = vld [vmem:[#allocation86_spill] sm:$0xff] }
 0x6e1   :  { %14745 = vst [vmem:[#allocation115_spill] sm:$0xff] %v11890_v62 }
 0x6e2   :  { %v11857_v51 = vpop.f32.mrf.mxu1  ;;  %5736 = vmatpush.msra.mxu0 %v4991_v30  ;;  %14752 = vst [vmem:[#allocation108_spill] sm:$0xff] %v11917_v29 }
 0x6e3   :  { %5683 = vmatmul.f32.vlgmr.msrb.gmra.mxu3 %v11389_v26  ;;  %5506 = vmatmul.f32.gmra.mxu0 %v14739_v38  ;;  %v5233_v26 = vadd.f32 %v11737_v8, %v11839_v34  ;;  %v14746_v8 = vld [vmem:[#allocation90_spill] sm:$0xff] }
 0x6e4   :  { %5571 = vmatmul.f32.gmra.mxu1 %v14741_v32  ;;  %5636 = vmatmul.f32.gmra.mxu2 %v14742_v0 }
 0x6e5   :  { %v5298_v31 = vadd.f32 %v11739_v3, %v5233_v26  ;;  %v5236_v3 = vadd.f32 %v11755_v9, %v11839_v34  ;;  %v14753_v9 = vld [vmem:[#allocation19_spill] sm:$0xff] }
 0x6e6   :  { %v5424_v50 = vpop.f32.mrf.mxu3 }
 0x6e7   :  { %v5425_v41 = vadd.f32 %v5424_v50, %v5360_v46  ;;  %v11879_v33 = vpop.f32.mrf.mxu2  ;;  %v14749_v46 = vld [vmem:[#allocation103_spill] sm:$0xff]  ;;  %v5183_v50 = vunpack.c.l.bf16 %v11890_v62  ;;  %v5363_v26 = vadd.f32 %v11753_v23, %v5298_v31 }
 0x6e8   :  { %v11881_v54 = vpop.f32.mrf.mxu0  ;;  %v11913_v23 = vld [vmem:[#allocation5 + $0xea8] sm:$0xff] }
 0x6e9   :  { %v6252_v32 = vadd.f32 %v14695_v47, %v5425_v41  ;;  %v11897_v41 = vld [vmem:[#allocation5 + $0xdb8] sm:$0xff]  ;;  %5931 = vmatpush.msra.mxu3 %v5183_v50  ;;  %14750 = vst [vmem:[#allocation110_spill] sm:$0xff] %v11913_v23  ;;  %v11915_v31 = vld [vmem:[#allocation5 + $0xca8] sm:$0xff]  ;;  %v5115_v30 = vunpack.c.l.bf16 %v11913_v23 }
 0x6ea   :  { %v11884_v0 = vpop.f32.mrf.mxu1  ;;  %14747 = vst [vmem:[#allocation13_spill] sm:$0xff] %v11897_v41  ;;  %v5055_v47 = vunpack.c.l.bf16 %v11897_v41  ;;  %v11924_v50 = vld [vmem:[#allocation5 + $0xda8] sm:$0xff] }
 0x6eb   :  { %6858 = vtanh.f32 %v6252_v32  ;;  %5686 = vmatmul.f32.gmra.mxu3 %v11423_v52  ;;  %5509 = vmatmul.f32.gmra.mxu0 %v14746_v8  ;;  %14751 = vst [vmem:[#allocation111_spill] sm:$0xff] %v11915_v31  ;;  %v5051_v41 = vunpack.c.l.bf16 %v11924_v50 }
 0x6ec   :  { %5574 = vmatmul.f32.gmra.mxu1 %v14748_v1  ;;  %5639 = vmatmul.f32.gmra.mxu2 %v14749_v46  ;;  %14754 = vst [vmem:[#allocation57_spill] sm:$0xff] %v11924_v50 }
 0x6ed   :  { %5801 = vmatpush.msra.mxu1 %v5055_v47  ;;  %v5301_v47 = vadd.f32 %v11757_v42, %v5236_v3  ;;  %5867 = vmatpush.msra.mxu2 %v5115_v30  ;;  %v5239_v3 = vadd.f32 %v11784_v14, %v11839_v34  ;;  %v11944_v30 = vld [vmem:[#allocation5 + $0xf98] sm:$0xff]  ;;  %v14760_v14 = vld [vmem:[#allocation83_spill] sm:$0xff] }
 0x6ee   :  { %v5427_v32 = vpop.f32.mrf.mxu3  ;;  %14759 = vst [vmem:[#allocation76_spill] sm:$0xff] %v11944_v30 }
 0x6ef   :  { %v5428_v52 = vadd.f32 %v5427_v32, %v5363_v26  ;;  %v11906_v48 = vpop.f32.mrf.mxu2  ;;  %v14756_v26 = vld [vmem:[#allocation95_spill] sm:$0xff]  ;;  %v5179_v32 = vunpack.c.l.bf16 %v11917_v29  ;;  %v5366_v42 = vadd.f32 %v11780_v27, %v5301_v47  ;;  %5802 = vmatpush.msra.mxu1 %v5051_v41  ;;  %v11940_v27 = vld [vmem:[#allocation5 + $0xe98] sm:$0xff]  ;;  %v5304_v41 = vadd.f32 %v11786_v22, %v5239_v3 }
 0x6f0   :  { %v11908_v1 = vpop.f32.mrf.mxu0  ;;  %14757 = vst [vmem:[#allocation64_spill] sm:$0xff] %v11940_v27  ;;  %v11942_v47 = vld [vmem:[#allocation5 + $0xc98] sm:$0xff]  ;;  %v5242_v3 = vadd.f32 %v11799_v15, %v11839_v34 }
 0x6f1   :  { %v6859_v46 = vpop.eup %6858  ;;  %v6256_v62 = vadd.f32 %v14701_v49, %v5428_v52  ;;  %v4987_v52 = vunpack.c.l.bf16 %v11915_v31  ;;  %5932 = vmatpush.msra.mxu3 %v5179_v32  ;;  %14758 = vst [vmem:[#allocation72_spill] sm:$0xff] %v11942_v47  ;;  %v11951_v32 = vld [vmem:[#allocation5 + $0xd98] sm:$0xff]  ;;  %v5369_v22 = vadd.f32 %v11797_v5, %v5304_v41 }
 0x6f2   :  { %v11911_v59 = vpop.f32.mrf.mxu1  ;;  %6380 = vst [vmem:[#allocation8] sm:$0xff] %v6859_v46  ;;  %v14755_v46 = vld [vmem:[#allocation22_spill] sm:$0xff]  ;;  %v5047_v50 = vunpack.c.l.bf16 %v11951_v32 }
 0x6f3   :  { %6860 = vtanh.f32 %v6256_v62  ;;  %5689 = vmatmul.f32.gmra.mxu3 %v11457_v60  ;;  %5512 = vmatmul.f32.gmra.mxu0 %v14753_v9  ;;  %14761 = vst [vmem:[#allocation98_spill] sm:$0xff] %v11951_v32  ;;  %v11968_v32 = vld [vmem:[#allocation5 + $0xd88] sm:$0xff] }
 0x6f4   :  { %5577 = vmatmul.f32.gmra.mxu1 %v14755_v46  ;;  %5642 = vmatmul.f32.gmra.mxu2 %v14756_v26  ;;  %14766 = vst [vmem:[#allocation26_spill] sm:$0xff] %v11968_v32 }
 0x6f5   :  { %5737 = vmatpush.msra.mxu0 %v4987_v52  ;;  %v5111_v52 = vunpack.c.l.bf16 %v11940_v27  ;;  %5803 = vmatpush.msra.mxu1 %v5047_v50  ;;  %v5307_v27 = vadd.f32 %v11801_v35, %v5242_v3  ;;  %v11993_v35 = vld [vmem:[#allocation5 + $0xc68] sm:$0xff] }
 0x6f6   :  { %v5430_v62 = vpop.f32.mrf.mxu3  ;;  %v11995_v3 = vld [vmem:[#allocation5 + $0xd68] sm:$0xff] }
 0x6f7   :  { %v5431_v60 = vadd.f32 %v5430_v62, %v5366_v42  ;;  %v11933_v31 = vpop.f32.mrf.mxu2  ;;  %v14763_v42 = vld [vmem:[#allocation30_spill] sm:$0xff]  ;;  %v5175_v62 = vunpack.c.l.bf16 %v11944_v30  ;;  %5868 = vmatpush.msra.mxu2 %v5111_v52  ;;  %v11966_v30 = vld [vmem:[#allocation5 + $0xc88] sm:$0xff]  ;;  %14773 = vst [vmem:[#allocation119_spill] sm:$0xff] %v11995_v3 }
 0x6f8   :  { %v11935_v46 = vpop.f32.mrf.mxu0  ;;  %14765 = vst [vmem:[#allocation97_spill] sm:$0xff] %v11966_v30  ;;  %v4979_v15 = vunpack.c.l.bf16 %v11966_v30 }
 0x6f9   :  { %v6861_v26 = vpop.eup %6860  ;;  %v6260_v29 = vadd.f32 %v14707_v7, %v5431_v60  ;;  %v4983_v60 = vunpack.c.l.bf16 %v11942_v47  ;;  %5933 = vmatpush.msra.mxu3 %v5175_v62  ;;  %v5043_v62 = vunpack.c.l.bf16 %v11968_v32  ;;  %v14772_v32 = vld [vmem:[#allocation61_spill] sm:$0xff] }
 0x6fa   :  { %v11938_v23 = vpop.f32.mrf.mxu1  ;;  %6384 = vst [vmem:[#allocation8 + $0x20] sm:$0xff] %v6861_v26  ;;  %v14762_v26 = vld [vmem:[#allocation124_spill] sm:$0xff] }
 0x6fb   :  { %6862 = vtanh.f32 %v6260_v29  ;;  %5692 = vmatmul.f32.gmra.mxu3 %v11491_v4  ;;  %5515 = vmatmul.f32.gmra.mxu0 %v14760_v14 }
 0x6fc   :  { %5580 = vmatmul.f32.gmra.mxu1 %v14762_v26  ;;  %5645 = vmatmul.f32.gmra.mxu2 %v14763_v42  ;;  %v11964_v42 = vld [vmem:[#allocation5 + $0xe88] sm:$0xff] }
 0x6fd   :  { %5738 = vmatpush.msra.mxu0 %v4983_v60  ;;  %14764 = vst [vmem:[#allocation99_spill] sm:$0xff] %v11964_v42  ;;  %v5107_v50 = vunpack.c.l.bf16 %v11964_v42  ;;  %v11975_v60 = vld [vmem:[#allocation5 + $0xf88] sm:$0xff]  ;;  %5804 = vmatpush.msra.mxu1 %v5043_v62 }
 0x6fe   :  { %v5433_v29 = vpop.f32.mrf.mxu3  ;;  %14767 = vst [vmem:[#allocation116_spill] sm:$0xff] %v11975_v60  ;;  %v5171_v42 = vunpack.c.l.bf16 %v11975_v60 }
 0x6ff   :  { %v5434_v4 = vadd.f32 %v5433_v29, %v5369_v22  ;;  %v11960_v47 = vpop.f32.mrf.mxu2  ;;  %v11978_v22 = vld [vmem:[#allocation5 + $0xe78] sm:$0xff]  ;;  %5869 = vmatpush.msra.mxu2 %v5107_v50  ;;  %5739 = vmatpush.msra.mxu0 %v4979_v15 }
 0x700   :  { %v11962_v26 = vpop.f32.mrf.mxu0  ;;  %14768 = vst [vmem:[#allocation117_spill] sm:$0xff] %v11978_v22  ;;  %v11980_v29 = vld [vmem:[#allocation5 + $0xc78] sm:$0xff]  ;;  %v5103_v30 = vunpack.c.l.bf16 %v11978_v22  ;;  %v4971_v22 = vunpack.c.l.bf16 %v11993_v35  ;;  %5934 = vmatpush.msra.mxu3 %v5171_v42  ;;  %v12015_v42 = vld [vmem:[#allocation5 + $0xc48] sm:$0xff] }
 0x701   :  { %v6863_v5 = vpop.eup %6862  ;;  %v6264_v41 = vadd.f32 %v14716_v25, %v5434_v4  ;;  %14769 = vst [vmem:[#allocation118_spill] sm:$0xff] %v11980_v29  ;;  %v14770_v4 = vld [vmem:[#allocation104_spill] sm:$0xff]  ;;  %v4975_v25 = vunpack.c.l.bf16 %v11980_v29  ;;  %v5245_v29 = vadd.f32 %v11826_v10, %v11839_v34  ;;  %v12021_v10 = vld [vmem:[#allocation5 + $0xd48] sm:$0xff] }
 0x702   :  { %v11971_v52 = vpop.f32.mrf.mxu1  ;;  %6388 = vst [vmem:[#allocation8 + $0x40] sm:$0xff] %v6863_v5  ;;  %v11987_v5 = vld [vmem:[#allocation5 + $0xd78] sm:$0xff]  ;;  %5870 = vmatpush.msra.mxu2 %v5103_v30 }
 0x703   :  { %6864 = vtanh.f32 %v6264_v41  ;;  %5695 = vmatmul.f32.gmra.mxu3 %v11525_v16  ;;  %5518 = vmatmul.f32.gmra.mxu0 %v14770_v4  ;;  %14771 = vst [vmem:[#allocation109_spill] sm:$0xff] %v11987_v5  ;;  %v5039_v7 = vunpack.c.l.bf16 %v11987_v5  ;;  %v11997_v41 = vld [vmem:[#allocation5 + $0xe68] sm:$0xff]  ;;  %v5372_v16 = vadd.f32 %v11822_v63, %v5307_v27  ;;  %v12003_v5 = vld [vmem:[#allocation5 + $0xc58] sm:$0xff] }
 0x704   :  { %5583 = vmatmul.f32.gmra.mxu1 %v11521_v11  ;;  %5648 = vmatmul.f32.gmra.mxu2 %v14772_v32  ;;  %14774 = vst [vmem:[#allocation42_spill] sm:$0xff] %v11997_v41  ;;  %v5099_v11 = vunpack.c.l.bf16 %v11997_v41  ;;  %v5035_v32 = vunpack.c.l.bf16 %v11995_v3  ;;  %v12009_v63 = vld [vmem:[#allocation5 + $0xd58] sm:$0xff] }
 0x705   :  { %5740 = vmatpush.msra.mxu0 %v4975_v25  ;;  %14775 = vst [vmem:[#allocation135_spill] sm:$0xff] %v12009_v63  ;;  %v12011_v27 = vld [vmem:[#allocation5 + $0xe58] sm:$0xff]  ;;  %5805 = vmatpush.msra.mxu1 %v5039_v7  ;;  %v12023_v25 = vld [vmem:[#allocation5 + $0xe48] sm:$0xff]  ;;  %v5031_v7 = vunpack.c.l.bf16 %v12009_v63  ;;  %v5027_v63 = vunpack.c.l.bf16 %v12021_v10 }
 0x706   :  { %v5436_v60 = vpop.f32.mrf.mxu3  ;;  %14776 = vst [vmem:[#allocation78_spill] sm:$0xff] %v12011_v27  ;;  %5871 = vmatpush.msra.mxu2 %v5099_v11  ;;  %v12025_v30 = vld [vmem:[#allocation5 + $0xf78] sm:$0xff] }
 0x707   :  { %v5437_v49 = vadd.f32 %v5436_v60, %v5372_v16  ;;  %v12007_v4 = vpop.f32.mrf.mxu2  ;;  %14777 = vst [vmem:[#allocation24_spill] sm:$0xff] %v12015_v42  ;;  %5741 = vmatpush.msra.mxu0 %v4971_v22  ;;  %v4967_v16 = vunpack.c.l.bf16 %v12003_v5  ;;  %5806 = vmatpush.msra.mxu1 %v5035_v32  ;;  %v5095_v60 = vunpack.c.l.bf16 %v12011_v27  ;;  %v12029_v41 = vld [vmem:[#allocation5 + $0xc38] sm:$0xff]  ;;  %v5167_v11 = vunpack.c.l.bf16 %v12025_v30  ;;  %v14783_v27 = vld [vmem:[#allocation94_spill] sm:$0xff] }
 0x708   :  { %v12013_v50 = vpop.f32.mrf.mxu0  ;;  %14778 = vst [vmem:[#allocation74_spill] sm:$0xff] %v12021_v10  ;;  %v4963_v22 = vunpack.c.l.bf16 %v12015_v42  ;;  %v12038_v32 = vld [vmem:[#allocation5 + $0xe38] sm:$0xff]  ;;  %v5248_v10 = vadd.f32 %v11855_v36, %v11839_v34 }
 0x709   :  { %v6865_v15 = vpop.eup %6864  ;;  %v6268_v62 = vadd.f32 %v14724_v37, %v5437_v49  ;;  %14779 = vst [vmem:[#allocation122_spill] sm:$0xff] %v12023_v25  ;;  %v5310_v49 = vadd.f32 %v11828_v44, %v5245_v29  ;;  %v5091_v44 = vunpack.c.l.bf16 %v12023_v25  ;;  %5935 = vmatpush.msra.mxu3 %v5167_v11  ;;  %5742 = vmatpush.msra.mxu0 %v4967_v16  ;;  %v12056_v16 = vld [vmem:[#allocation5 + $0xe28] sm:$0xff]  ;;  %v12066_v36 = vld [vmem:[#allocation5 + $0xd18] sm:$0xff] }
 0x70a   :  { %v12018_v3 = vpop.f32.mrf.mxu1  ;;  %6392 = vst [vmem:[#allocation8 + $0x60] sm:$0xff] %v6865_v15  ;;  %v12036_v15 = vld [vmem:[#allocation5 + $0xd38] sm:$0xff]  ;;  %5807 = vmatpush.msra.mxu1 %v5031_v7  ;;  %5872 = vmatpush.msra.mxu2 %v5095_v60 }
 0x70b   :  { %14780 = vst [vmem:[#allocation79_spill] sm:$0xff] %v12025_v30  ;;  %6866 = vtanh.f32 %v6268_v62  ;;  %5698 = vmatmul.f32.gmra.mxu3 %v11569_v2  ;;  %5521 = vmatmul.f32.gmra.mxu0 %v11547_v45  ;;  %v5375_v29 = vadd.f32 %v11853_v13, %v5310_v49  ;;  %v4959_v62 = vunpack.c.l.bf16 %v12029_v41  ;;  %v5023_v42 = vunpack.c.l.bf16 %v12036_v15  ;;  %v12054_v13 = vld [vmem:[#allocation5 + $0xd28] sm:$0xff]  ;;  %v12060_v7 = vld [vmem:[#allocation5 + $0xc18] sm:$0xff] }
 0x70c   :  { %14781 = vst [vmem:[#allocation54_spill] sm:$0xff] %v12036_v15  ;;  %5586 = vmatmul.f32.gmra.mxu1 %v11556_v19  ;;  %5651 = vmatmul.f32.gmra.mxu2 %v14783_v27  ;;  %v5087_v30 = vunpack.c.l.bf16 %v12038_v32  ;;  %v12048_v19 = vld [vmem:[#allocation5 + $0xc28] sm:$0xff] }
 0x70d   :  { %14782 = vst [vmem:[#allocation46_spill] sm:$0xff] %v12038_v32  ;;  %5743 = vmatpush.msra.mxu0 %v4963_v22  ;;  %5808 = vmatpush.msra.mxu1 %v5027_v63  ;;  %v12068_v22 = vld [vmem:[#allocation5 + $0xe18] sm:$0xff]  ;;  %v5019_v63 = vunpack.c.l.bf16 %v12054_v13  ;;  %v12074_v15 = vld [vmem:[#allocation5 + $0xc08] sm:$0xff] }
 0x70e   :  { %v5439_v2 = vpop.f32.mrf.mxu3  ;;  %14784 = vst [vmem:[#allocation125_spill] sm:$0xff] %v12048_v19  ;;  %5873 = vmatpush.msra.mxu2 %v5091_v44  ;;  %v5083_v44 = vunpack.c.l.bf16 %v12056_v16 }
 0x70f   :  { %v5440_v27 = vadd.f32 %v5439_v2, %v5375_v29  ;;  %v12052_v25 = vpop.f32.mrf.mxu2  ;;  %14785 = vst [vmem:[#allocation128_spill] sm:$0xff] %v12056_v16  ;;  %5744 = vmatpush.msra.mxu0 %v4959_v62  ;;  %v4955_v2 = vunpack.c.l.bf16 %v12048_v19  ;;  %v12070_v29 = vld [vmem:[#allocation5 + $0xf68] sm:$0xff]  ;;  %5809 = vmatpush.msra.mxu1 %v5023_v42 }
 0x710   :  { %v12058_v49 = vpop.f32.mrf.mxu0  ;;  %14786 = vst [vmem:[#allocation130_spill] sm:$0xff] %v12060_v7  ;;  %5874 = vmatpush.msra.mxu2 %v5087_v30  ;;  %v5163_v62 = vunpack.c.l.bf16 %v12070_v29  ;;  %v12081_v19 = vld [vmem:[#allocation5 + $0xd08] sm:$0xff]  ;;  %v5015_v30 = vunpack.c.l.bf16 %v12066_v36 }
 0x711   :  { %v6867_v60 = vpop.eup %6866  ;;  %v6272_v11 = vadd.f32 %v11349_v17, %v5440_v27  ;;  %14787 = vst [vmem:[#allocation129_spill] sm:$0xff] %v12066_v36  ;;  %v5313_v27 = vadd.f32 %v11857_v51, %v5248_v10  ;;  %v12083_v42 = vld [vmem:[#allocation5 + $0xe08] sm:$0xff]  ;;  %v5079_v51 = vunpack.c.l.bf16 %v12068_v22  ;;  %5745 = vmatpush.msra.mxu0 %v4955_v2  ;;  %5810 = vmatpush.msra.mxu1 %v5019_v63 }
 0x712   :  { %v12063_v32 = vpop.f32.mrf.mxu1  ;;  %14788 = vst [vmem:[#allocation96_spill] sm:$0xff] %v12068_v22  ;;  %5936 = vmatpush.msra.mxu3 %v5163_v62  ;;  %5875 = vmatpush.msra.mxu2 %v5083_v44  ;;  %v5075_v16 = vunpack.c.l.bf16 %v12083_v42  ;;  %v12102_v44 = vld [vmem:[#allocation5 + $0xf58] sm:$0xff] }
 0x713   :  { %6396 = vst [vmem:[#allocation8 + $0x80] sm:$0xff] %v6867_v60  ;;  %6868 = vtanh.f32 %v6272_v11  ;;  %5701 = vmatmul.f32.gmra.mxu3 %v11610_v39  ;;  %5524 = vmatmul.f32.gmra.mxu0 %v11596_v55  ;;  %v4951_v60 = vunpack.c.l.bf16 %v12060_v7  ;;  %v5378_v10 = vadd.f32 %v11879_v33, %v5313_v27  ;;  %v4947_v11 = vunpack.c.l.bf16 %v12074_v15 }
 0x714   :  { %5589 = vmatmul.f32.gmra.mxu1 %v11602_v57  ;;  %5654 = vmatmul.f32.gmra.mxu2 %v11614_v61  ;;  %v5011_v7 = vunpack.c.l.bf16 %v12081_v19  ;;  %v5251_v61 = vadd.f32 %v11881_v54, %v11839_v34  ;;  %v5159_v54 = vunpack.c.l.bf16 %v12102_v44 }
 0x715   :  { %5746 = vmatpush.msra.mxu0 %v4951_v60  ;;  %5811 = vmatpush.msra.mxu1 %v5015_v30 }
 0x716   :  { %v5442_v39 = vpop.f32.mrf.mxu3  ;;  %5876 = vmatpush.msra.mxu2 %v5079_v51  ;;  %5937 = vmatpush.msra.mxu3 %v5159_v54  ;;  %v12120_v51 = vld [vmem:[#allocation5 + $0xf48] sm:$0xff] }
 0x717   :  { %v5443_v57 = vadd.f32 %v5442_v39, %v5378_v10  ;;  %v12095_v36 = vpop.f32.mrf.mxu2  ;;  %5747 = vmatpush.msra.mxu0 %v4947_v11  ;;  %5812 = vmatpush.msra.mxu1 %v5011_v7  ;;  %v5316_v39 = vadd.f32 %v11884_v0, %v5251_v61 }
 0x718   :  { %v12097_v22 = vpop.f32.mrf.mxu0  ;;  %5877 = vmatpush.msra.mxu2 %v5075_v16  ;;  %v5254_v16 = vadd.f32 %v11908_v1, %v11839_v34  ;;  %v5155_v1 = vunpack.c.l.bf16 %v12120_v51 }
 0x719   :  { %v6869_v33 = vpop.eup %6868  ;;  %v6276_v2 = vadd.f32 %v14739_v38, %v5443_v57  ;;  %v5381_v57 = vadd.f32 %v11906_v48, %v5316_v39 }
 0x71a   :  { %v12100_v63 = vpop.f32.mrf.mxu1  ;;  %6400 = vst [vmem:[#allocation8 + $0xa0] sm:$0xff] %v6869_v33  ;;  %v5319_v48 = vadd.f32 %v11911_v59, %v5254_v16  ;;  %5938 = vmatpush.msra.mxu3 %v5155_v1  ;;  %v5257_v33 = vadd.f32 %v11935_v46, %v11839_v34  ;;  %v12138_v16 = vld [vmem:[#allocation5 + $0xf38] sm:$0xff] }
 0x71b   :  { %6870 = vtanh.f32 %v6276_v2  ;;  %5704 = vmatmul.f32.gmra.mxu3 %v11648_v18  ;;  %5527 = vmatmul.f32.gmra.mxu0 %v11636_v53  ;;  %14789 = vst [vmem:[#allocation131_spill] sm:$0xff] %v12138_v16  ;;  %v5151_v46 = vunpack.c.l.bf16 %v12138_v16 }
 0x71c   :  { %5592 = vmatmul.f32.gmra.mxu1 %v11642_v24  ;;  %5657 = vmatmul.f32.gmra.mxu2 %v11651_v40  ;;  %v5384_v10 = vadd.f32 %v11933_v31, %v5319_v48  ;;  %v5322_v31 = vadd.f32 %v11938_v23, %v5257_v33 }
 0x71d   :  { %5939 = vmatpush.msra.mxu3 %v5151_v46  ;;  %v14794_v46 = vld [vmem:[#allocation75_spill] sm:$0xff] }
 0x71e   :  { %v5445_v7 = vpop.f32.mrf.mxu3 }
 0x71f   :  { %v5446_v27 = vadd.f32 %v5445_v7, %v5381_v57  ;;  %v12113_v61 = vpop.f32.mrf.mxu2 }
 0x720   :  { %v12115_v0 = vpop.f32.mrf.mxu0 }
 0x721   :  { %v6871_v62 = vpop.eup %6870  ;;  %v6280_v60 = vadd.f32 %v14746_v8, %v5446_v27  ;;  %v5387_v27 = vadd.f32 %v11960_v47, %v5322_v31  ;;  %v14793_v31 = vld [vmem:[#allocation69_spill] sm:$0xff] }
 0x722   :  { %v12118_v30 = vpop.f32.mrf.mxu1  ;;  %6404 = vst [vmem:[#allocation8 + $0xc0] sm:$0xff] %v6871_v62 }
 0x723   :  { %6872 = vtanh.f32 %v6280_v60  ;;  %5707 = vmatmul.f32.gmra.mxu3 %v11679_v20  ;;  %5530 = vmatmul.f32.gmra.mxu0 %v11668_v58  ;;  %v5260_v60 = vadd.f32 %v11962_v26, %v11839_v34  ;;  %v14812_v20 = vld [vmem:[#allocation28_spill] sm:$0xff] }
 0x724   :  { %5595 = vmatmul.f32.gmra.mxu1 %v11674_v28  ;;  %5660 = vmatmul.f32.gmra.mxu2 %v11682_v6  ;;  %v14809_v6 = vld [vmem:[#allocation53_spill] sm:$0xff] }
 0x725   :  { %v5325_v47 = vadd.f32 %v11971_v52, %v5260_v60  ;;  %v5072_v28 = vunpack.c.h.bf16 %v14809_v6  ;;  %v5272_v6 = vadd.f32 %v12115_v0, %v11839_v34 }
 0x726   :  { %v5448_v11 = vpop.f32.mrf.mxu3 }
 0x727   :  { %v5449_v2 = vadd.f32 %v5448_v11, %v5384_v10  ;;  %v12131_v59 = vpop.f32.mrf.mxu2  ;;  %6057 = vmatpush.msrb.mxu1 %v5072_v28  ;;  %v5337_v0 = vadd.f32 %v12118_v30, %v5272_v6 }
 0x728   :  { %v12133_v39 = vpop.f32.mrf.mxu0 }
 0x729   :  { %v6873_v54 = vpop.eup %6872  ;;  %v6284_v57 = vadd.f32 %v14753_v9, %v5449_v2  ;;  %v12156_v2 = vld [vmem:[#allocation5 + $0xf28] sm:$0xff] }
 0x72a   :  { %v12136_v7 = vpop.f32.mrf.mxu1  ;;  %6408 = vst [vmem:[#allocation8 + $0xe0] sm:$0xff] %v6873_v54  ;;  %v14791_v54 = vld [vmem:[#allocation32_spill] sm:$0xff]  ;;  %v5147_v26 = vunpack.c.l.bf16 %v12156_v2 }
 0x72b   :  { %6874 = vtanh.f32 %v6284_v57  ;;  %5710 = vmatmul.f32.gmra.mxu3 %v11703_v56  ;;  %5533 = vmatmul.f32.gmra.mxu0 %v11693_v12  ;;  %14790 = vst [vmem:[#allocation136_spill] sm:$0xff] %v12156_v2  ;;  %v14792_v57 = vld [vmem:[#allocation138_spill] sm:$0xff] }
 0x72c   :  { %5598 = vmatmul.f32.gmra.mxu1 %v11699_v21  ;;  %5663 = vmatmul.f32.gmra.mxu2 %v11706_v43  ;;  %v12174_v43 = vld [vmem:[#allocation5 + $0xf18] sm:$0xff] }
 0x72d   :  { %5940 = vmatpush.msra.mxu3 %v5147_v26  ;;  %14796 = vst [vmem:[#allocation55_spill] sm:$0xff] %v12174_v43  ;;  %v14798_v26 = vld [vmem:[#allocation112_spill] sm:$0xff] }
 0x72e   :  { %v5451_v62 = vpop.f32.mrf.mxu3 }
 0x72f   :  { %v5452_v48 = vadd.f32 %v5451_v62, %v5387_v27  ;;  %v12149_v23 = vpop.f32.mrf.mxu2  ;;  %v5390_v27 = vadd.f32 %v12007_v4, %v5325_v47  ;;  %v14797_v47 = vld [vmem:[#allocation25_spill] sm:$0xff] }
 0x730   :  { %v12151_v1 = vpop.f32.mrf.mxu0 }
 0x731   :  { %v6875_v10 = vpop.eup %6874  ;;  %v6288_v11 = vadd.f32 %v14760_v14, %v5452_v48  ;;  %v5263_v48 = vadd.f32 %v12013_v50, %v11839_v34  ;;  %v5143_v50 = vunpack.c.l.bf16 %v12174_v43 }
 0x732   :  { %v12154_v33 = vpop.f32.mrf.mxu1  ;;  %6412 = vst [vmem:[#allocation8 + $0x100] sm:$0xff] %v6875_v10 }
 0x733   :  { %6876 = vtanh.f32 %v6288_v11  ;;  %5713 = vmatmul.f32.gmra.mxu3 %v14791_v54  ;;  %5748 = vmatmul.f32.vlgmr.msra.gmra.mxu0 %v14792_v57  ;;  %v14795_v57 = vld [vmem:[#allocation104_spill] sm:$0xff]  ;;  %v5328_v4 = vadd.f32 %v12018_v3, %v5263_v48 }
 0x734   :  { %5813 = vmatmul.f32.vlgmr.msra.gmra.mxu1 %v14793_v31  ;;  %5878 = vmatmul.f32.vlgmr.msra.gmra.mxu2 %v14794_v46 }
 0x735   :  { %5941 = vmatpush.msra.mxu3 %v5143_v50  ;;  %v14805_v50 = vld [vmem:[#allocation147_spill] sm:$0xff] }
 0x736   :  { %v5454_v62 = vpop.f32.mrf.mxu3 }
 0x737   :  { %v5455_v10 = vadd.f32 %v5454_v62, %v5390_v27  ;;  %v12167_v52 = vpop.f32.mrf.mxu2  ;;  %v14799_v27 = vld [vmem:[#allocation139_spill] sm:$0xff]  ;;  %v14800_v62 = vld [vmem:[#allocation145_spill] sm:$0xff] }
 0x738   :  { %v12169_v60 = vpop.f32.mrf.mxu0 }
 0x739   :  { %v6877_v11 = vpop.eup %6876  ;;  %v6292_v54 = vadd.f32 %v14795_v57, %v5455_v10  ;;  %v5393_v10 = vadd.f32 %v12052_v25, %v5328_v4  ;;  %v14804_v4 = vld [vmem:[#allocation140_spill] sm:$0xff] }
 0x73a   :  { %v12172_v2 = vpop.f32.mrf.mxu1  ;;  %6416 = vst [vmem:[#allocation8 + $0x120] sm:$0xff] %v6877_v11  ;;  %v5266_v11 = vadd.f32 %v12058_v49, %v11839_v34  ;;  %v14802_v49 = vld [vmem:[#allocation60_spill] sm:$0xff] }
 0x73b   :  { %6878 = vtanh.f32 %v6292_v54  ;;  %5716 = vmatmul.f32.gmra.mxu3 %v14797_v47  ;;  %5751 = vmatmul.f32.gmra.mxu0 %v14798_v26  ;;  %v12187_v54 = vld [vmem:[#allocation5 + $0xf08] sm:$0xff] }
 0x73c   :  { %5816 = vmatmul.f32.gmra.mxu1 %v14799_v27  ;;  %5881 = vmatmul.f32.gmra.mxu2 %v14800_v62  ;;  %14801 = vst [vmem:[#allocation27_spill] sm:$0xff] %v12187_v54  ;;  %v5139_v26 = vunpack.c.l.bf16 %v12187_v54  ;;  %v5331_v25 = vadd.f32 %v12063_v32, %v5266_v11 }
 0x73e   :  { %v5457_v46 = vpop.f32.mrf.mxu3  ;;  %5942 = vmatpush.msra.mxu3 %v5139_v26 }
 0x73f   :  { %v5458_v21 = vadd.f32 %v5457_v46, %v5393_v10  ;;  %v12185_v3 = vpop.f32.mrf.mxu2  ;;  %v14803_v46 = vld [vmem:[#allocation35_spill] sm:$0xff]  ;;  %v5396_v10 = vadd.f32 %v12095_v36, %v5331_v25  ;;  %v14808_v36 = vld [vmem:[#allocation120_spill] sm:$0xff] }
 0x740   :  { %v12189_v48 = vpop.f32.mrf.mxu0  ;;  %v5200_v25 = vunpack.c.h.bf16 %v14808_v36 }
 0x741   :  { %v6879_v47 = vpop.eup %6878  ;;  %v6296_v43 = vadd.f32 %v11547_v45, %v5458_v21  ;;  %v5269_v21 = vadd.f32 %v12097_v22, %v11839_v34 }
 0x742   :  { %v12193_v62 = vpop.f32.mrf.mxu1  ;;  %6420 = vst [vmem:[#allocation8 + $0x140] sm:$0xff] %v6879_v47  ;;  %6187 = vmatpush.msrb.mxu3 %v5200_v25  ;;  %v14816_v25 = vld [vmem:[#allocation66_spill] sm:$0xff] }
 0x743   :  { %6880 = vtanh.f32 %v6296_v43  ;;  %5719 = vmatmul.f32.gmra.mxu3 %v14802_v49  ;;  %5754 = vmatmul.f32.gmra.mxu0 %v14803_v46  ;;  %v14806_v46 = vld [vmem:[#allocation34_spill] sm:$0xff]  ;;  %v5334_v22 = vadd.f32 %v12100_v63, %v5269_v21  ;;  %v5196_v28 = vunpack.c.h.bf16 %v14816_v25 }
 0x744   :  { %5819 = vmatmul.f32.gmra.mxu1 %v14804_v4  ;;  %5884 = vmatmul.f32.gmra.mxu2 %v14805_v50  ;;  %v5136_v49 = vunpack.c.h.bf16 %v14806_v46  ;;  %v14807_v50 = vld [vmem:[#allocation93_spill] sm:$0xff] }
 0x745   :  { %v5008_v16 = vunpack.c.h.bf16 %v14807_v50  ;;  %6188 = vmatpush.msrb.mxu3 %v5196_v28  ;;  %v14823_v28 = vld [vmem:[#allocation21_spill] sm:$0xff] }
 0x746   :  { %v5460_v54 = vpop.f32.mrf.mxu3  ;;  %6122 = vmatpush.msrb.mxu2 %v5136_v49 }
 0x747   :  { %v5461_v56 = vadd.f32 %v5460_v54, %v5396_v10  ;;  %v12203_v47 = vpop.f32.mrf.mxu2  ;;  %v14810_v54 = vld [vmem:[#allocation91_spill] sm:$0xff]  ;;  %v14811_v10 = vld [vmem:[#allocation49_spill] sm:$0xff]  ;;  %5992 = vmatpush.msrb.mxu0 %v5008_v16 }
 0x748   :  { %v12205_v26 = vpop.f32.mrf.mxu0  ;;  %v14815_v16 = vld [vmem:[#allocation133_spill] sm:$0xff] }
 0x749   :  { %v6881_v43 = vpop.eup %6880  ;;  %v6300_v32 = vadd.f32 %v11596_v55, %v5461_v56  ;;  %v14813_v56 = vld [vmem:[#allocation126_spill] sm:$0xff] }
 0x74a   :  { %v12208_v11 = vpop.f32.mrf.mxu1  ;;  %6424 = vst [vmem:[#allocation8 + $0x160] sm:$0xff] %v6881_v43  ;;  %v5399_v43 = vadd.f32 %v12113_v61, %v5334_v22  ;;  %v14814_v61 = vld [vmem:[#allocation36_spill] sm:$0xff]  ;;  %v5004_v22 = vunpack.c.h.bf16 %v14815_v16 }
 0x74b   :  { %6882 = vtanh.f32 %v6300_v32  ;;  %5722 = vmatmul.f32.gmra.mxu3 %v14810_v54  ;;  %5757 = vmatmul.f32.gmra.mxu0 %v14811_v10  ;;  %v5132_v49 = vunpack.c.h.bf16 %v14814_v61 }
 0x74c   :  { %5822 = vmatmul.f32.gmra.mxu1 %v14812_v20  ;;  %5887 = vmatmul.f32.gmra.mxu2 %v14813_v56  ;;  %v14817_v56 = vld [vmem:[#allocation141_spill] sm:$0xff] }
 0x74d   :  { %v5068_v54 = vunpack.c.h.bf16 %v14817_v56  ;;  %6123 = vmatpush.msrb.mxu2 %v5132_v49  ;;  %5993 = vmatpush.msrb.mxu0 %v5004_v22  ;;  %v5275_v56 = vadd.f32 %v12133_v39, %v11839_v34  ;;  %v14822_v22 = vld [vmem:[#allocation107_spill] sm:$0xff] }
 0x74e   :  { %v5463_v46 = vpop.f32.mrf.mxu3  ;;  %v14825_v39 = vld [vmem:[#allocation15_spill] sm:$0xff] }
 0x74f   :  { %v5464_v63 = vadd.f32 %v5463_v46, %v5399_v43  ;;  %v12222_v50 = vpop.f32.mrf.mxu2  ;;  %v14818_v43 = vld [vmem:[#allocation113_spill] sm:$0xff]  ;;  %v14819_v46 = vld [vmem:[#allocation82_spill] sm:$0xff]  ;;  %6058 = vmatpush.msrb.mxu1 %v5068_v54  ;;  %v5192_v54 = vunpack.c.h.bf16 %v14823_v28  ;;  %v5340_v34 = vadd.f32 %v12136_v7, %v5275_v56 }
 0x750   :  { %v12224_v21 = vpop.f32.mrf.mxu0 }
 0x751   :  { %v6883_v32 = vpop.eup %6882  ;;  %v6304_v36 = vadd.f32 %v11636_v53, %v5464_v63  ;;  %v14820_v63 = vld [vmem:[#allocation85_spill] sm:$0xff]  ;;  %6189 = vmatpush.msrb.mxu3 %v5192_v54  ;;  %v14831_v54 = vld [vmem:[#allocation134_spill] sm:$0xff] }
 0x752   :  { %v12227_v10 = vpop.f32.mrf.mxu1  ;;  %6428 = vst [vmem:[#allocation8 + $0x180] sm:$0xff] %v6883_v32  ;;  %v5402_v32 = vadd.f32 %v12131_v59, %v5337_v0  ;;  %v14821_v59 = vld [vmem:[#allocation59_spill] sm:$0xff]  ;;  %v5000_v0 = vunpack.c.h.bf16 %v14822_v22 }
 0x753   :  { %6884 = vtanh.f32 %v6304_v36  ;;  %5725 = vmatmul.f32.gmra.mxu3 %v14818_v43  ;;  %5760 = vmatmul.f32.gmra.mxu0 %v14724_v37  ;;  %v5128_v49 = vunpack.c.h.bf16 %v14821_v59  ;;  %v5405_v59 = vadd.f32 %v12149_v23, %v5340_v34  ;;  %v14829_v23 = vld [vmem:[#allocation123_spill] sm:$0xff] }
 0x754   :  { %5825 = vmatmul.f32.gmra.mxu1 %v14819_v46  ;;  %5890 = vmatmul.f32.gmra.mxu2 %v14820_v63  ;;  %v14824_v63 = vld [vmem:[#allocation41_spill] sm:$0xff] }
 0x755   :  { %v5064_v43 = vunpack.c.h.bf16 %v14824_v63  ;;  %6124 = vmatpush.msrb.mxu2 %v5128_v49  ;;  %5994 = vmatpush.msrb.mxu0 %v5000_v0  ;;  %v5124_v49 = vunpack.c.h.bf16 %v14829_v23  ;;  %v14830_v0 = vld [vmem:[#allocation71_spill] sm:$0xff] }
 0x756   :  { %v5466_v61 = vpop.f32.mrf.mxu3  ;;  %v4996_v34 = vunpack.c.h.bf16 %v14830_v0 }
 0x757   :  { %v5467_v30 = vadd.f32 %v5466_v61, %v5402_v32  ;;  %v12241_v6 = vpop.f32.mrf.mxu2  ;;  %v12254_v32 = vperm.slane %v14825_v39, 1  ;;  %v14826_v61 = vld [vmem:[#allocation14_spill] sm:$0xff]  ;;  %6059 = vmatpush.msrb.mxu1 %v5064_v43  ;;  %v5188_v43 = vunpack.c.h.bf16 %v14831_v54  ;;  %6125 = vmatpush.msrb.mxu2 %v5124_v49 }
 0x758   :  { %v12243_v36 = vpop.f32.mrf.mxu0  ;;  %5995 = vmatpush.msrb.mxu0 %v4996_v34  ;;  %v14837_v34 = vld [vmem:[#allocation67_spill] sm:$0xff] }
 0x759   :  { %v6885_v16 = vpop.eup %6884  ;;  %v6308_v25 = vadd.f32 %v11668_v58, %v5467_v30  ;;  %v14827_v30 = vld [vmem:[#allocation33_spill] sm:$0xff]  ;;  %v5490_v7 = vadd.f32 %v12151_v1, %v12254_v32  ;;  %6190 = vmatpush.msrb.mxu3 %v5188_v43  ;;  %v14838_v43 = vld [vmem:[#allocation115_spill] sm:$0xff] }
 0x75a   :  { %v12246_v37 = vpop.f32.mrf.mxu1  ;;  %6432 = vst [vmem:[#allocation8 + $0x1a0] sm:$0xff] %v6885_v16  ;;  %v14828_v16 = vld [vmem:[#allocation52_spill] sm:$0xff] }
 0x75b   :  { %6886 = vtanh.f32 %v6308_v25  ;;  %5728 = vmatmul.f32.gmra.mxu3 %v14826_v61  ;;  %5763 = vmatmul.f32.gmra.mxu0 %v11349_v17  ;;  %v5555_v1 = vadd.f32 %v12154_v33, %v5490_v7 }
 0x75c   :  { %5828 = vmatmul.f32.gmra.mxu1 %v14827_v30  ;;  %5893 = vmatmul.f32.gmra.mxu2 %v14828_v16  ;;  %v14832_v16 = vld [vmem:[#allocation84_spill] sm:$0xff] }
 0x75d   :  { %v5060_v61 = vunpack.c.h.bf16 %v14832_v16  ;;  %v5493_v16 = vadd.f32 %v12169_v60, %v12254_v32 }
 0x75e   :  { %v5469_v22 = vpop.f32.mrf.mxu3 }
 0x75f   :  { %v5470_v63 = vadd.f32 %v5469_v22, %v5405_v59  ;;  %v12263_v56 = vpop.f32.mrf.mxu2  ;;  %v14833_v59 = vld [vmem:[#allocation89_spill] sm:$0xff]  ;;  %v14834_v22 = vld [vmem:[#allocation62_spill] sm:$0xff]  ;;  %6060 = vmatpush.msrb.mxu1 %v5060_v61  ;;  %v5184_v61 = vunpack.c.h.bf16 %v14838_v43  ;;  %v5558_v60 = vadd.f32 %v12172_v2, %v5493_v16 }
 0x760   :  { %v12265_v25 = vpop.f32.mrf.mxu0 }
 0x761   :  { %v6887_v28 = vpop.eup %6886  ;;  %v6312_v39 = vadd.f32 %v11693_v12, %v5470_v63  ;;  %v14835_v63 = vld [vmem:[#allocation51_spill] sm:$0xff]  ;;  %6191 = vmatpush.msrb.mxu3 %v5184_v61  ;;  %v14845_v61 = vld [vmem:[#allocation108_spill] sm:$0xff] }
 0x762   :  { %v12268_v17 = vpop.f32.mrf.mxu1  ;;  %6436 = vst [vmem:[#allocation8 + $0x1c0] sm:$0xff] %v6887_v28  ;;  %v5620_v28 = vadd.f32 %v12167_v52, %v5555_v1  ;;  %v14836_v52 = vld [vmem:[#allocation80_spill] sm:$0xff]  ;;  %v4992_v1 = vunpack.c.h.bf16 %v14837_v34 }
 0x763   :  { %6888 = vtanh.f32 %v6312_v39  ;;  %5943 = vmatmul.f32.vlgmr.msra.gmra.mxu3 %v14833_v59  ;;  %5766 = vmatmul.f32.gmra.mxu0 %v14739_v38  ;;  %v5120_v49 = vunpack.c.h.bf16 %v14836_v52 }
 0x764   :  { %5831 = vmatmul.f32.gmra.mxu1 %v14834_v22  ;;  %5896 = vmatmul.f32.gmra.mxu2 %v14835_v63  ;;  %v14839_v63 = vld [vmem:[#allocation13_spill] sm:$0xff] }
 0x765   :  { %v5056_v59 = vunpack.c.h.bf16 %v14839_v63  ;;  %6126 = vmatpush.msrb.mxu2 %v5120_v49  ;;  %5996 = vmatpush.msrb.mxu0 %v4992_v1  ;;  %v5496_v63 = vadd.f32 %v12189_v48, %v12254_v32  ;;  %v14844_v1 = vld [vmem:[#allocation111_spill] sm:$0xff] }
 0x766   :  { %v5684_v23 = vpop.f32.mrf.mxu3 }
 0x767   :  { %v5685_v33 = vadd.f32 %v5684_v23, %v5620_v28  ;;  %v12282_v7 = vpop.f32.mrf.mxu2  ;;  %v14840_v28 = vld [vmem:[#allocation127_spill] sm:$0xff]  ;;  %v14841_v23 = vld [vmem:[#allocation86_spill] sm:$0xff]  ;;  %6061 = vmatpush.msrb.mxu1 %v5056_v59  ;;  %v5180_v59 = vunpack.c.h.bf16 %v14845_v61  ;;  %v5561_v48 = vadd.f32 %v12193_v62, %v5496_v63 }
 0x768   :  { %v12284_v39 = vpop.f32.mrf.mxu0 }
 0x769   :  { %v6889_v0 = vpop.eup %6888  ;;  %v6253_v54 = vadd.f32 %v14793_v31, %v5685_v33  ;;  %v14842_v33 = vld [vmem:[#allocation103_spill] sm:$0xff]  ;;  %6192 = vmatpush.msrb.mxu3 %v5180_v59  ;;  %v14852_v59 = vld [vmem:[#allocation76_spill] sm:$0xff] }
 0x76a   :  { %v12287_v38 = vpop.f32.mrf.mxu1  ;;  %6440 = vst [vmem:[#allocation8 + $0x1e0] sm:$0xff] %v6889_v0  ;;  %v5623_v0 = vadd.f32 %v12185_v3, %v5558_v60  ;;  %v14843_v3 = vld [vmem:[#allocation110_spill] sm:$0xff]  ;;  %v4988_v60 = vunpack.c.h.bf16 %v14844_v1 }
 0x76b   :  { %6890 = vtanh.f32 %v6253_v54  ;;  %5946 = vmatmul.f32.gmra.mxu3 %v14840_v28  ;;  %5769 = vmatmul.f32.gmra.mxu0 %v14746_v8  ;;  %v5116_v49 = vunpack.c.h.bf16 %v14843_v3 }
 0x76c   :  { %5834 = vmatmul.f32.gmra.mxu1 %v14841_v23  ;;  %5899 = vmatmul.f32.gmra.mxu2 %v14842_v33  ;;  %v14846_v33 = vld [vmem:[#allocation57_spill] sm:$0xff] }
 0x76d   :  { %v5052_v28 = vunpack.c.h.bf16 %v14846_v33  ;;  %6127 = vmatpush.msrb.mxu2 %v5116_v49  ;;  %5997 = vmatpush.msrb.mxu0 %v4988_v60  ;;  %v5499_v33 = vadd.f32 %v12205_v26, %v12254_v32  ;;  %v14851_v60 = vld [vmem:[#allocation72_spill] sm:$0xff] }
 0x76e   :  { %v5687_v52 = vpop.f32.mrf.mxu3 }
 0x76f   :  { %v5688_v2 = vadd.f32 %v5687_v52, %v5623_v0  ;;  %v12301_v16 = vpop.f32.mrf.mxu2  ;;  %v14847_v0 = vld [vmem:[#allocation92_spill] sm:$0xff]  ;;  %v14848_v52 = vld [vmem:[#allocation22_spill] sm:$0xff]  ;;  %6062 = vmatpush.msrb.mxu1 %v5052_v28  ;;  %v5176_v28 = vunpack.c.h.bf16 %v14852_v59  ;;  %v5564_v26 = vadd.f32 %v12208_v11, %v5499_v33 }
 0x770   :  { %v12303_v54 = vpop.f32.mrf.mxu0 }
 0x771   :  { %v6891_v34 = vpop.eup %6890  ;;  %v6257_v43 = vadd.f32 %v14799_v27, %v5688_v2  ;;  %v14849_v2 = vld [vmem:[#allocation95_spill] sm:$0xff]  ;;  %6193 = vmatpush.msrb.mxu3 %v5176_v28  ;;  %v14859_v28 = vld [vmem:[#allocation116_spill] sm:$0xff]  ;;  %v14864_v27 = vld [vmem:[#allocation101_spill] sm:$0xff] }
 0x772   :  { %v12306_v8 = vpop.f32.mrf.mxu1  ;;  %6381 = vst [vmem:[#allocation8 + $0x8] sm:$0xff] %v6891_v34  ;;  %v5626_v34 = vadd.f32 %v12203_v47, %v5561_v48  ;;  %v14850_v47 = vld [vmem:[#allocation64_spill] sm:$0xff]  ;;  %v4984_v48 = vunpack.c.h.bf16 %v14851_v60 }
 0x773   :  { %6892 = vtanh.f32 %v6257_v43  ;;  %5949 = vmatmul.f32.gmra.mxu3 %v14847_v0  ;;  %5772 = vmatmul.f32.gmra.mxu0 %v14753_v9  ;;  %v5112_v49 = vunpack.c.h.bf16 %v14850_v47 }
 0x774   :  { %5837 = vmatmul.f32.gmra.mxu1 %v14848_v52  ;;  %5902 = vmatmul.f32.gmra.mxu2 %v14849_v2  ;;  %v14853_v2 = vld [vmem:[#allocation98_spill] sm:$0xff] }
 0x775   :  { %v5048_v0 = vunpack.c.h.bf16 %v14853_v2  ;;  %6128 = vmatpush.msrb.mxu2 %v5112_v49  ;;  %5998 = vmatpush.msrb.mxu0 %v4984_v48  ;;  %v5502_v2 = vadd.f32 %v12224_v21, %v12254_v32  ;;  %v14858_v49 = vld [vmem:[#allocation97_spill] sm:$0xff] }
 0x776   :  { %v5690_v3 = vpop.f32.mrf.mxu3  ;;  %v4980_v48 = vunpack.c.h.bf16 %v14858_v49 }
 0x777   :  { %v5691_v62 = vadd.f32 %v5690_v3, %v5626_v34  ;;  %v12320_v63 = vpop.f32.mrf.mxu2  ;;  %v14854_v34 = vld [vmem:[#allocation56_spill] sm:$0xff]  ;;  %6063 = vmatpush.msrb.mxu1 %v5048_v0  ;;  %v5172_v0 = vunpack.c.h.bf16 %v14859_v28  ;;  %v5567_v21 = vadd.f32 %v12227_v10, %v5502_v2  ;;  %v4972_v10 = vunpack.c.h.bf16 %v11993_v35  ;;  %v14867_v2 = vld [vmem:[#allocation42_spill] sm:$0xff] }
 0x778   :  { %v12322_v43 = vpop.f32.mrf.mxu0  ;;  %v14855_v3 = vld [vmem:[#allocation124_spill] sm:$0xff]  ;;  %5999 = vmatpush.msrb.mxu0 %v4980_v48 }
 0x779   :  { %v6893_v1 = vpop.eup %6892  ;;  %v6261_v61 = vadd.f32 %v14804_v4, %v5691_v62  ;;  %v14856_v62 = vld [vmem:[#allocation30_spill] sm:$0xff]  ;;  %v5632_v28 = vadd.f32 %v12241_v6, %v5567_v21  ;;  %6194 = vmatpush.msrb.mxu3 %v5172_v0  ;;  %v14869_v0 = vld [vmem:[#allocation79_spill] sm:$0xff] }
 0x77a   :  { %v12325_v9 = vpop.f32.mrf.mxu1  ;;  %6385 = vst [vmem:[#allocation8 + $0x28] sm:$0xff] %v6893_v1  ;;  %v5629_v1 = vadd.f32 %v12222_v50, %v5564_v26  ;;  %v14860_v26 = vld [vmem:[#allocation26_spill] sm:$0xff]  ;;  %v14870_v21 = vld [vmem:[#allocation135_spill] sm:$0xff] }
 0x77b   :  { %6894 = vtanh.f32 %v6261_v61  ;;  %5952 = vmatmul.f32.gmra.mxu3 %v14854_v34  ;;  %5775 = vmatmul.f32.gmra.mxu0 %v14760_v14  ;;  %v5044_v34 = vunpack.c.h.bf16 %v14860_v26 }
 0x77c   :  { %5840 = vmatmul.f32.gmra.mxu1 %v14855_v3  ;;  %5905 = vmatmul.f32.gmra.mxu2 %v14856_v62  ;;  %v14857_v62 = vld [vmem:[#allocation99_spill] sm:$0xff] }
 0x77d   :  { %v5108_v50 = vunpack.c.h.bf16 %v14857_v62  ;;  %v14865_v62 = vld [vmem:[#allocation61_spill] sm:$0xff]  ;;  %6064 = vmatpush.msrb.mxu1 %v5044_v34  ;;  %v4968_v34 = vunpack.c.h.bf16 %v12003_v5  ;;  %v14875_v5 = vld [vmem:[#allocation94_spill] sm:$0xff] }
 0x77e   :  { %v5693_v47 = vpop.f32.mrf.mxu3 }
 0x77f   :  { %v5694_v11 = vadd.f32 %v5693_v47, %v5629_v1  ;;  %v12339_v33 = vpop.f32.mrf.mxu2  ;;  %v14861_v1 = vld [vmem:[#allocation48_spill] sm:$0xff]  ;;  %v14862_v47 = vld [vmem:[#allocation117_spill] sm:$0xff]  ;;  %6129 = vmatpush.msrb.mxu2 %v5108_v50 }
 0x780   :  { %v12341_v61 = vpop.f32.mrf.mxu0 }
 0x781   :  { %v6895_v60 = vpop.eup %6894  ;;  %v6265_v59 = vadd.f32 %v14812_v20, %v5694_v11  ;;  %v5104_v11 = vunpack.c.h.bf16 %v14862_v47  ;;  %v14863_v20 = vld [vmem:[#allocation118_spill] sm:$0xff]  ;;  %v14868_v47 = vld [vmem:[#allocation119_spill] sm:$0xff] }
 0x782   :  { %v12344_v14 = vpop.f32.mrf.mxu1  ;;  %6389 = vst [vmem:[#allocation8 + $0x48] sm:$0xff] %v6895_v60  ;;  %v4976_v4 = vunpack.c.h.bf16 %v14863_v20  ;;  %v14866_v60 = vld [vmem:[#allocation109_spill] sm:$0xff]  ;;  %v5505_v20 = vadd.f32 %v12243_v36, %v12254_v32  ;;  %v5168_v36 = vunpack.c.h.bf16 %v14869_v0 }
 0x783   :  { %6896 = vtanh.f32 %v6265_v59  ;;  %5955 = vmatmul.f32.gmra.mxu3 %v14861_v1  ;;  %5778 = vmatmul.f32.gmra.mxu0 %v14795_v57  ;;  %v5040_v49 = vunpack.c.h.bf16 %v14866_v60  ;;  %v5100_v59 = vunpack.c.h.bf16 %v14867_v2  ;;  %v5036_v57 = vunpack.c.h.bf16 %v14868_v47  ;;  %v14874_v2 = vld [vmem:[#allocation73_spill] sm:$0xff] }
 0x784   :  { %5843 = vmatmul.f32.gmra.mxu1 %v14864_v27  ;;  %5908 = vmatmul.f32.gmra.mxu2 %v14865_v62  ;;  %v5032_v60 = vunpack.c.h.bf16 %v14870_v21  ;;  %v14879_v21 = vld [vmem:[#allocation46_spill] sm:$0xff] }
 0x785   :  { %6130 = vmatpush.msrb.mxu2 %v5104_v11  ;;  %6000 = vmatpush.msrb.mxu0 %v4976_v4  ;;  %v14871_v11 = vld [vmem:[#allocation78_spill] sm:$0xff] }
 0x786   :  { %v5696_v26 = vpop.f32.mrf.mxu3  ;;  %6065 = vmatpush.msrb.mxu1 %v5040_v49  ;;  %v5096_v4 = vunpack.c.h.bf16 %v14871_v11  ;;  %v14872_v49 = vld [vmem:[#allocation77_spill] sm:$0xff]  ;;  %6195 = vmatpush.msrb.mxu3 %v5168_v36  ;;  %v5088_v11 = vunpack.c.h.bf16 %v14879_v21 }
 0x787   :  { %v5697_v1 = vadd.f32 %v5696_v26, %v5632_v28  ;;  %v12364_v62 = vpop.f32.mrf.mxu2  ;;  %6001 = vmatpush.msrb.mxu0 %v4972_v10  ;;  %6131 = vmatpush.msrb.mxu2 %v5100_v59  ;;  %v5570_v28 = vadd.f32 %v12246_v37, %v5505_v20  ;;  %v14876_v59 = vld [vmem:[#allocation74_spill] sm:$0xff]  ;;  %v4960_v37 = vunpack.c.h.bf16 %v12029_v41  ;;  %v14880_v36 = vld [vmem:[#allocation125_spill] sm:$0xff] }
 0x788   :  { %v12366_v6 = vpop.f32.mrf.mxu0  ;;  %6066 = vmatpush.msrb.mxu1 %v5036_v57  ;;  %v5028_v26 = vunpack.c.h.bf16 %v14876_v59  ;;  %v14877_v57 = vld [vmem:[#allocation122_spill] sm:$0xff] }
 0x789   :  { %v6897_v50 = vpop.eup %6896  ;;  %v6269_v35 = vadd.f32 %v14819_v46, %v5697_v1  ;;  %v14873_v1 = vld [vmem:[#allocation24_spill] sm:$0xff]  ;;  %v5092_v47 = vunpack.c.h.bf16 %v14877_v57  ;;  %6002 = vmatpush.msrb.mxu0 %v4968_v34  ;;  %6132 = vmatpush.msrb.mxu2 %v5096_v4  ;;  %v5164_v4 = vunpack.c.h.bf16 %v12070_v29  ;;  %v14886_v29 = vld [vmem:[#allocation129_spill] sm:$0xff] }
 0x78a   :  { %v12369_v48 = vpop.f32.mrf.mxu1  ;;  %6393 = vst [vmem:[#allocation8 + $0x68] sm:$0xff] %v6897_v50  ;;  %v4964_v10 = vunpack.c.h.bf16 %v14873_v1  ;;  %v5635_v50 = vadd.f32 %v12263_v56, %v5570_v28  ;;  %6067 = vmatpush.msrb.mxu1 %v5032_v60  ;;  %v5508_v1 = vadd.f32 %v12265_v25, %v12254_v32  ;;  %v4956_v60 = vunpack.c.h.bf16 %v14880_v36  ;;  %v14881_v28 = vld [vmem:[#allocation128_spill] sm:$0xff] }
 0x78b   :  { %6898 = vtanh.f32 %v6269_v35  ;;  %5958 = vmatmul.f32.gmra.mxu3 %v14872_v49  ;;  %5781 = vmatmul.f32.gmra.mxu0 %v11547_v45  ;;  %v14878_v35 = vld [vmem:[#allocation54_spill] sm:$0xff]  ;;  %v5020_v25 = vunpack.c.h.bf16 %v12054_v13 }
 0x78c   :  { %5846 = vmatmul.f32.gmra.mxu1 %v14874_v2  ;;  %5911 = vmatmul.f32.gmra.mxu2 %v14875_v5  ;;  %v5024_v0 = vunpack.c.h.bf16 %v14878_v35  ;;  %v5016_v35 = vunpack.c.h.bf16 %v14886_v29 }
 0x78d   :  { %6003 = vmatpush.msrb.mxu0 %v4964_v10  ;;  %6068 = vmatpush.msrb.mxu1 %v5028_v26  ;;  %v5084_v10 = vunpack.c.h.bf16 %v14881_v28  ;;  %v5573_v26 = vadd.f32 %v12268_v17, %v5508_v1  ;;  %v4948_v17 = vunpack.c.h.bf16 %v12074_v15  ;;  %v5012_v1 = vunpack.c.h.bf16 %v12081_v19 }
 0x78e   :  { %v5699_v20 = vpop.f32.mrf.mxu3  ;;  %6133 = vmatpush.msrb.mxu2 %v5092_v47  ;;  %v14882_v47 = vld [vmem:[#allocation38_spill] sm:$0xff]  ;;  %6196 = vmatpush.msrb.mxu3 %v5164_v4  ;;  %v5160_v19 = vunpack.c.h.bf16 %v12102_v44 }
 0x78f   :  { %v5700_v5 = vadd.f32 %v5699_v20, %v5635_v50  ;;  %v12389_v59 = vpop.f32.mrf.mxu2  ;;  %6004 = vmatpush.msrb.mxu0 %v4960_v37  ;;  %6069 = vmatpush.msrb.mxu1 %v5024_v0  ;;  %v14884_v37 = vld [vmem:[#allocation29_spill] sm:$0xff]  ;;  %v14885_v20 = vld [vmem:[#allocation12_spill] sm:$0xff]  ;;  %v5638_v13 = vadd.f32 %v12282_v7, %v5573_v26 }
 0x790   :  { %v12391_v57 = vpop.f32.mrf.mxu0  ;;  %6134 = vmatpush.msrb.mxu2 %v5088_v11  ;;  %v14887_v0 = vld [vmem:[#allocation96_spill] sm:$0xff]  ;;  %6197 = vmatpush.msrb.mxu3 %v5160_v19  ;;  %v14892_v19 = vld [vmem:[#allocation17_spill] sm:$0xff] }
 0x791   :  { %v6899_v56 = vpop.eup %6898  ;;  %v6273_v41 = vadd.f32 %v14827_v30, %v5700_v5  ;;  %v14883_v5 = vld [vmem:[#allocation130_spill] sm:$0xff]  ;;  %v5080_v21 = vunpack.c.h.bf16 %v14887_v0  ;;  %6005 = vmatpush.msrb.mxu0 %v4956_v60  ;;  %6070 = vmatpush.msrb.mxu1 %v5020_v25  ;;  %v5514_v25 = vadd.f32 %v12303_v54, %v12254_v32  ;;  %v14888_v0 = vld [vmem:[#allocation81_spill] sm:$0xff]  ;;  %v14889_v54 = vld [vmem:[#allocation40_spill] sm:$0xff] }
 0x792   :  { %v12394_v34 = vpop.f32.mrf.mxu1  ;;  %6397 = vst [vmem:[#allocation8 + $0x88] sm:$0xff] %v6899_v56  ;;  %v4952_v50 = vunpack.c.h.bf16 %v14883_v5  ;;  %6135 = vmatpush.msrb.mxu2 %v5084_v10  ;;  %v5076_v56 = vunpack.c.h.bf16 %v12083_v42 }
 0x793   :  { %6900 = vtanh.f32 %v6273_v41  ;;  %5961 = vmatmul.f32.gmra.mxu3 %v14882_v47  ;;  %5784 = vmatmul.f32.gmra.mxu0 %v11596_v55  ;;  %v5511_v41 = vadd.f32 %v12284_v39, %v12254_v32 }
 0x794   :  { %5849 = vmatmul.f32.gmra.mxu1 %v14884_v37  ;;  %5914 = vmatmul.f32.gmra.mxu2 %v14885_v20 }
 0x795   :  { %6006 = vmatpush.msrb.mxu0 %v4952_v50  ;;  %6071 = vmatpush.msrb.mxu1 %v5016_v35  ;;  %v5576_v42 = vadd.f32 %v12287_v38, %v5511_v41  ;;  %v5156_v35 = vunpack.c.h.bf16 %v12120_v51 }
 0x796   :  { %v5702_v11 = vpop.f32.mrf.mxu3  ;;  %6136 = vmatpush.msrb.mxu2 %v5080_v21  ;;  %v14890_v21 = vld [vmem:[#allocation70_spill] sm:$0xff] }
 0x797   :  { %v5703_v36 = vadd.f32 %v5702_v11, %v5638_v13  ;;  %v12414_v28 = vpop.f32.mrf.mxu2  ;;  %6007 = vmatpush.msrb.mxu0 %v4948_v17  ;;  %6072 = vmatpush.msrb.mxu1 %v5012_v1  ;;  %v5641_v39 = vadd.f32 %v12301_v16, %v5576_v42  ;;  %v5579_v16 = vadd.f32 %v12306_v8, %v5514_v25  ;;  %v14894_v42 = vld [vmem:[#allocation132_spill] sm:$0xff] }
 0x798   :  { %v12416_v5 = vpop.f32.mrf.mxu0  ;;  %6137 = vmatpush.msrb.mxu2 %v5076_v56  ;;  %6198 = vmatpush.msrb.mxu3 %v5156_v35  ;;  %v5517_v11 = vadd.f32 %v12322_v43, %v12254_v32  ;;  %v14893_v43 = vld [vmem:[#allocation50_spill] sm:$0xff]  ;;  %v5520_v25 = vadd.f32 %v12341_v61, %v12254_v32  ;;  %v14898_v61 = vld [vmem:[#allocation75_spill] sm:$0xff] }
 0x799   :  { %v6901_v7 = vpop.eup %6900  ;;  %v6277_v15 = vadd.f32 %v14834_v22, %v5703_v36  ;;  %v5644_v13 = vadd.f32 %v12320_v63, %v5579_v16 }
 0x79a   :  { %v12419_v60 = vpop.f32.mrf.mxu1  ;;  %6401 = vst [vmem:[#allocation8 + $0xa8] sm:$0xff] %v6901_v7  ;;  %v14891_v7 = vld [vmem:[#allocation131_spill] sm:$0xff]  ;;  %v5582_v63 = vadd.f32 %v12325_v9, %v5517_v11  ;;  %v14896_v11 = vld [vmem:[#allocation32_spill] sm:$0xff] }
 0x79b   :  { %6902 = vtanh.f32 %v6277_v15  ;;  %5964 = vmatmul.f32.gmra.mxu3 %v11648_v18  ;;  %5787 = vmatmul.f32.gmra.mxu0 %v11636_v53  ;;  %v5152_v15 = vunpack.c.h.bf16 %v14891_v7  ;;  %v5523_v7 = vadd.f32 %v12366_v6, %v12254_v32  ;;  %v14902_v6 = vld [vmem:[#allocation139_spill] sm:$0xff] }
 0x79c   :  { %5852 = vmatmul.f32.gmra.mxu1 %v11642_v24  ;;  %5917 = vmatmul.f32.gmra.mxu2 %v11651_v40 }
 0x79d   :  { %6199 = vmatpush.msrb.mxu3 %v5152_v15 }
 0x79e   :  { %v5705_v4 = vpop.f32.mrf.mxu3 }
 0x79f   :  { %v5706_v10 = vadd.f32 %v5705_v4, %v5641_v39  ;;  %v12430_v44 = vpop.f32.mrf.mxu2  ;;  %v5647_v39 = vadd.f32 %v12339_v33, %v5582_v63  ;;  %v5585_v33 = vadd.f32 %v12344_v14, %v5520_v25 }
 0x7a0   :  { %v12432_v38 = vpop.f32.mrf.mxu0 }
 0x7a1   :  { %v6903_v26 = vpop.eup %6902  ;;  %v6281_v50 = vadd.f32 %v14841_v23, %v5706_v10 }
 0x7a2   :  { %v12435_v29 = vpop.f32.mrf.mxu1  ;;  %6405 = vst [vmem:[#allocation8 + $0xc8] sm:$0xff] %v6903_v26 }
 0x7a3   :  { %6904 = vtanh.f32 %v6281_v50  ;;  %5967 = vmatmul.f32.gmra.mxu3 %v14888_v0  ;;  %5790 = vmatmul.f32.gmra.mxu0 %v11668_v58 }
 0x7a4   :  { %5855 = vmatmul.f32.gmra.mxu1 %v14889_v54  ;;  %5920 = vmatmul.f32.gmra.mxu2 %v14890_v21 }
 0x7a6   :  { %v5708_v17 = vpop.f32.mrf.mxu3 }
 0x7a7   :  { %v5709_v1 = vadd.f32 %v5708_v17, %v5644_v13  ;;  %v12446_v51 = vpop.f32.mrf.mxu2  ;;  %v14895_v13 = vld [vmem:[#allocation136_spill] sm:$0xff] }
 0x7a8   :  { %v12448_v8 = vpop.f32.mrf.mxu0  ;;  %v5148_v17 = vunpack.c.h.bf16 %v14895_v13  ;;  %v14903_v13 = vld [vmem:[#allocation145_spill] sm:$0xff] }
 0x7a9   :  { %v6905_v56 = vpop.eup %6904  ;;  %v6285_v41 = vadd.f32 %v14848_v52, %v5709_v1  ;;  %v14897_v1 = vld [vmem:[#allocation138_spill] sm:$0xff] }
 0x7aa   :  { %v12451_v36 = vpop.f32.mrf.mxu1  ;;  %6409 = vst [vmem:[#allocation8 + $0xe8] sm:$0xff] %v6905_v56  ;;  %v5650_v56 = vadd.f32 %v12364_v62, %v5585_v33  ;;  %6200 = vmatpush.msrb.mxu3 %v5148_v17  ;;  %v5588_v62 = vadd.f32 %v12369_v48, %v5523_v7  ;;  %v14904_v7 = vld [vmem:[#allocation27_spill] sm:$0xff] }
 0x7ab   :  { %6906 = vtanh.f32 %v6285_v41  ;;  %5970 = vmatmul.f32.gmra.mxu3 %v14892_v19  ;;  %5793 = vmatmul.f32.gmra.mxu0 %v11693_v12 }
 0x7ac   :  { %5858 = vmatmul.f32.gmra.mxu1 %v14893_v43  ;;  %5923 = vmatmul.f32.gmra.mxu2 %v14894_v42  ;;  %v5653_v17 = vadd.f32 %v12389_v59, %v5588_v62  ;;  %v14907_v62 = vld [vmem:[#allocation140_spill] sm:$0xff] }
 0x7ae   :  { %v5711_v4 = vpop.f32.mrf.mxu3 }
 0x7af   :  { %v5712_v10 = vadd.f32 %v5711_v4, %v5647_v39  ;;  %v12462_v26 = vpop.f32.mrf.mxu2 }
 0x7b0   :  { %v12464_v9 = vpop.f32.mrf.mxu0 }
 0x7b1   :  { %v6907_v50 = vpop.eup %6906  ;;  %v6289_v35 = vadd.f32 %v14855_v3, %v5712_v10 }
 0x7b2   :  { %v12467_v16 = vpop.f32.mrf.mxu1  ;;  %6413 = vst [vmem:[#allocation8 + $0x108] sm:$0xff] %v6907_v50  ;;  %v14900_v50 = vld [vmem:[#allocation25_spill] sm:$0xff] }
 0x7b3   :  { %6908 = vtanh.f32 %v6289_v35  ;;  %5973 = vmatmul.f32.gmra.mxu3 %v14896_v11  ;;  %6008 = vmatmul.f32.vlgmr.msrb.gmra.mxu0 %v14897_v1  ;;  %v14901_v35 = vld [vmem:[#allocation112_spill] sm:$0xff]  ;;  %v5526_v1 = vadd.f32 %v12391_v57, %v12254_v32  ;;  %v14906_v57 = vld [vmem:[#allocation35_spill] sm:$0xff] }
 0x7b4   :  { %6073 = vmatmul.f32.vlgmr.msrb.gmra.mxu1 %v14793_v31  ;;  %6138 = vmatmul.f32.vlgmr.msrb.gmra.mxu2 %v14898_v61  ;;  %v14899_v31 = vld [vmem:[#allocation55_spill] sm:$0xff] }
 0x7b5   :  { %v5144_v10 = vunpack.c.h.bf16 %v14899_v31  ;;  %v5591_v59 = vadd.f32 %v12394_v34, %v5526_v1 }
 0x7b6   :  { %v5714_v41 = vpop.f32.mrf.mxu3 }
 0x7b7   :  { %v5715_v15 = vadd.f32 %v5714_v41, %v5650_v56  ;;  %v12478_v63 = vpop.f32.mrf.mxu2  ;;  %6201 = vmatpush.msrb.mxu3 %v5144_v10  ;;  %v14905_v10 = vld [vmem:[#allocation60_spill] sm:$0xff] }
 0x7b8   :  { %v12480_v14 = vpop.f32.mrf.mxu0 }
 0x7b9   :  { %v6909_v39 = vpop.eup %6908  ;;  %v6293_v4 = vadd.f32 %v14864_v27, %v5715_v15  ;;  %v5140_v15 = vunpack.c.h.bf16 %v14904_v7 }
 0x7ba   :  { %v12483_v25 = vpop.f32.mrf.mxu1  ;;  %6417 = vst [vmem:[#allocation8 + $0x128] sm:$0xff] %v6909_v39 }
 0x7bb   :  { %6910 = vtanh.f32 %v6293_v4  ;;  %5976 = vmatmul.f32.gmra.mxu3 %v14900_v50  ;;  %6011 = vmatmul.f32.gmra.mxu0 %v14901_v35  ;;  %v14908_v35 = vld [vmem:[#allocation147_spill] sm:$0xff] }
 0x7bc   :  { %6076 = vmatmul.f32.gmra.mxu1 %v14902_v6  ;;  %6141 = vmatmul.f32.gmra.mxu2 %v14903_v13  ;;  %v5656_v6 = vadd.f32 %v12414_v28, %v5591_v59  ;;  %v14910_v28 = vld [vmem:[#allocation49_spill] sm:$0xff]  ;;  %v14911_v59 = vld [vmem:[#allocation28_spill] sm:$0xff] }
 0x7bd   :  { %6202 = vmatpush.msrb.mxu3 %v5140_v15 }
 0x7be   :  { %v5717_v33 = vpop.f32.mrf.mxu3 }
 0x7bf   :  { %v5718_v56 = vadd.f32 %v5717_v33, %v5653_v17  ;;  %v12494_v41 = vpop.f32.mrf.mxu2  ;;  %v5529_v33 = vadd.f32 %v12416_v5, %v12254_v32  ;;  %v14912_v5 = vld [vmem:[#allocation126_spill] sm:$0xff] }
 0x7c0   :  { %v12496_v48 = vpop.f32.mrf.mxu0 }
 0x7c1   :  { %v6911_v39 = vpop.eup %6910  ;;  %v6297_v4 = vadd.f32 %v14874_v2, %v5718_v56 }
 0x7c2   :  { %v12500_v31 = vpop.f32.mrf.mxu1  ;;  %6421 = vst [vmem:[#allocation8 + $0x148] sm:$0xff] %v6911_v39 }
 0x7c3   :  { %6912 = vtanh.f32 %v6297_v4  ;;  %5979 = vmatmul.f32.gmra.mxu3 %v14905_v10  ;;  %6014 = vmatmul.f32.gmra.mxu0 %v14906_v57  ;;  %v5594_v4 = vadd.f32 %v12419_v60, %v5529_v33  ;;  %v14909_v57 = vld [vmem:[#allocation91_spill] sm:$0xff] }
 0x7c4   :  { %6079 = vmatmul.f32.gmra.mxu1 %v14907_v62  ;;  %6144 = vmatmul.f32.gmra.mxu2 %v14908_v35 }
 0x7c5   :  { %v5659_v62 = vadd.f32 %v12430_v44, %v5594_v4  ;;  %v14914_v44 = vld [vmem:[#allocation20_spill] sm:$0xff] }
 0x7c6   :  { %v5720_v17 = vpop.f32.mrf.mxu3 }
 0x7c7   :  { %v5721_v56 = vadd.f32 %v5720_v17, %v5656_v6  ;;  %v12510_v7 = vpop.f32.mrf.mxu2  ;;  %v5532_v17 = vadd.f32 %v12432_v38, %v12254_v32  ;;  %v14915_v38 = vld [vmem:[#allocation85_spill] sm:$0xff] }
 0x7c8   :  { %v12512_v15 = vpop.f32.mrf.mxu0 }
 0x7c9   :  { %v6913_v34 = vpop.eup %6912  ;;  %v6301_v1 = vadd.f32 %v14884_v37, %v5721_v56 }
 0x7ca   :  { %v12515_v39 = vpop.f32.mrf.mxu1  ;;  %6425 = vst [vmem:[#allocation8 + $0x168] sm:$0xff] %v6913_v34 }
 0x7cb   :  { %6914 = vtanh.f32 %v6301_v1  ;;  %5982 = vmatmul.f32.gmra.mxu3 %v14909_v57  ;;  %6017 = vmatmul.f32.gmra.mxu0 %v14910_v28  ;;  %v5597_v28 = vadd.f32 %v12435_v29, %v5532_v17 }
 0x7cc   :  { %6082 = vmatmul.f32.gmra.mxu1 %v14911_v59  ;;  %6147 = vmatmul.f32.gmra.mxu2 %v14912_v5  ;;  %v14913_v59 = vld [vmem:[#allocation113_spill] sm:$0xff] }
 0x7cd   :  { %v5662_v4 = vadd.f32 %v12446_v51, %v5597_v28  ;;  %v14919_v28 = vld [vmem:[#allocation52_spill] sm:$0xff] }
 0x7ce   :  { %v5723_v6 = vpop.f32.mrf.mxu3 }
 0x7cf   :  { %v5724_v56 = vadd.f32 %v5723_v6, %v5659_v62  ;;  %v12525_v10 = vpop.f32.mrf.mxu2  ;;  %v5535_v6 = vadd.f32 %v12448_v8, %v12254_v32  ;;  %v14917_v32 = vld [vmem:[#allocation14_spill] sm:$0xff]  ;;  %v14918_v8 = vld [vmem:[#allocation16_spill] sm:$0xff] }
 0x7d0   :  { %v12527_v34 = vpop.f32.mrf.mxu0 }
 0x7d1   :  { %v6915_v60 = vpop.eup %6914  ;;  %v6305_v33 = vadd.f32 %v11642_v24, %v5724_v56 }
 0x7d2   :  { %v12530_v1 = vpop.f32.mrf.mxu1  ;;  %6429 = vst [vmem:[#allocation8 + $0x188] sm:$0xff] %v6915_v60 }
 0x7d3   :  { %6916 = vtanh.f32 %v6305_v33  ;;  %5985 = vmatmul.f32.gmra.mxu3 %v14913_v59  ;;  %6020 = vmatmul.f32.gmra.mxu0 %v14914_v44  ;;  %v12548_v44 = vld [vmem:[#allocation7 + $0xc] sm:$0xf] }
 0x7d4   :  { %6085 = vmatmul.f32.gmra.mxu1 %v14819_v46  ;;  %6150 = vmatmul.f32.gmra.mxu2 %v14915_v38  ;;  %v5600_v46 = vadd.f32 %v12451_v36, %v5535_v6  ;;  %14916 = vst [vmem:[#allocation100_spill] sm:$0xff] %v12548_v44  ;;  %v12551_v51 = vperm.slane %v12548_v44, 2 }
 0x7d6   :  { %v5726_v62 = vpop.f32.mrf.mxu3  ;;  %v5750_v36 = vadd.f32 %v12464_v9, %v12551_v51  ;;  %v14922_v9 = vld [vmem:[#allocation51_spill] sm:$0xff] }
 0x7d7   :  { %v5727_v56 = vadd.f32 %v5726_v62, %v5662_v4  ;;  %v12540_v57 = vpop.f32.mrf.mxu2  ;;  %v5665_v4 = vadd.f32 %v12462_v26, %v5600_v46  ;;  %v14921_v26 = vld [vmem:[#allocation88_spill] sm:$0xff] }
 0x7d8   :  { %v12542_v60 = vpop.f32.mrf.mxu0 }
 0x7d9   :  { %v6917_v29 = vpop.eup %6916  ;;  %v6309_v17 = vadd.f32 %v14889_v54, %v5727_v56 }
 0x7da   :  { %v12545_v33 = vpop.f32.mrf.mxu1  ;;  %6433 = vst [vmem:[#allocation8 + $0x1a8] sm:$0xff] %v6917_v29 }
 0x7db   :  { %6918 = vtanh.f32 %v6309_v17  ;;  %5988 = vmatmul.f32.gmra.mxu3 %v14917_v32  ;;  %6023 = vmatmul.f32.gmra.mxu0 %v14918_v8  ;;  %v14920_v8 = vld [vmem:[#allocation89_spill] sm:$0xff] }
 0x7dc   :  { %6088 = vmatmul.f32.gmra.mxu1 %v14827_v30  ;;  %6153 = vmatmul.f32.gmra.mxu2 %v14919_v28  ;;  %v5815_v30 = vadd.f32 %v12467_v16, %v5750_v36 }
 0x7de   :  { %v5729_v62 = vpop.f32.mrf.mxu3  ;;  %v5880_v46 = vadd.f32 %v12478_v63, %v5815_v30  ;;  %v14924_v63 = vld [vmem:[#allocation90_spill] sm:$0xff] }
 0x7df   :  { %v5730_v6 = vadd.f32 %v5729_v62, %v5665_v4  ;;  %v12560_v56 = vpop.f32.mrf.mxu2  ;;  %v5753_v62 = vadd.f32 %v12480_v14, %v12551_v51  ;;  %v14925_v14 = vld [vmem:[#allocation103_spill] sm:$0xff] }
 0x7e0   :  { %v12562_v29 = vpop.f32.mrf.mxu0 }
 0x7e1   :  { %v6919_v17 = vpop.eup %6918  ;;  %v6313_v32 = vadd.f32 %v14893_v43, %v5730_v6 }
 0x7e2   :  { %v12565_v44 = vpop.f32.mrf.mxu1  ;;  %6437 = vst [vmem:[#allocation8 + $0x1c8] sm:$0xff] %v6919_v17 }
 0x7e3   :  { %6920 = vtanh.f32 %v6313_v32  ;;  %6203 = vmatmul.f32.vlgmr.msrb.gmra.mxu3 %v14920_v8  ;;  %6026 = vmatmul.f32.gmra.mxu0 %v14921_v26  ;;  %v14923_v26 = vld [vmem:[#allocation127_spill] sm:$0xff] }
 0x7e4   :  { %6091 = vmatmul.f32.gmra.mxu1 %v14834_v22  ;;  %6156 = vmatmul.f32.gmra.mxu2 %v14922_v9  ;;  %v5818_v22 = vadd.f32 %v12483_v25, %v5753_v62 }
 0x7e6   :  { %v5944_v4 = vpop.f32.mrf.mxu3  ;;  %v5883_v30 = vadd.f32 %v12494_v41, %v5818_v22  ;;  %v14927_v41 = vld [vmem:[#allocation19_spill] sm:$0xff] }
 0x7e7   :  { %v5945_v6 = vadd.f32 %v5944_v4, %v5880_v46  ;;  %v12575_v59 = vpop.f32.mrf.mxu2 }
 0x7e8   :  { %v12577_v17 = vpop.f32.mrf.mxu0 }
 0x7e9   :  { %v6921_v16 = vpop.eup %6920  ;;  %v6254_v32 = vadd.f32 %v14898_v61, %v5945_v6  ;;  %v5756_v61 = vadd.f32 %v12496_v48, %v12551_v51  ;;  %v14928_v48 = vld [vmem:[#allocation95_spill] sm:$0xff] }
 0x7ea   :  { %v12580_v36 = vpop.f32.mrf.mxu1  ;;  %6441 = vst [vmem:[#allocation8 + $0x1e8] sm:$0xff] %v6921_v16 }
 0x7eb   :  { %6922 = vtanh.f32 %v6254_v32  ;;  %6206 = vmatmul.f32.gmra.mxu3 %v14923_v26  ;;  %6029 = vmatmul.f32.gmra.mxu0 %v14924_v63  ;;  %v5821_v32 = vadd.f32 %v12500_v31, %v5756_v61  ;;  %v14926_v63 = vld [vmem:[#allocation92_spill] sm:$0xff] }
 0x7ec   :  { %6094 = vmatmul.f32.gmra.mxu1 %v14841_v23  ;;  %6159 = vmatmul.f32.gmra.mxu2 %v14925_v14 }
 0x7ed   :  { %v5886_v22 = vadd.f32 %v12510_v7, %v5821_v32  ;;  %v14931_v7 = vld [vmem:[#allocation30_spill] sm:$0xff] }
 0x7ee   :  { %v5947_v46 = vpop.f32.mrf.mxu3 }
 0x7ef   :  { %v5948_v4 = vadd.f32 %v5947_v46, %v5883_v30  ;;  %v12590_v6 = vpop.f32.mrf.mxu2 }
 0x7f0   :  { %v12592_v16 = vpop.f32.mrf.mxu0 }
 0x7f1   :  { %v6923_v25 = vpop.eup %6922  ;;  %v6258_v62 = vadd.f32 %v14903_v13, %v5948_v4  ;;  %v5759_v13 = vadd.f32 %v12512_v15, %v12551_v51 }
 0x7f2   :  { %6382 = vst [vmem:[#allocation8 + $0x10] sm:$0xff] %v6923_v25  ;;  %v12596_v23 = vpop.f32.mrf.mxu1 }
 0x7f3   :  { %6924 = vtanh.f32 %v6258_v62  ;;  %6209 = vmatmul.f32.gmra.mxu3 %v14926_v63  ;;  %6032 = vmatmul.f32.gmra.mxu0 %v14927_v41  ;;  %v5824_v62 = vadd.f32 %v12515_v39, %v5759_v13  ;;  %v14930_v41 = vld [vmem:[#allocation83_spill] sm:$0xff] }
 0x7f4   :  { %6097 = vmatmul.f32.gmra.mxu1 %v14848_v52  ;;  %6162 = vmatmul.f32.gmra.mxu2 %v14928_v48  ;;  %v14929_v52 = vld [vmem:[#allocation56_spill] sm:$0xff] }
 0x7f5   :  { %v5889_v15 = vadd.f32 %v12525_v10, %v5824_v62  ;;  %v14933_v10 = vld [vmem:[#allocation104_spill] sm:$0xff]  ;;  %v14934_v62 = vld [vmem:[#allocation61_spill] sm:$0xff] }
 0x7f6   :  { %v5950_v30 = vpop.f32.mrf.mxu3 }
 0x7f7   :  { %v5951_v46 = vadd.f32 %v5950_v30, %v5886_v22  ;;  %v12605_v4 = vpop.f32.mrf.mxu2 }
 0x7f8   :  { %v12607_v31 = vpop.f32.mrf.mxu0 }
 0x7f9   :  { %v6925_v61 = vpop.eup %6924  ;;  %v6262_v25 = vadd.f32 %v14908_v35, %v5951_v46  ;;  %v5762_v35 = vadd.f32 %v12527_v34, %v12551_v51 }
 0x7fa   :  { %6386 = vst [vmem:[#allocation8 + $0x30] sm:$0xff] %v6925_v61  ;;  %v12616_v32 = vpop.f32.mrf.mxu1 }
 0x7fb   :  { %6926 = vtanh.f32 %v6262_v25  ;;  %6212 = vmatmul.f32.gmra.mxu3 %v14929_v52  ;;  %6035 = vmatmul.f32.gmra.mxu0 %v14930_v41  ;;  %v14932_v25 = vld [vmem:[#allocation48_spill] sm:$0xff] }
 0x7fc   :  { %6100 = vmatmul.f32.gmra.mxu1 %v14855_v3  ;;  %6165 = vmatmul.f32.gmra.mxu2 %v14931_v7  ;;  %v5827_v3 = vadd.f32 %v12530_v1, %v5762_v35 }
 0x7fe   :  { %v5953_v22 = vpop.f32.mrf.mxu3  ;;  %v5892_v34 = vadd.f32 %v12540_v57, %v5827_v3  ;;  %v14935_v57 = vld [vmem:[#allocation94_spill] sm:$0xff] }
 0x7ff   :  { %v5954_v30 = vadd.f32 %v5953_v22, %v5889_v15  ;;  %v12620_v46 = vpop.f32.mrf.mxu2 }
 0x800   :  { %v12623_v61 = vpop.f32.mrf.mxu0 }
 0x801   :  { %v6927_v39 = vpop.eup %6926  ;;  %v6266_v13 = vadd.f32 %v14912_v5, %v5954_v30  ;;  %v5765_v5 = vadd.f32 %v12542_v60, %v12551_v51 }
 0x802   :  { %6390 = vst [vmem:[#allocation8 + $0x50] sm:$0xff] %v6927_v39  ;;  %v12633_v15 = vpop.f32.mrf.mxu1 }
 0x803   :  { %6928 = vtanh.f32 %v6266_v13  ;;  %6215 = vmatmul.f32.gmra.mxu3 %v14932_v25  ;;  %6038 = vmatmul.f32.gmra.mxu0 %v14933_v10  ;;  %v5830_v39 = vadd.f32 %v12545_v33, %v5765_v5 }
 0x804   :  { %6103 = vmatmul.f32.gmra.mxu1 %v14864_v27  ;;  %6168 = vmatmul.f32.gmra.mxu2 %v14934_v62 }
 0x805   :  { %v5895_v60 = vadd.f32 %v12560_v56, %v5830_v39 }
 0x806   :  { %v5956_v41 = vpop.f32.mrf.mxu3 }
 0x807   :  { %v5957_v22 = vadd.f32 %v5956_v41, %v5892_v34  ;;  %v12635_v30 = vpop.f32.mrf.mxu2 }
 0x808   :  { %v12641_v27 = vpop.f32.mrf.mxu0 }
 0x809   :  { %v6929_v1 = vpop.eup %6928  ;;  %v6270_v35 = vadd.f32 %v14915_v38, %v5957_v22  ;;  %v5768_v38 = vadd.f32 %v12562_v29, %v12551_v51 }
 0x80a   :  { %6394 = vst [vmem:[#allocation8 + $0x70] sm:$0xff] %v6929_v1  ;;  %v12648_v33 = vpop.f32.mrf.mxu1 }
 0x80b   :  { %6930 = vtanh.f32 %v6270_v35  ;;  %6218 = vmatmul.f32.gmra.mxu3 %v14872_v49  ;;  %6041 = vmatmul.f32.gmra.mxu0 %v11547_v45  ;;  %v5833_v41 = vadd.f32 %v12565_v44, %v5768_v38 }
 0x80c   :  { %6106 = vmatmul.f32.gmra.mxu1 %v14874_v2  ;;  %6171 = vmatmul.f32.gmra.mxu2 %v14935_v57 }
 0x80d   :  { %v5898_v2 = vadd.f32 %v12575_v59, %v5833_v41 }
 0x80e   :  { %v5959_v13 = vpop.f32.mrf.mxu3 }
 0x80f   :  { %v5960_v3 = vadd.f32 %v5959_v13, %v5895_v60  ;;  %v12651_v45 = vpop.f32.mrf.mxu2 }
 0x810   :  { %v12659_v56 = vpop.f32.mrf.mxu0 }
 0x811   :  { %v6931_v10 = vpop.eup %6930  ;;  %v6274_v34 = vadd.f32 %v14919_v28, %v5960_v3  ;;  %v5771_v28 = vadd.f32 %v12577_v17, %v12551_v51 }
 0x812   :  { %6398 = vst [vmem:[#allocation8 + $0x90] sm:$0xff] %v6931_v10 }
 0x813   :  { %6932 = vtanh.f32 %v6274_v34  ;;  %6221 = vmatmul.f32.gmra.mxu3 %v14882_v47  ;;  %6044 = vmatmul.f32.gmra.mxu0 %v11596_v55  ;;  %v5836_v1 = vadd.f32 %v12580_v36, %v5771_v28  ;;  %v12665_v55 = vpop.f32.mrf.mxu1  ;;  %v5783_v28 = vadd.f32 %v12641_v27, %v12551_v51 }
 0x814   :  { %6109 = vmatmul.f32.gmra.mxu1 %v14884_v37  ;;  %6174 = vmatmul.f32.gmra.mxu2 %v14885_v20 }
 0x815   :  { %v5901_v59 = vadd.f32 %v12590_v6, %v5836_v1  ;;  %v5848_v1 = vadd.f32 %v12648_v33, %v5783_v28  ;;  %v14936_v33 = vld [vmem:[#allocation60_spill] sm:$0xff] }
 0x816   :  { %v5962_v29 = vpop.f32.mrf.mxu3 }
 0x817   :  { %v5963_v5 = vadd.f32 %v5962_v29, %v5898_v2  ;;  %v12669_v37 = vpop.f32.mrf.mxu2 }
 0x818   :  { %v12676_v35 = vpop.f32.mrf.mxu0 }
 0x819   :  { %v6933_v22 = vpop.eup %6932  ;;  %v6278_v44 = vadd.f32 %v14922_v9, %v5963_v5  ;;  %v5774_v9 = vadd.f32 %v12592_v16, %v12551_v51 }
 0x81a   :  { %6402 = vst [vmem:[#allocation8 + $0xb0] sm:$0xff] %v6933_v22 }
 0x81b   :  { %6934 = vtanh.f32 %v6278_v44  ;;  %6224 = vmatmul.f32.gmra.mxu3 %v11648_v18  ;;  %6047 = vmatmul.f32.gmra.mxu0 %v11636_v53  ;;  %v5839_v53 = vadd.f32 %v12596_v23, %v5774_v9  ;;  %v5853_v6 = vpop.f32.mrf.mxu1 }
 0x81c   :  { %6112 = vmatmul.f32.gmra.mxu1 %v11642_v24  ;;  %6177 = vmatmul.f32.gmra.mxu2 %v11651_v40 }
 0x81d   :  { %v5904_v24 = vadd.f32 %v12605_v4, %v5839_v53 }
 0x81e   :  { %v5965_v17 = vpop.f32.mrf.mxu3 }
 0x81f   :  { %v5966_v36 = vadd.f32 %v5965_v17, %v5901_v59  ;;  %v12685_v16 = vpop.f32.mrf.mxu2  ;;  %v5786_v17 = vadd.f32 %v12659_v56, %v12551_v51 }
 0x820   :  { %v5791_v10 = vpop.f32.mrf.mxu0 }
 0x821   :  { %v6935_v39 = vpop.eup %6934  ;;  %v6282_v60 = vadd.f32 %v14925_v14, %v5966_v36  ;;  %v5777_v14 = vadd.f32 %v12607_v31, %v12551_v51  ;;  %v5780_v31 = vadd.f32 %v12623_v61, %v12551_v51 }
 0x822   :  { %6406 = vst [vmem:[#allocation8 + $0xd0] sm:$0xff] %v6935_v39 }
 0x823   :  { %6936 = vtanh.f32 %v6282_v60  ;;  %6227 = vmatmul.f32.gmra.mxu3 %v14888_v0  ;;  %6050 = vmatmul.f32.gmra.mxu0 %v11668_v58  ;;  %v5842_v58 = vadd.f32 %v12616_v32, %v5777_v14  ;;  %v5845_v29 = vadd.f32 %v12633_v15, %v5780_v31  ;;  %v5913_v15 = vadd.f32 %v12651_v45, %v5848_v1 }
 0x824   :  { %6115 = vmatmul.f32.gmra.mxu1 %v14889_v54  ;;  %6180 = vmatmul.f32.gmra.mxu2 %v14890_v21 }
 0x825   :  { %v5907_v54 = vadd.f32 %v12620_v46, %v5842_v58 }
 0x826   :  { %v5968_v13 = vpop.f32.mrf.mxu3 }
 0x827   :  { %v5969_v38 = vadd.f32 %v5968_v13, %v5904_v24  ;;  %v5921_v41 = vpop.f32.mrf.mxu2  ;;  %v5789_v24 = vadd.f32 %v12676_v35, %v12551_v51 }
 0x829   :  { %v6937_v23 = vpop.eup %6936  ;;  %v6286_v3 = vadd.f32 %v14928_v48, %v5969_v38  ;;  %v5856_v48 = vpop.f32.mrf.mxu1 }
 0x82a   :  { %6410 = vst [vmem:[#allocation8 + $0xf0] sm:$0xff] %v6937_v23 }
 0x82b   :  { %6938 = vtanh.f32 %v6286_v3  ;;  %6230 = vmatmul.f32.gmra.mxu3 %v14892_v19  ;;  %6053 = vmatmul.f32.gmra.mxu0 %v11693_v12  ;;  %v5794_v12 = vpop.f32.mrf.mxu0 }
 0x82c   :  { %6118 = vmatmul.f32.gmra.mxu1 %v14893_v43  ;;  %6183 = vmatmul.f32.gmra.mxu2 %v14894_v42  ;;  %v5910_v43 = vadd.f32 %v12635_v30, %v5845_v29  ;;  %v5795_v29 = vadd.f32 %v5794_v12, %v12551_v51 }
 0x82e   :  { %v5971_v4 = vpop.f32.mrf.mxu3 }
 0x82f   :  { %v5972_v34 = vadd.f32 %v5971_v4, %v5907_v54 }
 0x831   :  { %v6939_v2 = vpop.eup %6938  ;;  %v6290_v32 = vadd.f32 %v14931_v7, %v5972_v34  ;;  %v5859_v22 = vpop.f32.mrf.mxu1 }
 0x832   :  { %6414 = vst [vmem:[#allocation8 + $0x110] sm:$0xff] %v6939_v2  ;;  %v5924_v7 = vpop.f32.mrf.mxu2 }
 0x833   :  { %6940 = vtanh.f32 %v6290_v32  ;;  %6233 = vmatmul.f32.gmra.mxu3 %v14896_v11  ;;  %v6009_v59 = vpop.f32.mrf.mxu0 }
 0x836   :  { %v5974_v46 = vpop.f32.mrf.mxu3 }
 0x837   :  { %v5975_v61 = vadd.f32 %v5974_v46, %v5910_v43 }
 0x839   :  { %v6941_v5 = vpop.eup %6940  ;;  %v6294_v44 = vadd.f32 %v14934_v62, %v5975_v61  ;;  %v5851_v62 = vadd.f32 %v12665_v55, %v5786_v17  ;;  %v6074_v39 = vpop.f32.mrf.mxu1  ;;  %v14937_v55 = vld [vmem:[#allocation91_spill] sm:$0xff]  ;;  %v5860_v61 = vadd.f32 %v5859_v22, %v5795_v29 }
 0x83a   :  { %6418 = vst [vmem:[#allocation8 + $0x130] sm:$0xff] %v6941_v5  ;;  %v6139_v60 = vpop.f32.mrf.mxu2  ;;  %v14939_v5 = vld [vmem:[#allocation100_spill] sm:$0xff] }
 0x83b   :  { %6942 = vtanh.f32 %v6294_v44  ;;  %6236 = vmatmul.f32.gmra.mxu3 %v14900_v50  ;;  %v5916_v53 = vadd.f32 %v12669_v37, %v5851_v62  ;;  %v6012_v56 = vpop.f32.mrf.mxu0  ;;  %v5792_v37 = vadd.f32 %v5791_v10, %v12551_v51  ;;  %v5925_v1 = vadd.f32 %v5924_v7, %v5860_v61 }
 0x83d   :  { %v5857_v2 = vadd.f32 %v5856_v48, %v5792_v37  ;;  %v14940_v48 = vld [vmem:[#allocation14_spill] sm:$0xff] }
 0x83e   :  { %v5977_v30 = vpop.f32.mrf.mxu3 }
 0x83f   :  { %v5978_v27 = vadd.f32 %v5977_v30, %v5913_v15 }
 0x841   :  { %v6943_v9 = vpop.eup %6942  ;;  %v6298_v36 = vadd.f32 %v14935_v57, %v5978_v27  ;;  %v5854_v57 = vadd.f32 %v5853_v6, %v5789_v24  ;;  %v6077_v3 = vpop.f32.mrf.mxu1  ;;  %v5922_v6 = vadd.f32 %v5921_v41, %v5857_v2 }
 0x842   :  { %6422 = vst [vmem:[#allocation8 + $0x150] sm:$0xff] %v6943_v9  ;;  %v6142_v58 = vpop.f32.mrf.mxu2 }
 0x843   :  { %6944 = vtanh.f32 %v6298_v36  ;;  %6239 = vmatmul.f32.gmra.mxu3 %v14936_v33  ;;  %v5919_v23 = vadd.f32 %v12685_v16, %v5854_v57  ;;  %v6015_v34 = vpop.f32.mrf.mxu0 }
 0x846   :  { %v5980_v45 = vpop.f32.mrf.mxu3 }
 0x847   :  { %v5981_v13 = vadd.f32 %v5980_v45, %v5916_v53 }
 0x849   :  { %v6945_v14 = vpop.eup %6944  ;;  %v6302_v38 = vadd.f32 %v14885_v20, %v5981_v13  ;;  %v14938_v20 = vld [vmem:[#allocation113_spill] sm:$0xff]  ;;  %v6080_v16 = vpop.f32.mrf.mxu1 }
 0x84a   :  { %6426 = vst [vmem:[#allocation8 + $0x170] sm:$0xff] %v6945_v14  ;;  %v6145_v46 = vpop.f32.mrf.mxu2 }
 0x84b   :  { %6946 = vtanh.f32 %v6302_v38  ;;  %6242 = vmatmul.f32.gmra.mxu3 %v14937_v55  ;;  %v6018_v44 = vpop.f32.mrf.mxu0 }
 0x84e   :  { %v5983_v54 = vpop.f32.mrf.mxu3 }
 0x84f   :  { %v5984_v4 = vadd.f32 %v5983_v54, %v5919_v23 }
 0x851   :  { %v6947_v31 = vpop.eup %6946  ;;  %v6306_v35 = vadd.f32 %v11651_v40, %v5984_v4  ;;  %v12725_v40 = vperm.slane %v14939_v5, 3  ;;  %v6083_v30 = vpop.f32.mrf.mxu1 }
 0x852   :  { %6430 = vst [vmem:[#allocation8 + $0x190] sm:$0xff] %v6947_v31  ;;  %v6148_v27 = vpop.f32.mrf.mxu2 }
 0x853   :  { %6948 = vtanh.f32 %v6306_v35  ;;  %6245 = vmatmul.f32.gmra.mxu3 %v14938_v20  ;;  %v6010_v15 = vadd.f32 %v6009_v59, %v12725_v40  ;;  %v6021_v9 = vpop.f32.mrf.mxu0  ;;  %v6013_v62 = vadd.f32 %v6012_v56, %v12725_v40  ;;  %v6016_v38 = vadd.f32 %v6015_v34, %v12725_v40 }
 0x855   :  { %v6078_v59 = vadd.f32 %v6077_v3, %v6013_v62  ;;  %v6081_v56 = vadd.f32 %v6080_v16, %v6016_v38  ;;  %v6019_v3 = vadd.f32 %v6018_v44, %v12725_v40 }
 0x856   :  { %v5986_v32 = vpop.f32.mrf.mxu3 }
 0x857   :  { %v5987_v43 = vadd.f32 %v5986_v32, %v5922_v6  ;;  %v6143_v14 = vadd.f32 %v6142_v58, %v6078_v59  ;;  %v6146_v54 = vadd.f32 %v6145_v46, %v6081_v56  ;;  %v6084_v34 = vadd.f32 %v6083_v30, %v6019_v3 }
 0x859   :  { %v6949_v28 = vpop.eup %6948  ;;  %v6310_v10 = vadd.f32 %v14890_v21, %v5987_v43  ;;  %v6075_v21 = vadd.f32 %v6074_v39, %v6010_v15  ;;  %v6086_v24 = vpop.f32.mrf.mxu1  ;;  %v6149_v6 = vadd.f32 %v6148_v27, %v6084_v34 }
 0x85a   :  { %6434 = vst [vmem:[#allocation8 + $0x1b0] sm:$0xff] %v6949_v28  ;;  %v6151_v13 = vpop.f32.mrf.mxu2 }
 0x85b   :  { %6950 = vtanh.f32 %v6310_v10  ;;  %6248 = vmatmul.f32.gmra.mxu3 %v14940_v48  ;;  %v6140_v22 = vadd.f32 %v6139_v60, %v6075_v21  ;;  %v6024_v57 = vpop.f32.mrf.mxu0 }
 0x85c   :  { %v6025_v44 = vadd.f32 %v6024_v57, %v12725_v40 }
 0x85e   :  { %v5989_v41 = vpop.f32.mrf.mxu3 }
 0x85f   :  { %v5990_v51 = vadd.f32 %v5989_v41, %v5925_v1 }
 0x861   :  { %v6951_v12 = vpop.eup %6950  ;;  %v6314_v17 = vadd.f32 %v14894_v42, %v5990_v51  ;;  %v6089_v37 = vpop.f32.mrf.mxu1 }
 0x862   :  { %6438 = vst [vmem:[#allocation8 + $0x1d0] sm:$0xff] %v6951_v12  ;;  %v6090_v30 = vadd.f32 %v6089_v37, %v6025_v44 }
 0x863   :  { %6952 = vtanh.f32 %v6314_v17  ;;  %v6027_v2 = vpop.f32.mrf.mxu0 }
 0x864   :  { %v6028_v21 = vadd.f32 %v6027_v2, %v12725_v40 }
 0x866   :  { %v6204_v36 = vpop.f32.mrf.mxu3 }
 0x867   :  { %v6205_v53 = vadd.f32 %v6204_v36, %v6140_v22 }
 0x869   :  { %v6953_v45 = vpop.eup %6952  ;;  %v6255_v7 = vadd.f32 %v14920_v8, %v6205_v53  ;;  %v6154_v8 = vpop.f32.mrf.mxu2 }
 0x86a   :  { %6442 = vst [vmem:[#allocation8 + $0x1f0] sm:$0xff] %v6953_v45  ;;  %v6092_v29 = vpop.f32.mrf.mxu1  ;;  %v6155_v17 = vadd.f32 %v6154_v8, %v6090_v30 }
 0x86b   :  { %6954 = vtanh.f32 %v6255_v7  ;;  %v6030_v61 = vpop.f32.mrf.mxu0  ;;  %v6093_v62 = vadd.f32 %v6092_v29, %v6028_v21 }
 0x86c   :  { %v6031_v59 = vadd.f32 %v6030_v61, %v12725_v40 }
 0x86e   :  { %v6207_v42 = vpop.f32.mrf.mxu3 }
 0x86f   :  { %v6208_v39 = vadd.f32 %v6207_v42, %v6143_v14 }
 0x871   :  { %v6955_v60 = vpop.eup %6954  ;;  %v6259_v23 = vadd.f32 %v14923_v26, %v6208_v39  ;;  %v6022_v26 = vadd.f32 %v6021_v9, %v12725_v40  ;;  %v6157_v43 = vpop.f32.mrf.mxu2 }
 0x872   :  { %6383 = vst [vmem:[#allocation8 + $0x18] sm:$0xff] %v6955_v60  ;;  %v6095_v15 = vpop.f32.mrf.mxu1  ;;  %v6158_v7 = vadd.f32 %v6157_v43, %v6093_v62 }
 0x873   :  { %6956 = vtanh.f32 %v6259_v23  ;;  %v6087_v10 = vadd.f32 %v6086_v24, %v6022_v26  ;;  %v6033_v27 = vpop.f32.mrf.mxu0  ;;  %v6096_v38 = vadd.f32 %v6095_v15, %v6031_v59 }
 0x874   :  { %v6034_v23 = vadd.f32 %v6033_v27, %v12725_v40 }
 0x875   :  { %v6152_v5 = vadd.f32 %v6151_v13, %v6087_v10 }
 0x876   :  { %v6210_v4 = vpop.f32.mrf.mxu3 }
 0x877   :  { %v6211_v31 = vadd.f32 %v6210_v4, %v6146_v54 }
 0x879   :  { %v6957_v35 = vpop.eup %6956  ;;  %v6263_v58 = vadd.f32 %v14926_v63, %v6211_v31  ;;  %v6160_v12 = vpop.f32.mrf.mxu2 }
 0x87a   :  { %6387 = vst [vmem:[#allocation8 + $0x38] sm:$0xff] %v6957_v35  ;;  %v6098_v53 = vpop.f32.mrf.mxu1  ;;  %v6161_v39 = vadd.f32 %v6160_v12, %v6096_v38 }
 0x87b   :  { %6958 = vtanh.f32 %v6263_v58  ;;  %v6036_v13 = vpop.f32.mrf.mxu0  ;;  %v6099_v4 = vadd.f32 %v6098_v53, %v6034_v23 }
 0x87e   :  { %v6213_v32 = vpop.f32.mrf.mxu3 }
 0x87f   :  { %v6214_v16 = vadd.f32 %v6213_v32, %v6149_v6 }
 0x881   :  { %v6959_v46 = vpop.eup %6958  ;;  %v6267_v28 = vadd.f32 %v14929_v52, %v6214_v16  ;;  %v6163_v45 = vpop.f32.mrf.mxu2 }
 0x882   :  { %6391 = vst [vmem:[#allocation8 + $0x58] sm:$0xff] %v6959_v46  ;;  %v6101_v57 = vpop.f32.mrf.mxu1  ;;  %v6164_v3 = vadd.f32 %v6163_v45, %v6099_v4 }
 0x883   :  { %6960 = vtanh.f32 %v6267_v28  ;;  %v6039_v8 = vpop.f32.mrf.mxu0 }
 0x884   :  { %v6040_v16 = vadd.f32 %v6039_v8, %v12725_v40 }
 0x886   :  { %v6216_v63 = vpop.f32.mrf.mxu3 }
 0x887   :  { %v6217_v1 = vadd.f32 %v6216_v63, %v6152_v5 }
 0x889   :  { %v6961_v41 = vpop.eup %6960  ;;  %v6271_v51 = vadd.f32 %v14932_v25, %v6217_v1 }
 0x88a   :  { %6395 = vst [vmem:[#allocation8 + $0x78] sm:$0xff] %v6961_v41  ;;  %v6104_v35 = vpop.f32.mrf.mxu1 }
 0x88b   :  { %6962 = vtanh.f32 %v6271_v51  ;;  %v6042_v26 = vpop.f32.mrf.mxu0  ;;  %v6105_v5 = vadd.f32 %v6104_v35, %v6040_v16 }
 0x88c   :  { %v6043_v1 = vadd.f32 %v6042_v26, %v12725_v40 }
 0x88e   :  { %v6219_v52 = vpop.f32.mrf.mxu3 }
 0x88f   :  { %v6220_v22 = vadd.f32 %v6219_v52, %v6155_v17 }
 0x891   :  { %v6963_v9 = vpop.eup %6962  ;;  %v6275_v36 = vadd.f32 %v14872_v49, %v6220_v22  ;;  %v6166_v49 = vpop.f32.mrf.mxu2 }
 0x892   :  { %6399 = vst [vmem:[#allocation8 + $0x98] sm:$0xff] %v6963_v9  ;;  %v6107_v28 = vpop.f32.mrf.mxu1 }
 0x893   :  { %6964 = vtanh.f32 %v6275_v36  ;;  %v6045_v44 = vpop.f32.mrf.mxu0  ;;  %v6108_v12 = vadd.f32 %v6107_v28, %v6043_v1 }
 0x894   :  { %v6046_v52 = vadd.f32 %v6045_v44, %v12725_v40 }
 0x896   :  { %v6222_v25 = vpop.f32.mrf.mxu3 }
 0x897   :  { %v6223_v24 = vadd.f32 %v6222_v25, %v6158_v7 }
 0x899   :  { %v6965_v14 = vpop.eup %6964  ;;  %v6279_v42 = vadd.f32 %v14882_v47, %v6223_v24  ;;  %v6037_v47 = vadd.f32 %v6036_v13, %v12725_v40  ;;  %v6169_v2 = vpop.f32.mrf.mxu2 }
 0x89a   :  { %6403 = vst [vmem:[#allocation8 + $0xb8] sm:$0xff] %v6965_v14  ;;  %v6170_v63 = vadd.f32 %v6169_v2, %v6105_v5  ;;  %v6110_v30 = vpop.f32.mrf.mxu1 }
 0x89b   :  { %6966 = vtanh.f32 %v6279_v42  ;;  %v6102_v32 = vadd.f32 %v6101_v57, %v6037_v47  ;;  %v6048_v22 = vpop.f32.mrf.mxu0  ;;  %v6111_v62 = vadd.f32 %v6110_v30, %v6046_v52 }
 0x89c   :  { %v6049_v25 = vadd.f32 %v6048_v22, %v12725_v40 }
 0x89d   :  { %v6167_v29 = vadd.f32 %v6166_v49, %v6102_v32 }
 0x89e   :  { %v6225_v60 = vpop.f32.mrf.mxu3 }
 0x89f   :  { %v6226_v56 = vadd.f32 %v6225_v60, %v6161_v39 }
 0x8a1   :  { %v6967_v54 = vpop.eup %6966  ;;  %v6283_v37 = vadd.f32 %v11648_v18, %v6226_v56  ;;  %v6172_v61 = vpop.f32.mrf.mxu2 }
 0x8a2   :  { %6407 = vst [vmem:[#allocation8 + $0xd8] sm:$0xff] %v6967_v54  ;;  %v6173_v27 = vadd.f32 %v6172_v61, %v6108_v12  ;;  %v6113_v45 = vpop.f32.mrf.mxu1 }
 0x8a3   :  { %6968 = vtanh.f32 %v6283_v37  ;;  %v6051_v14 = vpop.f32.mrf.mxu0  ;;  %v6114_v42 = vadd.f32 %v6113_v45, %v6049_v25 }
 0x8a6   :  { %v6228_v31 = vpop.f32.mrf.mxu3 }
 0x8a7   :  { %v6229_v58 = vadd.f32 %v6228_v31, %v6164_v3 }
 0x8a9   :  { %v6969_v34 = vpop.eup %6968  ;;  %v6287_v6 = vadd.f32 %v14888_v0, %v6229_v58  ;;  %v6175_v17 = vpop.f32.mrf.mxu2 }
 0x8aa   :  { %6411 = vst [vmem:[#allocation8 + $0xf8] sm:$0xff] %v6969_v34  ;;  %v6176_v53 = vadd.f32 %v6175_v17, %v6111_v62  ;;  %v6116_v49 = vpop.f32.mrf.mxu1 }
 0x8ab   :  { %6970 = vtanh.f32 %v6287_v6  ;;  %v6054_v37 = vpop.f32.mrf.mxu0 }
 0x8ac   :  { %v6055_v4 = vadd.f32 %v6054_v37, %v12725_v40 }
 0x8ae   :  { %v6231_v18 = vpop.f32.mrf.mxu3 }
 0x8af   :  { %v6232_v43 = vadd.f32 %v6231_v18, %v6167_v29 }
 0x8b1   :  { %v6971_v46 = vpop.eup %6970  ;;  %v6291_v10 = vadd.f32 %v14892_v19, %v6232_v43 }
 0x8b2   :  { %6415 = vst [vmem:[#allocation8 + $0x118] sm:$0xff] %v6971_v46  ;;  %v6119_v35 = vpop.f32.mrf.mxu1 }
 0x8b3   :  { %6972 = vtanh.f32 %v6291_v10  ;;  %v6120_v2 = vadd.f32 %v6119_v35, %v6055_v4 }
 0x8b6   :  { %v6234_v0 = vpop.f32.mrf.mxu3 }
 0x8b7   :  { %v6235_v41 = vadd.f32 %v6234_v0, %v6170_v63 }
 0x8b9   :  { %v6973_v15 = vpop.eup %6972  ;;  %v6295_v51 = vadd.f32 %v14896_v11, %v6235_v41  ;;  %v6178_v11 = vpop.f32.mrf.mxu2 }
 0x8ba   :  { %6419 = vst [vmem:[#allocation8 + $0x138] sm:$0xff] %v6973_v15  ;;  %v6179_v38 = vadd.f32 %v6178_v11, %v6114_v42 }
 0x8bb   :  { %6974 = vtanh.f32 %v6295_v51 }
 0x8be   :  { %v6237_v19 = vpop.f32.mrf.mxu3 }
 0x8bf   :  { %v6238_v21 = vadd.f32 %v6237_v19, %v6173_v27 }
 0x8c1   :  { %v6975_v9 = vpop.eup %6974  ;;  %v6299_v36 = vadd.f32 %v14900_v50, %v6238_v21  ;;  %v6052_v50 = vadd.f32 %v6051_v14, %v12725_v40  ;;  %v6181_v60 = vpop.f32.mrf.mxu2 }
 0x8c2   :  { %6423 = vst [vmem:[#allocation8 + $0x158] sm:$0xff] %v6975_v9 }
 0x8c3   :  { %6976 = vtanh.f32 %v6299_v36  ;;  %v6117_v54 = vadd.f32 %v6116_v49, %v6052_v50 }
 0x8c5   :  { %v6182_v8 = vadd.f32 %v6181_v60, %v6117_v54 }
 0x8c6   :  { %v6240_v7 = vpop.f32.mrf.mxu3 }
 0x8c7   :  { %v6241_v59 = vadd.f32 %v6240_v7, %v6176_v53 }
 0x8c9   :  { %v6977_v24 = vpop.eup %6976  ;;  %v6303_v13 = vadd.f32 %v14936_v33, %v6241_v59  ;;  %v6184_v58 = vpop.f32.mrf.mxu2 }
 0x8ca   :  { %6427 = vst [vmem:[#allocation8 + $0x178] sm:$0xff] %v6977_v24  ;;  %v6185_v34 = vadd.f32 %v6184_v58, %v6120_v2 }
 0x8cb   :  { %6978 = vtanh.f32 %v6303_v13 }
 0x8ce   :  { %v6243_v39 = vpop.f32.mrf.mxu3 }
 0x8cf   :  { %v6244_v57 = vadd.f32 %v6243_v39, %v6179_v38 }
 0x8d1   :  { %v6979_v23 = vpop.eup %6978  ;;  %v6307_v56 = vadd.f32 %v14937_v55, %v6244_v57 }
 0x8d2   :  { %6431 = vst [vmem:[#allocation8 + $0x198] sm:$0xff] %v6979_v23 }
 0x8d3   :  { %6980 = vtanh.f32 %v6307_v56 }
 0x8d6   :  { %v6246_v33 = vpop.f32.mrf.mxu3 }
 0x8d7   :  { %v6247_v3 = vadd.f32 %v6246_v33, %v6182_v8 }
 0x8d9   :  { %v6981_v31 = vpop.eup %6980  ;;  %v6311_v47 = vadd.f32 %v14938_v20, %v6247_v3 }
 0x8da   :  { %6435 = vst [vmem:[#allocation8 + $0x1b8] sm:$0xff] %v6981_v31 }
 0x8db   :  { %6982 = vtanh.f32 %v6311_v47 }
 0x8de   :  { %v6249_v6 = vpop.f32.mrf.mxu3 }
 0x8df   :  { %v6250_v55 = vadd.f32 %v6249_v6, %v6185_v34 }
 0x8e1   :  { %v6983_v32 = vpop.eup %6982  ;;  %v6315_v26 = vadd.f32 %v14940_v48, %v6250_v55 }
 0x8e2   :  { %6439 = vst [vmem:[#allocation8 + $0x1d8] sm:$0xff] %v6983_v32 }
 0x8e3   :  { %6984 = vtanh.f32 %v6315_v26 }
 0x8e9   :  { %v6985_v20 = vpop.eup %6984 }
 0x8ea   :  { %6443 = vst [vmem:[#allocation8 + $0x1f8] sm:$0xff] %v6985_v20 }
 0x8eb   :  { %6456 = dma.vmem_to_hbm [thread:$0]  %s6449_s4, 8192, %s6451_s7, [#allocation4], %s7224_s24, %s7224_s24, %s7225_s25  }
 0x8ec   :  { %7218 = dma.done.wait [#allocation4], 8192  }
 0x8ed   :  { %7219 = vsyncadd [#allocation4], 4294959104 }
 0x8ee   :  { %6461 = vsyncpa [#allocation3], 1 }
 0x8ef   :  { %6462 = vsyncpa [#allocation6], 1 }
 0x8f0   :  { %6463 = vsyncpa [#allocation4], 1 }

</bundles_post_ra>
